<compile_context>
chip_gen: v7x
topology: tpu7x:2x2x1
jax: 0.10.0
libtpu: 0.0.40
codegen_flags: <defaults>
</compile_context>

<pallas_src>
import functools

import jax
import jax.numpy as jnp
from jax.experimental import pallas as pl
from jax.experimental.pallas import tpu as pltpu

LANE = 128      # TPU lane width (last-dim tiling unit)
SUBLANE = 8     # TPU sublane width (second-to-last-dim tiling unit)
HIDDEN = (512, 1024, 2048)
BN_EPS = 1e-5


def _round_up(x, m):
    return (x + m - 1) // m * m


def _fnn_kernel(x_ref, w1_ref, b1_ref, w2_ref, b2_ref, w3_ref, b3_ref,
                w4_ref, b4_ref, o_ref):
    """Fused 4-layer MLP: (((x@W1+b1)+ @W2+b2)+ @W3+b3) @W4 + b4, ReLU between."""

    def layer(h, w_ref, b_ref, relu):
        # Weights are bf16; cast activations to bf16 and accumulate in f32 on the MXU.
        y = jnp.dot(h.astype(jnp.bfloat16), w_ref[...],
                    preferred_element_type=jnp.float32)
        y = y + b_ref[...]
        if relu:
            y = jnp.maximum(y, 0.0)
        return y

    h = x_ref[...]                              # (tm, K0p) f32
    h = layer(h, w1_ref, b1_ref, relu=True)
    h = layer(h, w2_ref, b2_ref, relu=True)
    h = layer(h, w3_ref, b3_ref, relu=True)
    o_ref[...] = layer(h, w4_ref, b4_ref, relu=False).astype(o_ref.dtype)


def init_params(key, num_feat, num_class):
    """PyTorch-style init for the 4 Linear layers + eval-mode BatchNorm defaults."""
    dims = [num_feat, *HIDDEN, num_class]
    params = []
    for i in range(4):
        fan_in, fan_out = dims[i], dims[i + 1]
        key, kw, kb = jax.random.split(key, 3)
        bound = 1.0 / float(fan_in) ** 0.5
        w = jax.random.uniform(kw, (fan_in, fan_out), jnp.float32, -bound, bound)
        b = jax.random.uniform(kb, (fan_out,), jnp.float32, -bound, bound)
        # BatchNorm1d preceding this Linear (eval-mode defaults).
        gamma = jnp.ones((fan_in,), jnp.float32)
        beta = jnp.zeros((fan_in,), jnp.float32)
        running_mean = jnp.zeros((fan_in,), jnp.float32)
        running_var = jnp.ones((fan_in,), jnp.float32)
        params.append(dict(w=w, b=b, gamma=gamma, beta=beta,
                           mean=running_mean, var=running_var))
    return params


def fold_and_pad_params(params, num_feat, num_class):
    """Fold eval-mode BN into (W, b), cast W to bf16, zero-pad edge dims to lane width."""
    k0p = _round_up(num_feat, LANE)
    ncp = _round_up(num_class, LANE)
    folded = []
    for li, p in enumerate(params):
        scale = p["gamma"] / jnp.sqrt(p["var"] + BN_EPS)
        shift = p["beta"] - p["mean"] * scale
        w = scale[:, None] * p["w"]                 # fold BN scale into W
        b = p["b"] + shift @ p["w"]                 # fold BN shift into b
        if li == 0:                                 # pad input-feature dim -> 128
            w = jnp.pad(w, ((0, k0p - w.shape[0]), (0, 0)))
        if li == 3:                                 # pad class dim -> 128 (lane-dense out)
            w = jnp.pad(w, ((0, 0), (0, ncp - w.shape[1])))
            b = jnp.pad(b, (0, ncp - b.shape[0]))
        folded.append((w.astype(jnp.bfloat16), b.reshape(1, -1)))
    return folded, k0p, ncp


def fnn_forward(params, x, *, num_class):
    """x: (batch, num_feat) f32 -> logits (batch, num_class) f32."""
    B, num_feat = x.shape
    folded, k0p, ncp = fold_and_pad_params(params, num_feat, num_class)

    # Pad batch to a sublane multiple and features to a lane multiple (zeros).
    bp = _round_up(max(B, SUBLANE), SUBLANE)
    xp = jnp.pad(x, ((0, bp - B), (0, k0p - num_feat)))

    tm = min(bp, 256)                     # batch tile; grid axis is "parallel"
    grid = (bp // tm,)

    (w1, b1), (w2, b2), (w3, b3), (w4, b4) = folded

    def whole(arr):                       # whole-array (VMEM-resident) block
        return pl.BlockSpec(arr.shape, lambda i: (0,) * arr.ndim)

    weight_bytes = sum(w.size * w.dtype.itemsize + b.size * b.dtype.itemsize
                       for (w, b) in folded)
    flops = 2 * bp * (k0p * HIDDEN[0] + HIDDEN[0] * HIDDEN[1]
                      + HIDDEN[1] * HIDDEN[2] + HIDDEN[2] * ncp)
    bytes_accessed = xp.size * 4 + bp * ncp * 4 + weight_bytes

    out = pl.pallas_call(
        _fnn_kernel,
        out_shape=jax.ShapeDtypeStruct((bp, ncp), jnp.float32),
        grid=grid,
        in_specs=[
            pl.BlockSpec((tm, k0p), lambda i: (i, 0)),   # activations (batch-tiled)
            whole(w1), whole(b1),
            whole(w2), whole(b2),
            whole(w3), whole(b3),
            whole(w4), whole(b4),
        ],
        out_specs=pl.BlockSpec((tm, ncp), lambda i: (i, 0)),
        compiler_params=pltpu.CompilerParams(
            dimension_semantics=("parallel",),           # shard batch tiles across TCs
            vmem_limit_bytes=48 << 20,                   # < v7x's 64 MiB physical VMEM
        ),
        cost_estimate=pl.CostEstimate(
            flops=flops, transcendentals=0, bytes_accessed=bytes_accessed),
    )(xp, w1, b1, w2, b2, w3, b3, w4, b4)

    return out[:B, :num_class]


def fnn_reference(params, x):
    """Pure-JAX eval-mode reference (f32 everywhere) for correctness checking."""
    h = x
    for li, p in enumerate(params):
        scale = p["gamma"] / jnp.sqrt(p["var"] + BN_EPS)
        shift = p["beta"] - p["mean"] * scale
        h = (h * scale + shift) @ p["w"] + p["b"]
        if li < 3:
            h = jnp.maximum(h, 0.0)
    return h


if __name__ == "__main__":
    num_feat, num_class, batch = 32, 10, 8
    key = jax.random.PRNGKey(0)
    key_x, key_p = jax.random.split(key)

    x = jax.random.normal(key_x, (batch, num_feat), jnp.float32)
    params = init_params(key_p, num_feat, num_class)

    y = fnn_forward(params, x, num_class=num_class)
    jax.block_until_ready(y)

    assert y.shape == (batch, num_class) and y.dtype == jnp.float32
    y_ref = fnn_reference(params, x)
    # Loose tolerance: weights are streamed in bf16 (~1e-3 relative rounding).
    assert jnp.allclose(y, y_ref, rtol=3e-2, atol=3e-2), (
        f"max abs err {float(jnp.max(jnp.abs(y - y_ref)))}")
    print("KERNEL_OK")
</pallas_src>

<mosaic_0001>
module attributes {stable_mosaic.version = 11 : i64} {
  func.func @_fnn_kernel(%arg0: i32, %arg1: memref<8x128xf32, #tpu.memory_space<vmem>>, %arg2: memref<128x512xbf16, #tpu.memory_space<vmem>>, %arg3: memref<1x512xf32, #tpu.memory_space<vmem>>, %arg4: memref<512x1024xbf16, #tpu.memory_space<vmem>>, %arg5: memref<1x1024xf32, #tpu.memory_space<vmem>>, %arg6: memref<1024x2048xbf16, #tpu.memory_space<vmem>>, %arg7: memref<1x2048xf32, #tpu.memory_space<vmem>>, %arg8: memref<2048x128xbf16, #tpu.memory_space<vmem>>, %arg9: memref<1x128xf32, #tpu.memory_space<vmem>>, %arg10: memref<8x128xf32, #tpu.memory_space<vmem>>) attributes {dimension_semantics = [#tpu.dimension_semantics<parallel>], iteration_bounds = array<i64: 1>, scalar_prefetch = 0 : i64, scratch_operands = 0 : i64, tpu.core_type = #tpu.core_type<tc>, window_params = [{transform_indices = @transform_0, window_bounds = array<i64: 8, 128>}, {pipeline_mode = #tpu.pipeline_mode<synchronous>, transform_indices = @transform_1, window_bounds = array<i64: 128, 512>}, {pipeline_mode = #tpu.pipeline_mode<synchronous>, transform_indices = @transform_2, window_bounds = array<i64: 1, 512>}, {pipeline_mode = #tpu.pipeline_mode<synchronous>, transform_indices = @transform_3, window_bounds = array<i64: 512, 1024>}, {pipeline_mode = #tpu.pipeline_mode<synchronous>, transform_indices = @transform_4, window_bounds = array<i64: 1, 1024>}, {pipeline_mode = #tpu.pipeline_mode<synchronous>, transform_indices = @transform_5, window_bounds = array<i64: 1024, 2048>}, {pipeline_mode = #tpu.pipeline_mode<synchronous>, transform_indices = @transform_6, window_bounds = array<i64: 1, 2048>}, {pipeline_mode = #tpu.pipeline_mode<synchronous>, transform_indices = @transform_7, window_bounds = array<i64: 2048, 128>}, {pipeline_mode = #tpu.pipeline_mode<synchronous>, transform_indices = @transform_8, window_bounds = array<i64: 1, 128>}, {transform_indices = @transform_9, window_bounds = array<i64: 8, 128>}]} {
    %c0 = arith.constant 0 : index
    %c0_0 = arith.constant 0 : index
    %0 = vector.load %arg1[%c0, %c0_0] : memref<8x128xf32, #tpu.memory_space<vmem>>, vector<8x128xf32>
    %1 = arith.truncf %0 : vector<8x128xf32> to vector<8x128xbf16>
    %c0_1 = arith.constant 0 : index
    %c0_2 = arith.constant 0 : index
    %2 = vector.load %arg2[%c0_1, %c0_2] : memref<128x512xbf16, #tpu.memory_space<vmem>>, vector<128x512xbf16>
    %cst = arith.constant dense<0.000000e+00> : vector<8x512xf32>
    %3 = tpu.matmul %1, %2, %cst {dimension_numbers = #tpu.dot_dimension_numbers<[1], [0], [0], [1], [0, 0, 1, 1], [], []>} : vector<8x128xbf16>, vector<128x512xbf16>, vector<8x512xf32> -> vector<8x512xf32>
    %c0_3 = arith.constant 0 : index
    %c0_4 = arith.constant 0 : index
    %4 = vector.load %arg3[%c0_3, %c0_4] : memref<1x512xf32, #tpu.memory_space<vmem>>, vector<1x512xf32>
    %5 = vector.broadcast %4 : vector<1x512xf32> to vector<8x512xf32>
    %6 = arith.addf %3, %5 : vector<8x512xf32>
    %cst_5 = arith.constant 0.000000e+00 : f32
    %7 = vector.broadcast %cst_5 : f32 to vector<8x512xf32>
    %8 = arith.maximumf %6, %7 : vector<8x512xf32>
    %9 = arith.truncf %8 : vector<8x512xf32> to vector<8x512xbf16>
    %c0_6 = arith.constant 0 : index
    %c0_7 = arith.constant 0 : index
    %10 = vector.load %arg4[%c0_6, %c0_7] : memref<512x1024xbf16, #tpu.memory_space<vmem>>, vector<512x1024xbf16>
    %cst_8 = arith.constant dense<0.000000e+00> : vector<8x1024xf32>
    %11 = tpu.matmul %9, %10, %cst_8 {dimension_numbers = #tpu.dot_dimension_numbers<[1], [0], [0], [1], [0, 0, 1, 1], [], []>} : vector<8x512xbf16>, vector<512x1024xbf16>, vector<8x1024xf32> -> vector<8x1024xf32>
    %c0_9 = arith.constant 0 : index
    %c0_10 = arith.constant 0 : index
    %12 = vector.load %arg5[%c0_9, %c0_10] : memref<1x1024xf32, #tpu.memory_space<vmem>>, vector<1x1024xf32>
    %13 = vector.broadcast %12 : vector<1x1024xf32> to vector<8x1024xf32>
    %14 = arith.addf %11, %13 : vector<8x1024xf32>
    %cst_11 = arith.constant 0.000000e+00 : f32
    %15 = vector.broadcast %cst_11 : f32 to vector<8x1024xf32>
    %16 = arith.maximumf %14, %15 : vector<8x1024xf32>
    %17 = arith.truncf %16 : vector<8x1024xf32> to vector<8x1024xbf16>
    %c0_12 = arith.constant 0 : index
    %c0_13 = arith.constant 0 : index
    %18 = vector.load %arg6[%c0_12, %c0_13] : memref<1024x2048xbf16, #tpu.memory_space<vmem>>, vector<1024x2048xbf16>
    %cst_14 = arith.constant dense<0.000000e+00> : vector<8x2048xf32>
    %19 = tpu.matmul %17, %18, %cst_14 {dimension_numbers = #tpu.dot_dimension_numbers<[1], [0], [0], [1], [0, 0, 1, 1], [], []>} : vector<8x1024xbf16>, vector<1024x2048xbf16>, vector<8x2048xf32> -> vector<8x2048xf32>
    %c0_15 = arith.constant 0 : index
    %c0_16 = arith.constant 0 : index
    %20 = vector.load %arg7[%c0_15, %c0_16] : memref<1x2048xf32, #tpu.memory_space<vmem>>, vector<1x2048xf32>
    %21 = vector.broadcast %20 : vector<1x2048xf32> to vector<8x2048xf32>
    %22 = arith.addf %19, %21 : vector<8x2048xf32>
    %cst_17 = arith.constant 0.000000e+00 : f32
    %23 = vector.broadcast %cst_17 : f32 to vector<8x2048xf32>
    %24 = arith.maximumf %22, %23 : vector<8x2048xf32>
    %25 = arith.truncf %24 : vector<8x2048xf32> to vector<8x2048xbf16>
    %c0_18 = arith.constant 0 : index
    %c0_19 = arith.constant 0 : index
    %26 = vector.load %arg8[%c0_18, %c0_19] : memref<2048x128xbf16, #tpu.memory_space<vmem>>, vector<2048x128xbf16>
    %cst_20 = arith.constant dense<0.000000e+00> : vector<8x128xf32>
    %27 = tpu.matmul %25, %26, %cst_20 {dimension_numbers = #tpu.dot_dimension_numbers<[1], [0], [0], [1], [0, 0, 1, 1], [], []>} : vector<8x2048xbf16>, vector<2048x128xbf16>, vector<8x128xf32> -> vector<8x128xf32>
    %c0_21 = arith.constant 0 : index
    %c0_22 = arith.constant 0 : index
    %28 = vector.load %arg9[%c0_21, %c0_22] : memref<1x128xf32, #tpu.memory_space<vmem>>, vector<1x128xf32>
    %29 = vector.broadcast %28 : vector<1x128xf32> to vector<8x128xf32>
    %30 = arith.addf %27, %29 : vector<8x128xf32>
    %c0_23 = arith.constant 0 : index
    %c0_24 = arith.constant 0 : index
    %31 = vector.load %arg10[%c0_23, %c0_24] : memref<8x128xf32, #tpu.memory_space<vmem>>, vector<8x128xf32>
    tpu.vector_store %arg10[%c0_23, %c0_24], %30 {strides = array<i32>} : memref<8x128xf32, #tpu.memory_space<vmem>>, vector<8x128xf32>,
    return
  }
  func.func @transform_0(%arg0: i32) -> (i32, i32) {
    %c0_i32 = arith.constant 0 : i32
    %c0_i32_0 = arith.constant 0 : i32
    return %arg0, %c0_i32 : i32, i32
  }
  func.func @transform_1(%arg0: i32) -> (i32, i32) {
    %c0_i32 = arith.constant 0 : i32
    %c0_i32_0 = arith.constant 0 : i32
    %c0_i32_1 = arith.constant 0 : i32
    return %c0_i32, %c0_i32_0 : i32, i32
  }
  func.func @transform_2(%arg0: i32) -> (i32, i32) {
    %c0_i32 = arith.constant 0 : i32
    %c0_i32_0 = arith.constant 0 : i32
    %c0_i32_1 = arith.constant 0 : i32
    return %c0_i32, %c0_i32_0 : i32, i32
  }
  func.func @transform_3(%arg0: i32) -> (i32, i32) {
    %c0_i32 = arith.constant 0 : i32
    %c0_i32_0 = arith.constant 0 : i32
    %c0_i32_1 = arith.constant 0 : i32
    return %c0_i32, %c0_i32_0 : i32, i32
  }
  func.func @transform_4(%arg0: i32) -> (i32, i32) {
    %c0_i32 = arith.constant 0 : i32
    %c0_i32_0 = arith.constant 0 : i32
    %c0_i32_1 = arith.constant 0 : i32
    return %c0_i32, %c0_i32_0 : i32, i32
  }
  func.func @transform_5(%arg0: i32) -> (i32, i32) {
    %c0_i32 = arith.constant 0 : i32
    %c0_i32_0 = arith.constant 0 : i32
    %c0_i32_1 = arith.constant 0 : i32
    return %c0_i32, %c0_i32_0 : i32, i32
  }
  func.func @transform_6(%arg0: i32) -> (i32, i32) {
    %c0_i32 = arith.constant 0 : i32
    %c0_i32_0 = arith.constant 0 : i32
    %c0_i32_1 = arith.constant 0 : i32
    return %c0_i32, %c0_i32_0 : i32, i32
  }
  func.func @transform_7(%arg0: i32) -> (i32, i32) {
    %c0_i32 = arith.constant 0 : i32
    %c0_i32_0 = arith.constant 0 : i32
    %c0_i32_1 = arith.constant 0 : i32
    return %c0_i32, %c0_i32_0 : i32, i32
  }
  func.func @transform_8(%arg0: i32) -> (i32, i32) {
    %c0_i32 = arith.constant 0 : i32
    %c0_i32_0 = arith.constant 0 : i32
    %c0_i32_1 = arith.constant 0 : i32
    return %c0_i32, %c0_i32_0 : i32, i32
  }
  func.func @transform_9(%arg0: i32) -> (i32, i32) {
    %c0_i32 = arith.constant 0 : i32
    %c0_i32_0 = arith.constant 0 : i32
    return %arg0, %c0_i32 : i32, i32
  }
}

</mosaic_0001>

<bundles_post_ra>
// kernel: tpu_custom_call.1
= control target key start
LH: loop header
LB: loop body
LE: loop exit
PB: predicated region body
PF: predicated region fallthrough
CT: control target
= control target key end

     0   :  { %14 = vsyncpa [#allocation3], 0  ;;  %s13923_s0 = inlined_call_operand.hbm [shape: f32[8,128], index: 0, kind: input, shape index: {}]   ;;  %s13924_s1 = inlined_call_operand.hbm [shape: bf16[128,512], index: 1, kind: input, shape index: {}]   ;;  %s13925_s2 = inlined_call_operand.hbm [shape: f32[1,512], index: 2, kind: input, shape index: {}]   ;;  %s13926_s3 = inlined_call_operand.hbm [shape: bf16[512,1024], index: 3, kind: input, shape index: {}]   ;;  %s13927_s4 = inlined_call_operand.hbm [shape: f32[1,1024], index: 4, kind: input, shape index: {}]   ;;  %s13928_s5 = inlined_call_operand.hbm [shape: bf16[1024,2048], index: 5, kind: input, shape index: {}]   ;;  %s13929_s6 = inlined_call_operand.hbm [shape: f32[1,2048], index: 6, kind: input, shape index: {}]   ;;  %s13930_s7 = inlined_call_operand.hbm [shape: bf16[2048,128], index: 7, kind: input, shape index: {}]   ;;  %s13931_s8 = inlined_call_operand.hbm [shape: f32[1,128], index: 8, kind: input, shape index: {}]   ;;  %s13932_s9 = inlined_call_operand.hbm [shape: f32[8,128], index: 9, kind: output, shape index: {}]  }
   0x1   :  { %15 = vsyncpa [#allocation6], 0 }
   0x2   :  { %16 = vsyncpa [#allocation9], 0 }
   0x3   :  { %17 = vsyncpa [#allocation12], 0 }
   0x4   :  { %18 = vsyncpa [#allocation15], 0 }
   0x5   :  { %19 = vsyncpa [#allocation4], 0  ;;  %s13497_s30 = smov [#allocation5]   ;;  %s13265_s13 = scalar_lea.hbm %s13924_s1, 4096 }
   0x6   :  { %s35_s10 = sshll.u32 %s13497_s30, 4  ;;  %p13266_p0 = scmp.ne.s32.totalorder %s13924_s1, %s13265_s13  ;;  %s36_s10 = int_to_ptr.vmem [resolvable:$true] %s35_s10 }
   0x7   :  { %p13269_p1 = scmp.lt.u32.totalorder %s13265_s13, %s13924_s1 }
   0x9   :  { %p13271_p2 = pnand %p13269_p1, %p13266_p0 }
   0xb   :  { %13274 = shalt.err (!%p13271_p2)
}
   0xc   :  { %s13275_s18 = scalar_lea.vmem %s36_s10, 4096  ;;  %p13280_p4 = scmp.lt.s32.totalorder %s36_s10, %s36_s10 }
   0xd   :  { %p13276_p3 = scmp.ne.s32.totalorder %s36_s10, %s13275_s18  ;;  %p13281_p5 = scmp.lt.s32.totalorder %s13275_s18, %s13275_s18 }
   0xf   :  { %p13282_p6 = por %p13281_p5, %p13280_p4 }
  0x11   :  { %p13283_p7 = pnand %p13282_p6, %p13276_p3 }
  0x13   :  { %13286 = shalt.err (!%p13283_p7)
}
  0x14   :  { %s13498_s19 = smov 256   ;;  %s13499_s20 = smov 16  }
  0x15   :  { %41 = dma.hbm_to_vmem [thread:$0]  %s13924_s1, 4096, %s36_s10, [#allocation6], %s13498_s19, %s13498_s19, %s13499_s20  }
  0x16   :  { %s13500_s23 = smov [#allocation8]   ;;  %s13287_s27 = scalar_lea.hbm %s13926_s3, 32768 }
  0x17   :  { %s57_s24 = sshll.u32 %s13500_s23, 4  ;;  %p13288_p8 = scmp.ne.s32.totalorder %s13926_s3, %s13287_s27  ;;  %s58_s24 = int_to_ptr.vmem [resolvable:$true] %s57_s24 }
  0x18   :  { %p13291_p9 = scmp.lt.u32.totalorder %s13287_s27, %s13926_s3 }
  0x1a   :  { %p13293_p10 = pnand %p13291_p9, %p13288_p8 }
  0x1c   :  { %13296 = shalt.err (!%p13293_p10)
}
  0x1d   :  { %s13297_s12 = scalar_lea.vmem %s58_s24, 32768  ;;  %p13302_p12 = scmp.lt.s32.totalorder %s58_s24, %s58_s24 }
  0x1e   :  { %p13298_p11 = scmp.ne.s32.totalorder %s58_s24, %s13297_s12  ;;  %p13303_p13 = scmp.lt.s32.totalorder %s13297_s12, %s13297_s12 }
  0x20   :  { %p13304_p0 = por %p13303_p13, %p13302_p12 }
  0x22   :  { %p13305_p1 = pnand %p13304_p0, %p13298_p11 }
  0x24   :  { %13308 = shalt.err (!%p13305_p1)
}
  0x25   :  { %s13501_s1 = smov 512   ;;  %s13502_s10 = smov 32  }
  0x26   :  { %63 = dma.hbm_to_vmem [thread:$0]  %s13926_s3, 32768, %s58_s24, [#allocation9], %s13501_s1, %s13501_s1, %s13502_s10  }
  0x27   :  { %s13503_s15 = smov [#allocation11]   ;;  %s13309_s19 = scalar_lea.hbm %s13928_s5, 131072 }
  0x28   :  { %s79_s16 = sshll.u32 %s13503_s15, 4  ;;  %p13310_p2 = scmp.ne.s32.totalorder %s13928_s5, %s13309_s19  ;;  %s80_s16 = int_to_ptr.vmem [resolvable:$true] %s79_s16 }
  0x29   :  { %p13313_p3 = scmp.lt.u32.totalorder %s13309_s19, %s13928_s5 }
  0x2b   :  { %p13315_p4 = pnand %p13313_p3, %p13310_p2 }
  0x2d   :  { %13318 = shalt.err (!%p13315_p4)
}
  0x2e   :  { %s13319_s25 = scalar_lea.vmem %s80_s16, 131072  ;;  %p13324_p6 = scmp.lt.s32.totalorder %s80_s16, %s80_s16 }
  0x2f   :  { %p13320_p5 = scmp.ne.s32.totalorder %s80_s16, %s13319_s25  ;;  %p13325_p7 = scmp.lt.s32.totalorder %s13319_s25, %s13319_s25 }
  0x31   :  { %p13326_p8 = por %p13325_p7, %p13324_p6 }
  0x33   :  { %p13327_p9 = pnand %p13326_p8, %p13320_p5 }
  0x35   :  { %13330 = shalt.err (!%p13327_p9)
}
  0x36   :  { %s13504_s3 = smov 1024   ;;  %s13505_s24 = smov 64  }
  0x37   :  { %85 = dma.hbm_to_vmem [thread:$0]  %s13928_s5, 131072, %s80_s16, [#allocation12], %s13504_s3, %s13504_s3, %s13505_s24  }
  0x38   :  { %s13506_s28 = smov [#allocation14]   ;;  %s13331_s12 = scalar_lea.hbm %s13930_s7, 16384 }
  0x39   :  { %s101_s29 = sshll.u32 %s13506_s28, 4  ;;  %p13332_p10 = scmp.ne.s32.totalorder %s13930_s7, %s13331_s12  ;;  %s102_s29 = int_to_ptr.vmem [resolvable:$true] %s101_s29 }
  0x3a   :  { %p13335_p11 = scmp.lt.u32.totalorder %s13331_s12, %s13930_s7 }
  0x3c   :  { %p13337_p12 = pnand %p13335_p11, %p13332_p10 }
  0x3e   :  { %13340 = shalt.err (!%p13337_p12)
}
  0x3f   :  { %s13341_s15 = scalar_lea.vmem %s102_s29, 16384  ;;  %p13346_p0 = scmp.lt.s32.totalorder %s102_s29, %s102_s29 }
  0x40   :  { %p13342_p13 = scmp.ne.s32.totalorder %s102_s29, %s13341_s15  ;;  %p13347_p1 = scmp.lt.s32.totalorder %s13341_s15, %s13341_s15 }
  0x42   :  { %p13348_p2 = por %p13347_p1, %p13346_p0 }
  0x44   :  { %p13349_p3 = pnand %p13348_p2, %p13342_p13 }
  0x46   :  { %13352 = shalt.err (!%p13349_p3)
}
  0x47   :  { %s13507_s5 = smov 4   ;;  %s13508_s18 = smov [#allocation2]  }
  0x48   :  { %107 = dma.hbm_to_vmem [thread:$0]  %s13930_s7, 16384, %s102_s29, [#allocation15], %s13505_s24, %s13505_s24, %s13507_s5  }
  0x49   :  { %s26_s19 = sshll.u32 %s13508_s18, 4  ;;  %s13509_s20 = smov [#allocation7]   ;;  %s27_s19 = int_to_ptr.vmem [resolvable:$true] %s26_s19 }
  0x4a   :  { %s48_s21 = sshll.u32 %s13509_s20, 4  ;;  %s13353_s25 = scalar_lea.hbm %s13923_s0, 128  ;;  %s49_s21 = int_to_ptr.vmem [resolvable:$true] %s48_s21 }
  0x4b   :  { %p13354_p4 = scmp.ne.s32.totalorder %s13923_s0, %s13353_s25  ;;  %p13357_p5 = scmp.lt.u32.totalorder %s13353_s25, %s13923_s0 }
  0x4d   :  { %p13359_p6 = pnand %p13357_p5, %p13354_p4 }
  0x4f   :  { %13362 = shalt.err (!%p13359_p6)
}
  0x50   :  { %s13363_s7 = scalar_lea.vmem %s27_s19, 128  ;;  %p13368_p8 = scmp.lt.s32.totalorder %s27_s19, %s27_s19 }
  0x51   :  { %p13364_p7 = scmp.ne.s32.totalorder %s27_s19, %s13363_s7  ;;  %p13369_p9 = scmp.lt.s32.totalorder %s13363_s7, %s13363_s7 }
  0x53   :  { %p13370_p10 = por %p13369_p9, %p13368_p8 }
  0x55   :  { %p13371_p11 = pnand %p13370_p10, %p13364_p7 }
  0x57   :  { %13374 = shalt.err (!%p13371_p11)
}
  0x58   :  { %29 = dma.hbm_to_vmem [thread:$0]  %s13923_s0, 128, %s27_s19, [#allocation3]  }
  0x59   :  { %s13375_s12 = scalar_lea.hbm %s13925_s2, 64 }
  0x5a   :  { %p13376_p12 = scmp.ne.s32.totalorder %s13925_s2, %s13375_s12  ;;  %p13379_p13 = scmp.lt.u32.totalorder %s13375_s12, %s13925_s2 }
  0x5c   :  { %p13381_p0 = pnand %p13379_p13, %p13376_p12 }
  0x5e   :  { %13384 = shalt.err (!%p13381_p0)
}
  0x5f   :  { %s13385_s15 = scalar_lea.vmem %s49_s21, 64  ;;  %p13390_p2 = scmp.lt.s32.totalorder %s49_s21, %s49_s21 }
  0x60   :  { %p13386_p1 = scmp.ne.s32.totalorder %s49_s21, %s13385_s15  ;;  %p13391_p3 = scmp.lt.s32.totalorder %s13385_s15, %s13385_s15 }
  0x62   :  { %p13392_p4 = por %p13391_p3, %p13390_p2 }
  0x64   :  { %p13393_p5 = pnand %p13392_p4, %p13386_p1 }
  0x66   :  { %13396 = shalt.err (!%p13393_p5)
}
  0x67   :  { %51 = dma.hbm_to_vmem [thread:$0]  %s13925_s2, 64, %s49_s21, [#allocation6]  }
  0x68   :  { %s13510_s16 = smov [#allocation10]   ;;  %s13511_s18 = smov [#allocation13]  }
  0x69   :  { %s70_s17 = sshll.u32 %s13510_s16, 4  ;;  %s92_s19 = sshll.u32 %s13511_s18, 4  ;;  %s71_s17 = int_to_ptr.vmem [resolvable:$true] %s70_s17  ;;  %s93_s19 = int_to_ptr.vmem [resolvable:$true] %s92_s19 }
  0x6a   :  { %s13397_s23 = scalar_lea.hbm %s13927_s4, 128 }
  0x6b   :  { %p13398_p6 = scmp.ne.s32.totalorder %s13927_s4, %s13397_s23  ;;  %p13401_p7 = scmp.lt.u32.totalorder %s13397_s23, %s13927_s4 }
  0x6d   :  { %p13403_p8 = pnand %p13401_p7, %p13398_p6 }
  0x6f   :  { %13406 = shalt.err (!%p13403_p8)
}
  0x70   :  { %s13407_s2 = scalar_lea.vmem %s71_s17, 128  ;;  %p13412_p10 = scmp.lt.s32.totalorder %s71_s17, %s71_s17 }
  0x71   :  { %p13408_p9 = scmp.ne.s32.totalorder %s71_s17, %s13407_s2  ;;  %p13413_p11 = scmp.lt.s32.totalorder %s13407_s2, %s13407_s2 }
  0x73   :  { %p13414_p12 = por %p13413_p11, %p13412_p10 }
  0x75   :  { %p13415_p13 = pnand %p13414_p12, %p13408_p9 }
  0x77   :  { %13418 = shalt.err (!%p13415_p13)
}
  0x78   :  { %73 = dma.hbm_to_vmem [thread:$0]  %s13927_s4, 128, %s71_s17, [#allocation9]  }
  0x79   :  { %s13419_s29 = scalar_lea.hbm %s13929_s6, 256 }
  0x7a   :  { %p13420_p0 = scmp.ne.s32.totalorder %s13929_s6, %s13419_s29  ;;  %p13423_p1 = scmp.lt.u32.totalorder %s13419_s29, %s13929_s6 }
  0x7c   :  { %p13425_p2 = pnand %p13423_p1, %p13420_p0 }
  0x7e   :  { %13428 = shalt.err (!%p13425_p2)
}
  0x7f   :  { %s13429_s10 = scalar_lea.vmem %s93_s19, 256  ;;  %p13434_p4 = scmp.lt.s32.totalorder %s93_s19, %s93_s19 }
  0x80   :  { %p13430_p3 = scmp.ne.s32.totalorder %s93_s19, %s13429_s10  ;;  %p13435_p5 = scmp.lt.s32.totalorder %s13429_s10, %s13429_s10 }
  0x82   :  { %p13436_p6 = por %p13435_p5, %p13434_p4 }
  0x84   :  { %p13437_p7 = pnand %p13436_p6, %p13430_p3 }
  0x86   :  { %13440 = shalt.err (!%p13437_p7)
}
  0x87   :  { %95 = dma.hbm_to_vmem [thread:$0]  %s13929_s6, 256, %s93_s19, [#allocation12]  }
  0x88   :  { %s13512_s14 = smov [#allocation16]   ;;  %s13441_s16 = scalar_lea.hbm %s13931_s8, 16 }
  0x89   :  { %s114_s15 = sshll.u32 %s13512_s14, 4  ;;  %p13442_p8 = scmp.ne.s32.totalorder %s13931_s8, %s13441_s16  ;;  %s115_s15 = int_to_ptr.vmem [resolvable:$true] %s114_s15 }
  0x8a   :  { %p13445_p9 = scmp.lt.u32.totalorder %s13441_s16, %s13931_s8 }
  0x8c   :  { %p13447_p10 = pnand %p13445_p9, %p13442_p8 }
  0x8e   :  { %13450 = shalt.err (!%p13447_p10)
}
  0x8f   :  { %s13451_s23 = scalar_lea.vmem %s115_s15, 16  ;;  %s13455_s6 = scalar_lea.vmem %s115_s15, 32 }
  0x90   :  { %p13452_p11 = scmp.ne.s32.totalorder %s115_s15, %s13451_s23  ;;  %p13456_p12 = scmp.lt.s32.totalorder %s115_s15, %s115_s15 }
  0x91   :  { %p13457_p13 = scmp.lt.s32.totalorder %s13455_s6, %s13451_s23 }
  0x93   :  { %p13458_p0 = por %p13457_p13, %p13456_p12 }
  0x95   :  { %p13459_p1 = pnand %p13458_p0, %p13452_p11 }
  0x97   :  { %13462 = shalt.err (!%p13459_p1)
}
  0x98   :  { %117 = dma.hbm_to_vmem [thread:$0]  %s13931_s8, 16, %s115_s15, [#allocation15]  }
  0x99   :  { %13485 = dma.done.wait [#allocation3], 128  }
  0x9a   :  { %13486 = vsyncadd [#allocation3], 4294967168 }
  0x9b   :  { %13487 = dma.done.wait [#allocation6], 4160  }
  0x9c   :  { %13488 = vsyncadd [#allocation6], 4294963136 }
  0x9d   :  { %13489 = dma.done.wait [#allocation9], 32896  }
  0x9e   :  { %13490 = vsyncadd [#allocation9], 4294934400 }
  0x9f   :  { %13491 = dma.done.wait [#allocation12], 131328  }
  0xa0   :  { %13492 = vsyncadd [#allocation12], 4294835968 }
  0xa1   :  { %13493 = dma.done.wait [#allocation15], 16400  }
  0xa2   :  { %13494 = vsyncadd [#allocation15], 4294950896  ;;  %v13513_v0 = vmov 0   ;;  %v13088_v1 = vld [vmem:[#allocation5 + $0x4] ss:$16 sps:$4 sm:$0xff]   ;;  %v146_v29 = vld [vmem:[#allocation2] sm:$0xff] }
  0xa3   :  { %394 = vmatprep.mubr.bf16.mxu0 %v13513_v0  ;;  %435 = vmatprep.mubr.bf16.mxu1 %v13513_v0  ;;  %v13090_v2 = vld [vmem:[#allocation5] ss:$16 sps:$4 sm:$0xff]   ;;  %v13091_v3 = vld [vmem:[#allocation5 + $0x24] ss:$16 sps:$4 sm:$0xff]   ;;  %v13112_v10 = vld [vmem:[#allocation5 + $0xc] ss:$16 sps:$4 sm:$0xff]   ;;  %v147_v34 = vpack.c.bf16 %v146_v29, %v146_v29 }
  0xa4   :  { %362 = vmatprep.subr.bf16.mxu0 %v13088_v1  ;;  %v13093_v4 = vld [vmem:[#allocation5 + $0x20] ss:$16 sps:$4 sm:$0xff]   ;;  %v13094_v5 = vld [vmem:[#allocation5 + $0x44] ss:$16 sps:$4 sm:$0xff]   ;;  %v13114_v11 = vld [vmem:[#allocation5 + $0x8] ss:$16 sps:$4 sm:$0xff]   ;;  %403 = vmatprep.subr.bf16.mxu1 %v13112_v10 }
  0xa5   :  { %363 = vmatpush1.bf16.msra.mxu0 %v13090_v2  ;;  %v13096_v6 = vld [vmem:[#allocation5 + $0x40] ss:$16 sps:$4 sm:$0xff]   ;;  %v13097_v7 = vld [vmem:[#allocation5 + $0x64] ss:$16 sps:$4 sm:$0xff]   ;;  %v13115_v12 = vld [vmem:[#allocation5 + $0x2c] ss:$16 sps:$4 sm:$0xff]   ;;  %404 = vmatpush1.bf16.msra.mxu1 %v13114_v11 }
  0xa6   :  { %364 = vmatprep.subr.bf16.mxu0 %v13091_v3  ;;  %v13099_v8 = vld [vmem:[#allocation5 + $0x60] ss:$16 sps:$4 sm:$0xff]   ;;  %v13100_v9 = vld [vmem:[#allocation5 + $0x84] ss:$16 sps:$4 sm:$0xff]   ;;  %v13117_v14 = vld [vmem:[#allocation5 + $0x28] ss:$16 sps:$4 sm:$0xff]   ;;  %405 = vmatprep.subr.bf16.mxu1 %v13115_v12 }
  0xa7   :  { %v13102_v13 = vld [vmem:[#allocation5 + $0x80] ss:$16 sps:$4 sm:$0xff]   ;;  %v13118_v15 = vld [vmem:[#allocation5 + $0x4c] ss:$16 sps:$4 sm:$0xff]   ;;  %v13103_v16 = vld [vmem:[#allocation5 + $0xa4] ss:$16 sps:$4 sm:$0xff]  }
  0xa8   :  { %v13105_v17 = vld [vmem:[#allocation5 + $0xa0] ss:$16 sps:$4 sm:$0xff]   ;;  %v13120_v18 = vld [vmem:[#allocation5 + $0x48] ss:$16 sps:$4 sm:$0xff]   ;;  %v13121_v19 = vld [vmem:[#allocation5 + $0x6c] ss:$16 sps:$4 sm:$0xff]  }
  0xa9   :  { %365 = vmatpush1.bf16.msra.mxu0 %v13093_v4  ;;  %406 = vmatpush1.bf16.msra.mxu1 %v13117_v14  ;;  %v13106_v20 = vld [vmem:[#allocation5 + $0xc4] ss:$16 sps:$4 sm:$0xff]   ;;  %v13123_v21 = vld [vmem:[#allocation5 + $0x68] ss:$16 sps:$4 sm:$0xff]   ;;  %v13108_v22 = vld [vmem:[#allocation5 + $0xc0] ss:$16 sps:$4 sm:$0xff]  }
  0xaa   :  { %366 = vmatprep.subr.bf16.mxu0 %v13094_v5  ;;  %407 = vmatprep.subr.bf16.mxu1 %v13118_v15  ;;  %v13124_v23 = vld [vmem:[#allocation5 + $0x8c] ss:$16 sps:$4 sm:$0xff]   ;;  %v13109_v24 = vld [vmem:[#allocation5 + $0xe4] ss:$16 sps:$4 sm:$0xff]   ;;  %v13126_v27 = vld [vmem:[#allocation5 + $0x88] ss:$16 sps:$4 sm:$0xff]  }
  0xab   :  { %v452_v25 = vld [vmem:[#allocation8] sm:$0xff]  ;;  %v13111_v28 = vld [vmem:[#allocation5 + $0xe0] ss:$16 sps:$4 sm:$0xff]   ;;  %v13127_v30 = vld [vmem:[#allocation5 + $0xac] ss:$16 sps:$4 sm:$0xff]   ;;  %s13514_s8 = smov [#allocation17]  }
  0xac   :  { %v456_v26 = vld [vmem:[#allocation8 + $0x20] sm:$0xff]  ;;  %v13130_v36 = vld [vmem:[#allocation5 + $0xcc] ss:$16 sps:$4 sm:$0xff]   ;;  %s11304_s3 = sshll.u32 %s13514_s8, 4  ;;  %s11305_s3 = int_to_ptr.vmem [resolvable:$true] %s11304_s3 }
  0xad   :  { %367 = vmatpush1.bf16.msra.mxu0 %v13096_v6  ;;  %408 = vmatpush1.bf16.msra.mxu1 %v13120_v18  ;;  %v11350_v31 = vcombine.high %v452_v25, %v456_v26  ;;  %v460_v32 = vld [vmem:[#allocation8 + $0x40] sm:$0xff]  ;;  %v11349_v37 = vcombine.low %v452_v25, %v456_v26  ;;  %v13133_v42 = vld [vmem:[#allocation5 + $0xec] ss:$16 sps:$4 sm:$0xff]   ;;  %s13463_s26 = scalar_lea.vmem %s11305_s3, 128  ;;  %p13468_p3 = scmp.lt.s32.totalorder %s11305_s3, %s11305_s3 }
  0xae   :  { %368 = vmatprep.subr.bf16.mxu0 %v13097_v7  ;;  %409 = vmatprep.subr.bf16.mxu1 %v13121_v19  ;;  %v464_v33 = vld [vmem:[#allocation8 + $0x60] sm:$0xff]  ;;  %v453_v44 = vld [vmem:[#allocation8 + $0x8] sm:$0xff]  ;;  %p13464_p2 = scmp.ne.s32.totalorder %s11305_s3, %s13463_s26  ;;  %p13469_p4 = scmp.lt.s32.totalorder %s13463_s26, %s13463_s26 }
  0xaf   :  { %v13129_v35 = vld [vmem:[#allocation5 + $0xa8] ss:$16 sps:$4 sm:$0xff]   ;;  %v11358_v38 = vcombine.high %v460_v32, %v464_v33  ;;  %v11357_v43 = vcombine.low %v460_v32, %v464_v33  ;;  %v457_v45 = vld [vmem:[#allocation8 + $0x28] sm:$0xff] }
  0xb0   :  { %v468_v39 = vld [vmem:[#allocation8 + $0x80] sm:$0xff]  ;;  %v11352_v50 = vcombine.high %v453_v44, %v457_v45  ;;  %v461_v51 = vld [vmem:[#allocation8 + $0x48] sm:$0xff]  ;;  %v11351_v57 = vcombine.low %v453_v44, %v457_v45  ;;  %p13470_p5 = por %p13469_p4, %p13468_p3 }
  0xb1   :  { %369 = vmatpush1.bf16.msra.mxu0 %v13099_v8  ;;  %410 = vmatpush1.bf16.msra.mxu1 %v13123_v21  ;;  %v472_v40 = vld [vmem:[#allocation8 + $0xa0] sm:$0xff]  ;;  %v465_v52 = vld [vmem:[#allocation8 + $0x68] sm:$0xff] }
  0xb2   :  { %370 = vmatprep.subr.bf16.mxu0 %v13100_v9  ;;  %411 = vmatprep.subr.bf16.mxu1 %v13124_v23  ;;  %v13132_v41 = vld [vmem:[#allocation5 + $0xc8] ss:$16 sps:$4 sm:$0xff]   ;;  %v11366_v46 = vcombine.high %v468_v39, %v472_v40  ;;  %v11365_v53 = vcombine.low %v468_v39, %v472_v40  ;;  %v469_v58 = vld [vmem:[#allocation8 + $0x88] sm:$0xff]  ;;  %v11360_v60 = vcombine.high %v461_v51, %v465_v52  ;;  %p13471_p6 = pnand %p13470_p5, %p13464_p2 }
  0xb3   :  { %v476_v47 = vld [vmem:[#allocation8 + $0xc0] sm:$0xff]  ;;  %v473_v59 = vld [vmem:[#allocation8 + $0xa8] sm:$0xff]  ;;  %v11359_v1 = vcombine.low %v461_v51, %v465_v52 }
  0xb4   :  { %v480_v48 = vld [vmem:[#allocation8 + $0xe0] sm:$0xff]  ;;  %v477_v2 = vld [vmem:[#allocation8 + $0xc8] sm:$0xff]  ;;  %v11368_v4 = vcombine.high %v469_v58, %v473_v59  ;;  %v11367_v9 = vcombine.low %v469_v58, %v473_v59 }
  0xb5   :  { %371 = vmatpush1.bf16.msra.mxu0 %v13102_v13  ;;  %412 = vmatpush1.bf16.msra.mxu1 %v13126_v27  ;;  %v13135_v49 = vld [vmem:[#allocation5 + $0xe8] ss:$16 sps:$4 sm:$0xff]   ;;  %v11374_v54 = vcombine.high %v476_v47, %v480_v48  ;;  %v11373_v61 = vcombine.low %v476_v47, %v480_v48  ;;  %v481_v3 = vld [vmem:[#allocation8 + $0xe8] sm:$0xff] }
  0xb6   :  { %372 = vmatprep.subr.bf16.mxu0 %v13103_v16  ;;  %413 = vmatprep.subr.bf16.mxu1 %v13127_v30  ;;  %v484_v55 = vld [vmem:[#allocation8 + $0x100] sm:$0xff]  ;;  %v485_v10 = vld [vmem:[#allocation8 + $0x108] sm:$0xff]  ;;  %v11376_v12 = vcombine.high %v477_v2, %v481_v3 }
  0xb7   :  { %v488_v56 = vld [vmem:[#allocation8 + $0x120] sm:$0xff]  ;;  %v489_v11 = vld [vmem:[#allocation8 + $0x128] sm:$0xff] }
  0xb8   :  { %v492_v62 = vld [vmem:[#allocation8 + $0x140] sm:$0xff]  ;;  %v11382_v0 = vcombine.high %v484_v55, %v488_v56  ;;  %v11381_v5 = vcombine.low %v484_v55, %v488_v56  ;;  %v493_v18 = vld [vmem:[#allocation8 + $0x148] sm:$0xff]  ;;  %v11383_v25 = vcombine.low %v485_v10, %v489_v11 }
  0xb9   :  { %373 = vmatpush1.bf16.msra.mxu0 %v13105_v17  ;;  %414 = vmatpush1.bf16.msra.mxu1 %v13129_v35  ;;  %v496_v63 = vld [vmem:[#allocation8 + $0x160] sm:$0xff]  ;;  %v11375_v17 = vcombine.low %v477_v2, %v481_v3  ;;  %v497_v19 = vld [vmem:[#allocation8 + $0x168] sm:$0xff] }
  0xba   :  { %374 = vmatprep.subr.bf16.mxu0 %v13106_v20  ;;  %415 = vmatprep.subr.bf16.mxu1 %v13130_v36  ;;  %v500_v6 = vld [vmem:[#allocation8 + $0x180] sm:$0xff]  ;;  %v11390_v8 = vcombine.high %v492_v62, %v496_v63  ;;  %v11389_v13 = vcombine.low %v492_v62, %v496_v63  ;;  %v11384_v20 = vcombine.high %v485_v10, %v489_v11  ;;  %v501_v26 = vld [vmem:[#allocation8 + $0x188] sm:$0xff] }
  0xbb   :  { %v504_v7 = vld [vmem:[#allocation8 + $0x1a0] sm:$0xff]  ;;  %v505_v27 = vld [vmem:[#allocation8 + $0x1a8] sm:$0xff]  ;;  %v11391_v33 = vcombine.low %v493_v18, %v497_v19 }
  0xbc   :  { %v508_v14 = vld [vmem:[#allocation8 + $0x1c0] sm:$0xff]  ;;  %v11398_v16 = vcombine.high %v500_v6, %v504_v7  ;;  %v11397_v21 = vcombine.low %v500_v6, %v504_v7  ;;  %v513_v35 = vld [vmem:[#allocation8 + $0x1e8] sm:$0xff]  ;;  %v11400_v36 = vcombine.high %v501_v26, %v505_v27 }
  0xbd   :  { %375 = vmatpush1.bf16.msra.mxu0 %v13108_v22  ;;  %416 = vmatpush1.bf16.msra.mxu1 %v13132_v41  ;;  %v512_v15 = vld [vmem:[#allocation8 + $0x1e0] sm:$0xff]  ;;  %v11399_v41 = vcombine.low %v501_v26, %v505_v27  ;;  %v529_v51 = vld [vmem:[#allocation8 + $0x268] sm:$0xff] }
  0xbe   :  { %376 = vmatprep.subr.bf16.mxu0 %v13109_v24  ;;  %417 = vmatprep.subr.bf16.mxu1 %v13133_v42  ;;  %v516_v22 = vld [vmem:[#allocation8 + $0x200] sm:$0xff]  ;;  %v11406_v24 = vcombine.high %v508_v14, %v512_v15  ;;  %v11405_v29 = vcombine.low %v508_v14, %v512_v15  ;;  %v517_v42 = vld [vmem:[#allocation8 + $0x208] sm:$0xff] }
  0xbf   :  { %v520_v23 = vld [vmem:[#allocation8 + $0x220] sm:$0xff]  ;;  %v533_v58 = vld [vmem:[#allocation8 + $0x288] sm:$0xff] }
  0xc0   :  { %v524_v30 = vld [vmem:[#allocation8 + $0x240] sm:$0xff]  ;;  %v11414_v32 = vcombine.high %v516_v22, %v520_v23  ;;  %v537_v59 = vld [vmem:[#allocation8 + $0x2a8] sm:$0xff] }
  0xc1   :  { %377 = vmatpush1.bf16.msra.mxu0 %v13111_v28  ;;  %418 = vmatpush1.bf16.msra.mxu1 %v13135_v49  ;;  %v11392_v28 = vcombine.high %v493_v18, %v497_v19  ;;  %v536_v39 = vld [vmem:[#allocation8 + $0x2a0] sm:$0xff]  ;;  %v541_v2 = vld [vmem:[#allocation8 + $0x2c8] sm:$0xff]  ;;  %v11431_v7 = vcombine.low %v533_v58, %v537_v59 }
  0xc2   :  { %2030 = vmatprep.subr.bf16.mxu0 %v11350_v31  ;;  %2112 = vmatprep.subr.bf16.mxu1 %v11352_v50  ;;  %v528_v31 = vld [vmem:[#allocation8 + $0x260] sm:$0xff]  ;;  %v525_v50 = vld [vmem:[#allocation8 + $0x248] sm:$0xff] }
  0xc3   :  { %v11422_v40 = vcombine.high %v524_v30, %v528_v31  ;;  %v11421_v45 = vcombine.low %v524_v30, %v528_v31  ;;  %v544_v47 = vld [vmem:[#allocation8 + $0x2e0] sm:$0xff]  ;;  %v545_v3 = vld [vmem:[#allocation8 + $0x2e8] sm:$0xff] }
  0xc4   :  { %395 = vmatmul.mubr.bf16.vlgmr.msra.gmra.mrb[0].mxu0 %v147_v34  ;;  %436 = vmatmul.mubr.bf16.vlgmr.msra.gmra.mrb[0].mxu1 %v147_v34  ;;  %v509_v34 = vld [vmem:[#allocation8 + $0x1c8] sm:$0xff]  ;;  %v552_v55 = vld [vmem:[#allocation8 + $0x320] sm:$0xff]  ;;  %v11440_v10 = vcombine.high %v541_v2, %v545_v3 }
  0xc5   :  { %2031 = vmatpush1.bf16.msra.mxu0 %v11349_v37  ;;  %2113 = vmatpush1.bf16.msra.mxu1 %v11351_v57  ;;  %v11413_v37 = vcombine.low %v516_v22, %v520_v23  ;;  %v11408_v44 = vcombine.high %v509_v34, %v513_v35  ;;  %v11407_v49 = vcombine.low %v509_v34, %v513_v35  ;;  %v556_v62 = vld [vmem:[#allocation8 + $0x340] sm:$0xff]  ;;  %v561_v14 = vld [vmem:[#allocation8 + $0x368] sm:$0xff] }
  0xc6   :  { %2032 = vmatprep.subr.bf16.mxu0 %v11358_v38  ;;  %2114 = vmatprep.subr.bf16.mxu1 %v11360_v60  ;;  %v532_v38 = vld [vmem:[#allocation8 + $0x280] sm:$0xff]  ;;  %v11424_v60 = vcombine.high %v525_v50, %v529_v51  ;;  %v569_v23 = vld [vmem:[#allocation8 + $0x3a8] sm:$0xff] }
  0xc7   :  { %v11430_v48 = vcombine.high %v532_v38, %v536_v39  ;;  %v560_v63 = vld [vmem:[#allocation8 + $0x360] sm:$0xff]  ;;  %v577_v31 = vld [vmem:[#allocation8 + $0x3e8] sm:$0xff] }
  0xc8   :  { %v11454_v6 = vcombine.high %v556_v62, %v560_v63  ;;  %v11453_v11 = vcombine.low %v556_v62, %v560_v63  ;;  %v564_v19 = vld [vmem:[#allocation8 + $0x380] sm:$0xff] }
  0xc9   :  { %2033 = vmatpush1.bf16.msra.mxu0 %v11357_v43  ;;  %2115 = vmatpush1.bf16.msra.mxu1 %v11359_v1  ;;  %v521_v43 = vld [vmem:[#allocation8 + $0x228] sm:$0xff]  ;;  %v11423_v1 = vcombine.low %v525_v50, %v529_v51  ;;  %v572_v27 = vld [vmem:[#allocation8 + $0x3c0] sm:$0xff] }
  0xca   :  { %2034 = vmatprep.subr.bf16.mxu0 %v11366_v46  ;;  %2116 = vmatprep.subr.bf16.mxu1 %v11368_v4  ;;  %v540_v46 = vld [vmem:[#allocation8 + $0x2c0] sm:$0xff]  ;;  %v11416_v52 = vcombine.high %v517_v42, %v521_v43  ;;  %v11415_v57 = vcombine.low %v517_v42, %v521_v43  ;;  %v11432_v4 = vcombine.high %v533_v58, %v537_v59  ;;  %v182_v43 = vlaneseq }
  0xcb   :  { %v11438_v56 = vcombine.high %v540_v46, %v544_v47  ;;  %v580_v35 = vld [vmem:[#allocation8 + $0x400] sm:$0xff] }
  0xcc   :  { %v592_v59 = vld [vmem:[#allocation8 + $0x460] sm:$0xff] }
  0xcd   :  { %2035 = vmatpush1.bf16.msra.mxu0 %v11365_v53  ;;  %2117 = vmatpush1.bf16.msra.mxu1 %v11367_v9  ;;  %v11429_v53 = vcombine.low %v532_v38, %v536_v39  ;;  %v553_v9 = vld [vmem:[#allocation8 + $0x328] sm:$0xff] }
  0xce   :  { %2036 = vmatprep.subr.bf16.mxu0 %v11374_v54  ;;  %2118 = vmatprep.subr.bf16.mxu1 %v11376_v12  ;;  %v548_v54 = vld [vmem:[#allocation8 + $0x300] sm:$0xff]  ;;  %v11439_v12 = vcombine.low %v541_v2, %v545_v3  ;;  %v585_v39 = vld [vmem:[#allocation8 + $0x428] sm:$0xff] }
  0xcf   :  { %v596_v3 = vld [vmem:[#allocation8 + $0x480] sm:$0xff] }
  0xd1   :  { %2037 = vmatpush1.bf16.msra.mxu0 %v11373_v61  ;;  %2119 = vmatpush1.bf16.msra.mxu1 %v11375_v17  ;;  %v11437_v61 = vcombine.low %v540_v46, %v544_v47  ;;  %v13678_v46 = vld [vmem:[#allocation7] sm:$0xf] }
  0xd2   :  { %2038 = vmatprep.subr.bf16.mxu0 %v11382_v0  ;;  %2120 = vmatprep.subr.bf16.mxu1 %v11384_v20  ;;  %v11446_v0 = vcombine.high %v548_v54, %v552_v55  ;;  %v568_v20 = vld [vmem:[#allocation8 + $0x3a0] sm:$0xff] }
  0xd3   :  { %v11462_v22 = vcombine.high %v564_v19, %v568_v20 }
  0xd5   :  { %2039 = vmatpush1.bf16.msra.mxu0 %v11381_v5  ;;  %2121 = vmatpush1.bf16.msra.mxu1 %v11383_v25  ;;  %v11445_v5 = vcombine.low %v548_v54, %v552_v55 }
  0xd6   :  { %2040 = vmatprep.subr.bf16.mxu0 %v11390_v8  ;;  %2122 = vmatprep.subr.bf16.mxu1 %v11392_v28  ;;  %v549_v8 = vld [vmem:[#allocation8 + $0x308] sm:$0xff]  ;;  %v576_v28 = vld [vmem:[#allocation8 + $0x3e0] sm:$0xff] }
  0xd7   :  { %v11448_v15 = vcombine.high %v549_v8, %v553_v9  ;;  %v11470_v30 = vcombine.high %v572_v27, %v576_v28 }
  0xd9   :  { %2041 = vmatpush1.bf16.msra.mxu0 %v11389_v13  ;;  %2123 = vmatpush1.bf16.msra.mxu1 %v11391_v33  ;;  %v557_v13 = vld [vmem:[#allocation8 + $0x348] sm:$0xff] }
  0xda   :  { %2042 = vmatprep.subr.bf16.mxu0 %v11398_v16  ;;  %2124 = vmatprep.subr.bf16.mxu1 %v11400_v36  ;;  %v11447_v16 = vcombine.low %v549_v8, %v553_v9  ;;  %v11456_v17 = vcombine.high %v557_v13, %v561_v14  ;;  %v11455_v18 = vcombine.low %v557_v13, %v561_v14  ;;  %v584_v36 = vld [vmem:[#allocation8 + $0x420] sm:$0xff] }
  0xdb   :  { %v11478_v38 = vcombine.high %v580_v35, %v584_v36  ;;  %v608_v14 = vld [vmem:[#allocation8 + $0x4e0] sm:$0xff] }
  0xdd   :  { %2043 = vmatpush1.bf16.msra.mxu0 %v11397_v21  ;;  %2125 = vmatpush1.bf16.msra.mxu1 %v11399_v41  ;;  %v565_v21 = vld [vmem:[#allocation8 + $0x388] sm:$0xff] }
  0xde   :  { %2044 = vmatprep.subr.bf16.mxu0 %v11406_v24  ;;  %2126 = vmatprep.subr.bf16.mxu1 %v11408_v44  ;;  %v11461_v24 = vcombine.low %v564_v19, %v568_v20  ;;  %v11463_v25 = vcombine.low %v565_v21, %v569_v23  ;;  %v11464_v26 = vcombine.high %v565_v21, %v569_v23  ;;  %v13673_v44 = vshrl.u32 %v182_v43, 7  ;;  %v628_v43 = vld [vmem:[#allocation8 + $0x580] sm:$0xff] }
  0xe0   :  { %v13681_v47 = vsub.s32 1, %v13673_v44  ;;  %v13688_v62 = vsub.s32 3, %v13673_v44 }
  0xe1   :  { %2045 = vmatpush1.bf16.msra.mxu0 %v11405_v29  ;;  %2127 = vmatpush1.bf16.msra.mxu1 %v11407_v49  ;;  %v573_v29 = vld [vmem:[#allocation8 + $0x3c8] sm:$0xff] }
  0xe2   :  { %2046 = vmatprep.subr.bf16.mxu0 %v11414_v32  ;;  %2128 = vmatprep.subr.bf16.mxu1 %v11416_v52  ;;  %v11469_v32 = vcombine.low %v572_v27, %v576_v28  ;;  %v11471_v33 = vcombine.low %v573_v29, %v577_v31  ;;  %v11472_v34 = vcombine.high %v573_v29, %v577_v31  ;;  %v616_v27 = vld [vmem:[#allocation8 + $0x520] sm:$0xff]  ;;  %v613_v28 = vld [vmem:[#allocation8 + $0x508] sm:$0xff] }
  0xe3   :  { %v189_v49 = vrot.slane %v13678_v46, %v13681_v47  ;;  %v617_v29 = vld [vmem:[#allocation8 + $0x528] sm:$0xff] }
  0xe5   :  { %2047 = vmatpush1.bf16.msra.mxu0 %v11413_v37  ;;  %2129 = vmatpush1.bf16.msra.mxu1 %v11415_v57  ;;  %v581_v37 = vld [vmem:[#allocation8 + $0x408] sm:$0xff]  ;;  %v588_v57 = vld [vmem:[#allocation8 + $0x440] sm:$0xff] }
  0xe6   :  { %2048 = vmatprep.subr.bf16.mxu0 %v11422_v40  ;;  %2130 = vmatprep.subr.bf16.mxu1 %v11424_v60  ;;  %v11477_v40 = vcombine.low %v580_v35, %v584_v36  ;;  %v11479_v41 = vcombine.low %v581_v37, %v585_v39  ;;  %v11480_v42 = vcombine.high %v581_v37, %v585_v39  ;;  %v589_v60 = vld [vmem:[#allocation8 + $0x448] sm:$0xff]  ;;  %v620_v35 = vld [vmem:[#allocation8 + $0x540] sm:$0xff] }
  0xe7   :  { %v11485_v8 = vcombine.low %v588_v57, %v592_v59  ;;  %v624_v36 = vld [vmem:[#allocation8 + $0x560] sm:$0xff]  ;;  %v621_v37 = vld [vmem:[#allocation8 + $0x548] sm:$0xff] }
  0xe9   :  { %2049 = vmatpush1.bf16.msra.mxu0 %v11421_v45  ;;  %2131 = vmatpush1.bf16.msra.mxu1 %v11423_v1  ;;  %v13676_v45 = vsub.s32 0, %v13673_v44  ;;  %v11486_v1 = vcombine.high %v588_v57, %v592_v59  ;;  %v637_v57 = vld [vmem:[#allocation8 + $0x5c8] sm:$0xff] }
  0xea   :  { %2050 = vmatprep.subr.bf16.mxu0 %v11430_v48  ;;  %2132 = vmatprep.subr.bf16.mxu1 %v11432_v4  ;;  %v600_v4 = vld [vmem:[#allocation8 + $0x4a0] sm:$0xff] }
  0xeb   :  { %v185_v48 = vrot.slane %v13678_v46, %v13676_v45  ;;  %v11493_v20 = vcombine.low %v596_v3, %v600_v4 }
  0xed   :  { %2051 = vmatpush1.bf16.msra.mxu0 %v11429_v53  ;;  %2133 = vmatpush1.bf16.msra.mxu1 %v11431_v7  ;;  %v197_v7 = vrot.slane %v13678_v46, %v13688_v62 }
  0xee   :  { %2052 = vmatprep.subr.bf16.mxu0 %v11438_v56  ;;  %2134 = vmatprep.subr.bf16.mxu1 %v11440_v10  ;;  %v11494_v10 = vcombine.high %v596_v3, %v600_v4  ;;  %v648_v3 = vld [vmem:[#allocation8 + $0x620] sm:$0xff]  ;;  %v645_v4 = vld [vmem:[#allocation8 + $0x608] sm:$0xff] }
  0xf1   :  { %2053 = vmatpush1.bf16.msra.mxu0 %v11437_v61  ;;  %2135 = vmatpush1.bf16.msra.mxu1 %v11439_v12  ;;  %v593_v61 = vld [vmem:[#allocation8 + $0x468] sm:$0xff]  ;;  %v604_v12 = vld [vmem:[#allocation8 + $0x4c0] sm:$0xff] }
  0xf2   :  { %2054 = vmatprep.subr.bf16.mxu0 %v11446_v0  ;;  %2136 = vmatprep.subr.bf16.mxu1 %v11448_v15  ;;  %v11488_v2 = vcombine.high %v589_v60, %v593_v61  ;;  %v11487_v9 = vcombine.low %v589_v60, %v593_v61  ;;  %v605_v15 = vld [vmem:[#allocation8 + $0x4c8] sm:$0xff]  ;;  %v11502_v23 = vcombine.high %v604_v12, %v608_v14 }
  0xf3   :  { %v11501_v31 = vcombine.low %v604_v12, %v608_v14  ;;  %v653_v12 = vld [vmem:[#allocation8 + $0x648] sm:$0xff] }
  0xf4   :  { %v657_v14 = vld [vmem:[#allocation8 + $0x668] sm:$0xff] }
  0xf5   :  { %2055 = vmatpush1.bf16.msra.mxu0 %v11445_v5  ;;  %2137 = vmatpush1.bf16.msra.mxu1 %v11447_v16  ;;  %v597_v5 = vld [vmem:[#allocation8 + $0x488] sm:$0xff] }
  0xf6   :  { %2056 = vmatprep.subr.bf16.mxu0 %v11454_v6  ;;  %2138 = vmatprep.subr.bf16.mxu1 %v11456_v17  ;;  %v601_v6 = vld [vmem:[#allocation8 + $0x4a8] sm:$0xff] }
  0xf7   :  { %v609_v16 = vld [vmem:[#allocation8 + $0x4e8] sm:$0xff]  ;;  %v11495_v21 = vcombine.low %v597_v5, %v601_v6 }
  0xf9   :  { %2057 = vmatpush1.bf16.msra.mxu0 %v11453_v11  ;;  %2139 = vmatpush1.bf16.msra.mxu1 %v11455_v18  ;;  %v11496_v11 = vcombine.high %v597_v5, %v601_v6  ;;  %v649_v5 = vld [vmem:[#allocation8 + $0x628] sm:$0xff] }
  0xfa   :  { %2058 = vmatprep.subr.bf16.mxu0 %v11462_v22  ;;  %2140 = vmatprep.subr.bf16.mxu1 %v11464_v26 }
  0xfd   :  { %2059 = vmatpush1.bf16.msra.mxu0 %v11461_v24  ;;  %2141 = vmatpush1.bf16.msra.mxu1 %v11463_v25  ;;  %v11504_v24 = vcombine.high %v605_v15, %v609_v16  ;;  %v612_v25 = vld [vmem:[#allocation8 + $0x500] sm:$0xff] }
  0xfe   :  { %2060 = vmatprep.subr.bf16.mxu0 %v11470_v30  ;;  %2142 = vmatprep.subr.bf16.mxu1 %v11472_v34  ;;  %v11512_v34 = vcombine.high %v613_v28, %v617_v29  ;;  %v11509_v39 = vcombine.low %v612_v25, %v616_v27 }
 0x101   :  { %2061 = vmatpush1.bf16.msra.mxu0 %v11469_v32  ;;  %2143 = vmatpush1.bf16.msra.mxu1 %v11471_v33  ;;  %v11503_v32 = vcombine.low %v605_v15, %v609_v16  ;;  %v11510_v33 = vcombine.high %v612_v25, %v616_v27  ;;  %v11543_v16 = vcombine.low %v645_v4, %v649_v5  ;;  %v668_v27 = vld [vmem:[#allocation8 + $0x6c0] sm:$0xff] }
 0x102   :  { %2071 = vmatprep.subr.bf16.mxu0 %v11478_v38  ;;  %2153 = vmatprep.subr.bf16.mxu1 %v11480_v42  ;;  %v625_v38 = vld [vmem:[#allocation8 + $0x568] sm:$0xff] }
 0x103   :  { %v11520_v42 = vcombine.high %v621_v37, %v625_v38 }
 0x197   :  { %v396_v50 = vpop.f32.mrb[0].mxu0  ;;  %v13700_v13 = vpop.f32.mrb[0].mxu1 }
 0x198   :  { %v397_v51 = vadd.f32 %v396_v50, %v185_v48  ;;  %v398_v52 = vpop.f32.mrb[1].mxu0  ;;  %v439_v17 = vpop.f32.mrb[1].mxu1  ;;  %v632_v48 = vld [vmem:[#allocation8 + $0x5a0] sm:$0xff]  ;;  %v633_v50 = vld [vmem:[#allocation8 + $0x5a8] sm:$0xff] }
 0x199   :  { %v399_v53 = vadd.f32 %v398_v52, %v189_v49  ;;  %v400_v54 = vpop.f32.mrb[2].mxu0  ;;  %v440_v18 = vadd.f32 %v439_v17, %v197_v7  ;;  %v441_v19 = vpop.f32.mrb[2].mxu1  ;;  %v629_v49 = vld [vmem:[#allocation8 + $0x588] sm:$0xff]  ;;  %v11519_v52 = vcombine.low %v621_v37, %v625_v38  ;;  %v11525_v59 = vcombine.low %v628_v43, %v632_v48  ;;  %v680_v37 = vld [vmem:[#allocation8 + $0x720] sm:$0xff] }
 0x19a   :  { %v444_v55 = vmax.f32 %v397_v51, 0.0  ;;  %v401_v56 = vpop.f32.mrb[3].mxu0  ;;  %v442_v22 = vpop.f32.mrb[3].mxu1  ;;  %v11517_v51 = vcombine.low %v620_v35, %v624_v36  ;;  %v11528_v54 = vcombine.high %v629_v49, %v633_v50  ;;  %v11527_v60 = vcombine.low %v629_v49, %v633_v50  ;;  %v660_v19 = vld [vmem:[#allocation8 + $0x680] sm:$0xff]  ;;  %v677_v38 = vld [vmem:[#allocation8 + $0x708] sm:$0xff] }
 0x19b   :  { %v445_v58 = vmax.f32 %v399_v53, 0.0  ;;  %v447_v26 = vmax.f32 %v440_v18, 0.0  ;;  %v11526_v53 = vcombine.high %v628_v43, %v632_v48  ;;  %v640_v56 = vld [vmem:[#allocation8 + $0x5e0] sm:$0xff]  ;;  %v11552_v18 = vcombine.high %v653_v12, %v657_v14  ;;  %v665_v22 = vld [vmem:[#allocation8 + $0x6a8] sm:$0xff] }
 0x19c   :  { %v13692_v0 = vpack.c.bf16 %v444_v55, %v444_v55  ;;  %v636_v55 = vld [vmem:[#allocation8 + $0x5c0] sm:$0xff]  ;;  %v685_v50 = vld [vmem:[#allocation8 + $0x748] sm:$0xff] }
 0x19d   :  { %v13690_v63 = vpack.c.bf16 %v445_v58, %v445_v58  ;;  %v13702_v30 = vpack.c.bf16 %v447_v26, %v447_v26  ;;  %v641_v58 = vld [vmem:[#allocation8 + $0x5e8] sm:$0xff]  ;;  %v11534_v61 = vcombine.high %v636_v55, %v640_v56  ;;  %v11533_v6 = vcombine.low %v636_v55, %v640_v56  ;;  %v684_v48 = vld [vmem:[#allocation8 + $0x740] sm:$0xff] }
 0x19e   :  { %v11535_v7 = vcombine.low %v637_v57, %v641_v58  ;;  %v688_v49 = vld [vmem:[#allocation8 + $0x760] sm:$0xff] }
 0x19f   :  { %2062 = vmatprep.mubr.bf16.mxu0 %v13690_v63  ;;  %2144 = vmatprep.mubr.bf16.mxu1 %v13690_v63  ;;  %v11582_v55 = vcombine.high %v684_v48, %v688_v49 }
 0x1a0   :  { %2063 = vmatmul.mubr.bf16.vlgmr.msra.gmra.mrb[4].mxu0 %v13692_v0  ;;  %2145 = vmatmul.mubr.bf16.vlgmr.msra.gmra.mrb[4].mxu1 %v13692_v0 }
 0x1a1   :  { %2072 = vmatpush1.bf16.msra.mxu0 %v11477_v40  ;;  %2154 = vmatpush1.bf16.msra.mxu1 %v11479_v41  ;;  %v11511_v40 = vcombine.low %v613_v28, %v617_v29  ;;  %v11518_v41 = vcombine.high %v620_v35, %v624_v36  ;;  %v672_v28 = vld [vmem:[#allocation8 + $0x6e0] sm:$0xff]  ;;  %v669_v29 = vld [vmem:[#allocation8 + $0x6c8] sm:$0xff] }
 0x1a2   :  { %2073 = vmatprep.subr.bf16.mxu0 %v11486_v1  ;;  %2155 = vmatprep.subr.bf16.mxu1 %v11488_v2  ;;  %v11536_v1 = vcombine.high %v637_v57, %v641_v58  ;;  %v644_v2 = vld [vmem:[#allocation8 + $0x600] sm:$0xff] }
 0x1a3   :  { %2103 = vmatprep.mubr.bf16.mxu0 %v13702_v30  ;;  %2185 = vmatprep.mubr.bf16.mxu1 %v13702_v30  ;;  %v11541_v15 = vcombine.low %v644_v2, %v648_v3  ;;  %v676_v36 = vld [vmem:[#allocation8 + $0x700] sm:$0xff] }
 0x1a4   :  { %v692_v57 = vld [vmem:[#allocation8 + $0x780] sm:$0xff] }
 0x1a5   :  { %2074 = vmatpush1.bf16.msra.mxu0 %v11485_v8  ;;  %2156 = vmatpush1.bf16.msra.mxu1 %v11487_v9  ;;  %v11542_v8 = vcombine.high %v644_v2, %v648_v3  ;;  %v11544_v9 = vcombine.high %v645_v4, %v649_v5  ;;  %v696_v58 = vld [vmem:[#allocation8 + $0x7a0] sm:$0xff] }
 0x1a6   :  { %2075 = vmatprep.subr.bf16.mxu0 %v11494_v10  ;;  %2157 = vmatprep.subr.bf16.mxu1 %v11496_v11  ;;  %v652_v10 = vld [vmem:[#allocation8 + $0x640] sm:$0xff]  ;;  %v11590_v3 = vcombine.high %v692_v57, %v696_v58 }
 0x1a7   :  { %v656_v11 = vld [vmem:[#allocation8 + $0x660] sm:$0xff] }
 0x1a8   :  { %v11550_v17 = vcombine.high %v652_v10, %v656_v11  ;;  %v700_v5 = vld [vmem:[#allocation8 + $0x7c0] sm:$0xff] }
 0x1a9   :  { %2076 = vmatpush1.bf16.msra.mxu0 %v11493_v20  ;;  %2158 = vmatpush1.bf16.msra.mxu1 %v11495_v21  ;;  %v664_v20 = vld [vmem:[#allocation8 + $0x6a0] sm:$0xff]  ;;  %v661_v21 = vld [vmem:[#allocation8 + $0x688] sm:$0xff] }
 0x1aa   :  { %2077 = vmatprep.subr.bf16.mxu0 %v11502_v23  ;;  %2159 = vmatprep.subr.bf16.mxu1 %v11504_v24  ;;  %v11549_v23 = vcombine.low %v652_v10, %v656_v11  ;;  %v11551_v24 = vcombine.low %v653_v12, %v657_v14  ;;  %v11558_v25 = vcombine.high %v660_v19, %v664_v20 }
 0x1ab   :  { %v11560_v26 = vcombine.high %v661_v21, %v665_v22 }
 0x1ad   :  { %2078 = vmatpush1.bf16.msra.mxu0 %v11501_v31  ;;  %2160 = vmatpush1.bf16.msra.mxu1 %v11503_v32  ;;  %v673_v31 = vld [vmem:[#allocation8 + $0x6e8] sm:$0xff]  ;;  %v11557_v32 = vcombine.low %v660_v19, %v664_v20 }
 0x1ae   :  { %2079 = vmatprep.subr.bf16.mxu0 %v11510_v33  ;;  %2161 = vmatprep.subr.bf16.mxu1 %v11512_v34  ;;  %v11559_v33 = vcombine.low %v661_v21, %v665_v22  ;;  %v11566_v34 = vcombine.high %v668_v27, %v672_v28  ;;  %v11568_v35 = vcombine.high %v669_v29, %v673_v31 }
 0x1b1   :  { %2080 = vmatpush1.bf16.msra.mxu0 %v11509_v39  ;;  %2162 = vmatpush1.bf16.msra.mxu1 %v11511_v40  ;;  %v681_v39 = vld [vmem:[#allocation8 + $0x728] sm:$0xff]  ;;  %v11565_v40 = vcombine.low %v668_v27, %v672_v28 }
 0x1b2   :  { %2081 = vmatprep.subr.bf16.mxu0 %v11518_v41  ;;  %2163 = vmatprep.subr.bf16.mxu1 %v11520_v42  ;;  %v11567_v41 = vcombine.low %v669_v29, %v673_v31  ;;  %v11574_v42 = vcombine.high %v676_v36, %v680_v37  ;;  %v11576_v43 = vcombine.high %v677_v38, %v681_v39 }
 0x1b5   :  { %2082 = vmatpush1.bf16.msra.mxu0 %v11517_v51  ;;  %2164 = vmatpush1.bf16.msra.mxu1 %v11519_v52  ;;  %v689_v51 = vld [vmem:[#allocation8 + $0x768] sm:$0xff]  ;;  %v11573_v52 = vcombine.low %v676_v36, %v680_v37 }
 0x1b6   :  { %2083 = vmatprep.subr.bf16.mxu0 %v11526_v53  ;;  %2165 = vmatprep.subr.bf16.mxu1 %v11528_v54  ;;  %v11575_v53 = vcombine.low %v677_v38, %v681_v39  ;;  %v13707_v54 = vsub.s32 2, %v13673_v44  ;;  %v11584_v56 = vcombine.high %v685_v50, %v689_v51 }
 0x1b8   :  { %v193_v2 = vrot.slane %v13678_v46, %v13707_v54  ;;  %v458_v46 = vld [vmem:[#allocation8 + $0x30] sm:$0xff] }
 0x1b9   :  { %2084 = vmatpush1.bf16.msra.mxu0 %v11525_v59  ;;  %2166 = vmatpush1.bf16.msra.mxu1 %v11527_v60  ;;  %v693_v59 = vld [vmem:[#allocation8 + $0x788] sm:$0xff] }
 0x1ba   :  { %2085 = vmatprep.subr.bf16.mxu0 %v11534_v61  ;;  %2167 = vmatprep.subr.bf16.mxu1 %v11536_v1  ;;  %v697_v60 = vld [vmem:[#allocation8 + $0x7a8] sm:$0xff]  ;;  %v11581_v61 = vcombine.low %v684_v48, %v688_v49  ;;  %v11583_v1 = vcombine.low %v685_v50, %v689_v51  ;;  %v438_v11 = vadd.f32 %v13700_v13, %v193_v2  ;;  %v463_v13 = vld [vmem:[#allocation8 + $0x58] sm:$0xff] }
 0x1bb   :  { %v11592_v4 = vcombine.high %v693_v59, %v697_v60  ;;  %v11591_v10 = vcombine.low %v693_v59, %v697_v60  ;;  %v494_v60 = vld [vmem:[#allocation8 + $0x150] sm:$0xff]  ;;  %v499_v2 = vld [vmem:[#allocation8 + $0x178] sm:$0xff] }
 0x1bc   :  { %v446_v20 = vmax.f32 %v438_v11, 0.0 }
 0x1bd   :  { %2086 = vmatpush1.bf16.msra.mxu0 %v11533_v6  ;;  %2168 = vmatpush1.bf16.msra.mxu1 %v11535_v7  ;;  %v704_v6 = vld [vmem:[#allocation8 + $0x7e0] sm:$0xff]  ;;  %v701_v7 = vld [vmem:[#allocation8 + $0x7c8] sm:$0xff] }
 0x1be   :  { %2087 = vmatprep.subr.bf16.mxu0 %v11542_v8  ;;  %2169 = vmatprep.subr.bf16.mxu1 %v11544_v9  ;;  %v705_v8 = vld [vmem:[#allocation8 + $0x7e8] sm:$0xff]  ;;  %v11589_v9 = vcombine.low %v692_v57, %v696_v58  ;;  %v11598_v12 = vcombine.high %v700_v5, %v704_v6  ;;  %v13712_v27 = vpack.c.bf16 %v446_v20, %v446_v20 }
 0x1bf   :  { %v11600_v14 = vcombine.high %v701_v7, %v705_v8  ;;  %v11599_v19 = vcombine.low %v701_v7, %v705_v8  ;;  %v502_v7 = vld [vmem:[#allocation8 + $0x190] sm:$0xff] }
 0x1c0   :  { %v506_v8 = vld [vmem:[#allocation8 + $0x1b0] sm:$0xff] }
 0x1c1   :  { %2088 = vmatpush1.bf16.msra.mxu0 %v11541_v15  ;;  %2170 = vmatpush1.bf16.msra.mxu1 %v11543_v16  ;;  %v454_v15 = vld [vmem:[#allocation8 + $0x10] sm:$0xff]  ;;  %v455_v16 = vld [vmem:[#allocation8 + $0x18] sm:$0xff] }
 0x1c2   :  { %2089 = vmatprep.subr.bf16.mxu0 %v11550_v17  ;;  %2171 = vmatprep.subr.bf16.mxu1 %v11552_v18  ;;  %v459_v17 = vld [vmem:[#allocation8 + $0x38] sm:$0xff]  ;;  %v11597_v18 = vcombine.low %v700_v5, %v704_v6  ;;  %v11354_v21 = vcombine.high %v454_v15, %v458_v46 }
 0x1c3   :  { %v11356_v22 = vcombine.high %v455_v16, %v459_v17  ;;  %v11355_v28 = vcombine.low %v455_v16, %v459_v17  ;;  %v514_v16 = vld [vmem:[#allocation8 + $0x1f0] sm:$0xff]  ;;  %v511_v17 = vld [vmem:[#allocation8 + $0x1d8] sm:$0xff] }
 0x1c5   :  { %2090 = vmatpush1.bf16.msra.mxu0 %v11549_v23  ;;  %2172 = vmatpush1.bf16.msra.mxu1 %v11551_v24  ;;  %v462_v23 = vld [vmem:[#allocation8 + $0x50] sm:$0xff] }
 0x1c6   :  { %2091 = vmatprep.subr.bf16.mxu0 %v11558_v25  ;;  %2173 = vmatprep.subr.bf16.mxu1 %v11560_v26  ;;  %v466_v24 = vld [vmem:[#allocation8 + $0x70] sm:$0xff]  ;;  %v467_v25 = vld [vmem:[#allocation8 + $0x78] sm:$0xff]  ;;  %v11353_v26 = vcombine.low %v454_v15, %v458_v46 }
 0x1c7   :  { %v11362_v29 = vcombine.high %v462_v23, %v466_v24  ;;  %v11364_v31 = vcombine.high %v463_v13, %v467_v25  ;;  %v11361_v36 = vcombine.low %v462_v23, %v466_v24  ;;  %v11363_v37 = vcombine.low %v463_v13, %v467_v25  ;;  %v510_v46 = vld [vmem:[#allocation8 + $0x1d0] sm:$0xff]  ;;  %v519_v13 = vld [vmem:[#allocation8 + $0x218] sm:$0xff] }
 0x1c8   :  { %v518_v23 = vld [vmem:[#allocation8 + $0x210] sm:$0xff]  ;;  %v523_v25 = vld [vmem:[#allocation8 + $0x238] sm:$0xff] }
 0x1c9   :  { %2092 = vmatpush1.bf16.msra.mxu0 %v11557_v32  ;;  %2174 = vmatpush1.bf16.msra.mxu1 %v11559_v33  ;;  %v470_v32 = vld [vmem:[#allocation8 + $0x90] sm:$0xff] }
 0x1ca   :  { %2093 = vmatprep.subr.bf16.mxu0 %v11566_v34  ;;  %2175 = vmatprep.subr.bf16.mxu1 %v11568_v35  ;;  %v474_v33 = vld [vmem:[#allocation8 + $0xb0] sm:$0xff]  ;;  %v471_v34 = vld [vmem:[#allocation8 + $0x98] sm:$0xff] }
 0x1cb   :  { %v475_v35 = vld [vmem:[#allocation8 + $0xb8] sm:$0xff]  ;;  %v11370_v38 = vcombine.high %v470_v32, %v474_v33  ;;  %v11369_v48 = vcombine.low %v470_v32, %v474_v33  ;;  %v522_v24 = vld [vmem:[#allocation8 + $0x230] sm:$0xff] }
 0x1cc   :  { %v11372_v39 = vcombine.high %v471_v34, %v475_v35  ;;  %v11371_v49 = vcombine.low %v471_v34, %v475_v35  ;;  %v526_v32 = vld [vmem:[#allocation8 + $0x250] sm:$0xff]  ;;  %v527_v34 = vld [vmem:[#allocation8 + $0x258] sm:$0xff] }
 0x1cd   :  { %2094 = vmatpush1.bf16.msra.mxu0 %v11565_v40  ;;  %2176 = vmatpush1.bf16.msra.mxu1 %v11567_v41  ;;  %v478_v40 = vld [vmem:[#allocation8 + $0xd0] sm:$0xff]  ;;  %v531_v35 = vld [vmem:[#allocation8 + $0x278] sm:$0xff] }
 0x1ce   :  { %2095 = vmatprep.subr.bf16.mxu0 %v11574_v42  ;;  %2177 = vmatprep.subr.bf16.mxu1 %v11576_v43  ;;  %v482_v41 = vld [vmem:[#allocation8 + $0xf0] sm:$0xff]  ;;  %v479_v42 = vld [vmem:[#allocation8 + $0xd8] sm:$0xff] }
 0x1cf   :  { %v483_v43 = vld [vmem:[#allocation8 + $0xf8] sm:$0xff]  ;;  %v11378_v50 = vcombine.high %v478_v40, %v482_v41  ;;  %v530_v33 = vld [vmem:[#allocation8 + $0x270] sm:$0xff] }
 0x1d0   :  { %v11380_v51 = vcombine.high %v479_v42, %v483_v43  ;;  %v11379_v57 = vcombine.low %v479_v42, %v483_v43  ;;  %v535_v42 = vld [vmem:[#allocation8 + $0x298] sm:$0xff] }
 0x1d1   :  { %2096 = vmatpush1.bf16.msra.mxu0 %v11573_v52  ;;  %2178 = vmatpush1.bf16.msra.mxu1 %v11575_v53  ;;  %v486_v52 = vld [vmem:[#allocation8 + $0x110] sm:$0xff]  ;;  %v539_v43 = vld [vmem:[#allocation8 + $0x2b8] sm:$0xff] }
 0x1d2   :  { %2097 = vmatprep.subr.bf16.mxu0 %v11582_v55  ;;  %2179 = vmatprep.subr.bf16.mxu1 %v11584_v56  ;;  %v490_v53 = vld [vmem:[#allocation8 + $0x130] sm:$0xff]  ;;  %v491_v55 = vld [vmem:[#allocation8 + $0x138] sm:$0xff]  ;;  %v11377_v56 = vcombine.low %v478_v40, %v482_v41 }
 0x1d3   :  { %v11386_v58 = vcombine.high %v486_v52, %v490_v53  ;;  %v534_v40 = vld [vmem:[#allocation8 + $0x290] sm:$0xff] }
 0x1d4   :  { %v538_v41 = vld [vmem:[#allocation8 + $0x2b0] sm:$0xff] }
 0x1d5   :  { %2098 = vmatpush1.bf16.msra.mxu0 %v11581_v61  ;;  %2180 = vmatpush1.bf16.msra.mxu1 %v11583_v1  ;;  %v498_v61 = vld [vmem:[#allocation8 + $0x170] sm:$0xff]  ;;  %v495_v1 = vld [vmem:[#allocation8 + $0x158] sm:$0xff] }
 0x1d6   :  { %2099 = vmatprep.subr.bf16.mxu0 %v11590_v3  ;;  %2181 = vmatprep.subr.bf16.mxu1 %v11592_v4  ;;  %v11385_v3 = vcombine.low %v486_v52, %v490_v53  ;;  %v11394_v5 = vcombine.high %v494_v60, %v498_v61  ;;  %v11396_v6 = vcombine.high %v495_v1, %v499_v2  ;;  %v542_v52 = vld [vmem:[#allocation8 + $0x2d0] sm:$0xff] }
 0x1d7   :  { %v11393_v11 = vcombine.low %v494_v60, %v498_v61  ;;  %v546_v53 = vld [vmem:[#allocation8 + $0x2f0] sm:$0xff] }
 0x1d8   :  { %v550_v60 = vld [vmem:[#allocation8 + $0x310] sm:$0xff] }
 0x1d9   :  { %2100 = vmatpush1.bf16.msra.mxu0 %v11589_v9  ;;  %2182 = vmatpush1.bf16.msra.mxu1 %v11591_v10  ;;  %v503_v9 = vld [vmem:[#allocation8 + $0x198] sm:$0xff]  ;;  %v554_v61 = vld [vmem:[#allocation8 + $0x330] sm:$0xff] }
 0x1da   :  { %2101 = vmatprep.subr.bf16.mxu0 %v11598_v12  ;;  %2183 = vmatprep.subr.bf16.mxu1 %v11600_v14  ;;  %v507_v10 = vld [vmem:[#allocation8 + $0x1b8] sm:$0xff]  ;;  %v11395_v12 = vcombine.low %v495_v1, %v499_v2  ;;  %v11402_v14 = vcombine.high %v502_v7, %v506_v8 }
 0x1db   :  { %v11404_v15 = vcombine.high %v503_v9, %v507_v10  ;;  %v11403_v20 = vcombine.low %v503_v9, %v507_v10  ;;  %v551_v1 = vld [vmem:[#allocation8 + $0x318] sm:$0xff] }
 0x1dc   :  { %v555_v2 = vld [vmem:[#allocation8 + $0x338] sm:$0xff] }
 0x1dd   :  { %2102 = vmatpush1.bf16.msra.mxu0 %v11597_v18  ;;  %2184 = vmatpush1.bf16.msra.mxu1 %v11599_v19  ;;  %v515_v18 = vld [vmem:[#allocation8 + $0x1f8] sm:$0xff]  ;;  %v11401_v19 = vcombine.low %v502_v7, %v506_v8  ;;  %v558_v7 = vld [vmem:[#allocation8 + $0x350] sm:$0xff] }
 0x1de   :  { %2194 = vmatprep.subr.bf16.mxu0 %v11354_v21  ;;  %2276 = vmatprep.subr.bf16.mxu1 %v11356_v22  ;;  %v11410_v21 = vcombine.high %v510_v46, %v514_v16  ;;  %v11412_v22 = vcombine.high %v511_v17, %v515_v18  ;;  %v562_v8 = vld [vmem:[#allocation8 + $0x370] sm:$0xff]  ;;  %v559_v9 = vld [vmem:[#allocation8 + $0x358] sm:$0xff] }
 0x1df   :  { %v563_v10 = vld [vmem:[#allocation8 + $0x378] sm:$0xff] }
 0x1e0   :  { %2104 = vmatmul.mubr.bf16.vlgmr.msra.gmra.mrb[4].mxu0 %v13712_v27  ;;  %2186 = vmatmul.mubr.bf16.vlgmr.msra.gmra.mrb[4].mxu1 %v13712_v27 }
 0x1e1   :  { %2195 = vmatpush1.bf16.msra.mxu0 %v11353_v26  ;;  %2226 = vmatprep.mubr.bf16.mxu0 %v13690_v63  ;;  %v11409_v26 = vcombine.low %v510_v46, %v514_v16  ;;  %v566_v46 = vld [vmem:[#allocation8 + $0x390] sm:$0xff] }
 0x1e2   :  { %2277 = vmatpush1.bf16.msra.mxu1 %v11355_v28  ;;  %2308 = vmatprep.mubr.bf16.mxu1 %v13690_v63  ;;  %v487_v63 = vld [vmem:[#allocation8 + $0x118] sm:$0xff]  ;;  %v11411_v28 = vcombine.low %v511_v17, %v515_v18  ;;  %v570_v16 = vld [vmem:[#allocation8 + $0x3b0] sm:$0xff] }
 0x1e3   :  { %2196 = vmatprep.subr.bf16.mxu0 %v11362_v29  ;;  %2278 = vmatprep.subr.bf16.mxu1 %v11364_v31  ;;  %v11388_v59 = vcombine.high %v487_v63, %v491_v55  ;;  %v11387_v4 = vcombine.low %v487_v63, %v491_v55  ;;  %v11418_v29 = vcombine.high %v518_v23, %v522_v24  ;;  %v543_v63 = vld [vmem:[#allocation8 + $0x2d8] sm:$0xff] }
 0x1e4   :  { %v11420_v31 = vcombine.high %v519_v13, %v523_v25  ;;  %v547_v55 = vld [vmem:[#allocation8 + $0x2f8] sm:$0xff] }
 0x1e5   :  { %2197 = vmatpush1.bf16.msra.mxu0 %v11361_v36  ;;  %v11417_v36 = vcombine.low %v518_v23, %v522_v24  ;;  %v567_v17 = vld [vmem:[#allocation8 + $0x398] sm:$0xff]  ;;  %v574_v23 = vld [vmem:[#allocation8 + $0x3d0] sm:$0xff] }
 0x1e6   :  { %2279 = vmatpush1.bf16.msra.mxu1 %v11363_v37  ;;  %2198 = vmatprep.subr.bf16.mxu0 %v11370_v38  ;;  %v11419_v37 = vcombine.low %v519_v13, %v523_v25  ;;  %v11426_v38 = vcombine.high %v526_v32, %v530_v33  ;;  %v571_v18 = vld [vmem:[#allocation8 + $0x3b8] sm:$0xff]  ;;  %v578_v24 = vld [vmem:[#allocation8 + $0x3f0] sm:$0xff] }
 0x1e7   :  { %2280 = vmatprep.subr.bf16.mxu1 %v11372_v39  ;;  %v11428_v39 = vcombine.high %v527_v34, %v531_v35  ;;  %v575_v13 = vld [vmem:[#allocation8 + $0x3d8] sm:$0xff] }
 0x1e8   :  { %v579_v25 = vld [vmem:[#allocation8 + $0x3f8] sm:$0xff] }
 0x1e9   :  { %2199 = vmatpush1.bf16.msra.mxu0 %v11369_v48  ;;  %v11425_v48 = vcombine.low %v526_v32, %v530_v33  ;;  %v582_v32 = vld [vmem:[#allocation8 + $0x410] sm:$0xff] }
 0x1ea   :  { %2281 = vmatpush1.bf16.msra.mxu1 %v11371_v49  ;;  %2200 = vmatprep.subr.bf16.mxu0 %v11378_v50  ;;  %v11427_v49 = vcombine.low %v527_v34, %v531_v35  ;;  %v11434_v50 = vcombine.high %v534_v40, %v538_v41  ;;  %v586_v33 = vld [vmem:[#allocation8 + $0x430] sm:$0xff]  ;;  %v583_v34 = vld [vmem:[#allocation8 + $0x418] sm:$0xff] }
 0x1eb   :  { %2282 = vmatprep.subr.bf16.mxu1 %v11380_v51  ;;  %v11436_v51 = vcombine.high %v535_v42, %v539_v43  ;;  %v587_v35 = vld [vmem:[#allocation8 + $0x438] sm:$0xff] }
 0x1ed   :  { %2201 = vmatpush1.bf16.msra.mxu0 %v11377_v56  ;;  %v11433_v56 = vcombine.low %v534_v40, %v538_v41  ;;  %v590_v40 = vld [vmem:[#allocation8 + $0x450] sm:$0xff] }
 0x1ee   :  { %2283 = vmatpush1.bf16.msra.mxu1 %v11379_v57  ;;  %2202 = vmatprep.subr.bf16.mxu0 %v11386_v58  ;;  %v11435_v57 = vcombine.low %v535_v42, %v539_v43  ;;  %v11442_v58 = vcombine.high %v542_v52, %v546_v53  ;;  %v594_v41 = vld [vmem:[#allocation8 + $0x470] sm:$0xff]  ;;  %v11481_v42 = vcombine.low %v582_v32, %v586_v33  ;;  %v591_v43 = vld [vmem:[#allocation8 + $0x458] sm:$0xff] }
 0x1ef   :  { %2284 = vmatprep.subr.bf16.mxu1 %v11388_v59  ;;  %v11444_v59 = vcombine.high %v543_v63, %v547_v55 }
 0x1f1   :  { %2203 = vmatpush1.bf16.msra.mxu0 %v11385_v3  ;;  %v11441_v3 = vcombine.low %v542_v52, %v546_v53  ;;  %v602_v52 = vld [vmem:[#allocation8 + $0x4b0] sm:$0xff] }
 0x1f2   :  { %2285 = vmatpush1.bf16.msra.mxu1 %v11387_v4  ;;  %2204 = vmatprep.subr.bf16.mxu0 %v11394_v5  ;;  %v11443_v4 = vcombine.low %v543_v63, %v547_v55  ;;  %v11450_v5 = vcombine.high %v550_v60, %v554_v61  ;;  %v599_v63 = vld [vmem:[#allocation8 + $0x498] sm:$0xff] }
 0x1f3   :  { %2286 = vmatprep.subr.bf16.mxu1 %v11396_v6  ;;  %v11452_v6 = vcombine.high %v551_v1, %v555_v2  ;;  %v603_v55 = vld [vmem:[#allocation8 + $0x4b8] sm:$0xff] }
 0x1f5   :  { %2205 = vmatpush1.bf16.msra.mxu0 %v11393_v11  ;;  %v11449_v11 = vcombine.low %v550_v60, %v554_v61  ;;  %v606_v60 = vld [vmem:[#allocation8 + $0x4d0] sm:$0xff] }
 0x1f6   :  { %2287 = vmatpush1.bf16.msra.mxu1 %v11395_v12  ;;  %2206 = vmatprep.subr.bf16.mxu0 %v11402_v14  ;;  %v11451_v12 = vcombine.low %v551_v1, %v555_v2  ;;  %v11458_v14 = vcombine.high %v558_v7, %v562_v8  ;;  %v610_v61 = vld [vmem:[#allocation8 + $0x4f0] sm:$0xff]  ;;  %v607_v1 = vld [vmem:[#allocation8 + $0x4d8] sm:$0xff] }
 0x1f7   :  { %2288 = vmatprep.subr.bf16.mxu1 %v11404_v15  ;;  %v11460_v15 = vcombine.high %v559_v9, %v563_v10  ;;  %v611_v2 = vld [vmem:[#allocation8 + $0x4f8] sm:$0xff] }
 0x1f9   :  { %2207 = vmatpush1.bf16.msra.mxu0 %v11401_v19  ;;  %v11457_v19 = vcombine.low %v558_v7, %v562_v8  ;;  %v618_v7 = vld [vmem:[#allocation8 + $0x530] sm:$0xff]  ;;  %v615_v8 = vld [vmem:[#allocation8 + $0x518] sm:$0xff] }
 0x1fa   :  { %2289 = vmatpush1.bf16.msra.mxu1 %v11403_v20  ;;  %2208 = vmatprep.subr.bf16.mxu0 %v11410_v21  ;;  %v11459_v20 = vcombine.low %v559_v9, %v563_v10  ;;  %v11466_v21 = vcombine.high %v566_v46, %v570_v16  ;;  %v619_v9 = vld [vmem:[#allocation8 + $0x538] sm:$0xff]  ;;  %v11507_v10 = vcombine.low %v607_v1, %v611_v2 }
 0x1fb   :  { %2290 = vmatprep.subr.bf16.mxu1 %v11412_v22  ;;  %v11468_v22 = vcombine.high %v567_v17, %v571_v18 }
 0x1fd   :  { %2209 = vmatpush1.bf16.msra.mxu0 %v11409_v26  ;;  %v11465_v26 = vcombine.low %v566_v46, %v570_v16  ;;  %v623_v46 = vld [vmem:[#allocation8 + $0x558] sm:$0xff] }
 0x1fe   :  { %2291 = vmatpush1.bf16.msra.mxu1 %v11411_v28  ;;  %2210 = vmatprep.subr.bf16.mxu0 %v11418_v29  ;;  %v11467_v28 = vcombine.low %v567_v17, %v571_v18  ;;  %v11474_v29 = vcombine.high %v574_v23, %v578_v24  ;;  %v627_v16 = vld [vmem:[#allocation8 + $0x578] sm:$0xff]  ;;  %v11515_v18 = vcombine.low %v615_v8, %v619_v9 }
 0x1ff   :  { %2292 = vmatprep.subr.bf16.mxu1 %v11420_v31  ;;  %v11476_v31 = vcombine.high %v575_v13, %v579_v25 }
 0x201   :  { %2211 = vmatpush1.bf16.msra.mxu0 %v11417_v36  ;;  %v11473_v36 = vcombine.low %v574_v23, %v578_v24  ;;  %v631_v23 = vld [vmem:[#allocation8 + $0x598] sm:$0xff] }
 0x202   :  { %2293 = vmatpush1.bf16.msra.mxu1 %v11419_v37  ;;  %2212 = vmatprep.subr.bf16.mxu0 %v11426_v38  ;;  %v11475_v37 = vcombine.low %v575_v13, %v579_v25  ;;  %v11482_v38 = vcombine.high %v582_v32, %v586_v33  ;;  %v635_v24 = vld [vmem:[#allocation8 + $0x5b8] sm:$0xff]  ;;  %v11523_v25 = vcombine.low %v623_v46, %v627_v16 }
 0x203   :  { %2294 = vmatprep.subr.bf16.mxu1 %v11428_v39  ;;  %v11484_v39 = vcombine.high %v583_v34, %v587_v35  ;;  %v639_v32 = vld [vmem:[#allocation8 + $0x5d8] sm:$0xff] }
 0x204   :  { %v643_v33 = vld [vmem:[#allocation8 + $0x5f8] sm:$0xff] }
 0x205   :  { %2213 = vmatpush1.bf16.msra.mxu0 %v11425_v48  ;;  %v595_v48 = vld [vmem:[#allocation8 + $0x478] sm:$0xff] }
 0x206   :  { %2295 = vmatpush1.bf16.msra.mxu1 %v11427_v49  ;;  %2214 = vmatprep.subr.bf16.mxu0 %v11434_v50  ;;  %v11483_v49 = vcombine.low %v583_v34, %v587_v35  ;;  %v11490_v50 = vcombine.high %v590_v40, %v594_v41  ;;  %v11492_v53 = vcombine.high %v591_v43, %v595_v48 }
 0x207   :  { %2296 = vmatprep.subr.bf16.mxu1 %v11436_v51  ;;  %v598_v51 = vld [vmem:[#allocation8 + $0x490] sm:$0xff]  ;;  %v11531_v35 = vcombine.low %v631_v23, %v635_v24 }
 0x209   :  { %2215 = vmatpush1.bf16.msra.mxu0 %v11433_v56  ;;  %v11489_v56 = vcombine.low %v590_v40, %v594_v41  ;;  %v647_v40 = vld [vmem:[#allocation8 + $0x618] sm:$0xff] }
 0x20a   :  { %2297 = vmatpush1.bf16.msra.mxu1 %v11435_v57  ;;  %2216 = vmatprep.subr.bf16.mxu0 %v11442_v58  ;;  %v11491_v57 = vcombine.low %v591_v43, %v595_v48  ;;  %v11498_v58 = vcombine.high %v598_v51, %v602_v52  ;;  %v651_v41 = vld [vmem:[#allocation8 + $0x638] sm:$0xff]  ;;  %v11539_v43 = vcombine.low %v639_v32, %v643_v33 }
 0x20b   :  { %2298 = vmatprep.subr.bf16.mxu1 %v11444_v59  ;;  %v11500_v59 = vcombine.high %v599_v63, %v603_v55 }
 0x20d   :  { %2217 = vmatpush1.bf16.msra.mxu0 %v11441_v3  ;;  %v11497_v3 = vcombine.low %v598_v51, %v602_v52  ;;  %v658_v51 = vld [vmem:[#allocation8 + $0x670] sm:$0xff]  ;;  %v655_v52 = vld [vmem:[#allocation8 + $0x658] sm:$0xff] }
 0x20e   :  { %2299 = vmatpush1.bf16.msra.mxu1 %v11443_v4  ;;  %2218 = vmatprep.subr.bf16.mxu0 %v11450_v5  ;;  %v11506_v4 = vcombine.high %v606_v60, %v610_v61  ;;  %v11508_v5 = vcombine.high %v607_v1, %v611_v2 }
 0x20f   :  { %2300 = vmatprep.subr.bf16.mxu1 %v11452_v6  ;;  %v614_v6 = vld [vmem:[#allocation8 + $0x510] sm:$0xff] }
 0x210   :  { %v11513_v17 = vcombine.low %v614_v6, %v618_v7 }
 0x211   :  { %2219 = vmatpush1.bf16.msra.mxu0 %v11449_v11  ;;  %v11514_v11 = vcombine.high %v614_v6, %v618_v7  ;;  %v671_v6 = vld [vmem:[#allocation8 + $0x6d8] sm:$0xff] }
 0x212   :  { %2301 = vmatpush1.bf16.msra.mxu1 %v11451_v12  ;;  %2220 = vmatprep.subr.bf16.mxu0 %v11458_v14  ;;  %v11516_v12 = vcombine.high %v615_v8, %v619_v9  ;;  %v622_v14 = vld [vmem:[#allocation8 + $0x550] sm:$0xff]  ;;  %v675_v7 = vld [vmem:[#allocation8 + $0x6f8] sm:$0xff] }
 0x213   :  { %2302 = vmatprep.subr.bf16.mxu1 %v11460_v15  ;;  %v626_v15 = vld [vmem:[#allocation8 + $0x570] sm:$0xff] }
 0x214   :  { %v11521_v13 = vcombine.low %v622_v14, %v626_v15 }
 0x215   :  { %2221 = vmatpush1.bf16.msra.mxu0 %v11457_v19  ;;  %v11522_v19 = vcombine.high %v622_v14, %v626_v15  ;;  %v679_v14 = vld [vmem:[#allocation8 + $0x718] sm:$0xff] }
 0x216   :  { %2303 = vmatpush1.bf16.msra.mxu1 %v11459_v20  ;;  %2222 = vmatprep.subr.bf16.mxu0 %v11466_v21  ;;  %v11524_v20 = vcombine.high %v623_v46, %v627_v16  ;;  %v630_v21 = vld [vmem:[#allocation8 + $0x590] sm:$0xff]  ;;  %v683_v15 = vld [vmem:[#allocation8 + $0x738] sm:$0xff]  ;;  %v11571_v16 = vcombine.low %v671_v6, %v675_v7 }
 0x217   :  { %2304 = vmatprep.subr.bf16.mxu1 %v11468_v22  ;;  %v634_v22 = vld [vmem:[#allocation8 + $0x5b0] sm:$0xff] }
 0x218   :  { %v11529_v34 = vcombine.low %v630_v21, %v634_v22 }
 0x219   :  { %2223 = vmatpush1.bf16.msra.mxu0 %v11465_v26  ;;  %v11530_v26 = vcombine.high %v630_v21, %v634_v22  ;;  %v687_v21 = vld [vmem:[#allocation8 + $0x758] sm:$0xff] }
 0x21a   :  { %2305 = vmatpush1.bf16.msra.mxu1 %v11467_v28  ;;  %2224 = vmatprep.subr.bf16.mxu0 %v11474_v29  ;;  %v11532_v28 = vcombine.high %v631_v23, %v635_v24  ;;  %v638_v29 = vld [vmem:[#allocation8 + $0x5d0] sm:$0xff]  ;;  %v691_v22 = vld [vmem:[#allocation8 + $0x778] sm:$0xff]  ;;  %v11579_v24 = vcombine.low %v679_v14, %v683_v15 }
 0x21b   :  { %2306 = vmatprep.subr.bf16.mxu1 %v11476_v31  ;;  %v642_v31 = vld [vmem:[#allocation8 + $0x5f0] sm:$0xff] }
 0x21d   :  { %2225 = vmatpush1.bf16.msra.mxu0 %v11473_v36  ;;  %v11538_v36 = vcombine.high %v638_v29, %v642_v31 }
 0x21e   :  { %2307 = vmatpush1.bf16.msra.mxu1 %v11475_v37  ;;  %2235 = vmatprep.subr.bf16.mxu0 %v11482_v38  ;;  %v11540_v37 = vcombine.high %v639_v32, %v643_v33  ;;  %v646_v38 = vld [vmem:[#allocation8 + $0x610] sm:$0xff]  ;;  %v11587_v33 = vcombine.low %v687_v21, %v691_v22 }
 0x21f   :  { %2317 = vmatprep.subr.bf16.mxu1 %v11484_v39  ;;  %v650_v39 = vld [vmem:[#allocation8 + $0x630] sm:$0xff] }
 0x220   :  { %2227 = vmatmul.mubr.bf16.vlgmr.msra.gmra.mrb[8].mxu0 %v13692_v0  ;;  %v11546_v48 = vcombine.high %v646_v38, %v650_v39 }
 0x221   :  { %2309 = vmatmul.mubr.bf16.vlgmr.msra.gmra.mrb[8].mxu1 %v13692_v0  ;;  %2236 = vmatpush1.bf16.msra.mxu0 %v11481_v42  ;;  %v11499_v0 = vcombine.low %v599_v63, %v603_v55  ;;  %v11537_v42 = vcombine.low %v638_v29, %v642_v31  ;;  %v11545_v63 = vcombine.low %v646_v38, %v650_v39  ;;  %v695_v29 = vld [vmem:[#allocation8 + $0x798] sm:$0xff] }
 0x222   :  { %2267 = vmatprep.mubr.bf16.mxu0 %v13702_v30  ;;  %2318 = vmatpush1.bf16.msra.mxu1 %v11483_v49  ;;  %v11548_v49 = vcombine.high %v647_v40, %v651_v41  ;;  %v11547_v55 = vcombine.low %v647_v40, %v651_v41  ;;  %v699_v31 = vld [vmem:[#allocation8 + $0x7b8] sm:$0xff] }
 0x223   :  { %2349 = vmatprep.mubr.bf16.mxu1 %v13702_v30  ;;  %2237 = vmatprep.subr.bf16.mxu0 %v11490_v50  ;;  %v11505_v30 = vcombine.low %v606_v60, %v610_v61  ;;  %v654_v50 = vld [vmem:[#allocation8 + $0x650] sm:$0xff]  ;;  %v663_v60 = vld [vmem:[#allocation8 + $0x698] sm:$0xff]  ;;  %v11595_v41 = vcombine.low %v695_v29, %v699_v31 }
 0x224   :  { %2319 = vmatprep.subr.bf16.mxu1 %v11492_v53  ;;  %v659_v53 = vld [vmem:[#allocation8 + $0x678] sm:$0xff]  ;;  %v11553_v1 = vcombine.low %v654_v50, %v658_v51 }
 0x225   :  { %2238 = vmatpush1.bf16.msra.mxu0 %v11489_v56  ;;  %v11554_v56 = vcombine.high %v654_v50, %v658_v51  ;;  %v667_v61 = vld [vmem:[#allocation8 + $0x6b8] sm:$0xff]  ;;  %v11555_v2 = vcombine.low %v655_v52, %v659_v53  ;;  %v2375_v50 = vld [vmem:[#allocation11 + $0x8] sm:$0xff] }
 0x226   :  { %2320 = vmatpush1.bf16.msra.mxu1 %v11491_v57  ;;  %2239 = vmatprep.subr.bf16.mxu0 %v11498_v58  ;;  %v11556_v57 = vcombine.high %v655_v52, %v659_v53  ;;  %v662_v58 = vld [vmem:[#allocation8 + $0x690] sm:$0xff]  ;;  %v11563_v9 = vcombine.low %v663_v60, %v667_v61  ;;  %v703_v38 = vld [vmem:[#allocation8 + $0x7d8] sm:$0xff] }
 0x227   :  { %2321 = vmatprep.subr.bf16.mxu1 %v11500_v59  ;;  %v666_v59 = vld [vmem:[#allocation8 + $0x6b0] sm:$0xff]  ;;  %v707_v39 = vld [vmem:[#allocation8 + $0x7f8] sm:$0xff] }
 0x228   :  { %v11561_v8 = vcombine.low %v662_v58, %v666_v59  ;;  %v2383_v51 = vld [vmem:[#allocation11 + $0x48] sm:$0xff]  ;;  %v11603_v53 = vcombine.low %v703_v38, %v707_v39 }
 0x229   :  { %2240 = vmatpush1.bf16.msra.mxu0 %v11497_v3  ;;  %v11562_v3 = vcombine.high %v662_v58, %v666_v59  ;;  %v2391_v58 = vld [vmem:[#allocation11 + $0x88] sm:$0xff] }
 0x22a   :  { %2322 = vmatpush1.bf16.msra.mxu1 %v11499_v0  ;;  %2241 = vmatprep.subr.bf16.mxu0 %v11506_v4  ;;  %v11564_v0 = vcombine.high %v663_v60, %v667_v61  ;;  %v670_v4 = vld [vmem:[#allocation8 + $0x6d0] sm:$0xff]  ;;  %v11607_v61 = vcombine.low %v2375_v50, %v2383_v51 }
 0x22b   :  { %2323 = vmatprep.subr.bf16.mxu1 %v11508_v5  ;;  %v674_v5 = vld [vmem:[#allocation8 + $0x6f0] sm:$0xff] }
 0x22c   :  { %v11569_v46 = vcombine.low %v670_v4, %v674_v5  ;;  %v2399_v59 = vld [vmem:[#allocation11 + $0xc8] sm:$0xff] }
 0x22d   :  { %2242 = vmatpush1.bf16.msra.mxu0 %v11505_v30  ;;  %v11570_v30 = vcombine.high %v670_v4, %v674_v5  ;;  %v2407_v4 = vld [vmem:[#allocation11 + $0x108] sm:$0xff] }
 0x22e   :  { %2324 = vmatpush1.bf16.msra.mxu1 %v11507_v10  ;;  %2243 = vmatprep.subr.bf16.mxu0 %v11514_v11  ;;  %v11572_v10 = vcombine.high %v671_v6, %v675_v7  ;;  %v678_v11 = vld [vmem:[#allocation8 + $0x710] sm:$0xff]  ;;  %v11623_v7 = vcombine.low %v2391_v58, %v2399_v59 }
 0x22f   :  { %2325 = vmatprep.subr.bf16.mxu1 %v11516_v12  ;;  %v682_v12 = vld [vmem:[#allocation8 + $0x730] sm:$0xff] }
 0x230   :  { %v11577_v23 = vcombine.low %v678_v11, %v682_v12  ;;  %v2415_v5 = vld [vmem:[#allocation11 + $0x148] sm:$0xff] }
 0x231   :  { %2244 = vmatpush1.bf16.msra.mxu0 %v11513_v17  ;;  %v11578_v17 = vcombine.high %v678_v11, %v682_v12  ;;  %v2423_v11 = vld [vmem:[#allocation11 + $0x188] sm:$0xff] }
 0x232   :  { %2326 = vmatpush1.bf16.msra.mxu1 %v11515_v18  ;;  %2245 = vmatprep.subr.bf16.mxu0 %v11522_v19  ;;  %v11580_v18 = vcombine.high %v679_v14, %v683_v15  ;;  %v686_v19 = vld [vmem:[#allocation8 + $0x750] sm:$0xff]  ;;  %v11639_v15 = vcombine.low %v2407_v4, %v2415_v5 }
 0x233   :  { %2327 = vmatprep.subr.bf16.mxu1 %v11524_v20  ;;  %v690_v20 = vld [vmem:[#allocation8 + $0x770] sm:$0xff] }
 0x234   :  { %v11585_v32 = vcombine.low %v686_v19, %v690_v20  ;;  %v2431_v12 = vld [vmem:[#allocation11 + $0x1c8] sm:$0xff] }
 0x235   :  { %2246 = vmatpush1.bf16.msra.mxu0 %v11521_v13  ;;  %v11586_v13 = vcombine.high %v686_v19, %v690_v20  ;;  %v2447_v19 = vld [vmem:[#allocation11 + $0x248] sm:$0xff] }
 0x236   :  { %2328 = vmatpush1.bf16.msra.mxu1 %v11523_v25  ;;  %2247 = vmatprep.subr.bf16.mxu0 %v11530_v26  ;;  %v11588_v25 = vcombine.high %v687_v21, %v691_v22  ;;  %v694_v26 = vld [vmem:[#allocation8 + $0x790] sm:$0xff]  ;;  %v11655_v21 = vcombine.low %v2423_v11, %v2431_v12 }
 0x237   :  { %2329 = vmatprep.subr.bf16.mxu1 %v11532_v28  ;;  %v698_v28 = vld [vmem:[#allocation8 + $0x7b0] sm:$0xff] }
 0x238   :  { %v11593_v40 = vcombine.low %v694_v26, %v698_v28 }
 0x239   :  { %2248 = vmatpush1.bf16.msra.mxu0 %v11529_v34  ;;  %v11594_v34 = vcombine.high %v694_v26, %v698_v28  ;;  %v2463_v26 = vld [vmem:[#allocation11 + $0x2c8] sm:$0xff] }
 0x23a   :  { %2330 = vmatpush1.bf16.msra.mxu1 %v11531_v35  ;;  %2249 = vmatprep.subr.bf16.mxu0 %v11538_v36  ;;  %v11596_v35 = vcombine.high %v695_v29, %v699_v31  ;;  %v702_v36 = vld [vmem:[#allocation8 + $0x7d0] sm:$0xff] }
 0x23b   :  { %2331 = vmatprep.subr.bf16.mxu1 %v11540_v37  ;;  %v706_v37 = vld [vmem:[#allocation8 + $0x7f0] sm:$0xff] }
 0x23c   :  { %v11601_v52 = vcombine.low %v702_v36, %v706_v37 }
 0x23d   :  { %2250 = vmatpush1.bf16.msra.mxu0 %v11537_v42  ;;  %v11602_v42 = vcombine.high %v702_v36, %v706_v37  ;;  %v2479_v36 = vld [vmem:[#allocation11 + $0x348] sm:$0xff] }
 0x23e   :  { %2332 = vmatpush1.bf16.msra.mxu1 %v11539_v43  ;;  %2251 = vmatprep.subr.bf16.mxu0 %v11546_v48  ;;  %v11604_v43 = vcombine.high %v703_v38, %v707_v39  ;;  %v2374_v48 = vld [vmem:[#allocation11] sm:$0xff] }
 0x23f   :  { %2333 = vmatprep.subr.bf16.mxu1 %v11548_v49  ;;  %v2382_v49 = vld [vmem:[#allocation11 + $0x40] sm:$0xff] }
 0x240   :  { %v11605_v60 = vcombine.low %v2374_v48, %v2382_v49 }
 0x241   :  { %2252 = vmatpush1.bf16.msra.mxu0 %v11545_v63  ;;  %v11606_v63 = vcombine.high %v2374_v48, %v2382_v49  ;;  %v2495_v48 = vld [vmem:[#allocation11 + $0x3c8] sm:$0xff] }
 0x242   :  { %2334 = vmatpush1.bf16.msra.mxu1 %v11547_v55  ;;  %2253 = vmatprep.subr.bf16.mxu0 %v11554_v56  ;;  %v11608_v55 = vcombine.high %v2375_v50, %v2383_v51  ;;  %v2390_v56 = vld [vmem:[#allocation11 + $0x80] sm:$0xff] }
 0x243   :  { %2335 = vmatprep.subr.bf16.mxu1 %v11556_v57  ;;  %v2398_v57 = vld [vmem:[#allocation11 + $0xc0] sm:$0xff] }
 0x244   :  { %v11621_v6 = vcombine.low %v2390_v56, %v2398_v57 }
 0x245   :  { %2254 = vmatpush1.bf16.msra.mxu0 %v11553_v1  ;;  %v11622_v1 = vcombine.high %v2390_v56, %v2398_v57  ;;  %v2511_v56 = vld [vmem:[#allocation11 + $0x448] sm:$0xff] }
 0x246   :  { %2336 = vmatpush1.bf16.msra.mxu1 %v11555_v2  ;;  %2255 = vmatprep.subr.bf16.mxu0 %v11562_v3  ;;  %v11624_v2 = vcombine.high %v2391_v58, %v2399_v59  ;;  %v2406_v3 = vld [vmem:[#allocation11 + $0x100] sm:$0xff] }
 0x247   :  { %2337 = vmatprep.subr.bf16.mxu1 %v11564_v0  ;;  %v2414_v0 = vld [vmem:[#allocation11 + $0x140] sm:$0xff] }
 0x248   :  { %v11637_v14 = vcombine.low %v2406_v3, %v2414_v0 }
 0x249   :  { %2256 = vmatpush1.bf16.msra.mxu0 %v11561_v8  ;;  %v11638_v8 = vcombine.high %v2406_v3, %v2414_v0  ;;  %v2527_v3 = vld [vmem:[#allocation11 + $0x4c8] sm:$0xff] }
 0x24a   :  { %2338 = vmatpush1.bf16.msra.mxu1 %v11563_v9  ;;  %2257 = vmatprep.subr.bf16.mxu0 %v11570_v30  ;;  %v11640_v9 = vcombine.high %v2407_v4, %v2415_v5  ;;  %v2422_v30 = vld [vmem:[#allocation11 + $0x180] sm:$0xff] }
 0x24b   :  { %2339 = vmatprep.subr.bf16.mxu1 %v11572_v10  ;;  %v2430_v10 = vld [vmem:[#allocation11 + $0x1c0] sm:$0xff] }
 0x24c   :  { %v11653_v20 = vcombine.low %v2422_v30, %v2430_v10 }
 0x24d   :  { %2258 = vmatpush1.bf16.msra.mxu0 %v11569_v46  ;;  %v11654_v46 = vcombine.high %v2422_v30, %v2430_v10  ;;  %v2543_v30 = vld [vmem:[#allocation11 + $0x548] sm:$0xff] }
 0x24e   :  { %2340 = vmatpush1.bf16.msra.mxu1 %v11571_v16  ;;  %2259 = vmatprep.subr.bf16.mxu0 %v11578_v17  ;;  %v2438_v16 = vld [vmem:[#allocation11 + $0x200] sm:$0xff] }
 0x24f   :  { %2341 = vmatprep.subr.bf16.mxu1 %v11580_v18  ;;  %v2446_v17 = vld [vmem:[#allocation11 + $0x240] sm:$0xff]  ;;  %v2439_v18 = vld [vmem:[#allocation11 + $0x208] sm:$0xff] }
 0x250   :  { %v11670_v22 = vcombine.high %v2438_v16, %v2446_v17  ;;  %v11669_v28 = vcombine.low %v2438_v16, %v2446_v17  ;;  %v11671_v29 = vcombine.low %v2439_v18, %v2447_v19  ;;  %v2559_v16 = vld [vmem:[#allocation11 + $0x5c8] sm:$0xff] }
 0x251   :  { %2260 = vmatpush1.bf16.msra.mxu0 %v11577_v23  ;;  %v11672_v23 = vcombine.high %v2439_v18, %v2447_v19 }
 0x252   :  { %2342 = vmatpush1.bf16.msra.mxu1 %v11579_v24  ;;  %2261 = vmatprep.subr.bf16.mxu0 %v11586_v13  ;;  %v2454_v24 = vld [vmem:[#allocation11 + $0x280] sm:$0xff] }
 0x253   :  { %2343 = vmatprep.subr.bf16.mxu1 %v11588_v25  ;;  %v2462_v13 = vld [vmem:[#allocation11 + $0x2c0] sm:$0xff]  ;;  %v2455_v25 = vld [vmem:[#allocation11 + $0x288] sm:$0xff] }
 0x254   :  { %v11686_v31 = vcombine.high %v2454_v24, %v2462_v13  ;;  %v11685_v37 = vcombine.low %v2454_v24, %v2462_v13  ;;  %v11687_v38 = vcombine.low %v2455_v25, %v2463_v26  ;;  %v2575_v24 = vld [vmem:[#allocation11 + $0x648] sm:$0xff] }
 0x255   :  { %2262 = vmatpush1.bf16.msra.mxu0 %v11585_v32  ;;  %v11688_v32 = vcombine.high %v2455_v25, %v2463_v26 }
 0x256   :  { %2344 = vmatpush1.bf16.msra.mxu1 %v11587_v33  ;;  %2263 = vmatprep.subr.bf16.mxu0 %v11594_v34  ;;  %v2470_v33 = vld [vmem:[#allocation11 + $0x300] sm:$0xff] }
 0x257   :  { %2345 = vmatprep.subr.bf16.mxu1 %v11596_v35  ;;  %v2478_v34 = vld [vmem:[#allocation11 + $0x340] sm:$0xff]  ;;  %v2471_v35 = vld [vmem:[#allocation11 + $0x308] sm:$0xff] }
 0x258   :  { %v11702_v39 = vcombine.high %v2470_v33, %v2478_v34  ;;  %v11701_v49 = vcombine.low %v2470_v33, %v2478_v34  ;;  %v11703_v50 = vcombine.low %v2471_v35, %v2479_v36  ;;  %v2591_v33 = vld [vmem:[#allocation11 + $0x6c8] sm:$0xff] }
 0x259   :  { %2264 = vmatpush1.bf16.msra.mxu0 %v11593_v40  ;;  %v11704_v40 = vcombine.high %v2471_v35, %v2479_v36 }
 0x25a   :  { %2346 = vmatpush1.bf16.msra.mxu1 %v11595_v41  ;;  %2265 = vmatprep.subr.bf16.mxu0 %v11602_v42  ;;  %v2486_v41 = vld [vmem:[#allocation11 + $0x380] sm:$0xff] }
 0x25b   :  { %2347 = vmatprep.subr.bf16.mxu1 %v11604_v43  ;;  %v2494_v42 = vld [vmem:[#allocation11 + $0x3c0] sm:$0xff]  ;;  %v2487_v43 = vld [vmem:[#allocation11 + $0x388] sm:$0xff] }
 0x25c   :  { %v11718_v51 = vcombine.high %v2486_v41, %v2494_v42  ;;  %v11717_v57 = vcombine.low %v2486_v41, %v2494_v42  ;;  %v11719_v58 = vcombine.low %v2487_v43, %v2495_v48  ;;  %v2607_v41 = vld [vmem:[#allocation11 + $0x748] sm:$0xff] }
 0x25d   :  { %2266 = vmatpush1.bf16.msra.mxu0 %v11601_v52  ;;  %v11720_v52 = vcombine.high %v2487_v43, %v2495_v48 }
 0x25e   :  { %2348 = vmatpush1.bf16.msra.mxu1 %v11603_v53  ;;  %8602 = vmatprep.subr.bf16.mxu0 %v11606_v63  ;;  %v2502_v53 = vld [vmem:[#allocation11 + $0x400] sm:$0xff] }
 0x25f   :  { %8766 = vmatprep.subr.bf16.mxu1 %v11608_v55  ;;  %v2510_v63 = vld [vmem:[#allocation11 + $0x440] sm:$0xff]  ;;  %v2503_v55 = vld [vmem:[#allocation11 + $0x408] sm:$0xff] }
 0x260   :  { %2268 = vmatmul.mubr.bf16.vlgmr.msra.gmra.mrb[8].mxu0 %v13712_v27  ;;  %v11734_v59 = vcombine.high %v2502_v53, %v2510_v63  ;;  %v11733_v0 = vcombine.low %v2502_v53, %v2510_v63  ;;  %v11735_v4 = vcombine.low %v2503_v55, %v2511_v56  ;;  %v2623_v53 = vld [vmem:[#allocation11 + $0x7c8] sm:$0xff] }
 0x261   :  { %2350 = vmatmul.mubr.bf16.vlgmr.msra.gmra.mrb[8].mxu1 %v13712_v27  ;;  %8603 = vmatpush1.bf16.msra.mxu0 %v11605_v60  ;;  %v11656_v27 = vcombine.high %v2423_v11, %v2431_v12  ;;  %v11736_v60 = vcombine.high %v2503_v55, %v2511_v56 }
 0x262   :  { %8767 = vmatpush1.bf16.msra.mxu1 %v11607_v61  ;;  %8604 = vmatprep.subr.bf16.mxu0 %v11622_v1  ;;  %v2518_v61 = vld [vmem:[#allocation11 + $0x480] sm:$0xff] }
 0x263   :  { %8768 = vmatprep.subr.bf16.mxu1 %v11624_v2  ;;  %v2526_v1 = vld [vmem:[#allocation11 + $0x4c0] sm:$0xff]  ;;  %v2519_v2 = vld [vmem:[#allocation11 + $0x488] sm:$0xff] }
 0x264   :  { %v11750_v5 = vcombine.high %v2518_v61, %v2526_v1  ;;  %v11749_v10 = vcombine.low %v2518_v61, %v2526_v1  ;;  %v11751_v11 = vcombine.low %v2519_v2, %v2527_v3  ;;  %v2639_v61 = vld [vmem:[#allocation11 + $0x848] sm:$0xff] }
 0x265   :  { %8605 = vmatpush1.bf16.msra.mxu0 %v11621_v6  ;;  %v11752_v6 = vcombine.high %v2519_v2, %v2527_v3 }
 0x266   :  { %8769 = vmatpush1.bf16.msra.mxu1 %v11623_v7  ;;  %8606 = vmatprep.subr.bf16.mxu0 %v11638_v8  ;;  %v2534_v7 = vld [vmem:[#allocation11 + $0x500] sm:$0xff] }
 0x267   :  { %8770 = vmatprep.subr.bf16.mxu1 %v11640_v9  ;;  %v2542_v8 = vld [vmem:[#allocation11 + $0x540] sm:$0xff]  ;;  %v2535_v9 = vld [vmem:[#allocation11 + $0x508] sm:$0xff] }
 0x268   :  { %v11766_v12 = vcombine.high %v2534_v7, %v2542_v8  ;;  %v11765_v17 = vcombine.low %v2534_v7, %v2542_v8  ;;  %v11767_v18 = vcombine.low %v2535_v9, %v2543_v30 }
 0x269   :  { %8607 = vmatpush1.bf16.msra.mxu0 %v11637_v14  ;;  %v11768_v14 = vcombine.high %v2535_v9, %v2543_v30 }
 0x26a   :  { %8771 = vmatpush1.bf16.msra.mxu1 %v11639_v15  ;;  %8608 = vmatprep.subr.bf16.mxu0 %v11654_v46  ;;  %v2550_v15 = vld [vmem:[#allocation11 + $0x580] sm:$0xff] }
 0x26b   :  { %8772 = vmatprep.subr.bf16.mxu1 %v11656_v27  ;;  %v2558_v46 = vld [vmem:[#allocation11 + $0x5c0] sm:$0xff]  ;;  %v2551_v27 = vld [vmem:[#allocation11 + $0x588] sm:$0xff] }
 0x26c   :  { %v11782_v19 = vcombine.high %v2550_v15, %v2558_v46  ;;  %v11781_v13 = vcombine.low %v2550_v15, %v2558_v46  ;;  %v11783_v25 = vcombine.low %v2551_v27, %v2559_v16 }
 0x26d   :  { %8609 = vmatpush1.bf16.msra.mxu0 %v11653_v20  ;;  %v11784_v20 = vcombine.high %v2551_v27, %v2559_v16 }
 0x26e   :  { %8773 = vmatpush1.bf16.msra.mxu1 %v11655_v21  ;;  %8610 = vmatprep.subr.bf16.mxu0 %v11670_v22  ;;  %v2566_v21 = vld [vmem:[#allocation11 + $0x600] sm:$0xff] }
 0x26f   :  { %8774 = vmatprep.subr.bf16.mxu1 %v11672_v23  ;;  %v2574_v22 = vld [vmem:[#allocation11 + $0x640] sm:$0xff]  ;;  %v2567_v23 = vld [vmem:[#allocation11 + $0x608] sm:$0xff] }
 0x270   :  { %v11798_v26 = vcombine.high %v2566_v21, %v2574_v22  ;;  %v11797_v34 = vcombine.low %v2566_v21, %v2574_v22  ;;  %v11799_v35 = vcombine.low %v2567_v23, %v2575_v24  ;;  %v2654_v21 = vld [vmem:[#allocation11 + $0x8c0] sm:$0xff]  ;;  %v2647_v22 = vld [vmem:[#allocation11 + $0x888] sm:$0xff] }
 0x271   :  { %8611 = vmatpush1.bf16.msra.mxu0 %v11669_v28  ;;  %v11800_v28 = vcombine.high %v2567_v23, %v2575_v24  ;;  %v2655_v23 = vld [vmem:[#allocation11 + $0x8c8] sm:$0xff] }
 0x272   :  { %8775 = vmatpush1.bf16.msra.mxu1 %v11671_v29  ;;  %8612 = vmatprep.subr.bf16.mxu0 %v11686_v31  ;;  %v2582_v29 = vld [vmem:[#allocation11 + $0x680] sm:$0xff] }
 0x273   :  { %8776 = vmatprep.subr.bf16.mxu1 %v11688_v32  ;;  %v2590_v31 = vld [vmem:[#allocation11 + $0x6c0] sm:$0xff]  ;;  %v2583_v32 = vld [vmem:[#allocation11 + $0x688] sm:$0xff] }
 0x274   :  { %v11814_v36 = vcombine.high %v2582_v29, %v2590_v31  ;;  %v11813_v42 = vcombine.low %v2582_v29, %v2590_v31  ;;  %v11815_v43 = vcombine.low %v2583_v32, %v2591_v33  ;;  %v11880_v31 = vcombine.high %v2647_v22, %v2655_v23 }
 0x275   :  { %8613 = vmatpush1.bf16.msra.mxu0 %v11685_v37  ;;  %v11816_v37 = vcombine.high %v2583_v32, %v2591_v33  ;;  %v2670_v32 = vld [vmem:[#allocation11 + $0x940] sm:$0xff]  ;;  %v2663_v33 = vld [vmem:[#allocation11 + $0x908] sm:$0xff] }
 0x276   :  { %8777 = vmatpush1.bf16.msra.mxu1 %v11687_v38  ;;  %8614 = vmatprep.subr.bf16.mxu0 %v11702_v39  ;;  %v2598_v38 = vld [vmem:[#allocation11 + $0x700] sm:$0xff] }
 0x277   :  { %8778 = vmatprep.subr.bf16.mxu1 %v11704_v40  ;;  %v2606_v39 = vld [vmem:[#allocation11 + $0x740] sm:$0xff]  ;;  %v2599_v40 = vld [vmem:[#allocation11 + $0x708] sm:$0xff] }
 0x278   :  { %v11830_v48 = vcombine.high %v2598_v38, %v2606_v39  ;;  %v11829_v63 = vcombine.low %v2598_v38, %v2606_v39  ;;  %v11831_v55 = vcombine.low %v2599_v40, %v2607_v41 }
 0x279   :  { %8615 = vmatpush1.bf16.msra.mxu0 %v11701_v49  ;;  %v11832_v49 = vcombine.high %v2599_v40, %v2607_v41  ;;  %v2678_v40 = vld [vmem:[#allocation11 + $0x980] sm:$0xff] }
 0x27a   :  { %8779 = vmatpush1.bf16.msra.mxu1 %v11703_v50  ;;  %8616 = vmatprep.subr.bf16.mxu0 %v11718_v51  ;;  %v2614_v50 = vld [vmem:[#allocation11 + $0x780] sm:$0xff] }
 0x27b   :  { %8780 = vmatprep.subr.bf16.mxu1 %v11720_v52  ;;  %v2622_v51 = vld [vmem:[#allocation11 + $0x7c0] sm:$0xff]  ;;  %v2615_v52 = vld [vmem:[#allocation11 + $0x788] sm:$0xff] }
 0x27c   :  { %v11846_v56 = vcombine.high %v2614_v50, %v2622_v51  ;;  %v11845_v1 = vcombine.low %v2614_v50, %v2622_v51  ;;  %v11847_v2 = vcombine.low %v2615_v52, %v2623_v53  ;;  %v2686_v41 = vld [vmem:[#allocation11 + $0x9c0] sm:$0xff] }
 0x27d   :  { %8617 = vmatpush1.bf16.msra.mxu0 %v11717_v57  ;;  %v11848_v57 = vcombine.high %v2615_v52, %v2623_v53  ;;  %v11910_v50 = vcombine.high %v2678_v40, %v2686_v41  ;;  %v2694_v52 = vld [vmem:[#allocation11 + $0xa00] sm:$0xff] }
 0x27e   :  { %8781 = vmatpush1.bf16.msra.mxu1 %v11719_v58  ;;  %8618 = vmatprep.subr.bf16.mxu0 %v11734_v59  ;;  %v2630_v58 = vld [vmem:[#allocation11 + $0x800] sm:$0xff] }
 0x27f   :  { %8782 = vmatprep.subr.bf16.mxu1 %v11736_v60  ;;  %v2638_v59 = vld [vmem:[#allocation11 + $0x840] sm:$0xff]  ;;  %v2631_v60 = vld [vmem:[#allocation11 + $0x808] sm:$0xff] }
 0x280   :  { %v11862_v3 = vcombine.high %v2630_v58, %v2638_v59  ;;  %v2702_v53 = vld [vmem:[#allocation11 + $0xa40] sm:$0xff] }
 0x281   :  { %8619 = vmatpush1.bf16.msra.mxu0 %v11733_v0  ;;  %v11864_v0 = vcombine.high %v2631_v60, %v2639_v61 }
 0x282   :  { %8783 = vmatpush1.bf16.msra.mxu1 %v11735_v4  ;;  %8620 = vmatprep.subr.bf16.mxu0 %v11750_v5  ;;  %v13724_v4 = vld [vmem:[#allocation10] sm:$0xff] }
 0x283   :  { %8784 = vmatprep.subr.bf16.mxu1 %v11752_v6  ;;  %v713_v5 = vrot.slane %v13724_v4, %v13676_v45  ;;  %v717_v6 = vrot.slane %v13724_v4, %v13681_v47  ;;  %v725_v7 = vrot.slane %v13724_v4, %v13688_v62 }
 0x285   :  { %8621 = vmatpush1.bf16.msra.mxu0 %v11749_v10 }
 0x286   :  { %8785 = vmatpush1.bf16.msra.mxu1 %v11751_v11  ;;  %8622 = vmatprep.subr.bf16.mxu0 %v11766_v12 }
 0x287   :  { %8786 = vmatprep.subr.bf16.mxu1 %v11768_v14 }
 0x289   :  { %8623 = vmatpush1.bf16.msra.mxu0 %v11765_v17 }
 0x28a   :  { %8787 = vmatpush1.bf16.msra.mxu1 %v11767_v18  ;;  %8624 = vmatprep.subr.bf16.mxu0 %v11782_v19  ;;  %v2646_v19 = vld [vmem:[#allocation11 + $0x880] sm:$0xff] }
 0x28b   :  { %8788 = vmatprep.subr.bf16.mxu1 %v11784_v20  ;;  %v11878_v29 = vcombine.high %v2646_v19, %v2654_v21 }
 0x28d   :  { %8625 = vmatpush1.bf16.msra.mxu0 %v11781_v13  ;;  %v11861_v13 = vcombine.low %v2630_v58, %v2638_v59  ;;  %v11926_v58 = vcombine.high %v2694_v52, %v2702_v53 }
 0x28e   :  { %8789 = vmatpush1.bf16.msra.mxu1 %v11783_v25  ;;  %8626 = vmatprep.subr.bf16.mxu0 %v11798_v26  ;;  %v11863_v25 = vcombine.low %v2631_v60, %v2639_v61  ;;  %v2710_v60 = vld [vmem:[#allocation11 + $0xa80] sm:$0xff] }
 0x28f   :  { %8790 = vmatprep.subr.bf16.mxu1 %v11800_v28  ;;  %v2662_v28 = vld [vmem:[#allocation11 + $0x900] sm:$0xff] }
 0x290   :  { %v11894_v38 = vcombine.high %v2662_v28, %v2670_v32  ;;  %v2718_v61 = vld [vmem:[#allocation11 + $0xac0] sm:$0xff] }
 0x291   :  { %8627 = vmatpush1.bf16.msra.mxu0 %v11797_v34  ;;  %v2671_v34 = vld [vmem:[#allocation11 + $0x948] sm:$0xff] }
 0x292   :  { %8791 = vmatpush1.bf16.msra.mxu1 %v11799_v35  ;;  %8628 = vmatprep.subr.bf16.mxu0 %v11814_v36  ;;  %v11877_v36 = vcombine.low %v2646_v19, %v2654_v21  ;;  %v11896_v39 = vcombine.high %v2663_v33, %v2671_v34 }
 0x293   :  { %8792 = vmatprep.subr.bf16.mxu1 %v11816_v37  ;;  %v11879_v37 = vcombine.low %v2647_v22, %v2655_v23  ;;  %v2758_v22 = vld [vmem:[#allocation11 + $0xc00] sm:$0xff] }
 0x294   :  { %v2766_v23 = vld [vmem:[#allocation11 + $0xc40] sm:$0xff] }
 0x295   :  { %8629 = vmatpush1.bf16.msra.mxu0 %v11813_v42  ;;  %v2679_v42 = vld [vmem:[#allocation11 + $0x988] sm:$0xff] }
 0x296   :  { %8793 = vmatpush1.bf16.msra.mxu1 %v11815_v43  ;;  %8630 = vmatprep.subr.bf16.mxu0 %v11830_v48  ;;  %v2687_v43 = vld [vmem:[#allocation11 + $0x9c8] sm:$0xff]  ;;  %v11893_v48 = vcombine.low %v2662_v28, %v2670_v32 }
 0x297   :  { %8794 = vmatprep.subr.bf16.mxu1 %v11832_v49  ;;  %v11895_v49 = vcombine.low %v2663_v33, %v2671_v34  ;;  %v11912_v51 = vcombine.high %v2679_v42, %v2687_v43  ;;  %v2774_v33 = vld [vmem:[#allocation11 + $0xc80] sm:$0xff] }
 0x298   :  { %v2782_v34 = vld [vmem:[#allocation11 + $0xcc0] sm:$0xff] }
 0x299   :  { %8631 = vmatpush1.bf16.msra.mxu0 %v11829_v63  ;;  %v2695_v63 = vld [vmem:[#allocation11 + $0xa08] sm:$0xff] }
 0x29a   :  { %8795 = vmatpush1.bf16.msra.mxu1 %v11831_v55  ;;  %8632 = vmatprep.subr.bf16.mxu0 %v11846_v56  ;;  %v2703_v55 = vld [vmem:[#allocation11 + $0xa48] sm:$0xff]  ;;  %v11909_v56 = vcombine.low %v2678_v40, %v2686_v41  ;;  %v12006_v40 = vcombine.high %v2774_v33, %v2782_v34 }
 0x29b   :  { %8796 = vmatprep.subr.bf16.mxu1 %v11848_v57  ;;  %v11911_v57 = vcombine.low %v2679_v42, %v2687_v43  ;;  %v11928_v59 = vcombine.high %v2695_v63, %v2703_v55  ;;  %v2790_v42 = vld [vmem:[#allocation11 + $0xd00] sm:$0xff] }
 0x29c   :  { %v2798_v43 = vld [vmem:[#allocation11 + $0xd40] sm:$0xff] }
 0x29d   :  { %8633 = vmatpush1.bf16.msra.mxu0 %v11845_v1  ;;  %v2711_v1 = vld [vmem:[#allocation11 + $0xa88] sm:$0xff] }
 0x29e   :  { %8797 = vmatpush1.bf16.msra.mxu1 %v11847_v2  ;;  %8643 = vmatprep.subr.bf16.mxu0 %v11862_v3  ;;  %v2719_v2 = vld [vmem:[#allocation11 + $0xac8] sm:$0xff]  ;;  %v11925_v3 = vcombine.low %v2694_v52, %v2702_v53  ;;  %v12022_v52 = vcombine.high %v2790_v42, %v2798_v43 }
 0x29f   :  { %8807 = vmatprep.subr.bf16.mxu1 %v11864_v0  ;;  %v11927_v0 = vcombine.low %v2695_v63, %v2703_v55  ;;  %v2806_v63 = vld [vmem:[#allocation11 + $0xd80] sm:$0xff] }
 0x2a0   :  { %v2814_v55 = vld [vmem:[#allocation11 + $0xdc0] sm:$0xff] }
 0x2b3   :  { %v2105_v8 = vpop.f32.mrb[4].mxu0  ;;  %v13732_v9 = vpop.f32.mrb[4].mxu1 }
 0x2b4   :  { %v12934_v30 = vadd.f32 %v2105_v8, %v713_v5  ;;  %v2107_v10 = vpop.f32.mrb[5].mxu0  ;;  %v2189_v11 = vpop.f32.mrb[5].mxu1  ;;  %v11942_v5 = vcombine.high %v2710_v60, %v2718_v61  ;;  %v2734_v8 = vld [vmem:[#allocation11 + $0xb40] sm:$0xff] }
 0x2b5   :  { %v12935_v12 = vadd.f32 %v2107_v10, %v717_v6  ;;  %v12937_v14 = vadd.f32 %v2189_v11, %v725_v7  ;;  %v2109_v15 = vpop.f32.mrb[6].mxu0  ;;  %v2191_v46 = vpop.f32.mrb[6].mxu1  ;;  %v11944_v6 = vcombine.high %v2711_v1, %v2719_v2  ;;  %v2726_v7 = vld [vmem:[#allocation11 + $0xb00] sm:$0xff]  ;;  %v2735_v10 = vld [vmem:[#allocation11 + $0xb48] sm:$0xff]  ;;  %v11941_v11 = vcombine.low %v2710_v60, %v2718_v61 }
 0x2b6   :  { %v2358_v27 = vmax.f32 %v12934_v30, 0.0  ;;  %v2110_v16 = vpop.f32.mrb[7].mxu0  ;;  %v2192_v17 = vpop.f32.mrb[7].mxu1  ;;  %v2727_v30 = vld [vmem:[#allocation11 + $0xb08] sm:$0xff]  ;;  %v2742_v46 = vld [vmem:[#allocation11 + $0xb80] sm:$0xff]  ;;  %v12038_v60 = vcombine.high %v2806_v63, %v2814_v55 }
 0x2b7   :  { %v2359_v18 = vmax.f32 %v12935_v12, 0.0  ;;  %v2361_v20 = vmax.f32 %v12937_v14, 0.0  ;;  %v11943_v12 = vcombine.low %v2711_v1, %v2719_v2  ;;  %v11958_v14 = vcombine.high %v2726_v7, %v2734_v8  ;;  %v2743_v16 = vld [vmem:[#allocation11 + $0xb88] sm:$0xff]  ;;  %v2822_v1 = vld [vmem:[#allocation11 + $0xe00] sm:$0xff] }
 0x2b8   :  { %v13736_v26 = vpack.c.bf16 %v2358_v27, %v2358_v27  ;;  %v11960_v15 = vcombine.high %v2727_v30, %v2735_v10  ;;  %v2750_v27 = vld [vmem:[#allocation11 + $0xbc0] sm:$0xff]  ;;  %v2751_v17 = vld [vmem:[#allocation11 + $0xbc8] sm:$0xff]  ;;  %v11959_v19 = vcombine.low %v2727_v30, %v2735_v10 }
 0x2b9   :  { %v13734_v24 = vpack.c.bf16 %v2359_v18, %v2359_v18  ;;  %v13740_v35 = vpack.c.bf16 %v2361_v20, %v2361_v20  ;;  %v11957_v18 = vcombine.low %v2726_v7, %v2734_v8  ;;  %v11974_v20 = vcombine.high %v2742_v46, %v2750_v27  ;;  %v2830_v2 = vld [vmem:[#allocation11 + $0xe40] sm:$0xff] }
 0x2ba   :  { %v11976_v21 = vcombine.high %v2743_v16, %v2751_v17  ;;  %v11973_v28 = vcombine.low %v2742_v46, %v2750_v27  ;;  %v12054_v7 = vcombine.high %v2822_v1, %v2830_v2  ;;  %v2838_v30 = vld [vmem:[#allocation11 + $0xe80] sm:$0xff] }
 0x2bb   :  { %8634 = vmatprep.mubr.bf16.mxu0 %v13734_v24  ;;  %8798 = vmatprep.mubr.bf16.mxu1 %v13734_v24  ;;  %v2846_v10 = vld [vmem:[#allocation11 + $0xec0] sm:$0xff] }
 0x2bc   :  { %8635 = vmatmul.mubr.bf16.vlgmr.msra.gmra.mrb[12].mxu0 %v13736_v26  ;;  %8799 = vmatmul.mubr.bf16.vlgmr.msra.gmra.mrb[12].mxu1 %v13736_v26  ;;  %v12070_v46 = vcombine.high %v2838_v30, %v2846_v10 }
 0x2bd   :  { %8644 = vmatpush1.bf16.msra.mxu0 %v11861_v13  ;;  %8808 = vmatpush1.bf16.msra.mxu1 %v11863_v25  ;;  %v2759_v13 = vld [vmem:[#allocation11 + $0xc08] sm:$0xff] }
 0x2be   :  { %8675 = vmatprep.mubr.bf16.mxu0 %v13740_v35  ;;  %8839 = vmatprep.mubr.bf16.mxu1 %v13740_v35  ;;  %v2767_v25 = vld [vmem:[#allocation11 + $0xc48] sm:$0xff] }
 0x2bf   :  { %8645 = vmatprep.subr.bf16.mxu0 %v11878_v29  ;;  %8809 = vmatprep.subr.bf16.mxu1 %v11880_v31  ;;  %v11975_v29 = vcombine.low %v2743_v16, %v2751_v17  ;;  %v11990_v31 = vcombine.high %v2758_v22, %v2766_v23  ;;  %v11992_v32 = vcombine.high %v2759_v13, %v2767_v25  ;;  %v2854_v16 = vld [vmem:[#allocation11 + $0xf00] sm:$0xff] }
 0x2c0   :  { %v2862_v17 = vld [vmem:[#allocation11 + $0xf40] sm:$0xff] }
 0x2c1   :  { %8646 = vmatpush1.bf16.msra.mxu0 %v11877_v36  ;;  %8810 = vmatpush1.bf16.msra.mxu1 %v11879_v37  ;;  %v2775_v36 = vld [vmem:[#allocation11 + $0xc88] sm:$0xff] }
 0x2c2   :  { %8647 = vmatprep.subr.bf16.mxu0 %v11894_v38  ;;  %8811 = vmatprep.subr.bf16.mxu1 %v11896_v39  ;;  %v2783_v37 = vld [vmem:[#allocation11 + $0xcc8] sm:$0xff]  ;;  %v11989_v38 = vcombine.low %v2758_v22, %v2766_v23  ;;  %v11991_v39 = vcombine.low %v2759_v13, %v2767_v25  ;;  %v721_v22 = vrot.slane %v13724_v4, %v13707_v54  ;;  %v2870_v25 = vld [vmem:[#allocation11 + $0xf80] sm:$0xff] }
 0x2c3   :  { %v12008_v41 = vcombine.high %v2775_v36, %v2783_v37  ;;  %v12086_v23 = vcombine.high %v2854_v16, %v2862_v17 }
 0x2c5   :  { %8648 = vmatpush1.bf16.msra.mxu0 %v11893_v48  ;;  %8812 = vmatpush1.bf16.msra.mxu1 %v11895_v49  ;;  %v2791_v48 = vld [vmem:[#allocation11 + $0xd08] sm:$0xff] }
 0x2c6   :  { %8649 = vmatprep.subr.bf16.mxu0 %v11910_v50  ;;  %8813 = vmatprep.subr.bf16.mxu1 %v11912_v51  ;;  %v2799_v49 = vld [vmem:[#allocation11 + $0xd48] sm:$0xff]  ;;  %v12005_v50 = vcombine.low %v2774_v33, %v2782_v34  ;;  %v12007_v51 = vcombine.low %v2775_v36, %v2783_v37  ;;  %v12936_v34 = vadd.f32 %v13732_v9, %v721_v22  ;;  %v2974_v22 = vld [vmem:[#allocation11 + $0x12c0] sm:$0xff] }
 0x2c7   :  { %v12024_v53 = vcombine.high %v2791_v48, %v2799_v49  ;;  %v2903_v9 = vld [vmem:[#allocation11 + $0x1088] sm:$0xff] }
 0x2c9   :  { %8650 = vmatpush1.bf16.msra.mxu0 %v11909_v56  ;;  %8814 = vmatpush1.bf16.msra.mxu1 %v11911_v57  ;;  %v2807_v56 = vld [vmem:[#allocation11 + $0xd88] sm:$0xff] }
 0x2ca   :  { %8651 = vmatprep.subr.bf16.mxu0 %v11926_v58  ;;  %8815 = vmatprep.subr.bf16.mxu1 %v11928_v59  ;;  %v2815_v57 = vld [vmem:[#allocation11 + $0xdc8] sm:$0xff]  ;;  %v12021_v58 = vcombine.low %v2790_v42, %v2798_v43  ;;  %v12023_v59 = vcombine.low %v2791_v48, %v2799_v49  ;;  %v2360_v48 = vmax.f32 %v12936_v34, 0.0 }
 0x2cb   :  { %v12040_v61 = vcombine.high %v2807_v56, %v2815_v57  ;;  %v2983_v34 = vld [vmem:[#allocation11 + $0x1308] sm:$0xff] }
 0x2cd   :  { %8652 = vmatpush1.bf16.msra.mxu0 %v11925_v3  ;;  %8816 = vmatpush1.bf16.msra.mxu1 %v11927_v0  ;;  %v2823_v3 = vld [vmem:[#allocation11 + $0xe08] sm:$0xff] }
 0x2ce   :  { %8653 = vmatprep.subr.bf16.mxu0 %v11942_v5  ;;  %8817 = vmatprep.subr.bf16.mxu1 %v11944_v6  ;;  %v2831_v0 = vld [vmem:[#allocation11 + $0xe48] sm:$0xff]  ;;  %v12037_v5 = vcombine.low %v2806_v63, %v2814_v55  ;;  %v12039_v6 = vcombine.low %v2807_v56, %v2815_v57  ;;  %v13749_v56 = vpack.c.bf16 %v2360_v48, %v2360_v48 }
 0x2cf   :  { %v12056_v8 = vcombine.high %v2823_v3, %v2831_v0  ;;  %v3007_v48 = vld [vmem:[#allocation11 + $0x13c8] sm:$0xff] }
 0x2d1   :  { %8654 = vmatpush1.bf16.msra.mxu0 %v11941_v11  ;;  %8818 = vmatpush1.bf16.msra.mxu1 %v11943_v12  ;;  %v2839_v11 = vld [vmem:[#allocation11 + $0xe88] sm:$0xff] }
 0x2d2   :  { %8655 = vmatprep.subr.bf16.mxu0 %v11958_v14  ;;  %8819 = vmatprep.subr.bf16.mxu1 %v11960_v15  ;;  %v2847_v12 = vld [vmem:[#allocation11 + $0xec8] sm:$0xff]  ;;  %v12053_v14 = vcombine.low %v2822_v1, %v2830_v2  ;;  %v12055_v15 = vcombine.low %v2823_v3, %v2831_v0 }
 0x2d3   :  { %v12072_v27 = vcombine.high %v2839_v11, %v2847_v12  ;;  %v2927_v1 = vld [vmem:[#allocation11 + $0x1148] sm:$0xff] }
 0x2d5   :  { %8656 = vmatpush1.bf16.msra.mxu0 %v11957_v18  ;;  %8820 = vmatpush1.bf16.msra.mxu1 %v11959_v19  ;;  %v2855_v18 = vld [vmem:[#allocation11 + $0xf08] sm:$0xff] }
 0x2d6   :  { %8657 = vmatprep.subr.bf16.mxu0 %v11974_v20  ;;  %8821 = vmatprep.subr.bf16.mxu1 %v11976_v21  ;;  %v2863_v19 = vld [vmem:[#allocation11 + $0xf48] sm:$0xff]  ;;  %v12069_v20 = vcombine.low %v2838_v30, %v2846_v10  ;;  %v12071_v21 = vcombine.low %v2839_v11, %v2847_v12 }
 0x2d7   :  { %v12088_v13 = vcombine.high %v2855_v18, %v2863_v19  ;;  %v12087_v33 = vcombine.low %v2855_v18, %v2863_v19  ;;  %v2943_v30 = vld [vmem:[#allocation11 + $0x11c8] sm:$0xff] }
 0x2d9   :  { %8658 = vmatpush1.bf16.msra.mxu0 %v11973_v28  ;;  %8822 = vmatpush1.bf16.msra.mxu1 %v11975_v29  ;;  %v2878_v28 = vld [vmem:[#allocation11 + $0xfc0] sm:$0xff]  ;;  %v2871_v29 = vld [vmem:[#allocation11 + $0xf88] sm:$0xff] }
 0x2da   :  { %8659 = vmatprep.subr.bf16.mxu0 %v11990_v31  ;;  %8823 = vmatprep.subr.bf16.mxu1 %v11992_v32  ;;  %v2879_v31 = vld [vmem:[#allocation11 + $0xfc8] sm:$0xff]  ;;  %v12085_v32 = vcombine.low %v2854_v16, %v2862_v17  ;;  %v12102_v36 = vcombine.high %v2870_v25, %v2878_v28  ;;  %v12101_v42 = vcombine.low %v2870_v25, %v2878_v28 }
 0x2db   :  { %v12104_v37 = vcombine.high %v2871_v29, %v2879_v31  ;;  %v12103_v43 = vcombine.low %v2871_v29, %v2879_v31  ;;  %v2959_v16 = vld [vmem:[#allocation11 + $0x1248] sm:$0xff] }
 0x2dd   :  { %8660 = vmatpush1.bf16.msra.mxu0 %v11989_v38  ;;  %8824 = vmatpush1.bf16.msra.mxu1 %v11991_v39  ;;  %v2886_v38 = vld [vmem:[#allocation11 + $0x1000] sm:$0xff] }
 0x2de   :  { %8661 = vmatprep.subr.bf16.mxu0 %v12006_v40  ;;  %8825 = vmatprep.subr.bf16.mxu1 %v12008_v41  ;;  %v2894_v39 = vld [vmem:[#allocation11 + $0x1040] sm:$0xff]  ;;  %v2887_v40 = vld [vmem:[#allocation11 + $0x1008] sm:$0xff] }
 0x2df   :  { %v2895_v41 = vld [vmem:[#allocation11 + $0x1048] sm:$0xff]  ;;  %v12118_v49 = vcombine.high %v2886_v38, %v2894_v39  ;;  %v12117_v63 = vcombine.low %v2886_v38, %v2894_v39 }
 0x2e0   :  { %v12119_v55 = vcombine.low %v2887_v40, %v2895_v41 }
 0x2e1   :  { %8662 = vmatpush1.bf16.msra.mxu0 %v12005_v50  ;;  %8826 = vmatpush1.bf16.msra.mxu1 %v12007_v51  ;;  %v12120_v50 = vcombine.high %v2887_v40, %v2895_v41  ;;  %v2902_v51 = vld [vmem:[#allocation11 + $0x1080] sm:$0xff] }
 0x2e2   :  { %8663 = vmatprep.subr.bf16.mxu0 %v12022_v52  ;;  %8827 = vmatprep.subr.bf16.mxu1 %v12024_v53  ;;  %v2910_v52 = vld [vmem:[#allocation11 + $0x10c0] sm:$0xff]  ;;  %v2911_v53 = vld [vmem:[#allocation11 + $0x10c8] sm:$0xff] }
 0x2e3   :  { %v12134_v57 = vcombine.high %v2902_v51, %v2910_v52  ;;  %v12133_v2 = vcombine.low %v2902_v51, %v2910_v52  ;;  %v12135_v3 = vcombine.low %v2903_v9, %v2911_v53  ;;  %v2998_v41 = vld [vmem:[#allocation11 + $0x1380] sm:$0xff] }
 0x2e5   :  { %8664 = vmatpush1.bf16.msra.mxu0 %v12021_v58  ;;  %8828 = vmatpush1.bf16.msra.mxu1 %v12023_v59  ;;  %v12136_v58 = vcombine.high %v2903_v9, %v2911_v53  ;;  %v2918_v59 = vld [vmem:[#allocation11 + $0x1100] sm:$0xff] }
 0x2e6   :  { %8665 = vmatprep.subr.bf16.mxu0 %v12038_v60  ;;  %8829 = vmatprep.subr.bf16.mxu1 %v12040_v61  ;;  %v2926_v60 = vld [vmem:[#allocation11 + $0x1140] sm:$0xff]  ;;  %v2919_v61 = vld [vmem:[#allocation11 + $0x1108] sm:$0xff] }
 0x2e7   :  { %v12150_v0 = vcombine.high %v2918_v59, %v2926_v60  ;;  %v12149_v10 = vcombine.low %v2918_v59, %v2926_v60  ;;  %v12151_v11 = vcombine.low %v2919_v61, %v2927_v1  ;;  %v3014_v9 = vld [vmem:[#allocation11 + $0x1400] sm:$0xff] }
 0x2e8   :  { %v3022_v53 = vld [vmem:[#allocation11 + $0x1440] sm:$0xff] }
 0x2e9   :  { %8666 = vmatpush1.bf16.msra.mxu0 %v12037_v5  ;;  %8830 = vmatpush1.bf16.msra.mxu1 %v12039_v6  ;;  %v12152_v5 = vcombine.high %v2919_v61, %v2927_v1  ;;  %v2934_v6 = vld [vmem:[#allocation11 + $0x1180] sm:$0xff]  ;;  %v12246_v59 = vcombine.high %v3014_v9, %v3022_v53 }
 0x2ea   :  { %8667 = vmatprep.subr.bf16.mxu0 %v12054_v7  ;;  %8831 = vmatprep.subr.bf16.mxu1 %v12056_v8  ;;  %v2942_v7 = vld [vmem:[#allocation11 + $0x11c0] sm:$0xff]  ;;  %v2935_v8 = vld [vmem:[#allocation11 + $0x1188] sm:$0xff] }
 0x2eb   :  { %v12166_v12 = vcombine.high %v2934_v6, %v2942_v7  ;;  %v12165_v17 = vcombine.low %v2934_v6, %v2942_v7  ;;  %v12167_v18 = vcombine.low %v2935_v8, %v2943_v30  ;;  %v3030_v61 = vld [vmem:[#allocation11 + $0x1480] sm:$0xff] }
 0x2ec   :  { %v3038_v1 = vld [vmem:[#allocation11 + $0x14c0] sm:$0xff] }
 0x2ed   :  { %8668 = vmatpush1.bf16.msra.mxu0 %v12053_v14  ;;  %8832 = vmatpush1.bf16.msra.mxu1 %v12055_v15  ;;  %v12168_v14 = vcombine.high %v2935_v8, %v2943_v30  ;;  %v2950_v15 = vld [vmem:[#allocation11 + $0x1200] sm:$0xff]  ;;  %v12262_v6 = vcombine.high %v3030_v61, %v3038_v1 }
 0x2ee   :  { %8669 = vmatprep.subr.bf16.mxu0 %v12070_v46  ;;  %8833 = vmatprep.subr.bf16.mxu1 %v12072_v27  ;;  %v2958_v46 = vld [vmem:[#allocation11 + $0x1240] sm:$0xff]  ;;  %v2951_v27 = vld [vmem:[#allocation11 + $0x1208] sm:$0xff] }
 0x2ef   :  { %v12182_v19 = vcombine.high %v2950_v15, %v2958_v46  ;;  %v12181_v25 = vcombine.low %v2950_v15, %v2958_v46  ;;  %v12183_v28 = vcombine.low %v2951_v27, %v2959_v16  ;;  %v3046_v8 = vld [vmem:[#allocation11 + $0x1500] sm:$0xff] }
 0x2f0   :  { %v3054_v30 = vld [vmem:[#allocation11 + $0x1540] sm:$0xff] }
 0x2f1   :  { %8670 = vmatpush1.bf16.msra.mxu0 %v12069_v20  ;;  %8834 = vmatpush1.bf16.msra.mxu1 %v12071_v21  ;;  %v12184_v20 = vcombine.high %v2951_v27, %v2959_v16  ;;  %v2966_v21 = vld [vmem:[#allocation11 + $0x1280] sm:$0xff]  ;;  %v12278_v15 = vcombine.high %v3046_v8, %v3054_v30 }
 0x2f2   :  { %8671 = vmatprep.subr.bf16.mxu0 %v12086_v23  ;;  %8835 = vmatprep.subr.bf16.mxu1 %v12088_v13  ;;  %v2967_v23 = vld [vmem:[#allocation11 + $0x1288] sm:$0xff]  ;;  %v12198_v29 = vcombine.high %v2966_v21, %v2974_v22  ;;  %v3062_v27 = vld [vmem:[#allocation11 + $0x1580] sm:$0xff] }
 0x2f3   :  { %v2975_v13 = vld [vmem:[#allocation11 + $0x12c8] sm:$0xff]  ;;  %v3070_v16 = vld [vmem:[#allocation11 + $0x15c0] sm:$0xff] }
 0x2f4   :  { %v12200_v31 = vcombine.high %v2967_v23, %v2975_v13  ;;  %v12199_v38 = vcombine.low %v2967_v23, %v2975_v13  ;;  %v3078_v23 = vld [vmem:[#allocation11 + $0x1600] sm:$0xff] }
 0x2f5   :  { %8672 = vmatpush1.bf16.msra.mxu0 %v12085_v32  ;;  %8836 = vmatpush1.bf16.msra.mxu1 %v12087_v33  ;;  %v2982_v32 = vld [vmem:[#allocation11 + $0x1300] sm:$0xff] }
 0x2f6   :  { %8673 = vmatprep.subr.bf16.mxu0 %v12102_v36  ;;  %8837 = vmatprep.subr.bf16.mxu1 %v12104_v37  ;;  %v2990_v33 = vld [vmem:[#allocation11 + $0x1340] sm:$0xff]  ;;  %v2991_v36 = vld [vmem:[#allocation11 + $0x1348] sm:$0xff]  ;;  %v12197_v37 = vcombine.low %v2966_v21, %v2974_v22  ;;  %v12294_v21 = vcombine.high %v3062_v27, %v3070_v16 }
 0x2f7   :  { %v12214_v39 = vcombine.high %v2982_v32, %v2990_v33  ;;  %v12216_v40 = vcombine.high %v2983_v34, %v2991_v36  ;;  %v3086_v13 = vld [vmem:[#allocation11 + $0x1640] sm:$0xff] }
 0x2f9   :  { %8674 = vmatpush1.bf16.msra.mxu0 %v12101_v42  ;;  %8838 = vmatpush1.bf16.msra.mxu1 %v12103_v43  ;;  %v3006_v42 = vld [vmem:[#allocation11 + $0x13c0] sm:$0xff]  ;;  %v2999_v43 = vld [vmem:[#allocation11 + $0x1388] sm:$0xff] }
 0x2fa   :  { %8684 = vmatprep.subr.bf16.mxu0 %v12118_v49  ;;  %8848 = vmatprep.subr.bf16.mxu1 %v12120_v50  ;;  %v12213_v49 = vcombine.low %v2982_v32, %v2990_v33  ;;  %v12215_v50 = vcombine.low %v2983_v34, %v2991_v36  ;;  %v12230_v51 = vcombine.high %v2998_v41, %v3006_v42  ;;  %v3094_v34 = vld [vmem:[#allocation11 + $0x1680] sm:$0xff] }
 0x2fb   :  { %v12232_v52 = vcombine.high %v2999_v43, %v3007_v48  ;;  %v12310_v32 = vcombine.high %v3078_v23, %v3086_v13  ;;  %v3102_v36 = vld [vmem:[#allocation11 + $0x16c0] sm:$0xff] }
 0x2fc   :  { %8676 = vmatmul.mubr.bf16.vlgmr.msra.gmra.mrb[12].mxu0 %v13749_v56  ;;  %8840 = vmatmul.mubr.bf16.vlgmr.msra.gmra.mrb[12].mxu1 %v13749_v56 }
 0x2fd   :  { %8685 = vmatpush1.bf16.msra.mxu0 %v12117_v63  ;;  %8849 = vmatpush1.bf16.msra.mxu1 %v12119_v55  ;;  %v3015_v63 = vld [vmem:[#allocation11 + $0x1408] sm:$0xff] }
 0x2fe   :  { %8686 = vmatprep.subr.bf16.mxu0 %v12134_v57  ;;  %8850 = vmatprep.subr.bf16.mxu1 %v12136_v58  ;;  %v3023_v55 = vld [vmem:[#allocation11 + $0x1448] sm:$0xff]  ;;  %v12229_v57 = vcombine.low %v2998_v41, %v3006_v42  ;;  %v12231_v58 = vcombine.low %v2999_v43, %v3007_v48  ;;  %v12326_v41 = vcombine.high %v3094_v34, %v3102_v36  ;;  %v3110_v43 = vld [vmem:[#allocation11 + $0x1700] sm:$0xff] }
 0x2ff   :  { %v12248_v60 = vcombine.high %v3015_v63, %v3023_v55  ;;  %v3118_v48 = vld [vmem:[#allocation11 + $0x1740] sm:$0xff] }
 0x301   :  { %8687 = vmatpush1.bf16.msra.mxu0 %v12133_v2  ;;  %8851 = vmatpush1.bf16.msra.mxu1 %v12135_v3  ;;  %v3031_v2 = vld [vmem:[#allocation11 + $0x1488] sm:$0xff] }
 0x302   :  { %8688 = vmatprep.subr.bf16.mxu0 %v12150_v0  ;;  %8852 = vmatprep.subr.bf16.mxu1 %v12152_v5  ;;  %v3039_v3 = vld [vmem:[#allocation11 + $0x14c8] sm:$0xff]  ;;  %v12245_v0 = vcombine.low %v3014_v9, %v3022_v53  ;;  %v12247_v5 = vcombine.low %v3015_v63, %v3023_v55  ;;  %v13757_v53 = vsub.s32 5, %v13673_v44  ;;  %v12342_v63 = vcombine.high %v3110_v43, %v3118_v48 }
 0x303   :  { %v12264_v7 = vcombine.high %v3031_v2, %v3039_v3 }
 0x305   :  { %8689 = vmatpush1.bf16.msra.mxu0 %v12149_v10  ;;  %8853 = vmatpush1.bf16.msra.mxu1 %v12151_v11  ;;  %v3047_v10 = vld [vmem:[#allocation11 + $0x1508] sm:$0xff] }
 0x306   :  { %8690 = vmatprep.subr.bf16.mxu0 %v12166_v12  ;;  %8854 = vmatprep.subr.bf16.mxu1 %v12168_v14  ;;  %v3055_v11 = vld [vmem:[#allocation11 + $0x1548] sm:$0xff]  ;;  %v12261_v12 = vcombine.low %v3030_v61, %v3038_v1  ;;  %v12263_v14 = vcombine.low %v3031_v2, %v3039_v3  ;;  %v12341_v2 = vcombine.low %v3110_v43, %v3118_v48  ;;  %v3182_v43 = vld [vmem:[#allocation11 + $0x1940] sm:$0xff] }
 0x307   :  { %v12280_v46 = vcombine.high %v3047_v10, %v3055_v11  ;;  %v3135_v61 = vld [vmem:[#allocation11 + $0x17c8] sm:$0xff] }
 0x308   :  { %v3175_v48 = vld [vmem:[#allocation11 + $0x1908] sm:$0xff] }
 0x309   :  { %8691 = vmatpush1.bf16.msra.mxu0 %v12165_v17  ;;  %8855 = vmatpush1.bf16.msra.mxu1 %v12167_v18  ;;  %v3063_v17 = vld [vmem:[#allocation11 + $0x1588] sm:$0xff] }
 0x30a   :  { %8692 = vmatprep.subr.bf16.mxu0 %v12182_v19  ;;  %8856 = vmatprep.subr.bf16.mxu1 %v12184_v20  ;;  %v3071_v18 = vld [vmem:[#allocation11 + $0x15c8] sm:$0xff]  ;;  %v12277_v19 = vcombine.low %v3046_v8, %v3054_v30  ;;  %v12279_v20 = vcombine.low %v3047_v10, %v3055_v11  ;;  %v3142_v8 = vld [vmem:[#allocation11 + $0x1800] sm:$0xff] }
 0x30b   :  { %v12296_v22 = vcombine.high %v3063_v17, %v3071_v18  ;;  %v3150_v10 = vld [vmem:[#allocation11 + $0x1840] sm:$0xff]  ;;  %v3143_v11 = vld [vmem:[#allocation11 + $0x1808] sm:$0xff] }
 0x30d   :  { %8693 = vmatpush1.bf16.msra.mxu0 %v12181_v25  ;;  %8857 = vmatpush1.bf16.msra.mxu1 %v12183_v28  ;;  %v3079_v25 = vld [vmem:[#allocation11 + $0x1608] sm:$0xff] }
 0x30e   :  { %8694 = vmatprep.subr.bf16.mxu0 %v12198_v29  ;;  %8858 = vmatprep.subr.bf16.mxu1 %v12200_v31  ;;  %v3087_v28 = vld [vmem:[#allocation11 + $0x1648] sm:$0xff]  ;;  %v12293_v29 = vcombine.low %v3062_v27, %v3070_v16  ;;  %v12295_v31 = vcombine.low %v3063_v17, %v3071_v18 }
 0x30f   :  { %v12312_v33 = vcombine.high %v3079_v25, %v3087_v28 }
 0x311   :  { %8695 = vmatpush1.bf16.msra.mxu0 %v12197_v37  ;;  %8859 = vmatpush1.bf16.msra.mxu1 %v12199_v38  ;;  %v3095_v37 = vld [vmem:[#allocation11 + $0x1688] sm:$0xff] }
 0x312   :  { %8696 = vmatprep.subr.bf16.mxu0 %v12214_v39  ;;  %8860 = vmatprep.subr.bf16.mxu1 %v12216_v40  ;;  %v3103_v38 = vld [vmem:[#allocation11 + $0x16c8] sm:$0xff]  ;;  %v12309_v39 = vcombine.low %v3078_v23, %v3086_v13  ;;  %v12311_v40 = vcombine.low %v3079_v25, %v3087_v28  ;;  %v12374_v23 = vcombine.high %v3142_v8, %v3150_v10 }
 0x313   :  { %v12328_v42 = vcombine.high %v3095_v37, %v3103_v38  ;;  %v12327_v9 = vcombine.low %v3095_v37, %v3103_v38  ;;  %v12373_v37 = vcombine.low %v3142_v8, %v3150_v10  ;;  %v3215_v8 = vld [vmem:[#allocation11 + $0x1a48] sm:$0xff] }
 0x315   :  { %8697 = vmatpush1.bf16.msra.mxu0 %v12213_v49  ;;  %8861 = vmatpush1.bf16.msra.mxu1 %v12215_v50  ;;  %v3111_v49 = vld [vmem:[#allocation11 + $0x1708] sm:$0xff] }
 0x316   :  { %8698 = vmatprep.subr.bf16.mxu0 %v12230_v51  ;;  %8862 = vmatprep.subr.bf16.mxu1 %v12232_v52  ;;  %v3119_v50 = vld [vmem:[#allocation11 + $0x1748] sm:$0xff]  ;;  %v13754_v51 = vsub.s32 4, %v13673_v44  ;;  %v12325_v52 = vcombine.low %v3094_v34, %v3102_v36 }
 0x317   :  { %v12344_v55 = vcombine.high %v3111_v49, %v3119_v50  ;;  %v12343_v3 = vcombine.low %v3111_v49, %v3119_v50  ;;  %v3167_v34 = vld [vmem:[#allocation11 + $0x18c8] sm:$0xff] }
 0x318   :  { %v729_v1 = vrot.slane %v13724_v4, %v13754_v51  ;;  %v3183_v49 = vld [vmem:[#allocation11 + $0x1948] sm:$0xff] }
 0x319   :  { %8699 = vmatpush1.bf16.msra.mxu0 %v12229_v57  ;;  %8863 = vmatpush1.bf16.msra.mxu1 %v12231_v58  ;;  %v13760_v57 = vsub.s32 7, %v13673_v44  ;;  %v3126_v58 = vld [vmem:[#allocation11 + $0x1780] sm:$0xff] }
 0x31a   :  { %8700 = vmatprep.subr.bf16.mxu0 %v12246_v59  ;;  %8864 = vmatprep.subr.bf16.mxu1 %v12248_v60  ;;  %v3134_v59 = vld [vmem:[#allocation11 + $0x17c0] sm:$0xff]  ;;  %v3127_v60 = vld [vmem:[#allocation11 + $0x1788] sm:$0xff] }
 0x31b   :  { %v12357_v18 = vcombine.low %v3126_v58, %v3134_v59 }
 0x31d   :  { %8701 = vmatpush1.bf16.msra.mxu0 %v12245_v0  ;;  %8865 = vmatpush1.bf16.msra.mxu1 %v12247_v5  ;;  %v733_v0 = vrot.slane %v13724_v4, %v13757_v53  ;;  %v741_v5 = vrot.slane %v13724_v4, %v13760_v57 }
 0x31e   :  { %8702 = vmatprep.subr.bf16.mxu0 %v12262_v6  ;;  %8866 = vmatprep.subr.bf16.mxu1 %v12264_v7  ;;  %v12358_v6 = vcombine.high %v3126_v58, %v3134_v59  ;;  %v12360_v7 = vcombine.high %v3127_v60, %v3135_v61  ;;  %v3190_v58 = vld [vmem:[#allocation11 + $0x1980] sm:$0xff] }
 0x31f   :  { %v3198_v59 = vld [vmem:[#allocation11 + $0x19c0] sm:$0xff] }
 0x321   :  { %8703 = vmatpush1.bf16.msra.mxu0 %v12261_v12  ;;  %8867 = vmatpush1.bf16.msra.mxu1 %v12263_v14  ;;  %v3151_v12 = vld [vmem:[#allocation11 + $0x1848] sm:$0xff] }
 0x322   :  { %8704 = vmatprep.subr.bf16.mxu0 %v12278_v15  ;;  %8868 = vmatprep.subr.bf16.mxu1 %v12280_v46  ;;  %v12376_v13 = vcombine.high %v3143_v11, %v3151_v12  ;;  %v12375_v38 = vcombine.low %v3143_v11, %v3151_v12 }
 0x325   :  { %8705 = vmatpush1.bf16.msra.mxu0 %v12277_v19  ;;  %8869 = vmatpush1.bf16.msra.mxu1 %v12279_v20  ;;  %v12359_v19 = vcombine.low %v3127_v60, %v3135_v61  ;;  %v3191_v60 = vld [vmem:[#allocation11 + $0x1988] sm:$0xff] }
 0x326   :  { %8706 = vmatprep.subr.bf16.mxu0 %v12294_v21  ;;  %8870 = vmatprep.subr.bf16.mxu1 %v12296_v22  ;;  %v3199_v61 = vld [vmem:[#allocation11 + $0x19c8] sm:$0xff] }
 0x327   :  { %v12423_v10 = vcombine.low %v3191_v60, %v3199_v61 }
 0x329   :  { %8707 = vmatpush1.bf16.msra.mxu0 %v12293_v29  ;;  %8871 = vmatpush1.bf16.msra.mxu1 %v12295_v31  ;;  %v3158_v29 = vld [vmem:[#allocation11 + $0x1880] sm:$0xff] }
 0x32a   :  { %8708 = vmatprep.subr.bf16.mxu0 %v12310_v32  ;;  %8872 = vmatprep.subr.bf16.mxu1 %v12312_v33  ;;  %v3166_v32 = vld [vmem:[#allocation11 + $0x18c0] sm:$0xff]  ;;  %v3159_v33 = vld [vmem:[#allocation11 + $0x1888] sm:$0xff] }
 0x32d   :  { %8709 = vmatpush1.bf16.msra.mxu0 %v12309_v39  ;;  %8873 = vmatpush1.bf16.msra.mxu1 %v12311_v40  ;;  %v3174_v40 = vld [vmem:[#allocation11 + $0x1900] sm:$0xff] }
 0x32e   :  { %8710 = vmatprep.subr.bf16.mxu0 %v12326_v41  ;;  %8874 = vmatprep.subr.bf16.mxu1 %v12328_v42  ;;  %v12390_v41 = vcombine.high %v3158_v29, %v3166_v32  ;;  %v12392_v42 = vcombine.high %v3159_v33, %v3167_v34 }
 0x331   :  { %8711 = vmatpush1.bf16.msra.mxu0 %v12325_v52  ;;  %8875 = vmatpush1.bf16.msra.mxu1 %v12327_v9  ;;  %v12389_v52 = vcombine.low %v3158_v29, %v3166_v32  ;;  %v12391_v9 = vcombine.low %v3159_v33, %v3167_v34  ;;  %v3262_v32 = vld [vmem:[#allocation11 + $0x1bc0] sm:$0xff]  ;;  %v3255_v33 = vld [vmem:[#allocation11 + $0x1b88] sm:$0xff] }
 0x332   :  { %8712 = vmatprep.subr.bf16.mxu0 %v12342_v63  ;;  %8876 = vmatprep.subr.bf16.mxu1 %v12344_v55  ;;  %v12406_v63 = vcombine.high %v3174_v40, %v3182_v43  ;;  %v12408_v55 = vcombine.high %v3175_v48, %v3183_v49  ;;  %v3263_v34 = vld [vmem:[#allocation11 + $0x1bc8] sm:$0xff] }
 0x333   :  { %v2269_v30 = vpop.f32.mrb[8].mxu0 }
 0x334   :  { %v12938_v14 = vadd.f32 %v2269_v30, %v729_v1  ;;  %v13768_v15 = vpop.f32.mrb[8].mxu1  ;;  %v2271_v46 = vpop.f32.mrb[9].mxu0  ;;  %v12405_v1 = vcombine.low %v3174_v40, %v3182_v43  ;;  %v12421_v30 = vcombine.low %v3190_v58, %v3198_v59  ;;  %v3278_v43 = vld [vmem:[#allocation11 + $0x1c40] sm:$0xff] }
 0x335   :  { %v12939_v27 = vadd.f32 %v2271_v46, %v733_v0  ;;  %v2353_v16 = vpop.f32.mrb[9].mxu1  ;;  %8713 = vmatpush1.bf16.msra.mxu0 %v12341_v2  ;;  %8877 = vmatpush1.bf16.msra.mxu1 %v12343_v3  ;;  %v2273_v17 = vpop.f32.mrb[10].mxu0  ;;  %v12407_v2 = vcombine.low %v3175_v48, %v3183_v49  ;;  %v12422_v3 = vcombine.high %v3190_v58, %v3198_v59  ;;  %v3230_v46 = vld [vmem:[#allocation11 + $0x1ac0] sm:$0xff]  ;;  %v3271_v48 = vld [vmem:[#allocation11 + $0x1c08] sm:$0xff] }
 0x336   :  { %v2362_v20 = vmax.f32 %v12938_v14, 0.0  ;;  %v12941_v4 = vadd.f32 %v2353_v16, %v741_v5  ;;  %v2355_v21 = vpop.f32.mrb[10].mxu1  ;;  %v2274_v22 = vpop.f32.mrb[11].mxu0  ;;  %8714 = vmatprep.subr.bf16.mxu0 %v12358_v6  ;;  %8878 = vmatprep.subr.bf16.mxu1 %v12360_v7  ;;  %v12424_v0 = vcombine.high %v3191_v60, %v3199_v61  ;;  %v3206_v5 = vld [vmem:[#allocation11 + $0x1a00] sm:$0xff]  ;;  %v3207_v7 = vld [vmem:[#allocation11 + $0x1a08] sm:$0xff] }
 0x337   :  { %v2363_v25 = vmax.f32 %v12939_v27, 0.0  ;;  %v2356_v28 = vpop.f32.mrb[11].mxu1  ;;  %v3214_v6 = vld [vmem:[#allocation11 + $0x1a40] sm:$0xff]  ;;  %v12440_v12 = vcombine.high %v3207_v7, %v3215_v8  ;;  %v3223_v27 = vld [vmem:[#allocation11 + $0x1a88] sm:$0xff] }
 0x338   :  { %v2365_v31 = vmax.f32 %v12941_v4, 0.0  ;;  %v13772_v39 = vpack.c.bf16 %v2362_v20, %v2362_v20  ;;  %v12438_v11 = vcombine.high %v3206_v5, %v3214_v6  ;;  %v3222_v14 = vld [vmem:[#allocation11 + $0x1a80] sm:$0xff]  ;;  %v3231_v16 = vld [vmem:[#allocation11 + $0x1ac8] sm:$0xff]  ;;  %v12437_v17 = vcombine.low %v3206_v5, %v3214_v6 }
 0x339   :  { %v13770_v36 = vpack.c.bf16 %v2363_v25, %v2363_v25  ;;  %8715 = vmatpush1.bf16.msra.mxu0 %v12357_v18  ;;  %8879 = vmatpush1.bf16.msra.mxu1 %v12359_v19  ;;  %v12439_v18 = vcombine.low %v3207_v7, %v3215_v8  ;;  %v12454_v19 = vcombine.high %v3222_v14, %v3230_v46  ;;  %v3238_v4 = vld [vmem:[#allocation11 + $0x1b00] sm:$0xff]  ;;  %v3239_v22 = vld [vmem:[#allocation11 + $0x1b08] sm:$0xff] }
 0x33a   :  { %8725 = vmatprep.subr.bf16.mxu0 %v12374_v23  ;;  %8889 = vmatprep.subr.bf16.mxu1 %v12376_v13  ;;  %v13776_v50 = vpack.c.bf16 %v2365_v31, %v2365_v31  ;;  %v12456_v20 = vcombine.high %v3223_v27, %v3231_v16  ;;  %v3246_v21 = vld [vmem:[#allocation11 + $0x1b40] sm:$0xff]  ;;  %v3247_v23 = vld [vmem:[#allocation11 + $0x1b48] sm:$0xff]  ;;  %v12453_v13 = vcombine.low %v3222_v14, %v3230_v46 }
 0x33b   :  { %8716 = vmatprep.mubr.bf16.mxu0 %v13770_v36  ;;  %8880 = vmatprep.mubr.bf16.mxu1 %v13770_v36  ;;  %v12455_v25 = vcombine.low %v3223_v27, %v3231_v16  ;;  %v12470_v28 = vcombine.high %v3238_v4, %v3246_v21  ;;  %v12472_v29 = vcombine.high %v3239_v22, %v3247_v23  ;;  %v3254_v31 = vld [vmem:[#allocation11 + $0x1b80] sm:$0xff]  ;;  %v3279_v49 = vld [vmem:[#allocation11 + $0x1c48] sm:$0xff] }
 0x33c   :  { %8717 = vmatmul.mubr.bf16.vlgmr.msra.gmra.mrb[12].mxu0 %v13772_v39  ;;  %8881 = vmatmul.mubr.bf16.vlgmr.msra.gmra.mrb[12].mxu1 %v13772_v39  ;;  %v12486_v40 = vcombine.high %v3254_v31, %v3262_v32  ;;  %v3286_v58 = vld [vmem:[#allocation11 + $0x1c80] sm:$0xff]  ;;  %v3287_v60 = vld [vmem:[#allocation11 + $0x1c88] sm:$0xff] }
 0x33d   :  { %8726 = vmatpush1.bf16.msra.mxu0 %v12373_v37  ;;  %8890 = vmatpush1.bf16.msra.mxu1 %v12375_v38  ;;  %v12469_v37 = vcombine.low %v3238_v4, %v3246_v21  ;;  %v12471_v38 = vcombine.low %v3239_v22, %v3247_v23  ;;  %v3294_v59 = vld [vmem:[#allocation11 + $0x1cc0] sm:$0xff]  ;;  %v3295_v61 = vld [vmem:[#allocation11 + $0x1cc8] sm:$0xff] }
 0x33e   :  { %8757 = vmatprep.mubr.bf16.mxu0 %v13776_v50  ;;  %8921 = vmatprep.mubr.bf16.mxu1 %v13776_v50  ;;  %v3302_v5 = vld [vmem:[#allocation11 + $0x1d00] sm:$0xff]  ;;  %v3303_v7 = vld [vmem:[#allocation11 + $0x1d08] sm:$0xff] }
 0x33f   :  { %8727 = vmatprep.subr.bf16.mxu0 %v12390_v41  ;;  %8891 = vmatprep.subr.bf16.mxu1 %v12392_v42  ;;  %v12488_v41 = vcombine.high %v3255_v33, %v3263_v34  ;;  %v3270_v42 = vld [vmem:[#allocation11 + $0x1c00] sm:$0xff]  ;;  %v3311_v8 = vld [vmem:[#allocation11 + $0x1d48] sm:$0xff] }
 0x340   :  { %v3310_v6 = vld [vmem:[#allocation11 + $0x1d40] sm:$0xff]  ;;  %v3319_v27 = vld [vmem:[#allocation11 + $0x1d88] sm:$0xff] }
 0x341   :  { %8728 = vmatpush1.bf16.msra.mxu0 %v12389_v52  ;;  %8892 = vmatpush1.bf16.msra.mxu1 %v12391_v9  ;;  %v12485_v52 = vcombine.low %v3254_v31, %v3262_v32  ;;  %v12487_v9 = vcombine.low %v3255_v33, %v3263_v34  ;;  %v3318_v14 = vld [vmem:[#allocation11 + $0x1d80] sm:$0xff]  ;;  %v3327_v16 = vld [vmem:[#allocation11 + $0x1dc8] sm:$0xff] }
 0x342   :  { %8729 = vmatprep.subr.bf16.mxu0 %v12406_v63  ;;  %8893 = vmatprep.subr.bf16.mxu1 %v12408_v55  ;;  %v12502_v63 = vcombine.high %v3270_v42, %v3278_v43  ;;  %v12504_v55 = vcombine.high %v3271_v48, %v3279_v49  ;;  %v3326_v46 = vld [vmem:[#allocation11 + $0x1dc0] sm:$0xff]  ;;  %v3335_v22 = vld [vmem:[#allocation11 + $0x1e08] sm:$0xff] }
 0x343   :  { %v3334_v4 = vld [vmem:[#allocation11 + $0x1e00] sm:$0xff]  ;;  %v3343_v23 = vld [vmem:[#allocation11 + $0x1e48] sm:$0xff] }
 0x344   :  { %v3342_v21 = vld [vmem:[#allocation11 + $0x1e40] sm:$0xff]  ;;  %v3351_v33 = vld [vmem:[#allocation11 + $0x1e88] sm:$0xff] }
 0x345   :  { %8730 = vmatpush1.bf16.msra.mxu0 %v12405_v1  ;;  %8894 = vmatpush1.bf16.msra.mxu1 %v12407_v2  ;;  %v12501_v1 = vcombine.low %v3270_v42, %v3278_v43  ;;  %v12503_v2 = vcombine.low %v3271_v48, %v3279_v49  ;;  %v3350_v31 = vld [vmem:[#allocation11 + $0x1e80] sm:$0xff]  ;;  %v3359_v34 = vld [vmem:[#allocation11 + $0x1ec8] sm:$0xff] }
 0x346   :  { %8731 = vmatprep.subr.bf16.mxu0 %v12422_v3  ;;  %8895 = vmatprep.subr.bf16.mxu1 %v12424_v0  ;;  %v12518_v3 = vcombine.high %v3286_v58, %v3294_v59  ;;  %v12520_v0 = vcombine.high %v3287_v60, %v3295_v61  ;;  %v3358_v32 = vld [vmem:[#allocation11 + $0x1ec0] sm:$0xff]  ;;  %v12584_v42 = vcombine.high %v3351_v33, %v3359_v34  ;;  %v3367_v49 = vld [vmem:[#allocation11 + $0x1f08] sm:$0xff] }
 0x347   :  { %v3366_v43 = vld [vmem:[#allocation11 + $0x1f00] sm:$0xff] }
 0x348   :  { %v3374_v48 = vld [vmem:[#allocation11 + $0x1f40] sm:$0xff] }
 0x349   :  { %8732 = vmatpush1.bf16.msra.mxu0 %v12421_v30  ;;  %8896 = vmatpush1.bf16.msra.mxu1 %v12423_v10  ;;  %v12517_v30 = vcombine.low %v3286_v58, %v3294_v59  ;;  %v12519_v10 = vcombine.low %v3287_v60, %v3295_v61  ;;  %v12598_v59 = vcombine.high %v3366_v43, %v3374_v48  ;;  %v3382_v60 = vld [vmem:[#allocation11 + $0x1f80] sm:$0xff] }
 0x34a   :  { %8733 = vmatprep.subr.bf16.mxu0 %v12438_v11  ;;  %8897 = vmatprep.subr.bf16.mxu1 %v12440_v12  ;;  %v12534_v11 = vcombine.high %v3302_v5, %v3310_v6  ;;  %v12536_v12 = vcombine.high %v3303_v7, %v3311_v8  ;;  %v3390_v61 = vld [vmem:[#allocation11 + $0x1fc0] sm:$0xff] }
 0x34d   :  { %8734 = vmatpush1.bf16.msra.mxu0 %v12437_v17  ;;  %8898 = vmatpush1.bf16.msra.mxu1 %v12439_v18  ;;  %v12533_v17 = vcombine.low %v3302_v5, %v3310_v6  ;;  %v12535_v18 = vcombine.low %v3303_v7, %v3311_v8  ;;  %v12614_v6 = vcombine.high %v3382_v60, %v3390_v61  ;;  %v2376_v8 = vld [vmem:[#allocation11 + $0x10] sm:$0xff] }
 0x34e   :  { %8735 = vmatprep.subr.bf16.mxu0 %v12454_v19  ;;  %8899 = vmatprep.subr.bf16.mxu1 %v12456_v20  ;;  %v12550_v19 = vcombine.high %v3318_v14, %v3326_v46  ;;  %v12552_v20 = vcombine.high %v3319_v27, %v3327_v16 }
 0x351   :  { %8736 = vmatpush1.bf16.msra.mxu0 %v12453_v13  ;;  %8900 = vmatpush1.bf16.msra.mxu1 %v12455_v25  ;;  %v12549_v13 = vcombine.low %v3318_v14, %v3326_v46  ;;  %v12551_v25 = vcombine.low %v3319_v27, %v3327_v16 }
 0x352   :  { %8737 = vmatprep.subr.bf16.mxu0 %v12470_v28  ;;  %8901 = vmatprep.subr.bf16.mxu1 %v12472_v29  ;;  %v12566_v28 = vcombine.high %v3334_v4, %v3342_v21  ;;  %v12568_v29 = vcombine.high %v3335_v22, %v3343_v23 }
 0x355   :  { %8738 = vmatpush1.bf16.msra.mxu0 %v12469_v37  ;;  %8902 = vmatpush1.bf16.msra.mxu1 %v12471_v38  ;;  %v12565_v37 = vcombine.low %v3334_v4, %v3342_v21  ;;  %v12567_v38 = vcombine.low %v3335_v22, %v3343_v23 }
 0x356   :  { %8739 = vmatprep.subr.bf16.mxu0 %v12486_v40  ;;  %8903 = vmatprep.subr.bf16.mxu1 %v12488_v41  ;;  %v13783_v40 = vsub.s32 6, %v13673_v44  ;;  %v12582_v41 = vcombine.high %v3350_v31, %v3358_v32 }
 0x359   :  { %8740 = vmatpush1.bf16.msra.mxu0 %v12485_v52  ;;  %8904 = vmatpush1.bf16.msra.mxu1 %v12487_v9  ;;  %v3375_v52 = vld [vmem:[#allocation11 + $0x1f48] sm:$0xff]  ;;  %v12581_v9 = vcombine.low %v3350_v31, %v3358_v32 }
 0x35a   :  { %8741 = vmatprep.subr.bf16.mxu0 %v12502_v63  ;;  %8905 = vmatprep.subr.bf16.mxu1 %v12504_v55  ;;  %v12583_v63 = vcombine.low %v3351_v33, %v3359_v34  ;;  %v13264_v55 = vld [vmem:[#allocation10] sm:$0xff]  ;;  %v12600_v44 = vcombine.high %v3367_v49, %v3375_v52 }
 0x35b   :  { %v737_v58 = vrot.slane %v13264_v55, %v13783_v40  ;;  %v2441_v55 = vld [vmem:[#allocation11 + $0x218] sm:$0xff] }
 0x35d   :  { %8742 = vmatpush1.bf16.msra.mxu0 %v12501_v1  ;;  %8906 = vmatpush1.bf16.msra.mxu1 %v12503_v2  ;;  %v3383_v1 = vld [vmem:[#allocation11 + $0x1f88] sm:$0xff]  ;;  %v12940_v5 = vadd.f32 %v13768_v15, %v737_v58  ;;  %v2393_v15 = vld [vmem:[#allocation11 + $0x98] sm:$0xff] }
 0x35e   :  { %8743 = vmatprep.subr.bf16.mxu0 %v12518_v3  ;;  %8907 = vmatprep.subr.bf16.mxu1 %v12520_v0  ;;  %v3391_v2 = vld [vmem:[#allocation11 + $0x1fc8] sm:$0xff]  ;;  %v12597_v3 = vcombine.low %v3366_v43, %v3374_v48  ;;  %v12599_v0 = vcombine.low %v3367_v49, %v3375_v52  ;;  %v2449_v58 = vld [vmem:[#allocation11 + $0x258] sm:$0xff] }
 0x35f   :  { %v12616_v7 = vcombine.high %v3383_v1, %v3391_v2  ;;  %v12615_v14 = vcombine.low %v3383_v1, %v3391_v2  ;;  %v2364_v46 = vmax.f32 %v12940_v5, 0.0  ;;  %v2456_v1 = vld [vmem:[#allocation11 + $0x290] sm:$0xff] }
 0x360   :  { %v2464_v2 = vld [vmem:[#allocation11 + $0x2d0] sm:$0xff] }
 0x361   :  { %8744 = vmatpush1.bf16.msra.mxu0 %v12517_v30  ;;  %8908 = vmatpush1.bf16.msra.mxu1 %v12519_v10  ;;  %v2384_v30 = vld [vmem:[#allocation11 + $0x50] sm:$0xff]  ;;  %v2377_v10 = vld [vmem:[#allocation11 + $0x18] sm:$0xff]  ;;  %v13787_v4 = vpack.c.bf16 %v2364_v46, %v2364_v46 }
 0x362   :  { %8745 = vmatprep.subr.bf16.mxu0 %v12534_v11  ;;  %8909 = vmatprep.subr.bf16.mxu1 %v12536_v12  ;;  %v2385_v11 = vld [vmem:[#allocation11 + $0x58] sm:$0xff]  ;;  %v12613_v12 = vcombine.low %v3382_v60, %v3390_v61  ;;  %v11610_v27 = vcombine.high %v2376_v8, %v2384_v30  ;;  %v11676_v61 = vcombine.high %v2441_v55, %v2449_v58 }
 0x363   :  { %v11612_v16 = vcombine.high %v2377_v10, %v2385_v11  ;;  %v11611_v21 = vcombine.low %v2377_v10, %v2385_v11  ;;  %v2480_v10 = vld [vmem:[#allocation11 + $0x350] sm:$0xff]  ;;  %v2473_v11 = vld [vmem:[#allocation11 + $0x318] sm:$0xff] }
 0x365   :  { %8746 = vmatpush1.bf16.msra.mxu0 %v12533_v17  ;;  %8910 = vmatpush1.bf16.msra.mxu1 %v12535_v18  ;;  %v2392_v17 = vld [vmem:[#allocation11 + $0x90] sm:$0xff] }
 0x366   :  { %8747 = vmatprep.subr.bf16.mxu0 %v12550_v19  ;;  %8911 = vmatprep.subr.bf16.mxu1 %v12552_v20  ;;  %v2400_v18 = vld [vmem:[#allocation11 + $0xd0] sm:$0xff]  ;;  %v2401_v19 = vld [vmem:[#allocation11 + $0xd8] sm:$0xff]  ;;  %v11609_v20 = vcombine.low %v2376_v8, %v2384_v30 }
 0x367   :  { %v11626_v22 = vcombine.high %v2392_v17, %v2400_v18  ;;  %v11628_v23 = vcombine.high %v2393_v15, %v2401_v19  ;;  %v11625_v31 = vcombine.low %v2392_v17, %v2400_v18  ;;  %v11627_v32 = vcombine.low %v2393_v15, %v2401_v19  ;;  %v2472_v30 = vld [vmem:[#allocation11 + $0x310] sm:$0xff]  ;;  %v2489_v15 = vld [vmem:[#allocation11 + $0x398] sm:$0xff] }
 0x368   :  { %v2488_v17 = vld [vmem:[#allocation11 + $0x390] sm:$0xff]  ;;  %v2497_v19 = vld [vmem:[#allocation11 + $0x3d8] sm:$0xff] }
 0x369   :  { %8748 = vmatpush1.bf16.msra.mxu0 %v12549_v13  ;;  %8912 = vmatpush1.bf16.msra.mxu1 %v12551_v25  ;;  %v2408_v13 = vld [vmem:[#allocation11 + $0x110] sm:$0xff] }
 0x36a   :  { %8749 = vmatprep.subr.bf16.mxu0 %v12566_v28  ;;  %8913 = vmatprep.subr.bf16.mxu1 %v12568_v29  ;;  %v2416_v25 = vld [vmem:[#allocation11 + $0x150] sm:$0xff]  ;;  %v2409_v28 = vld [vmem:[#allocation11 + $0x118] sm:$0xff] }
 0x36b   :  { %v2417_v29 = vld [vmem:[#allocation11 + $0x158] sm:$0xff]  ;;  %v11642_v33 = vcombine.high %v2408_v13, %v2416_v25  ;;  %v11641_v43 = vcombine.low %v2408_v13, %v2416_v25  ;;  %v2496_v18 = vld [vmem:[#allocation11 + $0x3d0] sm:$0xff] }
 0x36c   :  { %v11644_v34 = vcombine.high %v2409_v28, %v2417_v29  ;;  %v11643_v48 = vcombine.low %v2409_v28, %v2417_v29  ;;  %v2504_v13 = vld [vmem:[#allocation11 + $0x410] sm:$0xff]  ;;  %v2505_v28 = vld [vmem:[#allocation11 + $0x418] sm:$0xff] }
 0x36d   :  { %8750 = vmatpush1.bf16.msra.mxu0 %v12565_v37  ;;  %8914 = vmatpush1.bf16.msra.mxu1 %v12567_v38  ;;  %v2424_v37 = vld [vmem:[#allocation11 + $0x190] sm:$0xff]  ;;  %v2513_v29 = vld [vmem:[#allocation11 + $0x458] sm:$0xff] }
 0x36e   :  { %8751 = vmatprep.subr.bf16.mxu0 %v12582_v41  ;;  %8915 = vmatprep.subr.bf16.mxu1 %v12584_v42  ;;  %v2432_v38 = vld [vmem:[#allocation11 + $0x1d0] sm:$0xff]  ;;  %v2425_v41 = vld [vmem:[#allocation11 + $0x198] sm:$0xff] }
 0x36f   :  { %v2433_v42 = vld [vmem:[#allocation11 + $0x1d8] sm:$0xff]  ;;  %v11658_v49 = vcombine.high %v2424_v37, %v2432_v38  ;;  %v2512_v25 = vld [vmem:[#allocation11 + $0x450] sm:$0xff] }
 0x370   :  { %v11660_v52 = vcombine.high %v2425_v41, %v2433_v42 }
 0x371   :  { %8752 = vmatpush1.bf16.msra.mxu0 %v12581_v9  ;;  %8916 = vmatpush1.bf16.msra.mxu1 %v12583_v63  ;;  %v2440_v9 = vld [vmem:[#allocation11 + $0x210] sm:$0xff] }
 0x372   :  { %8753 = vmatprep.subr.bf16.mxu0 %v12598_v59  ;;  %8917 = vmatprep.subr.bf16.mxu1 %v12600_v44  ;;  %v2448_v63 = vld [vmem:[#allocation11 + $0x250] sm:$0xff]  ;;  %v11657_v59 = vcombine.low %v2424_v37, %v2432_v38  ;;  %v11659_v44 = vcombine.low %v2425_v41, %v2433_v42  ;;  %v2521_v41 = vld [vmem:[#allocation11 + $0x498] sm:$0xff] }
 0x373   :  { %v11674_v60 = vcombine.high %v2440_v9, %v2448_v63  ;;  %v11673_v5 = vcombine.low %v2440_v9, %v2448_v63  ;;  %v2520_v37 = vld [vmem:[#allocation11 + $0x490] sm:$0xff]  ;;  %v2529_v42 = vld [vmem:[#allocation11 + $0x4d8] sm:$0xff] }
 0x374   :  { %v2528_v38 = vld [vmem:[#allocation11 + $0x4d0] sm:$0xff] }
 0x375   :  { %8754 = vmatpush1.bf16.msra.mxu0 %v12597_v3  ;;  %8918 = vmatpush1.bf16.msra.mxu1 %v12599_v0  ;;  %v2457_v3 = vld [vmem:[#allocation11 + $0x298] sm:$0xff]  ;;  %v2536_v9 = vld [vmem:[#allocation11 + $0x510] sm:$0xff] }
 0x376   :  { %8755 = vmatprep.subr.bf16.mxu0 %v12614_v6  ;;  %8919 = vmatprep.subr.bf16.mxu1 %v12616_v7  ;;  %v2465_v0 = vld [vmem:[#allocation11 + $0x2d8] sm:$0xff]  ;;  %v11675_v6 = vcombine.low %v2441_v55, %v2449_v58  ;;  %v11690_v7 = vcombine.high %v2456_v1, %v2464_v2  ;;  %v2544_v63 = vld [vmem:[#allocation11 + $0x550] sm:$0xff] }
 0x377   :  { %v11692_v8 = vcombine.high %v2457_v3, %v2465_v0  ;;  %v11691_v46 = vcombine.low %v2457_v3, %v2465_v0  ;;  %v2537_v55 = vld [vmem:[#allocation11 + $0x518] sm:$0xff] }
 0x378   :  { %v2545_v58 = vld [vmem:[#allocation11 + $0x558] sm:$0xff] }
 0x379   :  { %8756 = vmatpush1.bf16.msra.mxu0 %v12613_v12  ;;  %8920 = vmatpush1.bf16.msra.mxu1 %v12615_v14  ;;  %v2481_v12 = vld [vmem:[#allocation11 + $0x358] sm:$0xff]  ;;  %v11689_v14 = vcombine.low %v2456_v1, %v2464_v2  ;;  %v2552_v1 = vld [vmem:[#allocation11 + $0x590] sm:$0xff] }
 0x37a   :  { %8930 = vmatprep.subr.bf16.mxu0 %v11610_v27  ;;  %9094 = vmatprep.subr.bf16.mxu1 %v11612_v16  ;;  %v11706_v27 = vcombine.high %v2472_v30, %v2480_v10  ;;  %v11708_v16 = vcombine.high %v2473_v11, %v2481_v12  ;;  %v2560_v2 = vld [vmem:[#allocation11 + $0x5d0] sm:$0xff]  ;;  %v2553_v3 = vld [vmem:[#allocation11 + $0x598] sm:$0xff] }
 0x37b   :  { %v2561_v0 = vld [vmem:[#allocation11 + $0x5d8] sm:$0xff] }
 0x37c   :  { %8758 = vmatmul.mubr.bf16.vlgmr.msra.gmra.mrb[12].mxu0 %v13787_v4  ;;  %8922 = vmatmul.mubr.bf16.vlgmr.msra.gmra.mrb[12].mxu1 %v13787_v4 }
 0x37d   :  { %8931 = vmatpush1.bf16.msra.mxu0 %v11609_v20  ;;  %8962 = vmatprep.mubr.bf16.mxu0 %v13734_v24  ;;  %v11705_v20 = vcombine.low %v2472_v30, %v2480_v10  ;;  %v2568_v30 = vld [vmem:[#allocation11 + $0x610] sm:$0xff] }
 0x37e   :  { %9095 = vmatpush1.bf16.msra.mxu1 %v11611_v21  ;;  %9126 = vmatprep.mubr.bf16.mxu1 %v13734_v24  ;;  %v11707_v21 = vcombine.low %v2473_v11, %v2481_v12  ;;  %v2576_v10 = vld [vmem:[#allocation11 + $0x650] sm:$0xff]  ;;  %v2569_v11 = vld [vmem:[#allocation11 + $0x618] sm:$0xff] }
 0x37f   :  { %8932 = vmatprep.subr.bf16.mxu0 %v11626_v22  ;;  %9096 = vmatprep.subr.bf16.mxu1 %v11628_v23  ;;  %v11722_v22 = vcombine.high %v2488_v17, %v2496_v18  ;;  %v11724_v23 = vcombine.high %v2489_v15, %v2497_v19  ;;  %v2577_v12 = vld [vmem:[#allocation11 + $0x658] sm:$0xff] }
 0x381   :  { %8933 = vmatpush1.bf16.msra.mxu0 %v11625_v31  ;;  %v11721_v31 = vcombine.low %v2488_v17, %v2496_v18  ;;  %v2584_v17 = vld [vmem:[#allocation11 + $0x690] sm:$0xff] }
 0x382   :  { %9097 = vmatpush1.bf16.msra.mxu1 %v11627_v32  ;;  %8934 = vmatprep.subr.bf16.mxu0 %v11642_v33  ;;  %v11723_v32 = vcombine.low %v2489_v15, %v2497_v19  ;;  %v11738_v33 = vcombine.high %v2504_v13, %v2512_v25  ;;  %v2592_v18 = vld [vmem:[#allocation11 + $0x6d0] sm:$0xff]  ;;  %v2585_v15 = vld [vmem:[#allocation11 + $0x698] sm:$0xff] }
 0x383   :  { %9098 = vmatprep.subr.bf16.mxu1 %v11644_v34  ;;  %v11740_v34 = vcombine.high %v2505_v28, %v2513_v29  ;;  %v2593_v19 = vld [vmem:[#allocation11 + $0x6d8] sm:$0xff] }
 0x385   :  { %8935 = vmatpush1.bf16.msra.mxu0 %v11641_v43  ;;  %v11737_v43 = vcombine.low %v2504_v13, %v2512_v25  ;;  %v2600_v13 = vld [vmem:[#allocation11 + $0x710] sm:$0xff] }
 0x386   :  { %9099 = vmatpush1.bf16.msra.mxu1 %v11643_v48  ;;  %8936 = vmatprep.subr.bf16.mxu0 %v11658_v49  ;;  %v11739_v48 = vcombine.low %v2505_v28, %v2513_v29  ;;  %v11754_v49 = vcombine.high %v2520_v37, %v2528_v38  ;;  %v2608_v25 = vld [vmem:[#allocation11 + $0x750] sm:$0xff]  ;;  %v2601_v28 = vld [vmem:[#allocation11 + $0x718] sm:$0xff] }
 0x387   :  { %9100 = vmatprep.subr.bf16.mxu1 %v11660_v52  ;;  %v11756_v52 = vcombine.high %v2521_v41, %v2529_v42  ;;  %v2609_v29 = vld [vmem:[#allocation11 + $0x758] sm:$0xff] }
 0x389   :  { %8937 = vmatpush1.bf16.msra.mxu0 %v11657_v59  ;;  %v11753_v59 = vcombine.low %v2520_v37, %v2528_v38  ;;  %v2616_v37 = vld [vmem:[#allocation11 + $0x790] sm:$0xff] }
 0x38a   :  { %9101 = vmatpush1.bf16.msra.mxu1 %v11659_v44  ;;  %8938 = vmatprep.subr.bf16.mxu0 %v11674_v60  ;;  %v11755_v44 = vcombine.low %v2521_v41, %v2529_v42  ;;  %v11770_v60 = vcombine.high %v2536_v9, %v2544_v63  ;;  %v2624_v38 = vld [vmem:[#allocation11 + $0x7d0] sm:$0xff]  ;;  %v2617_v41 = vld [vmem:[#allocation11 + $0x798] sm:$0xff] }
 0x38b   :  { %9102 = vmatprep.subr.bf16.mxu1 %v11676_v61  ;;  %v11772_v61 = vcombine.high %v2537_v55, %v2545_v58  ;;  %v2625_v42 = vld [vmem:[#allocation11 + $0x7d8] sm:$0xff] }
 0x38d   :  { %8939 = vmatpush1.bf16.msra.mxu0 %v11673_v5  ;;  %v11769_v5 = vcombine.low %v2536_v9, %v2544_v63  ;;  %v2632_v9 = vld [vmem:[#allocation11 + $0x810] sm:$0xff] }
 0x38e   :  { %9103 = vmatpush1.bf16.msra.mxu1 %v11675_v6  ;;  %8940 = vmatprep.subr.bf16.mxu0 %v11690_v7  ;;  %v11771_v6 = vcombine.low %v2537_v55, %v2545_v58  ;;  %v11786_v7 = vcombine.high %v2552_v1, %v2560_v2  ;;  %v2640_v63 = vld [vmem:[#allocation11 + $0x850] sm:$0xff]  ;;  %v2633_v55 = vld [vmem:[#allocation11 + $0x818] sm:$0xff] }
 0x38f   :  { %9104 = vmatprep.subr.bf16.mxu1 %v11692_v8  ;;  %v11788_v8 = vcombine.high %v2553_v3, %v2561_v0  ;;  %v2641_v58 = vld [vmem:[#allocation11 + $0x858] sm:$0xff] }
 0x391   :  { %8941 = vmatpush1.bf16.msra.mxu0 %v11689_v14  ;;  %v11785_v14 = vcombine.low %v2552_v1, %v2560_v2  ;;  %v2648_v1 = vld [vmem:[#allocation11 + $0x890] sm:$0xff] }
 0x392   :  { %9105 = vmatpush1.bf16.msra.mxu1 %v11691_v46  ;;  %8942 = vmatprep.subr.bf16.mxu0 %v11706_v27  ;;  %v11787_v46 = vcombine.low %v2553_v3, %v2561_v0  ;;  %v11802_v27 = vcombine.high %v2568_v30, %v2576_v10  ;;  %v2656_v2 = vld [vmem:[#allocation11 + $0x8d0] sm:$0xff]  ;;  %v11865_v3 = vcombine.low %v2632_v9, %v2640_v63  ;;  %v2649_v0 = vld [vmem:[#allocation11 + $0x898] sm:$0xff] }
 0x393   :  { %9106 = vmatprep.subr.bf16.mxu1 %v11708_v16  ;;  %v11804_v16 = vcombine.high %v2569_v11, %v2577_v12 }
 0x395   :  { %8943 = vmatpush1.bf16.msra.mxu0 %v11705_v20  ;;  %v11801_v20 = vcombine.low %v2568_v30, %v2576_v10  ;;  %v2672_v30 = vld [vmem:[#allocation11 + $0x950] sm:$0xff] }
 0x396   :  { %9107 = vmatpush1.bf16.msra.mxu1 %v11707_v21  ;;  %8944 = vmatprep.subr.bf16.mxu0 %v11722_v22  ;;  %v11803_v21 = vcombine.low %v2569_v11, %v2577_v12  ;;  %v11818_v22 = vcombine.high %v2584_v17, %v2592_v18  ;;  %v2665_v11 = vld [vmem:[#allocation11 + $0x918] sm:$0xff] }
 0x397   :  { %9108 = vmatprep.subr.bf16.mxu1 %v11724_v23  ;;  %v11820_v23 = vcombine.high %v2585_v15, %v2593_v19  ;;  %v2673_v12 = vld [vmem:[#allocation11 + $0x958] sm:$0xff] }
 0x399   :  { %8945 = vmatpush1.bf16.msra.mxu0 %v11721_v31  ;;  %v11817_v31 = vcombine.low %v2584_v17, %v2592_v18  ;;  %v2680_v17 = vld [vmem:[#allocation11 + $0x990] sm:$0xff] }
 0x39a   :  { %9109 = vmatpush1.bf16.msra.mxu1 %v11723_v32  ;;  %8946 = vmatprep.subr.bf16.mxu0 %v11738_v33  ;;  %v11819_v32 = vcombine.low %v2585_v15, %v2593_v19  ;;  %v11834_v33 = vcombine.high %v2600_v13, %v2608_v25  ;;  %v2688_v18 = vld [vmem:[#allocation11 + $0x9d0] sm:$0xff]  ;;  %v2681_v15 = vld [vmem:[#allocation11 + $0x998] sm:$0xff] }
 0x39b   :  { %9110 = vmatprep.subr.bf16.mxu1 %v11740_v34  ;;  %v11836_v34 = vcombine.high %v2601_v28, %v2609_v29  ;;  %v2689_v19 = vld [vmem:[#allocation11 + $0x9d8] sm:$0xff] }
 0x39d   :  { %8947 = vmatpush1.bf16.msra.mxu0 %v11737_v43  ;;  %v11833_v43 = vcombine.low %v2600_v13, %v2608_v25  ;;  %v2696_v13 = vld [vmem:[#allocation11 + $0xa10] sm:$0xff] }
 0x39e   :  { %9111 = vmatpush1.bf16.msra.mxu1 %v11739_v48  ;;  %8948 = vmatprep.subr.bf16.mxu0 %v11754_v49  ;;  %v11835_v48 = vcombine.low %v2601_v28, %v2609_v29  ;;  %v11850_v49 = vcombine.high %v2616_v37, %v2624_v38  ;;  %v2704_v25 = vld [vmem:[#allocation11 + $0xa50] sm:$0xff]  ;;  %v2697_v28 = vld [vmem:[#allocation11 + $0xa18] sm:$0xff] }
 0x39f   :  { %9112 = vmatprep.subr.bf16.mxu1 %v11756_v52  ;;  %v11852_v52 = vcombine.high %v2617_v41, %v2625_v42  ;;  %v2705_v29 = vld [vmem:[#allocation11 + $0xa58] sm:$0xff] }
 0x3a1   :  { %8949 = vmatpush1.bf16.msra.mxu0 %v11753_v59  ;;  %v11849_v59 = vcombine.low %v2616_v37, %v2624_v38  ;;  %v2712_v37 = vld [vmem:[#allocation11 + $0xa90] sm:$0xff] }
 0x3a2   :  { %9113 = vmatpush1.bf16.msra.mxu1 %v11755_v44  ;;  %8950 = vmatprep.subr.bf16.mxu0 %v11770_v60  ;;  %v11851_v44 = vcombine.low %v2617_v41, %v2625_v42  ;;  %v11866_v60 = vcombine.high %v2632_v9, %v2640_v63  ;;  %v2720_v38 = vld [vmem:[#allocation11 + $0xad0] sm:$0xff]  ;;  %v2713_v41 = vld [vmem:[#allocation11 + $0xa98] sm:$0xff] }
 0x3a3   :  { %9114 = vmatprep.subr.bf16.mxu1 %v11772_v61  ;;  %v11868_v61 = vcombine.high %v2633_v55, %v2641_v58  ;;  %v2721_v42 = vld [vmem:[#allocation11 + $0xad8] sm:$0xff]  ;;  %v2728_v9 = vld [vmem:[#allocation11 + $0xb10] sm:$0xff] }
 0x3a4   :  { %v2736_v63 = vld [vmem:[#allocation11 + $0xb50] sm:$0xff] }
 0x3a5   :  { %8951 = vmatpush1.bf16.msra.mxu0 %v11769_v5  ;;  %v2657_v5 = vld [vmem:[#allocation11 + $0x8d8] sm:$0xff] }
 0x3a6   :  { %9115 = vmatpush1.bf16.msra.mxu1 %v11771_v6  ;;  %8952 = vmatprep.subr.bf16.mxu0 %v11786_v7  ;;  %v11867_v6 = vcombine.low %v2633_v55, %v2641_v58  ;;  %v11882_v7 = vcombine.high %v2648_v1, %v2656_v2  ;;  %v11884_v10 = vcombine.high %v2649_v0, %v2657_v5  ;;  %v2729_v55 = vld [vmem:[#allocation11 + $0xb18] sm:$0xff] }
 0x3a7   :  { %9116 = vmatprep.subr.bf16.mxu1 %v11788_v8  ;;  %v2664_v8 = vld [vmem:[#allocation11 + $0x910] sm:$0xff]  ;;  %v2737_v58 = vld [vmem:[#allocation11 + $0xb58] sm:$0xff] }
 0x3a9   :  { %8953 = vmatpush1.bf16.msra.mxu0 %v11785_v14  ;;  %v11881_v14 = vcombine.low %v2648_v1, %v2656_v2  ;;  %v2744_v1 = vld [vmem:[#allocation11 + $0xb90] sm:$0xff] }
 0x3aa   :  { %9117 = vmatpush1.bf16.msra.mxu1 %v11787_v46  ;;  %8954 = vmatprep.subr.bf16.mxu0 %v11802_v27  ;;  %v11883_v46 = vcombine.low %v2649_v0, %v2657_v5  ;;  %v11898_v27 = vcombine.high %v2664_v8, %v2672_v30  ;;  %v2752_v2 = vld [vmem:[#allocation11 + $0xbd0] sm:$0xff]  ;;  %v2753_v0 = vld [vmem:[#allocation11 + $0xbd8] sm:$0xff]  ;;  %v11961_v5 = vcombine.low %v2728_v9, %v2736_v63 }
 0x3ab   :  { %9118 = vmatprep.subr.bf16.mxu1 %v11804_v16  ;;  %v11900_v16 = vcombine.high %v2665_v11, %v2673_v12 }
 0x3ad   :  { %8955 = vmatpush1.bf16.msra.mxu0 %v11801_v20  ;;  %v11897_v20 = vcombine.low %v2664_v8, %v2672_v30  ;;  %v2760_v30 = vld [vmem:[#allocation11 + $0xc10] sm:$0xff] }
 0x3ae   :  { %9119 = vmatpush1.bf16.msra.mxu1 %v11803_v21  ;;  %8956 = vmatprep.subr.bf16.mxu0 %v11818_v22  ;;  %v11899_v21 = vcombine.low %v2665_v11, %v2673_v12  ;;  %v11914_v22 = vcombine.high %v2680_v17, %v2688_v18  ;;  %v2761_v11 = vld [vmem:[#allocation11 + $0xc18] sm:$0xff] }
 0x3af   :  { %9120 = vmatprep.subr.bf16.mxu1 %v11820_v23  ;;  %v11916_v23 = vcombine.high %v2681_v15, %v2689_v19  ;;  %v2769_v12 = vld [vmem:[#allocation11 + $0xc58] sm:$0xff] }
 0x3b1   :  { %8957 = vmatpush1.bf16.msra.mxu0 %v11817_v31  ;;  %v11913_v31 = vcombine.low %v2680_v17, %v2688_v18  ;;  %v2776_v17 = vld [vmem:[#allocation11 + $0xc90] sm:$0xff] }
 0x3b2   :  { %9121 = vmatpush1.bf16.msra.mxu1 %v11819_v32  ;;  %8958 = vmatprep.subr.bf16.mxu0 %v11834_v33  ;;  %v11915_v32 = vcombine.low %v2681_v15, %v2689_v19  ;;  %v11930_v33 = vcombine.high %v2696_v13, %v2704_v25  ;;  %v2784_v18 = vld [vmem:[#allocation11 + $0xcd0] sm:$0xff]  ;;  %v2777_v15 = vld [vmem:[#allocation11 + $0xc98] sm:$0xff] }
 0x3b3   :  { %9122 = vmatprep.subr.bf16.mxu1 %v11836_v34  ;;  %v11932_v34 = vcombine.high %v2697_v28, %v2705_v29  ;;  %v2785_v19 = vld [vmem:[#allocation11 + $0xcd8] sm:$0xff] }
 0x3b5   :  { %8959 = vmatpush1.bf16.msra.mxu0 %v11833_v43  ;;  %v11929_v43 = vcombine.low %v2696_v13, %v2704_v25  ;;  %v2792_v13 = vld [vmem:[#allocation11 + $0xd10] sm:$0xff] }
 0x3b6   :  { %9123 = vmatpush1.bf16.msra.mxu1 %v11835_v48  ;;  %8960 = vmatprep.subr.bf16.mxu0 %v11850_v49  ;;  %v11931_v48 = vcombine.low %v2697_v28, %v2705_v29  ;;  %v11946_v49 = vcombine.high %v2712_v37, %v2720_v38  ;;  %v2800_v25 = vld [vmem:[#allocation11 + $0xd50] sm:$0xff]  ;;  %v2793_v28 = vld [vmem:[#allocation11 + $0xd18] sm:$0xff] }
 0x3b7   :  { %9124 = vmatprep.subr.bf16.mxu1 %v11852_v52  ;;  %v11948_v52 = vcombine.high %v2713_v41, %v2721_v42  ;;  %v2801_v29 = vld [vmem:[#allocation11 + $0xd58] sm:$0xff] }
 0x3b9   :  { %8961 = vmatpush1.bf16.msra.mxu0 %v11849_v59  ;;  %v11945_v59 = vcombine.low %v2712_v37, %v2720_v38  ;;  %v2808_v37 = vld [vmem:[#allocation11 + $0xd90] sm:$0xff] }
 0x3ba   :  { %9125 = vmatpush1.bf16.msra.mxu1 %v11851_v44  ;;  %8971 = vmatprep.subr.bf16.mxu0 %v11866_v60  ;;  %v11947_v44 = vcombine.low %v2713_v41, %v2721_v42  ;;  %v11962_v60 = vcombine.high %v2728_v9, %v2736_v63  ;;  %v2816_v38 = vld [vmem:[#allocation11 + $0xdd0] sm:$0xff]  ;;  %v2809_v41 = vld [vmem:[#allocation11 + $0xd98] sm:$0xff] }
 0x3bb   :  { %9135 = vmatprep.subr.bf16.mxu1 %v11868_v61  ;;  %v11964_v61 = vcombine.high %v2729_v55, %v2737_v58  ;;  %v2817_v42 = vld [vmem:[#allocation11 + $0xdd8] sm:$0xff]  ;;  %v2824_v9 = vld [vmem:[#allocation11 + $0xe10] sm:$0xff] }
 0x3bc   :  { %8963 = vmatmul.mubr.bf16.vlgmr.msra.gmra.mrb[16].mxu0 %v13736_v26  ;;  %v2832_v63 = vld [vmem:[#allocation11 + $0xe50] sm:$0xff] }
 0x3bd   :  { %9127 = vmatmul.mubr.bf16.vlgmr.msra.gmra.mrb[16].mxu1 %v13736_v26  ;;  %8972 = vmatpush1.bf16.msra.mxu0 %v11865_v3  ;;  %v2745_v3 = vld [vmem:[#allocation11 + $0xb98] sm:$0xff] }
 0x3be   :  { %9003 = vmatprep.mubr.bf16.mxu0 %v13740_v35  ;;  %9136 = vmatpush1.bf16.msra.mxu1 %v11867_v6  ;;  %v11963_v6 = vcombine.low %v2729_v55, %v2737_v58  ;;  %v11980_v8 = vcombine.high %v2745_v3, %v2753_v0  ;;  %v2825_v55 = vld [vmem:[#allocation11 + $0xe18] sm:$0xff] }
 0x3bf   :  { %9167 = vmatprep.mubr.bf16.mxu1 %v13740_v35  ;;  %8973 = vmatprep.subr.bf16.mxu0 %v11882_v7  ;;  %v11978_v7 = vcombine.high %v2744_v1, %v2752_v2  ;;  %v2833_v58 = vld [vmem:[#allocation11 + $0xe58] sm:$0xff] }
 0x3c0   :  { %9137 = vmatprep.subr.bf16.mxu1 %v11884_v10  ;;  %v2768_v10 = vld [vmem:[#allocation11 + $0xc50] sm:$0xff] }
 0x3c1   :  { %8974 = vmatpush1.bf16.msra.mxu0 %v11881_v14  ;;  %v11977_v14 = vcombine.low %v2744_v1, %v2752_v2  ;;  %v2840_v1 = vld [vmem:[#allocation11 + $0xe90] sm:$0xff] }
 0x3c2   :  { %9138 = vmatpush1.bf16.msra.mxu1 %v11883_v46  ;;  %8975 = vmatprep.subr.bf16.mxu0 %v11898_v27  ;;  %v11979_v46 = vcombine.low %v2745_v3, %v2753_v0  ;;  %v11994_v27 = vcombine.high %v2760_v30, %v2768_v10  ;;  %v2848_v2 = vld [vmem:[#allocation11 + $0xed0] sm:$0xff]  ;;  %v2841_v3 = vld [vmem:[#allocation11 + $0xe98] sm:$0xff] }
 0x3c3   :  { %9139 = vmatprep.subr.bf16.mxu1 %v11900_v16  ;;  %v11996_v16 = vcombine.high %v2761_v11, %v2769_v12  ;;  %v2849_v0 = vld [vmem:[#allocation11 + $0xed8] sm:$0xff] }
 0x3c5   :  { %8976 = vmatpush1.bf16.msra.mxu0 %v11897_v20  ;;  %v11993_v20 = vcombine.low %v2760_v30, %v2768_v10  ;;  %v2856_v30 = vld [vmem:[#allocation11 + $0xf10] sm:$0xff] }
 0x3c6   :  { %9140 = vmatpush1.bf16.msra.mxu1 %v11899_v21  ;;  %8977 = vmatprep.subr.bf16.mxu0 %v11914_v22  ;;  %v11995_v21 = vcombine.low %v2761_v11, %v2769_v12  ;;  %v12010_v22 = vcombine.high %v2776_v17, %v2784_v18  ;;  %v2864_v10 = vld [vmem:[#allocation11 + $0xf50] sm:$0xff]  ;;  %v2857_v11 = vld [vmem:[#allocation11 + $0xf18] sm:$0xff] }
 0x3c7   :  { %9141 = vmatprep.subr.bf16.mxu1 %v11916_v23  ;;  %v12012_v23 = vcombine.high %v2777_v15, %v2785_v19  ;;  %v2865_v12 = vld [vmem:[#allocation11 + $0xf58] sm:$0xff] }
 0x3c9   :  { %8978 = vmatpush1.bf16.msra.mxu0 %v11913_v31  ;;  %v12009_v31 = vcombine.low %v2776_v17, %v2784_v18  ;;  %v2872_v17 = vld [vmem:[#allocation11 + $0xf90] sm:$0xff] }
 0x3ca   :  { %9142 = vmatpush1.bf16.msra.mxu1 %v11915_v32  ;;  %8979 = vmatprep.subr.bf16.mxu0 %v11930_v33  ;;  %v12011_v32 = vcombine.low %v2777_v15, %v2785_v19  ;;  %v12026_v33 = vcombine.high %v2792_v13, %v2800_v25  ;;  %v2880_v18 = vld [vmem:[#allocation11 + $0xfd0] sm:$0xff]  ;;  %v2873_v15 = vld [vmem:[#allocation11 + $0xf98] sm:$0xff] }
 0x3cb   :  { %9143 = vmatprep.subr.bf16.mxu1 %v11932_v34  ;;  %v12028_v34 = vcombine.high %v2793_v28, %v2801_v29  ;;  %v2881_v19 = vld [vmem:[#allocation11 + $0xfd8] sm:$0xff] }
 0x3cd   :  { %8980 = vmatpush1.bf16.msra.mxu0 %v11929_v43  ;;  %v12025_v43 = vcombine.low %v2792_v13, %v2800_v25  ;;  %v2888_v13 = vld [vmem:[#allocation11 + $0x1010] sm:$0xff] }
 0x3ce   :  { %9144 = vmatpush1.bf16.msra.mxu1 %v11931_v48  ;;  %8981 = vmatprep.subr.bf16.mxu0 %v11946_v49  ;;  %v12027_v48 = vcombine.low %v2793_v28, %v2801_v29  ;;  %v12042_v49 = vcombine.high %v2808_v37, %v2816_v38  ;;  %v2896_v25 = vld [vmem:[#allocation11 + $0x1050] sm:$0xff]  ;;  %v2889_v28 = vld [vmem:[#allocation11 + $0x1018] sm:$0xff] }
 0x3cf   :  { %9145 = vmatprep.subr.bf16.mxu1 %v11948_v52  ;;  %v12044_v52 = vcombine.high %v2809_v41, %v2817_v42  ;;  %v2897_v29 = vld [vmem:[#allocation11 + $0x1058] sm:$0xff] }
 0x3d1   :  { %8982 = vmatpush1.bf16.msra.mxu0 %v11945_v59  ;;  %v12041_v59 = vcombine.low %v2808_v37, %v2816_v38  ;;  %v2904_v37 = vld [vmem:[#allocation11 + $0x1090] sm:$0xff] }
 0x3d2   :  { %9146 = vmatpush1.bf16.msra.mxu1 %v11947_v44  ;;  %8983 = vmatprep.subr.bf16.mxu0 %v11962_v60  ;;  %v12043_v44 = vcombine.low %v2809_v41, %v2817_v42  ;;  %v12058_v60 = vcombine.high %v2824_v9, %v2832_v63  ;;  %v2912_v38 = vld [vmem:[#allocation11 + $0x10d0] sm:$0xff]  ;;  %v12121_v41 = vcombine.low %v2888_v13, %v2896_v25  ;;  %v2905_v42 = vld [vmem:[#allocation11 + $0x1098] sm:$0xff] }
 0x3d3   :  { %9147 = vmatprep.subr.bf16.mxu1 %v11964_v61  ;;  %v12060_v61 = vcombine.high %v2825_v55, %v2833_v58 }
 0x3d5   :  { %8984 = vmatpush1.bf16.msra.mxu0 %v11961_v5  ;;  %v12057_v5 = vcombine.low %v2824_v9, %v2832_v63  ;;  %v2928_v9 = vld [vmem:[#allocation11 + $0x1150] sm:$0xff] }
 0x3d6   :  { %9148 = vmatpush1.bf16.msra.mxu1 %v11963_v6  ;;  %8985 = vmatprep.subr.bf16.mxu0 %v11978_v7  ;;  %v12059_v6 = vcombine.low %v2825_v55, %v2833_v58  ;;  %v12074_v7 = vcombine.high %v2840_v1, %v2848_v2  ;;  %v2921_v55 = vld [vmem:[#allocation11 + $0x1118] sm:$0xff] }
 0x3d7   :  { %9149 = vmatprep.subr.bf16.mxu1 %v11980_v8  ;;  %v12076_v8 = vcombine.high %v2841_v3, %v2849_v0  ;;  %v2929_v58 = vld [vmem:[#allocation11 + $0x1158] sm:$0xff] }
 0x3d9   :  { %8986 = vmatpush1.bf16.msra.mxu0 %v11977_v14  ;;  %v12073_v14 = vcombine.low %v2840_v1, %v2848_v2  ;;  %v2936_v1 = vld [vmem:[#allocation11 + $0x1190] sm:$0xff] }
 0x3da   :  { %9150 = vmatpush1.bf16.msra.mxu1 %v11979_v46  ;;  %8987 = vmatprep.subr.bf16.mxu0 %v11994_v27  ;;  %v12075_v46 = vcombine.low %v2841_v3, %v2849_v0  ;;  %v12090_v27 = vcombine.high %v2856_v30, %v2864_v10  ;;  %v2944_v2 = vld [vmem:[#allocation11 + $0x11d0] sm:$0xff]  ;;  %v2937_v3 = vld [vmem:[#allocation11 + $0x1198] sm:$0xff] }
 0x3db   :  { %9151 = vmatprep.subr.bf16.mxu1 %v11996_v16  ;;  %v12092_v16 = vcombine.high %v2857_v11, %v2865_v12  ;;  %v2945_v0 = vld [vmem:[#allocation11 + $0x11d8] sm:$0xff] }
 0x3dd   :  { %8988 = vmatpush1.bf16.msra.mxu0 %v11993_v20  ;;  %v12089_v20 = vcombine.low %v2856_v30, %v2864_v10  ;;  %v2952_v30 = vld [vmem:[#allocation11 + $0x1210] sm:$0xff] }
 0x3de   :  { %9152 = vmatpush1.bf16.msra.mxu1 %v11995_v21  ;;  %8989 = vmatprep.subr.bf16.mxu0 %v12010_v22  ;;  %v12091_v21 = vcombine.low %v2857_v11, %v2865_v12  ;;  %v12106_v22 = vcombine.high %v2872_v17, %v2880_v18  ;;  %v2960_v10 = vld [vmem:[#allocation11 + $0x1250] sm:$0xff]  ;;  %v2953_v11 = vld [vmem:[#allocation11 + $0x1218] sm:$0xff] }
 0x3df   :  { %9153 = vmatprep.subr.bf16.mxu1 %v12012_v23  ;;  %v12108_v23 = vcombine.high %v2873_v15, %v2881_v19  ;;  %v2961_v12 = vld [vmem:[#allocation11 + $0x1258] sm:$0xff] }
 0x3e1   :  { %8990 = vmatpush1.bf16.msra.mxu0 %v12009_v31  ;;  %v12105_v31 = vcombine.low %v2872_v17, %v2880_v18  ;;  %v2968_v17 = vld [vmem:[#allocation11 + $0x1290] sm:$0xff] }
 0x3e2   :  { %9154 = vmatpush1.bf16.msra.mxu1 %v12011_v32  ;;  %8991 = vmatprep.subr.bf16.mxu0 %v12026_v33  ;;  %v12107_v32 = vcombine.low %v2873_v15, %v2881_v19  ;;  %v12122_v33 = vcombine.high %v2888_v13, %v2896_v25  ;;  %v2976_v18 = vld [vmem:[#allocation11 + $0x12d0] sm:$0xff]  ;;  %v2969_v15 = vld [vmem:[#allocation11 + $0x1298] sm:$0xff] }
 0x3e3   :  { %9155 = vmatprep.subr.bf16.mxu1 %v12028_v34  ;;  %v12124_v34 = vcombine.high %v2889_v28, %v2897_v29  ;;  %v2977_v19 = vld [vmem:[#allocation11 + $0x12d8] sm:$0xff]  ;;  %v2984_v13 = vld [vmem:[#allocation11 + $0x1310] sm:$0xff] }
 0x3e4   :  { %v2992_v25 = vld [vmem:[#allocation11 + $0x1350] sm:$0xff] }
 0x3e5   :  { %8992 = vmatpush1.bf16.msra.mxu0 %v12025_v43  ;;  %v2913_v43 = vld [vmem:[#allocation11 + $0x10d8] sm:$0xff] }
 0x3e6   :  { %9156 = vmatpush1.bf16.msra.mxu1 %v12027_v48  ;;  %8993 = vmatprep.subr.bf16.mxu0 %v12042_v49  ;;  %v12123_v48 = vcombine.low %v2889_v28, %v2897_v29  ;;  %v12138_v49 = vcombine.high %v2904_v37, %v2912_v38  ;;  %v12140_v63 = vcombine.high %v2905_v42, %v2913_v43  ;;  %v2985_v28 = vld [vmem:[#allocation11 + $0x1318] sm:$0xff] }
 0x3e7   :  { %9157 = vmatprep.subr.bf16.mxu1 %v12044_v52  ;;  %v2920_v52 = vld [vmem:[#allocation11 + $0x1110] sm:$0xff]  ;;  %v2993_v29 = vld [vmem:[#allocation11 + $0x1358] sm:$0xff] }
 0x3e9   :  { %8994 = vmatpush1.bf16.msra.mxu0 %v12041_v59  ;;  %v12137_v59 = vcombine.low %v2904_v37, %v2912_v38  ;;  %v3000_v37 = vld [vmem:[#allocation11 + $0x1390] sm:$0xff] }
 0x3ea   :  { %9158 = vmatpush1.bf16.msra.mxu1 %v12043_v44  ;;  %8995 = vmatprep.subr.bf16.mxu0 %v12058_v60  ;;  %v12139_v44 = vcombine.low %v2905_v42, %v2913_v43  ;;  %v12154_v60 = vcombine.high %v2920_v52, %v2928_v9  ;;  %v3008_v38 = vld [vmem:[#allocation11 + $0x13d0] sm:$0xff]  ;;  %v3009_v42 = vld [vmem:[#allocation11 + $0x13d8] sm:$0xff]  ;;  %v12217_v43 = vcombine.low %v2984_v13, %v2992_v25 }
 0x3eb   :  { %9159 = vmatprep.subr.bf16.mxu1 %v12060_v61  ;;  %v12156_v61 = vcombine.high %v2921_v55, %v2929_v58 }
 0x3ed   :  { %8996 = vmatpush1.bf16.msra.mxu0 %v12057_v5  ;;  %v12153_v5 = vcombine.low %v2920_v52, %v2928_v9  ;;  %v3016_v9 = vld [vmem:[#allocation11 + $0x1410] sm:$0xff] }
 0x3ee   :  { %9160 = vmatpush1.bf16.msra.mxu1 %v12059_v6  ;;  %8997 = vmatprep.subr.bf16.mxu0 %v12074_v7  ;;  %v12155_v6 = vcombine.low %v2921_v55, %v2929_v58  ;;  %v12170_v7 = vcombine.high %v2936_v1, %v2944_v2  ;;  %v3017_v55 = vld [vmem:[#allocation11 + $0x1418] sm:$0xff] }
 0x3ef   :  { %9161 = vmatprep.subr.bf16.mxu1 %v12076_v8  ;;  %v12172_v8 = vcombine.high %v2937_v3, %v2945_v0  ;;  %v3025_v58 = vld [vmem:[#allocation11 + $0x1458] sm:$0xff] }
 0x3f1   :  { %8998 = vmatpush1.bf16.msra.mxu0 %v12073_v14  ;;  %v12169_v14 = vcombine.low %v2936_v1, %v2944_v2  ;;  %v3032_v1 = vld [vmem:[#allocation11 + $0x1490] sm:$0xff] }
 0x3f2   :  { %9162 = vmatpush1.bf16.msra.mxu1 %v12075_v46  ;;  %8999 = vmatprep.subr.bf16.mxu0 %v12090_v27  ;;  %v12171_v46 = vcombine.low %v2937_v3, %v2945_v0  ;;  %v12186_v27 = vcombine.high %v2952_v30, %v2960_v10  ;;  %v3040_v2 = vld [vmem:[#allocation11 + $0x14d0] sm:$0xff]  ;;  %v3033_v3 = vld [vmem:[#allocation11 + $0x1498] sm:$0xff] }
 0x3f3   :  { %9163 = vmatprep.subr.bf16.mxu1 %v12092_v16  ;;  %v12188_v16 = vcombine.high %v2953_v11, %v2961_v12  ;;  %v3041_v0 = vld [vmem:[#allocation11 + $0x14d8] sm:$0xff] }
 0x3f5   :  { %9000 = vmatpush1.bf16.msra.mxu0 %v12089_v20  ;;  %v12185_v20 = vcombine.low %v2952_v30, %v2960_v10  ;;  %v3048_v30 = vld [vmem:[#allocation11 + $0x1510] sm:$0xff] }
 0x3f6   :  { %9164 = vmatpush1.bf16.msra.mxu1 %v12091_v21  ;;  %9001 = vmatprep.subr.bf16.mxu0 %v12106_v22  ;;  %v12187_v21 = vcombine.low %v2953_v11, %v2961_v12  ;;  %v12202_v22 = vcombine.high %v2968_v17, %v2976_v18  ;;  %v3056_v10 = vld [vmem:[#allocation11 + $0x1550] sm:$0xff]  ;;  %v3049_v11 = vld [vmem:[#allocation11 + $0x1518] sm:$0xff] }
 0x3f7   :  { %9165 = vmatprep.subr.bf16.mxu1 %v12108_v23  ;;  %v12204_v23 = vcombine.high %v2969_v15, %v2977_v19  ;;  %v3057_v12 = vld [vmem:[#allocation11 + $0x1558] sm:$0xff] }
 0x3f9   :  { %9002 = vmatpush1.bf16.msra.mxu0 %v12105_v31  ;;  %v12201_v31 = vcombine.low %v2968_v17, %v2976_v18  ;;  %v3064_v17 = vld [vmem:[#allocation11 + $0x1590] sm:$0xff] }
 0x3fa   :  { %9166 = vmatpush1.bf16.msra.mxu1 %v12107_v32  ;;  %9012 = vmatprep.subr.bf16.mxu0 %v12122_v33  ;;  %v12203_v32 = vcombine.low %v2969_v15, %v2977_v19  ;;  %v12218_v33 = vcombine.high %v2984_v13, %v2992_v25  ;;  %v3072_v18 = vld [vmem:[#allocation11 + $0x15d0] sm:$0xff]  ;;  %v3065_v15 = vld [vmem:[#allocation11 + $0x1598] sm:$0xff] }
 0x3fb   :  { %9176 = vmatprep.subr.bf16.mxu1 %v12124_v34  ;;  %v12220_v34 = vcombine.high %v2985_v28, %v2993_v29  ;;  %v3073_v19 = vld [vmem:[#allocation11 + $0x15d8] sm:$0xff]  ;;  %v3080_v13 = vld [vmem:[#allocation11 + $0x1610] sm:$0xff] }
 0x3fc   :  { %9004 = vmatmul.mubr.bf16.vlgmr.msra.gmra.mrb[16].mxu0 %v13749_v56  ;;  %v3088_v25 = vld [vmem:[#allocation11 + $0x1650] sm:$0xff] }
 0x3fd   :  { %9168 = vmatmul.mubr.bf16.vlgmr.msra.gmra.mrb[16].mxu1 %v13749_v56  ;;  %9013 = vmatpush1.bf16.msra.mxu0 %v12121_v41  ;;  %v3001_v41 = vld [vmem:[#allocation11 + $0x1398] sm:$0xff] }
 0x3fe   :  { %9044 = vmatprep.mubr.bf16.mxu0 %v13770_v36  ;;  %9177 = vmatpush1.bf16.msra.mxu1 %v12123_v48  ;;  %v12219_v48 = vcombine.low %v2985_v28, %v2993_v29  ;;  %v12236_v52 = vcombine.high %v3001_v41, %v3009_v42  ;;  %v3081_v28 = vld [vmem:[#allocation11 + $0x1618] sm:$0xff] }
 0x3ff   :  { %9208 = vmatprep.mubr.bf16.mxu1 %v13770_v36  ;;  %9014 = vmatprep.subr.bf16.mxu0 %v12138_v49  ;;  %v12234_v49 = vcombine.high %v3000_v37, %v3008_v38  ;;  %v3089_v29 = vld [vmem:[#allocation11 + $0x1658] sm:$0xff] }
 0x400   :  { %9178 = vmatprep.subr.bf16.mxu1 %v12140_v63  ;;  %v3024_v63 = vld [vmem:[#allocation11 + $0x1450] sm:$0xff] }
 0x401   :  { %9015 = vmatpush1.bf16.msra.mxu0 %v12137_v59  ;;  %v12233_v59 = vcombine.low %v3000_v37, %v3008_v38  ;;  %v3096_v37 = vld [vmem:[#allocation11 + $0x1690] sm:$0xff] }
 0x402   :  { %9179 = vmatpush1.bf16.msra.mxu1 %v12139_v44  ;;  %9016 = vmatprep.subr.bf16.mxu0 %v12154_v60  ;;  %v12235_v44 = vcombine.low %v3001_v41, %v3009_v42  ;;  %v12250_v60 = vcombine.high %v3016_v9, %v3024_v63  ;;  %v3104_v38 = vld [vmem:[#allocation11 + $0x16d0] sm:$0xff]  ;;  %v3097_v41 = vld [vmem:[#allocation11 + $0x1698] sm:$0xff] }
 0x403   :  { %9180 = vmatprep.subr.bf16.mxu1 %v12156_v61  ;;  %v12252_v61 = vcombine.high %v3017_v55, %v3025_v58  ;;  %v3105_v42 = vld [vmem:[#allocation11 + $0x16d8] sm:$0xff] }
 0x405   :  { %9017 = vmatpush1.bf16.msra.mxu0 %v12153_v5  ;;  %v12249_v5 = vcombine.low %v3016_v9, %v3024_v63  ;;  %v3112_v9 = vld [vmem:[#allocation11 + $0x1710] sm:$0xff] }
 0x406   :  { %9181 = vmatpush1.bf16.msra.mxu1 %v12155_v6  ;;  %9018 = vmatprep.subr.bf16.mxu0 %v12170_v7  ;;  %v12251_v6 = vcombine.low %v3017_v55, %v3025_v58  ;;  %v12266_v7 = vcombine.high %v3032_v1, %v3040_v2  ;;  %v3120_v63 = vld [vmem:[#allocation11 + $0x1750] sm:$0xff]  ;;  %v3113_v55 = vld [vmem:[#allocation11 + $0x1718] sm:$0xff] }
 0x407   :  { %9182 = vmatprep.subr.bf16.mxu1 %v12172_v8  ;;  %v12268_v8 = vcombine.high %v3033_v3, %v3041_v0  ;;  %v3121_v58 = vld [vmem:[#allocation11 + $0x1758] sm:$0xff] }
 0x409   :  { %9019 = vmatpush1.bf16.msra.mxu0 %v12169_v14  ;;  %v12265_v14 = vcombine.low %v3032_v1, %v3040_v2  ;;  %v3128_v1 = vld [vmem:[#allocation11 + $0x1790] sm:$0xff] }
 0x40a   :  { %9183 = vmatpush1.bf16.msra.mxu1 %v12171_v46  ;;  %9020 = vmatprep.subr.bf16.mxu0 %v12186_v27  ;;  %v12267_v46 = vcombine.low %v3033_v3, %v3041_v0  ;;  %v12282_v27 = vcombine.high %v3048_v30, %v3056_v10  ;;  %v3136_v2 = vld [vmem:[#allocation11 + $0x17d0] sm:$0xff]  ;;  %v3129_v3 = vld [vmem:[#allocation11 + $0x1798] sm:$0xff] }
 0x40b   :  { %9184 = vmatprep.subr.bf16.mxu1 %v12188_v16  ;;  %v12284_v16 = vcombine.high %v3049_v11, %v3057_v12  ;;  %v3137_v0 = vld [vmem:[#allocation11 + $0x17d8] sm:$0xff] }
 0x40d   :  { %9021 = vmatpush1.bf16.msra.mxu0 %v12185_v20  ;;  %v12281_v20 = vcombine.low %v3048_v30, %v3056_v10  ;;  %v3144_v30 = vld [vmem:[#allocation11 + $0x1810] sm:$0xff] }
 0x40e   :  { %9185 = vmatpush1.bf16.msra.mxu1 %v12187_v21  ;;  %9022 = vmatprep.subr.bf16.mxu0 %v12202_v22  ;;  %v12283_v21 = vcombine.low %v3049_v11, %v3057_v12  ;;  %v12298_v22 = vcombine.high %v3064_v17, %v3072_v18  ;;  %v3152_v10 = vld [vmem:[#allocation11 + $0x1850] sm:$0xff]  ;;  %v3145_v11 = vld [vmem:[#allocation11 + $0x1818] sm:$0xff] }
 0x40f   :  { %9186 = vmatprep.subr.bf16.mxu1 %v12204_v23  ;;  %v12300_v23 = vcombine.high %v3065_v15, %v3073_v19  ;;  %v3153_v12 = vld [vmem:[#allocation11 + $0x1858] sm:$0xff] }
 0x411   :  { %9023 = vmatpush1.bf16.msra.mxu0 %v12201_v31  ;;  %v12297_v31 = vcombine.low %v3064_v17, %v3072_v18  ;;  %v3160_v17 = vld [vmem:[#allocation11 + $0x1890] sm:$0xff] }
 0x412   :  { %9187 = vmatpush1.bf16.msra.mxu1 %v12203_v32  ;;  %9024 = vmatprep.subr.bf16.mxu0 %v12218_v33  ;;  %v12299_v32 = vcombine.low %v3065_v15, %v3073_v19  ;;  %v12314_v33 = vcombine.high %v3080_v13, %v3088_v25  ;;  %v3168_v18 = vld [vmem:[#allocation11 + $0x18d0] sm:$0xff]  ;;  %v12377_v15 = vcombine.low %v3144_v30, %v3152_v10  ;;  %v3161_v19 = vld [vmem:[#allocation11 + $0x1898] sm:$0xff] }
 0x413   :  { %9188 = vmatprep.subr.bf16.mxu1 %v12220_v34  ;;  %v12316_v34 = vcombine.high %v3081_v28, %v3089_v29 }
 0x415   :  { %9025 = vmatpush1.bf16.msra.mxu0 %v12217_v43  ;;  %v12313_v43 = vcombine.low %v3080_v13, %v3088_v25  ;;  %v3184_v13 = vld [vmem:[#allocation11 + $0x1950] sm:$0xff] }
 0x416   :  { %9189 = vmatpush1.bf16.msra.mxu1 %v12219_v48  ;;  %9026 = vmatprep.subr.bf16.mxu0 %v12234_v49  ;;  %v12315_v48 = vcombine.low %v3081_v28, %v3089_v29  ;;  %v12330_v49 = vcombine.high %v3096_v37, %v3104_v38  ;;  %v3177_v28 = vld [vmem:[#allocation11 + $0x1918] sm:$0xff] }
 0x417   :  { %9190 = vmatprep.subr.bf16.mxu1 %v12236_v52  ;;  %v12332_v52 = vcombine.high %v3097_v41, %v3105_v42  ;;  %v3185_v29 = vld [vmem:[#allocation11 + $0x1958] sm:$0xff] }
 0x419   :  { %9027 = vmatpush1.bf16.msra.mxu0 %v12233_v59  ;;  %v12329_v59 = vcombine.low %v3096_v37, %v3104_v38  ;;  %v3192_v37 = vld [vmem:[#allocation11 + $0x1990] sm:$0xff] }
 0x41a   :  { %9191 = vmatpush1.bf16.msra.mxu1 %v12235_v44  ;;  %9028 = vmatprep.subr.bf16.mxu0 %v12250_v60  ;;  %v12331_v44 = vcombine.low %v3097_v41, %v3105_v42  ;;  %v12346_v60 = vcombine.high %v3112_v9, %v3120_v63  ;;  %v3200_v38 = vld [vmem:[#allocation11 + $0x19d0] sm:$0xff]  ;;  %v3193_v41 = vld [vmem:[#allocation11 + $0x1998] sm:$0xff] }
 0x41b   :  { %9192 = vmatprep.subr.bf16.mxu1 %v12252_v61  ;;  %v12348_v61 = vcombine.high %v3113_v55, %v3121_v58  ;;  %v3201_v42 = vld [vmem:[#allocation11 + $0x19d8] sm:$0xff] }
 0x41d   :  { %9029 = vmatpush1.bf16.msra.mxu0 %v12249_v5  ;;  %v12345_v5 = vcombine.low %v3112_v9, %v3120_v63  ;;  %v3208_v9 = vld [vmem:[#allocation11 + $0x1a10] sm:$0xff] }
 0x41e   :  { %9193 = vmatpush1.bf16.msra.mxu1 %v12251_v6  ;;  %9030 = vmatprep.subr.bf16.mxu0 %v12266_v7  ;;  %v12347_v6 = vcombine.low %v3113_v55, %v3121_v58  ;;  %v12362_v7 = vcombine.high %v3128_v1, %v3136_v2  ;;  %v3216_v63 = vld [vmem:[#allocation11 + $0x1a50] sm:$0xff]  ;;  %v3209_v55 = vld [vmem:[#allocation11 + $0x1a18] sm:$0xff] }
 0x41f   :  { %9194 = vmatprep.subr.bf16.mxu1 %v12268_v8  ;;  %v12364_v8 = vcombine.high %v3129_v3, %v3137_v0  ;;  %v3217_v58 = vld [vmem:[#allocation11 + $0x1a58] sm:$0xff] }
 0x421   :  { %9031 = vmatpush1.bf16.msra.mxu0 %v12265_v14  ;;  %v12361_v14 = vcombine.low %v3128_v1, %v3136_v2  ;;  %v3224_v1 = vld [vmem:[#allocation11 + $0x1a90] sm:$0xff] }
 0x422   :  { %9195 = vmatpush1.bf16.msra.mxu1 %v12267_v46  ;;  %9032 = vmatprep.subr.bf16.mxu0 %v12282_v27  ;;  %v12363_v46 = vcombine.low %v3129_v3, %v3137_v0  ;;  %v12378_v27 = vcombine.high %v3144_v30, %v3152_v10  ;;  %v3232_v2 = vld [vmem:[#allocation11 + $0x1ad0] sm:$0xff]  ;;  %v3225_v3 = vld [vmem:[#allocation11 + $0x1a98] sm:$0xff] }
 0x423   :  { %9196 = vmatprep.subr.bf16.mxu1 %v12284_v16  ;;  %v12380_v16 = vcombine.high %v3145_v11, %v3153_v12  ;;  %v3233_v0 = vld [vmem:[#allocation11 + $0x1ad8] sm:$0xff]  ;;  %v3240_v30 = vld [vmem:[#allocation11 + $0x1b10] sm:$0xff] }
 0x424   :  { %v3248_v10 = vld [vmem:[#allocation11 + $0x1b50] sm:$0xff] }
 0x425   :  { %9033 = vmatpush1.bf16.msra.mxu0 %v12281_v20  ;;  %v3169_v20 = vld [vmem:[#allocation11 + $0x18d8] sm:$0xff] }
 0x426   :  { %9197 = vmatpush1.bf16.msra.mxu1 %v12283_v21  ;;  %9034 = vmatprep.subr.bf16.mxu0 %v12298_v22  ;;  %v12379_v21 = vcombine.low %v3145_v11, %v3153_v12  ;;  %v12394_v22 = vcombine.high %v3160_v17, %v3168_v18  ;;  %v12396_v25 = vcombine.high %v3161_v19, %v3169_v20  ;;  %v3241_v11 = vld [vmem:[#allocation11 + $0x1b18] sm:$0xff] }
 0x427   :  { %9198 = vmatprep.subr.bf16.mxu1 %v12300_v23  ;;  %v3176_v23 = vld [vmem:[#allocation11 + $0x1910] sm:$0xff]  ;;  %v3249_v12 = vld [vmem:[#allocation11 + $0x1b58] sm:$0xff] }
 0x429   :  { %9035 = vmatpush1.bf16.msra.mxu0 %v12297_v31  ;;  %v12393_v31 = vcombine.low %v3160_v17, %v3168_v18  ;;  %v12476_v18 = vcombine.high %v3241_v11, %v3249_v12 }
 0x42a   :  { %9199 = vmatpush1.bf16.msra.mxu1 %v12299_v32  ;;  %9036 = vmatprep.subr.bf16.mxu0 %v12314_v33  ;;  %v12395_v32 = vcombine.low %v3161_v19, %v3169_v20  ;;  %v12410_v33 = vcombine.high %v3176_v23, %v3184_v13  ;;  %v3264_v19 = vld [vmem:[#allocation11 + $0x1bd0] sm:$0xff] }
 0x42b   :  { %9200 = vmatprep.subr.bf16.mxu1 %v12316_v34  ;;  %v12412_v34 = vcombine.high %v3177_v28, %v3185_v29 }
 0x42d   :  { %9037 = vmatpush1.bf16.msra.mxu0 %v12313_v43  ;;  %v12409_v43 = vcombine.low %v3176_v23, %v3184_v13  ;;  %v3265_v23 = vld [vmem:[#allocation11 + $0x1bd8] sm:$0xff] }
 0x42e   :  { %9201 = vmatpush1.bf16.msra.mxu1 %v12315_v48  ;;  %9038 = vmatprep.subr.bf16.mxu0 %v12330_v49  ;;  %v12411_v48 = vcombine.low %v3177_v28, %v3185_v29  ;;  %v12426_v49 = vcombine.high %v3192_v37, %v3200_v38  ;;  %v12473_v28 = vcombine.low %v3240_v30, %v3248_v10 }
 0x42f   :  { %9202 = vmatprep.subr.bf16.mxu1 %v12332_v52  ;;  %v12428_v52 = vcombine.high %v3193_v41, %v3201_v42 }
 0x431   :  { %9039 = vmatpush1.bf16.msra.mxu0 %v12329_v59  ;;  %v12425_v59 = vcombine.low %v3192_v37, %v3200_v38  ;;  %v3272_v37 = vld [vmem:[#allocation11 + $0x1c10] sm:$0xff] }
 0x432   :  { %9203 = vmatpush1.bf16.msra.mxu1 %v12331_v44  ;;  %9040 = vmatprep.subr.bf16.mxu0 %v12346_v60  ;;  %v12427_v44 = vcombine.low %v3193_v41, %v3201_v42  ;;  %v12442_v60 = vcombine.high %v3208_v9, %v3216_v63  ;;  %v3280_v38 = vld [vmem:[#allocation11 + $0x1c50] sm:$0xff]  ;;  %v3273_v41 = vld [vmem:[#allocation11 + $0x1c18] sm:$0xff] }
 0x433   :  { %9204 = vmatprep.subr.bf16.mxu1 %v12348_v61  ;;  %v12444_v61 = vcombine.high %v3209_v55, %v3217_v58  ;;  %v3281_v42 = vld [vmem:[#allocation11 + $0x1c58] sm:$0xff] }
 0x435   :  { %9041 = vmatpush1.bf16.msra.mxu0 %v12345_v5  ;;  %v12441_v5 = vcombine.low %v3208_v9, %v3216_v63  ;;  %v3288_v9 = vld [vmem:[#allocation11 + $0x1c90] sm:$0xff] }
 0x436   :  { %9205 = vmatpush1.bf16.msra.mxu1 %v12347_v6  ;;  %9042 = vmatprep.subr.bf16.mxu0 %v12362_v7  ;;  %v12443_v6 = vcombine.low %v3209_v55, %v3217_v58  ;;  %v12458_v7 = vcombine.high %v3224_v1, %v3232_v2  ;;  %v3296_v63 = vld [vmem:[#allocation11 + $0x1cd0] sm:$0xff]  ;;  %v3289_v55 = vld [vmem:[#allocation11 + $0x1c98] sm:$0xff] }
 0x437   :  { %9206 = vmatprep.subr.bf16.mxu1 %v12364_v8  ;;  %v12460_v8 = vcombine.high %v3225_v3, %v3233_v0  ;;  %v3297_v58 = vld [vmem:[#allocation11 + $0x1cd8] sm:$0xff] }
 0x439   :  { %9043 = vmatpush1.bf16.msra.mxu0 %v12361_v14  ;;  %v12457_v14 = vcombine.low %v3224_v1, %v3232_v2  ;;  %v3304_v1 = vld [vmem:[#allocation11 + $0x1d10] sm:$0xff] }
 0x43a   :  { %9207 = vmatpush1.bf16.msra.mxu1 %v12363_v46  ;;  %9053 = vmatprep.subr.bf16.mxu0 %v12378_v27  ;;  %v12459_v46 = vcombine.low %v3225_v3, %v3233_v0  ;;  %v12474_v27 = vcombine.high %v3240_v30, %v3248_v10  ;;  %v3312_v2 = vld [vmem:[#allocation11 + $0x1d50] sm:$0xff]  ;;  %v3305_v3 = vld [vmem:[#allocation11 + $0x1d18] sm:$0xff] }
 0x43b   :  { %9217 = vmatprep.subr.bf16.mxu1 %v12380_v16  ;;  %v3313_v0 = vld [vmem:[#allocation11 + $0x1d58] sm:$0xff]  ;;  %v3320_v30 = vld [vmem:[#allocation11 + $0x1d90] sm:$0xff] }
 0x43c   :  { %9045 = vmatmul.mubr.bf16.vlgmr.msra.gmra.mrb[16].mxu0 %v13772_v39  ;;  %v3328_v10 = vld [vmem:[#allocation11 + $0x1dd0] sm:$0xff] }
 0x43d   :  { %9209 = vmatmul.mubr.bf16.vlgmr.msra.gmra.mrb[16].mxu1 %v13772_v39  ;;  %9054 = vmatpush1.bf16.msra.mxu0 %v12377_v15  ;;  %v3256_v15 = vld [vmem:[#allocation11 + $0x1b90] sm:$0xff] }
 0x43e   :  { %9085 = vmatprep.mubr.bf16.mxu0 %v13776_v50  ;;  %9218 = vmatpush1.bf16.msra.mxu1 %v12379_v21 }
 0x43f   :  { %9249 = vmatprep.mubr.bf16.mxu1 %v13776_v50  ;;  %9055 = vmatprep.subr.bf16.mxu0 %v12394_v22  ;;  %v3257_v22 = vld [vmem:[#allocation11 + $0x1b98] sm:$0xff] }
 0x440   :  { %9219 = vmatprep.subr.bf16.mxu1 %v12396_v25 }
 0x441   :  { %9056 = vmatpush1.bf16.msra.mxu0 %v12393_v31 }
 0x442   :  { %9220 = vmatpush1.bf16.msra.mxu1 %v12395_v32  ;;  %9057 = vmatprep.subr.bf16.mxu0 %v12410_v33  ;;  %v12475_v32 = vcombine.low %v3241_v11, %v3249_v12  ;;  %v12490_v33 = vcombine.high %v3256_v15, %v3264_v19  ;;  %v3321_v11 = vld [vmem:[#allocation11 + $0x1d98] sm:$0xff] }
 0x443   :  { %9221 = vmatprep.subr.bf16.mxu1 %v12412_v34  ;;  %v12492_v34 = vcombine.high %v3257_v22, %v3265_v23  ;;  %v3329_v12 = vld [vmem:[#allocation11 + $0x1dd8] sm:$0xff] }
 0x445   :  { %9058 = vmatpush1.bf16.msra.mxu0 %v12409_v43  ;;  %v12489_v43 = vcombine.low %v3256_v15, %v3264_v19  ;;  %v3336_v15 = vld [vmem:[#allocation11 + $0x1e10] sm:$0xff] }
 0x446   :  { %9222 = vmatpush1.bf16.msra.mxu1 %v12411_v48  ;;  %9059 = vmatprep.subr.bf16.mxu0 %v12426_v49  ;;  %v12491_v48 = vcombine.low %v3257_v22, %v3265_v23  ;;  %v12506_v49 = vcombine.high %v3272_v37, %v3280_v38  ;;  %v3344_v19 = vld [vmem:[#allocation11 + $0x1e50] sm:$0xff]  ;;  %v3337_v22 = vld [vmem:[#allocation11 + $0x1e18] sm:$0xff] }
 0x447   :  { %9223 = vmatprep.subr.bf16.mxu1 %v12428_v52  ;;  %v12508_v52 = vcombine.high %v3273_v41, %v3281_v42  ;;  %v3345_v23 = vld [vmem:[#allocation11 + $0x1e58] sm:$0xff] }
 0x449   :  { %9060 = vmatpush1.bf16.msra.mxu0 %v12425_v59  ;;  %v12505_v59 = vcombine.low %v3272_v37, %v3280_v38  ;;  %v12569_v37 = vcombine.low %v3336_v15, %v3344_v19  ;;  %v12571_v38 = vcombine.low %v3337_v22, %v3345_v23 }
 0x44a   :  { %9224 = vmatpush1.bf16.msra.mxu1 %v12427_v44  ;;  %9061 = vmatprep.subr.bf16.mxu0 %v12442_v60  ;;  %v12507_v44 = vcombine.low %v3273_v41, %v3281_v42  ;;  %v12522_v60 = vcombine.high %v3288_v9, %v3296_v63 }
 0x44b   :  { %9225 = vmatprep.subr.bf16.mxu1 %v12444_v61  ;;  %v12524_v61 = vcombine.high %v3289_v55, %v3297_v58 }
 0x44d   :  { %9062 = vmatpush1.bf16.msra.mxu0 %v12441_v5  ;;  %v12521_v5 = vcombine.low %v3288_v9, %v3296_v63 }
 0x44e   :  { %9226 = vmatpush1.bf16.msra.mxu1 %v12443_v6  ;;  %9063 = vmatprep.subr.bf16.mxu0 %v12458_v7  ;;  %v12523_v6 = vcombine.low %v3289_v55, %v3297_v58  ;;  %v12538_v7 = vcombine.high %v3304_v1, %v3312_v2 }
 0x44f   :  { %v13805_v16 = vpop.f32.mrb[12].mxu0  ;;  %v13807_v17 = vpop.f32.mrb[12].mxu1  ;;  %9227 = vmatprep.subr.bf16.mxu1 %v12460_v8  ;;  %v12540_v8 = vcombine.high %v3305_v3, %v3313_v0 }
 0x450   :  { %v13809_v20 = vpop.f32.mrb[13].mxu0  ;;  %v13811_v21 = vpop.f32.mrb[13].mxu1 }
 0x451   :  { %v8763_v13 = vpop.f32.mrb[14].mxu0  ;;  %v8927_v25 = vpop.f32.mrb[14].mxu1  ;;  %9064 = vmatpush1.bf16.msra.mxu0 %v12457_v14  ;;  %v12537_v14 = vcombine.low %v3304_v1, %v3312_v2 }
 0x452   :  { %9228 = vmatpush1.bf16.msra.mxu1 %v12459_v46  ;;  %v8764_v29 = vpop.f32.mrb[15].mxu0  ;;  %v8928_v31 = vpop.f32.mrb[15].mxu1  ;;  %9065 = vmatprep.subr.bf16.mxu0 %v12474_v27  ;;  %v12539_v46 = vcombine.low %v3305_v3, %v3313_v0  ;;  %v12554_v27 = vcombine.high %v3320_v30, %v3328_v10  ;;  %v12553_v13 = vcombine.low %v3320_v30, %v3328_v10 }
 0x453   :  { %9229 = vmatprep.subr.bf16.mxu1 %v12476_v18  ;;  %v12556_v18 = vcombine.high %v3321_v11, %v3329_v12  ;;  %v12555_v25 = vcombine.low %v3321_v11, %v3329_v12  ;;  %v12572_v29 = vcombine.high %v3337_v22, %v3345_v23  ;;  %v3352_v31 = vld [vmem:[#allocation11 + $0x1e90] sm:$0xff]  ;;  %v2410_v23 = vld [vmem:[#allocation11 + $0x120] sm:$0xff] }
 0x455   :  { %9066 = vmatpush1.bf16.msra.mxu0 %v12473_v28  ;;  %v12570_v28 = vcombine.high %v3336_v15, %v3344_v19  ;;  %v2403_v15 = vld [vmem:[#allocation11 + $0xe8] sm:$0xff] }
 0x456   :  { %9230 = vmatpush1.bf16.msra.mxu1 %v12475_v32  ;;  %9067 = vmatprep.subr.bf16.mxu0 %v12490_v33  ;;  %v3360_v32 = vld [vmem:[#allocation11 + $0x1ed0] sm:$0xff]  ;;  %v3353_v33 = vld [vmem:[#allocation11 + $0x1e98] sm:$0xff] }
 0x457   :  { %9231 = vmatprep.subr.bf16.mxu1 %v12492_v34  ;;  %v3361_v34 = vld [vmem:[#allocation11 + $0x1ed8] sm:$0xff]  ;;  %v12586_v41 = vcombine.high %v3352_v31, %v3360_v32  ;;  %v12585_v9 = vcombine.low %v3352_v31, %v3360_v32 }
 0x458   :  { %v12588_v42 = vcombine.high %v3353_v33, %v3361_v34  ;;  %v12587_v63 = vcombine.low %v3353_v33, %v3361_v34 }
 0x459   :  { %9068 = vmatpush1.bf16.msra.mxu0 %v12489_v43  ;;  %v3368_v43 = vld [vmem:[#allocation11 + $0x1f10] sm:$0xff] }
 0x45a   :  { %9232 = vmatpush1.bf16.msra.mxu1 %v12491_v48  ;;  %9069 = vmatprep.subr.bf16.mxu0 %v12506_v49  ;;  %v3376_v48 = vld [vmem:[#allocation11 + $0x1f50] sm:$0xff]  ;;  %v3369_v49 = vld [vmem:[#allocation11 + $0x1f18] sm:$0xff] }
 0x45b   :  { %9233 = vmatprep.subr.bf16.mxu1 %v12508_v52  ;;  %v3377_v52 = vld [vmem:[#allocation11 + $0x1f58] sm:$0xff]  ;;  %v12602_v55 = vcombine.high %v3368_v43, %v3376_v48  ;;  %v12601_v1 = vcombine.low %v3368_v43, %v3376_v48 }
 0x45c   :  { %v12604_v58 = vcombine.high %v3369_v49, %v3377_v52  ;;  %v12603_v2 = vcombine.low %v3369_v49, %v3377_v52 }
 0x45d   :  { %9070 = vmatpush1.bf16.msra.mxu0 %v12505_v59  ;;  %v3384_v59 = vld [vmem:[#allocation11 + $0x1f90] sm:$0xff] }
 0x45e   :  { %9234 = vmatpush1.bf16.msra.mxu1 %v12507_v44  ;;  %9071 = vmatprep.subr.bf16.mxu0 %v12522_v60  ;;  %v3392_v44 = vld [vmem:[#allocation11 + $0x1fd0] sm:$0xff]  ;;  %v3385_v60 = vld [vmem:[#allocation11 + $0x1f98] sm:$0xff] }
 0x45f   :  { %9235 = vmatprep.subr.bf16.mxu1 %v12524_v61  ;;  %v3393_v61 = vld [vmem:[#allocation11 + $0x1fd8] sm:$0xff]  ;;  %v12618_v3 = vcombine.high %v3384_v59, %v3392_v44  ;;  %v12617_v30 = vcombine.low %v3384_v59, %v3392_v44 }
 0x460   :  { %v12620_v0 = vcombine.high %v3385_v60, %v3393_v61  ;;  %v12619_v10 = vcombine.low %v3385_v60, %v3393_v61 }
 0x461   :  { %9072 = vmatpush1.bf16.msra.mxu0 %v12521_v5  ;;  %v2378_v5 = vld [vmem:[#allocation11 + $0x20] sm:$0xff] }
 0x462   :  { %9236 = vmatpush1.bf16.msra.mxu1 %v12523_v6  ;;  %9073 = vmatprep.subr.bf16.mxu0 %v12538_v7  ;;  %v2386_v6 = vld [vmem:[#allocation11 + $0x60] sm:$0xff]  ;;  %v2379_v7 = vld [vmem:[#allocation11 + $0x28] sm:$0xff] }
 0x463   :  { %9237 = vmatprep.subr.bf16.mxu1 %v12540_v8  ;;  %v2387_v8 = vld [vmem:[#allocation11 + $0x68] sm:$0xff]  ;;  %v11614_v11 = vcombine.high %v2378_v5, %v2386_v6 }
 0x464   :  { %v11616_v12 = vcombine.high %v2379_v7, %v2387_v8  ;;  %v11615_v19 = vcombine.low %v2379_v7, %v2387_v8 }
 0x465   :  { %9074 = vmatpush1.bf16.msra.mxu0 %v12537_v14  ;;  %v2394_v14 = vld [vmem:[#allocation11 + $0xa0] sm:$0xff] }
 0x466   :  { %9238 = vmatpush1.bf16.msra.mxu1 %v12539_v46  ;;  %9075 = vmatprep.subr.bf16.mxu0 %v12554_v27  ;;  %v2402_v46 = vld [vmem:[#allocation11 + $0xe0] sm:$0xff]  ;;  %v11613_v27 = vcombine.low %v2378_v5, %v2386_v6 }
 0x467   :  { %9239 = vmatprep.subr.bf16.mxu1 %v12556_v18  ;;  %v2395_v18 = vld [vmem:[#allocation11 + $0xa8] sm:$0xff]  ;;  %v11630_v22 = vcombine.high %v2394_v14, %v2402_v46  ;;  %v11629_v31 = vcombine.low %v2394_v14, %v2402_v46 }
 0x468   :  { %v11631_v32 = vcombine.low %v2395_v18, %v2403_v15 }
 0x469   :  { %9076 = vmatpush1.bf16.msra.mxu0 %v12553_v13  ;;  %v2418_v13 = vld [vmem:[#allocation11 + $0x160] sm:$0xff] }
 0x46a   :  { %9240 = vmatpush1.bf16.msra.mxu1 %v12555_v25  ;;  %9077 = vmatprep.subr.bf16.mxu0 %v12570_v28  ;;  %v11632_v25 = vcombine.high %v2395_v18, %v2403_v15  ;;  %v2411_v28 = vld [vmem:[#allocation11 + $0x128] sm:$0xff]  ;;  %v11646_v33 = vcombine.high %v2410_v23, %v2418_v13  ;;  %v11645_v43 = vcombine.low %v2410_v23, %v2418_v13  ;;  %v2490_v15 = vld [vmem:[#allocation11 + $0x3a0] sm:$0xff] }
 0x46b   :  { %9241 = vmatprep.subr.bf16.mxu1 %v12572_v29  ;;  %v2419_v29 = vld [vmem:[#allocation11 + $0x168] sm:$0xff] }
 0x46c   :  { %v11648_v34 = vcombine.high %v2411_v28, %v2419_v29  ;;  %v11647_v48 = vcombine.low %v2411_v28, %v2419_v29  ;;  %v2499_v23 = vld [vmem:[#allocation11 + $0x3e8] sm:$0xff] }
 0x46d   :  { %9078 = vmatpush1.bf16.msra.mxu0 %v12569_v37  ;;  %v2426_v37 = vld [vmem:[#allocation11 + $0x1a0] sm:$0xff] }
 0x46e   :  { %9242 = vmatpush1.bf16.msra.mxu1 %v12571_v38  ;;  %9079 = vmatprep.subr.bf16.mxu0 %v12586_v41  ;;  %v2434_v38 = vld [vmem:[#allocation11 + $0x1e0] sm:$0xff]  ;;  %v2427_v41 = vld [vmem:[#allocation11 + $0x1a8] sm:$0xff] }
 0x46f   :  { %9243 = vmatprep.subr.bf16.mxu1 %v12588_v42  ;;  %v2435_v42 = vld [vmem:[#allocation11 + $0x1e8] sm:$0xff]  ;;  %v11662_v49 = vcombine.high %v2426_v37, %v2434_v38  ;;  %v11661_v59 = vcombine.low %v2426_v37, %v2434_v38 }
 0x470   :  { %v11664_v52 = vcombine.high %v2427_v41, %v2435_v42  ;;  %v11663_v44 = vcombine.low %v2427_v41, %v2435_v42 }
 0x471   :  { %9080 = vmatpush1.bf16.msra.mxu0 %v12585_v9  ;;  %v2442_v9 = vld [vmem:[#allocation11 + $0x220] sm:$0xff] }
 0x472   :  { %9244 = vmatpush1.bf16.msra.mxu1 %v12587_v63  ;;  %9081 = vmatprep.subr.bf16.mxu0 %v12602_v55  ;;  %v2450_v63 = vld [vmem:[#allocation11 + $0x260] sm:$0xff]  ;;  %v2443_v55 = vld [vmem:[#allocation11 + $0x228] sm:$0xff] }
 0x473   :  { %9245 = vmatprep.subr.bf16.mxu1 %v12604_v58  ;;  %v2451_v58 = vld [vmem:[#allocation11 + $0x268] sm:$0xff]  ;;  %v11678_v60 = vcombine.high %v2442_v9, %v2450_v63  ;;  %v11677_v5 = vcombine.low %v2442_v9, %v2450_v63 }
 0x474   :  { %v11680_v61 = vcombine.high %v2443_v55, %v2451_v58  ;;  %v11679_v6 = vcombine.low %v2443_v55, %v2451_v58 }
 0x475   :  { %9082 = vmatpush1.bf16.msra.mxu0 %v12601_v1  ;;  %v2458_v1 = vld [vmem:[#allocation11 + $0x2a0] sm:$0xff] }
 0x476   :  { %9246 = vmatpush1.bf16.msra.mxu1 %v12603_v2  ;;  %9083 = vmatprep.subr.bf16.mxu0 %v12618_v3  ;;  %v2466_v2 = vld [vmem:[#allocation11 + $0x2e0] sm:$0xff]  ;;  %v2459_v3 = vld [vmem:[#allocation11 + $0x2a8] sm:$0xff] }
 0x477   :  { %9247 = vmatprep.subr.bf16.mxu1 %v12620_v0  ;;  %v2467_v0 = vld [vmem:[#allocation11 + $0x2e8] sm:$0xff]  ;;  %v11694_v7 = vcombine.high %v2458_v1, %v2466_v2  ;;  %v11693_v14 = vcombine.low %v2458_v1, %v2466_v2 }
 0x478   :  { %v11696_v8 = vcombine.high %v2459_v3, %v2467_v0  ;;  %v11695_v46 = vcombine.low %v2459_v3, %v2467_v0 }
 0x479   :  { %9084 = vmatpush1.bf16.msra.mxu0 %v12617_v30  ;;  %v2474_v30 = vld [vmem:[#allocation11 + $0x320] sm:$0xff] }
 0x47a   :  { %9248 = vmatpush1.bf16.msra.mxu1 %v12619_v10  ;;  %9258 = vmatprep.subr.bf16.mxu0 %v11614_v11  ;;  %v2482_v10 = vld [vmem:[#allocation11 + $0x360] sm:$0xff]  ;;  %v2475_v11 = vld [vmem:[#allocation11 + $0x328] sm:$0xff] }
 0x47b   :  { %9422 = vmatprep.subr.bf16.mxu1 %v11616_v12  ;;  %v2483_v12 = vld [vmem:[#allocation11 + $0x368] sm:$0xff]  ;;  %v11709_v13 = vcombine.low %v2474_v30, %v2482_v10 }
 0x47c   :  { %9086 = vmatmul.mubr.bf16.vlgmr.msra.gmra.mrb[16].mxu0 %v13787_v4  ;;  %v11712_v18 = vcombine.high %v2475_v11, %v2483_v12 }
 0x47d   :  { %9250 = vmatmul.mubr.bf16.vlgmr.msra.gmra.mrb[16].mxu1 %v13787_v4  ;;  %9259 = vmatpush1.bf16.msra.mxu0 %v11613_v27  ;;  %v11710_v27 = vcombine.high %v2474_v30, %v2482_v10 }
 0x47e   :  { %9290 = vmatprep.mubr.bf16.mxu0 %v13734_v24  ;;  %9423 = vmatpush1.bf16.msra.mxu1 %v11615_v19  ;;  %v2498_v19 = vld [vmem:[#allocation11 + $0x3e0] sm:$0xff] }
 0x47f   :  { %9454 = vmatprep.mubr.bf16.mxu1 %v13734_v24  ;;  %9260 = vmatprep.subr.bf16.mxu0 %v11630_v22  ;;  %v2491_v22 = vld [vmem:[#allocation11 + $0x3a8] sm:$0xff]  ;;  %v11726_v28 = vcombine.high %v2490_v15, %v2498_v19  ;;  %v11725_v37 = vcombine.low %v2490_v15, %v2498_v19 }
 0x480   :  { %9424 = vmatprep.subr.bf16.mxu1 %v11632_v25  ;;  %v11711_v25 = vcombine.low %v2475_v11, %v2483_v12  ;;  %v11728_v29 = vcombine.high %v2491_v22, %v2499_v23  ;;  %v11727_v38 = vcombine.low %v2491_v22, %v2499_v23 }
 0x481   :  { %9261 = vmatpush1.bf16.msra.mxu0 %v11629_v31  ;;  %v2506_v31 = vld [vmem:[#allocation11 + $0x420] sm:$0xff] }
 0x482   :  { %9425 = vmatpush1.bf16.msra.mxu1 %v11631_v32  ;;  %9262 = vmatprep.subr.bf16.mxu0 %v11646_v33  ;;  %v2514_v32 = vld [vmem:[#allocation11 + $0x460] sm:$0xff]  ;;  %v2507_v33 = vld [vmem:[#allocation11 + $0x428] sm:$0xff] }
 0x483   :  { %9426 = vmatprep.subr.bf16.mxu1 %v11648_v34  ;;  %v2515_v34 = vld [vmem:[#allocation11 + $0x468] sm:$0xff]  ;;  %v11742_v41 = vcombine.high %v2506_v31, %v2514_v32  ;;  %v11741_v9 = vcombine.low %v2506_v31, %v2514_v32 }
 0x484   :  { %v11744_v42 = vcombine.high %v2507_v33, %v2515_v34  ;;  %v11743_v63 = vcombine.low %v2507_v33, %v2515_v34 }
 0x485   :  { %9263 = vmatpush1.bf16.msra.mxu0 %v11645_v43  ;;  %v2522_v43 = vld [vmem:[#allocation11 + $0x4a0] sm:$0xff] }
 0x486   :  { %9427 = vmatpush1.bf16.msra.mxu1 %v11647_v48  ;;  %9264 = vmatprep.subr.bf16.mxu0 %v11662_v49  ;;  %v2530_v48 = vld [vmem:[#allocation11 + $0x4e0] sm:$0xff]  ;;  %v2523_v49 = vld [vmem:[#allocation11 + $0x4a8] sm:$0xff] }
 0x487   :  { %9428 = vmatprep.subr.bf16.mxu1 %v11664_v52  ;;  %v2531_v52 = vld [vmem:[#allocation11 + $0x4e8] sm:$0xff]  ;;  %v11758_v55 = vcombine.high %v2522_v43, %v2530_v48  ;;  %v11757_v1 = vcombine.low %v2522_v43, %v2530_v48 }
 0x488   :  { %v11760_v58 = vcombine.high %v2523_v49, %v2531_v52  ;;  %v11759_v2 = vcombine.low %v2523_v49, %v2531_v52 }
 0x489   :  { %9265 = vmatpush1.bf16.msra.mxu0 %v11661_v59  ;;  %v2538_v59 = vld [vmem:[#allocation11 + $0x520] sm:$0xff] }
 0x48a   :  { %9429 = vmatpush1.bf16.msra.mxu1 %v11663_v44  ;;  %9266 = vmatprep.subr.bf16.mxu0 %v11678_v60  ;;  %v2546_v44 = vld [vmem:[#allocation11 + $0x560] sm:$0xff]  ;;  %v2539_v60 = vld [vmem:[#allocation11 + $0x528] sm:$0xff] }
 0x48b   :  { %9430 = vmatprep.subr.bf16.mxu1 %v11680_v61  ;;  %v2547_v61 = vld [vmem:[#allocation11 + $0x568] sm:$0xff]  ;;  %v11774_v3 = vcombine.high %v2538_v59, %v2546_v44  ;;  %v11773_v30 = vcombine.low %v2538_v59, %v2546_v44 }
 0x48c   :  { %v11776_v0 = vcombine.high %v2539_v60, %v2547_v61  ;;  %v11775_v10 = vcombine.low %v2539_v60, %v2547_v61 }
 0x48d   :  { %9267 = vmatpush1.bf16.msra.mxu0 %v11677_v5  ;;  %v2554_v5 = vld [vmem:[#allocation11 + $0x5a0] sm:$0xff] }
 0x48e   :  { %9431 = vmatpush1.bf16.msra.mxu1 %v11679_v6  ;;  %9268 = vmatprep.subr.bf16.mxu0 %v11694_v7  ;;  %v2562_v6 = vld [vmem:[#allocation11 + $0x5e0] sm:$0xff]  ;;  %v2555_v7 = vld [vmem:[#allocation11 + $0x5a8] sm:$0xff] }
 0x48f   :  { %9432 = vmatprep.subr.bf16.mxu1 %v11696_v8  ;;  %v2563_v8 = vld [vmem:[#allocation11 + $0x5e8] sm:$0xff]  ;;  %v11790_v11 = vcombine.high %v2554_v5, %v2562_v6  ;;  %v11789_v15 = vcombine.low %v2554_v5, %v2562_v6 }
 0x490   :  { %v11792_v12 = vcombine.high %v2555_v7, %v2563_v8  ;;  %v11791_v19 = vcombine.low %v2555_v7, %v2563_v8 }
 0x491   :  { %9269 = vmatpush1.bf16.msra.mxu0 %v11693_v14  ;;  %v2570_v14 = vld [vmem:[#allocation11 + $0x620] sm:$0xff] }
 0x492   :  { %9433 = vmatpush1.bf16.msra.mxu1 %v11695_v46  ;;  %9270 = vmatprep.subr.bf16.mxu0 %v11710_v27  ;;  %v2578_v46 = vld [vmem:[#allocation11 + $0x660] sm:$0xff]  ;;  %v2571_v27 = vld [vmem:[#allocation11 + $0x628] sm:$0xff] }
 0x493   :  { %9434 = vmatprep.subr.bf16.mxu1 %v11712_v18  ;;  %v2579_v18 = vld [vmem:[#allocation11 + $0x668] sm:$0xff]  ;;  %v11806_v22 = vcombine.high %v2570_v14, %v2578_v46  ;;  %v11805_v31 = vcombine.low %v2570_v14, %v2578_v46 }
 0x494   :  { %v11808_v23 = vcombine.high %v2571_v27, %v2579_v18  ;;  %v11807_v32 = vcombine.low %v2571_v27, %v2579_v18  ;;  %v2659_v14 = vld [vmem:[#allocation11 + $0x8e8] sm:$0xff]  ;;  %v2666_v18 = vld [vmem:[#allocation11 + $0x920] sm:$0xff] }
 0x495   :  { %9271 = vmatpush1.bf16.msra.mxu0 %v11709_v13  ;;  %v2586_v13 = vld [vmem:[#allocation11 + $0x6a0] sm:$0xff] }
 0x496   :  { %9435 = vmatpush1.bf16.msra.mxu1 %v11711_v25  ;;  %9272 = vmatprep.subr.bf16.mxu0 %v11726_v28  ;;  %v2594_v25 = vld [vmem:[#allocation11 + $0x6e0] sm:$0xff]  ;;  %v2587_v28 = vld [vmem:[#allocation11 + $0x6a8] sm:$0xff] }
 0x497   :  { %9436 = vmatprep.subr.bf16.mxu1 %v11728_v29  ;;  %v2595_v29 = vld [vmem:[#allocation11 + $0x6e8] sm:$0xff]  ;;  %v11822_v33 = vcombine.high %v2586_v13, %v2594_v25  ;;  %v11821_v43 = vcombine.low %v2586_v13, %v2594_v25 }
 0x498   :  { %v11824_v34 = vcombine.high %v2587_v28, %v2595_v29  ;;  %v11823_v48 = vcombine.low %v2587_v28, %v2595_v29 }
 0x499   :  { %9273 = vmatpush1.bf16.msra.mxu0 %v11725_v37  ;;  %v2602_v37 = vld [vmem:[#allocation11 + $0x720] sm:$0xff] }
 0x49a   :  { %9437 = vmatpush1.bf16.msra.mxu1 %v11727_v38  ;;  %9274 = vmatprep.subr.bf16.mxu0 %v11742_v41  ;;  %v2610_v38 = vld [vmem:[#allocation11 + $0x760] sm:$0xff]  ;;  %v2603_v41 = vld [vmem:[#allocation11 + $0x728] sm:$0xff] }
 0x49b   :  { %9438 = vmatprep.subr.bf16.mxu1 %v11744_v42  ;;  %v2611_v42 = vld [vmem:[#allocation11 + $0x768] sm:$0xff]  ;;  %v11838_v49 = vcombine.high %v2602_v37, %v2610_v38  ;;  %v11837_v59 = vcombine.low %v2602_v37, %v2610_v38 }
 0x49c   :  { %v11840_v52 = vcombine.high %v2603_v41, %v2611_v42  ;;  %v11839_v44 = vcombine.low %v2603_v41, %v2611_v42 }
 0x49d   :  { %9275 = vmatpush1.bf16.msra.mxu0 %v11741_v9  ;;  %v2618_v9 = vld [vmem:[#allocation11 + $0x7a0] sm:$0xff] }
 0x49e   :  { %9439 = vmatpush1.bf16.msra.mxu1 %v11743_v63  ;;  %9276 = vmatprep.subr.bf16.mxu0 %v11758_v55  ;;  %v2626_v63 = vld [vmem:[#allocation11 + $0x7e0] sm:$0xff]  ;;  %v2619_v55 = vld [vmem:[#allocation11 + $0x7a8] sm:$0xff] }
 0x49f   :  { %9440 = vmatprep.subr.bf16.mxu1 %v11760_v58  ;;  %v2627_v58 = vld [vmem:[#allocation11 + $0x7e8] sm:$0xff]  ;;  %v11854_v60 = vcombine.high %v2618_v9, %v2626_v63  ;;  %v11853_v5 = vcombine.low %v2618_v9, %v2626_v63 }
 0x4a0   :  { %v11856_v61 = vcombine.high %v2619_v55, %v2627_v58  ;;  %v11855_v6 = vcombine.low %v2619_v55, %v2627_v58 }
 0x4a1   :  { %9277 = vmatpush1.bf16.msra.mxu0 %v11757_v1  ;;  %v2634_v1 = vld [vmem:[#allocation11 + $0x820] sm:$0xff] }
 0x4a2   :  { %9441 = vmatpush1.bf16.msra.mxu1 %v11759_v2  ;;  %9278 = vmatprep.subr.bf16.mxu0 %v11774_v3  ;;  %v2642_v2 = vld [vmem:[#allocation11 + $0x860] sm:$0xff]  ;;  %v2635_v3 = vld [vmem:[#allocation11 + $0x828] sm:$0xff] }
 0x4a3   :  { %9442 = vmatprep.subr.bf16.mxu1 %v11776_v0  ;;  %v2643_v0 = vld [vmem:[#allocation11 + $0x868] sm:$0xff]  ;;  %v11870_v7 = vcombine.high %v2634_v1, %v2642_v2 }
 0x4a4   :  { %v11872_v8 = vcombine.high %v2635_v3, %v2643_v0  ;;  %v11871_v46 = vcombine.low %v2635_v3, %v2643_v0 }
 0x4a5   :  { %9279 = vmatpush1.bf16.msra.mxu0 %v11773_v30  ;;  %v2650_v30 = vld [vmem:[#allocation11 + $0x8a0] sm:$0xff] }
 0x4a6   :  { %9443 = vmatpush1.bf16.msra.mxu1 %v11775_v10  ;;  %9280 = vmatprep.subr.bf16.mxu0 %v11790_v11  ;;  %v2658_v10 = vld [vmem:[#allocation11 + $0x8e0] sm:$0xff]  ;;  %v11869_v11 = vcombine.low %v2634_v1, %v2642_v2 }
 0x4a7   :  { %9444 = vmatprep.subr.bf16.mxu1 %v11792_v12  ;;  %v2651_v12 = vld [vmem:[#allocation11 + $0x8a8] sm:$0xff]  ;;  %v11886_v27 = vcombine.high %v2650_v30, %v2658_v10  ;;  %v11885_v13 = vcombine.low %v2650_v30, %v2658_v10 }
 0x4a8   :  { %v11887_v25 = vcombine.low %v2651_v12, %v2659_v14 }
 0x4a9   :  { %9281 = vmatpush1.bf16.msra.mxu0 %v11789_v15  ;;  %v2674_v15 = vld [vmem:[#allocation11 + $0x960] sm:$0xff] }
 0x4aa   :  { %9445 = vmatpush1.bf16.msra.mxu1 %v11791_v19  ;;  %9282 = vmatprep.subr.bf16.mxu0 %v11806_v22  ;;  %v11888_v19 = vcombine.high %v2651_v12, %v2659_v14  ;;  %v2667_v22 = vld [vmem:[#allocation11 + $0x928] sm:$0xff]  ;;  %v11902_v28 = vcombine.high %v2666_v18, %v2674_v15  ;;  %v11901_v37 = vcombine.low %v2666_v18, %v2674_v15  ;;  %v2746_v14 = vld [vmem:[#allocation11 + $0xba0] sm:$0xff] }
 0x4ab   :  { %9446 = vmatprep.subr.bf16.mxu1 %v11808_v23  ;;  %v2675_v23 = vld [vmem:[#allocation11 + $0x968] sm:$0xff] }
 0x4ac   :  { %v11904_v29 = vcombine.high %v2667_v22, %v2675_v23  ;;  %v11903_v38 = vcombine.low %v2667_v22, %v2675_v23  ;;  %v2755_v18 = vld [vmem:[#allocation11 + $0xbe8] sm:$0xff] }
 0x4ad   :  { %9283 = vmatpush1.bf16.msra.mxu0 %v11805_v31  ;;  %v2682_v31 = vld [vmem:[#allocation11 + $0x9a0] sm:$0xff] }
 0x4ae   :  { %9447 = vmatpush1.bf16.msra.mxu1 %v11807_v32  ;;  %9284 = vmatprep.subr.bf16.mxu0 %v11822_v33  ;;  %v2690_v32 = vld [vmem:[#allocation11 + $0x9e0] sm:$0xff]  ;;  %v2683_v33 = vld [vmem:[#allocation11 + $0x9a8] sm:$0xff] }
 0x4af   :  { %9448 = vmatprep.subr.bf16.mxu1 %v11824_v34  ;;  %v2691_v34 = vld [vmem:[#allocation11 + $0x9e8] sm:$0xff]  ;;  %v11918_v41 = vcombine.high %v2682_v31, %v2690_v32  ;;  %v11917_v9 = vcombine.low %v2682_v31, %v2690_v32 }
 0x4b0   :  { %v11920_v42 = vcombine.high %v2683_v33, %v2691_v34  ;;  %v11919_v63 = vcombine.low %v2683_v33, %v2691_v34 }
 0x4b1   :  { %9285 = vmatpush1.bf16.msra.mxu0 %v11821_v43  ;;  %v2698_v43 = vld [vmem:[#allocation11 + $0xa20] sm:$0xff] }
 0x4b2   :  { %9449 = vmatpush1.bf16.msra.mxu1 %v11823_v48  ;;  %9286 = vmatprep.subr.bf16.mxu0 %v11838_v49  ;;  %v2706_v48 = vld [vmem:[#allocation11 + $0xa60] sm:$0xff]  ;;  %v2699_v49 = vld [vmem:[#allocation11 + $0xa28] sm:$0xff] }
 0x4b3   :  { %9450 = vmatprep.subr.bf16.mxu1 %v11840_v52  ;;  %v2707_v52 = vld [vmem:[#allocation11 + $0xa68] sm:$0xff]  ;;  %v11934_v55 = vcombine.high %v2698_v43, %v2706_v48  ;;  %v11933_v1 = vcombine.low %v2698_v43, %v2706_v48 }
 0x4b4   :  { %v11936_v58 = vcombine.high %v2699_v49, %v2707_v52  ;;  %v11935_v2 = vcombine.low %v2699_v49, %v2707_v52 }
 0x4b5   :  { %9287 = vmatpush1.bf16.msra.mxu0 %v11837_v59  ;;  %v2714_v59 = vld [vmem:[#allocation11 + $0xaa0] sm:$0xff] }
 0x4b6   :  { %9451 = vmatpush1.bf16.msra.mxu1 %v11839_v44  ;;  %9288 = vmatprep.subr.bf16.mxu0 %v11854_v60  ;;  %v2722_v44 = vld [vmem:[#allocation11 + $0xae0] sm:$0xff]  ;;  %v2715_v60 = vld [vmem:[#allocation11 + $0xaa8] sm:$0xff] }
 0x4b7   :  { %9452 = vmatprep.subr.bf16.mxu1 %v11856_v61  ;;  %v2723_v61 = vld [vmem:[#allocation11 + $0xae8] sm:$0xff]  ;;  %v11950_v3 = vcombine.high %v2714_v59, %v2722_v44  ;;  %v11949_v30 = vcombine.low %v2714_v59, %v2722_v44 }
 0x4b8   :  { %v11952_v0 = vcombine.high %v2715_v60, %v2723_v61  ;;  %v11951_v10 = vcombine.low %v2715_v60, %v2723_v61 }
 0x4b9   :  { %9289 = vmatpush1.bf16.msra.mxu0 %v11853_v5  ;;  %v2730_v5 = vld [vmem:[#allocation11 + $0xb20] sm:$0xff] }
 0x4ba   :  { %9453 = vmatpush1.bf16.msra.mxu1 %v11855_v6  ;;  %9299 = vmatprep.subr.bf16.mxu0 %v11870_v7  ;;  %v2738_v6 = vld [vmem:[#allocation11 + $0xb60] sm:$0xff]  ;;  %v2731_v7 = vld [vmem:[#allocation11 + $0xb28] sm:$0xff] }
 0x4bb   :  { %9463 = vmatprep.subr.bf16.mxu1 %v11872_v8  ;;  %v2739_v8 = vld [vmem:[#allocation11 + $0xb68] sm:$0xff]  ;;  %v11965_v15 = vcombine.low %v2730_v5, %v2738_v6 }
 0x4bc   :  { %9291 = vmatmul.mubr.bf16.vlgmr.msra.gmra.mrb[20].mxu0 %v13736_v26  ;;  %v11968_v12 = vcombine.high %v2731_v7, %v2739_v8 }
 0x4bd   :  { %9455 = vmatmul.mubr.bf16.vlgmr.msra.gmra.mrb[20].mxu1 %v13736_v26  ;;  %9300 = vmatpush1.bf16.msra.mxu0 %v11869_v11  ;;  %v11966_v11 = vcombine.high %v2730_v5, %v2738_v6 }
 0x4be   :  { %9331 = vmatprep.mubr.bf16.mxu0 %v13740_v35  ;;  %9464 = vmatpush1.bf16.msra.mxu1 %v11871_v46  ;;  %v2754_v46 = vld [vmem:[#allocation11 + $0xbe0] sm:$0xff] }
 0x4bf   :  { %9495 = vmatprep.mubr.bf16.mxu1 %v13740_v35  ;;  %9301 = vmatprep.subr.bf16.mxu0 %v11886_v27  ;;  %v2747_v27 = vld [vmem:[#allocation11 + $0xba8] sm:$0xff]  ;;  %v11982_v22 = vcombine.high %v2746_v14, %v2754_v46  ;;  %v11981_v31 = vcombine.low %v2746_v14, %v2754_v46 }
 0x4c0   :  { %9465 = vmatprep.subr.bf16.mxu1 %v11888_v19  ;;  %v11967_v19 = vcombine.low %v2731_v7, %v2739_v8  ;;  %v11984_v23 = vcombine.high %v2747_v27, %v2755_v18  ;;  %v11983_v32 = vcombine.low %v2747_v27, %v2755_v18 }
 0x4c1   :  { %9302 = vmatpush1.bf16.msra.mxu0 %v11885_v13  ;;  %v2762_v13 = vld [vmem:[#allocation11 + $0xc20] sm:$0xff] }
 0x4c2   :  { %9466 = vmatpush1.bf16.msra.mxu1 %v11887_v25  ;;  %9303 = vmatprep.subr.bf16.mxu0 %v11902_v28  ;;  %v2770_v25 = vld [vmem:[#allocation11 + $0xc60] sm:$0xff]  ;;  %v2763_v28 = vld [vmem:[#allocation11 + $0xc28] sm:$0xff] }
 0x4c3   :  { %9467 = vmatprep.subr.bf16.mxu1 %v11904_v29  ;;  %v2771_v29 = vld [vmem:[#allocation11 + $0xc68] sm:$0xff]  ;;  %v11998_v33 = vcombine.high %v2762_v13, %v2770_v25  ;;  %v11997_v43 = vcombine.low %v2762_v13, %v2770_v25 }
 0x4c4   :  { %v12000_v34 = vcombine.high %v2763_v28, %v2771_v29  ;;  %v11999_v48 = vcombine.low %v2763_v28, %v2771_v29 }
 0x4c5   :  { %9304 = vmatpush1.bf16.msra.mxu0 %v11901_v37  ;;  %v2778_v37 = vld [vmem:[#allocation11 + $0xca0] sm:$0xff] }
 0x4c6   :  { %9468 = vmatpush1.bf16.msra.mxu1 %v11903_v38  ;;  %9305 = vmatprep.subr.bf16.mxu0 %v11918_v41  ;;  %v2786_v38 = vld [vmem:[#allocation11 + $0xce0] sm:$0xff]  ;;  %v2779_v41 = vld [vmem:[#allocation11 + $0xca8] sm:$0xff] }
 0x4c7   :  { %9469 = vmatprep.subr.bf16.mxu1 %v11920_v42  ;;  %v2787_v42 = vld [vmem:[#allocation11 + $0xce8] sm:$0xff]  ;;  %v12014_v49 = vcombine.high %v2778_v37, %v2786_v38  ;;  %v12013_v59 = vcombine.low %v2778_v37, %v2786_v38 }
 0x4c8   :  { %v12016_v52 = vcombine.high %v2779_v41, %v2787_v42  ;;  %v12015_v44 = vcombine.low %v2779_v41, %v2787_v42 }
 0x4c9   :  { %9306 = vmatpush1.bf16.msra.mxu0 %v11917_v9  ;;  %v2794_v9 = vld [vmem:[#allocation11 + $0xd20] sm:$0xff] }
 0x4ca   :  { %9470 = vmatpush1.bf16.msra.mxu1 %v11919_v63  ;;  %9307 = vmatprep.subr.bf16.mxu0 %v11934_v55  ;;  %v2802_v63 = vld [vmem:[#allocation11 + $0xd60] sm:$0xff]  ;;  %v2795_v55 = vld [vmem:[#allocation11 + $0xd28] sm:$0xff] }
 0x4cb   :  { %9471 = vmatprep.subr.bf16.mxu1 %v11936_v58  ;;  %v2803_v58 = vld [vmem:[#allocation11 + $0xd68] sm:$0xff]  ;;  %v12030_v60 = vcombine.high %v2794_v9, %v2802_v63  ;;  %v12029_v5 = vcombine.low %v2794_v9, %v2802_v63 }
 0x4cc   :  { %v12032_v61 = vcombine.high %v2795_v55, %v2803_v58  ;;  %v12031_v6 = vcombine.low %v2795_v55, %v2803_v58 }
 0x4cd   :  { %9308 = vmatpush1.bf16.msra.mxu0 %v11933_v1  ;;  %v2810_v1 = vld [vmem:[#allocation11 + $0xda0] sm:$0xff] }
 0x4ce   :  { %9472 = vmatpush1.bf16.msra.mxu1 %v11935_v2  ;;  %9309 = vmatprep.subr.bf16.mxu0 %v11950_v3  ;;  %v2818_v2 = vld [vmem:[#allocation11 + $0xde0] sm:$0xff]  ;;  %v2811_v3 = vld [vmem:[#allocation11 + $0xda8] sm:$0xff] }
 0x4cf   :  { %9473 = vmatprep.subr.bf16.mxu1 %v11952_v0  ;;  %v2819_v0 = vld [vmem:[#allocation11 + $0xde8] sm:$0xff]  ;;  %v12046_v7 = vcombine.high %v2810_v1, %v2818_v2  ;;  %v12045_v14 = vcombine.low %v2810_v1, %v2818_v2 }
 0x4d0   :  { %v12048_v8 = vcombine.high %v2811_v3, %v2819_v0  ;;  %v12047_v46 = vcombine.low %v2811_v3, %v2819_v0 }
 0x4d1   :  { %9310 = vmatpush1.bf16.msra.mxu0 %v11949_v30  ;;  %v2826_v30 = vld [vmem:[#allocation11 + $0xe20] sm:$0xff] }
 0x4d2   :  { %9474 = vmatpush1.bf16.msra.mxu1 %v11951_v10  ;;  %9311 = vmatprep.subr.bf16.mxu0 %v11966_v11  ;;  %v2834_v10 = vld [vmem:[#allocation11 + $0xe60] sm:$0xff]  ;;  %v2827_v11 = vld [vmem:[#allocation11 + $0xe28] sm:$0xff] }
 0x4d3   :  { %9475 = vmatprep.subr.bf16.mxu1 %v11968_v12  ;;  %v2835_v12 = vld [vmem:[#allocation11 + $0xe68] sm:$0xff]  ;;  %v12062_v27 = vcombine.high %v2826_v30, %v2834_v10  ;;  %v12061_v13 = vcombine.low %v2826_v30, %v2834_v10 }
 0x4d4   :  { %v12064_v18 = vcombine.high %v2827_v11, %v2835_v12  ;;  %v12063_v25 = vcombine.low %v2827_v11, %v2835_v12  ;;  %v2915_v30 = vld [vmem:[#allocation11 + $0x10e8] sm:$0xff]  ;;  %v2922_v12 = vld [vmem:[#allocation11 + $0x1120] sm:$0xff] }
 0x4d5   :  { %9312 = vmatpush1.bf16.msra.mxu0 %v11965_v15  ;;  %v2842_v15 = vld [vmem:[#allocation11 + $0xea0] sm:$0xff] }
 0x4d6   :  { %9476 = vmatpush1.bf16.msra.mxu1 %v11967_v19  ;;  %9313 = vmatprep.subr.bf16.mxu0 %v11982_v22  ;;  %v2850_v19 = vld [vmem:[#allocation11 + $0xee0] sm:$0xff]  ;;  %v2843_v22 = vld [vmem:[#allocation11 + $0xea8] sm:$0xff] }
 0x4d7   :  { %9477 = vmatprep.subr.bf16.mxu1 %v11984_v23  ;;  %v2851_v23 = vld [vmem:[#allocation11 + $0xee8] sm:$0xff]  ;;  %v12078_v28 = vcombine.high %v2842_v15, %v2850_v19  ;;  %v12077_v37 = vcombine.low %v2842_v15, %v2850_v19 }
 0x4d8   :  { %v12080_v29 = vcombine.high %v2843_v22, %v2851_v23  ;;  %v12079_v38 = vcombine.low %v2843_v22, %v2851_v23 }
 0x4d9   :  { %9314 = vmatpush1.bf16.msra.mxu0 %v11981_v31  ;;  %v2858_v31 = vld [vmem:[#allocation11 + $0xf20] sm:$0xff] }
 0x4da   :  { %9478 = vmatpush1.bf16.msra.mxu1 %v11983_v32  ;;  %9315 = vmatprep.subr.bf16.mxu0 %v11998_v33  ;;  %v2866_v32 = vld [vmem:[#allocation11 + $0xf60] sm:$0xff]  ;;  %v2859_v33 = vld [vmem:[#allocation11 + $0xf28] sm:$0xff] }
 0x4db   :  { %9479 = vmatprep.subr.bf16.mxu1 %v12000_v34  ;;  %v2867_v34 = vld [vmem:[#allocation11 + $0xf68] sm:$0xff]  ;;  %v12094_v41 = vcombine.high %v2858_v31, %v2866_v32  ;;  %v12093_v9 = vcombine.low %v2858_v31, %v2866_v32 }
 0x4dc   :  { %v12096_v42 = vcombine.high %v2859_v33, %v2867_v34  ;;  %v12095_v63 = vcombine.low %v2859_v33, %v2867_v34 }
 0x4dd   :  { %9316 = vmatpush1.bf16.msra.mxu0 %v11997_v43  ;;  %v2874_v43 = vld [vmem:[#allocation11 + $0xfa0] sm:$0xff] }
 0x4de   :  { %9480 = vmatpush1.bf16.msra.mxu1 %v11999_v48  ;;  %9317 = vmatprep.subr.bf16.mxu0 %v12014_v49  ;;  %v2882_v48 = vld [vmem:[#allocation11 + $0xfe0] sm:$0xff]  ;;  %v2875_v49 = vld [vmem:[#allocation11 + $0xfa8] sm:$0xff] }
 0x4df   :  { %9481 = vmatprep.subr.bf16.mxu1 %v12016_v52  ;;  %v2883_v52 = vld [vmem:[#allocation11 + $0xfe8] sm:$0xff]  ;;  %v12110_v55 = vcombine.high %v2874_v43, %v2882_v48  ;;  %v12109_v1 = vcombine.low %v2874_v43, %v2882_v48 }
 0x4e0   :  { %v12112_v58 = vcombine.high %v2875_v49, %v2883_v52  ;;  %v12111_v2 = vcombine.low %v2875_v49, %v2883_v52 }
 0x4e1   :  { %9318 = vmatpush1.bf16.msra.mxu0 %v12013_v59  ;;  %v2890_v59 = vld [vmem:[#allocation11 + $0x1020] sm:$0xff] }
 0x4e2   :  { %9482 = vmatpush1.bf16.msra.mxu1 %v12015_v44  ;;  %9319 = vmatprep.subr.bf16.mxu0 %v12030_v60  ;;  %v2898_v44 = vld [vmem:[#allocation11 + $0x1060] sm:$0xff]  ;;  %v2891_v60 = vld [vmem:[#allocation11 + $0x1028] sm:$0xff] }
 0x4e3   :  { %9483 = vmatprep.subr.bf16.mxu1 %v12032_v61  ;;  %v2899_v61 = vld [vmem:[#allocation11 + $0x1068] sm:$0xff]  ;;  %v12126_v3 = vcombine.high %v2890_v59, %v2898_v44 }
 0x4e4   :  { %v12128_v0 = vcombine.high %v2891_v60, %v2899_v61  ;;  %v12127_v10 = vcombine.low %v2891_v60, %v2899_v61 }
 0x4e5   :  { %9320 = vmatpush1.bf16.msra.mxu0 %v12029_v5  ;;  %v2906_v5 = vld [vmem:[#allocation11 + $0x10a0] sm:$0xff] }
 0x4e6   :  { %9484 = vmatpush1.bf16.msra.mxu1 %v12031_v6  ;;  %9321 = vmatprep.subr.bf16.mxu0 %v12046_v7  ;;  %v2914_v6 = vld [vmem:[#allocation11 + $0x10e0] sm:$0xff]  ;;  %v12125_v7 = vcombine.low %v2890_v59, %v2898_v44 }
 0x4e7   :  { %9485 = vmatprep.subr.bf16.mxu1 %v12048_v8  ;;  %v2907_v8 = vld [vmem:[#allocation11 + $0x10a8] sm:$0xff]  ;;  %v12142_v11 = vcombine.high %v2906_v5, %v2914_v6  ;;  %v12141_v15 = vcombine.low %v2906_v5, %v2914_v6 }
 0x4e8   :  { %v12143_v19 = vcombine.low %v2907_v8, %v2915_v30 }
 0x4e9   :  { %9322 = vmatpush1.bf16.msra.mxu0 %v12045_v14  ;;  %v2930_v14 = vld [vmem:[#allocation11 + $0x1160] sm:$0xff] }
 0x4ea   :  { %9486 = vmatpush1.bf16.msra.mxu1 %v12047_v46  ;;  %9323 = vmatprep.subr.bf16.mxu0 %v12062_v27  ;;  %v12144_v46 = vcombine.high %v2907_v8, %v2915_v30  ;;  %v2923_v27 = vld [vmem:[#allocation11 + $0x1128] sm:$0xff]  ;;  %v12158_v22 = vcombine.high %v2922_v12, %v2930_v14  ;;  %v12157_v31 = vcombine.low %v2922_v12, %v2930_v14  ;;  %v3002_v30 = vld [vmem:[#allocation11 + $0x13a0] sm:$0xff] }
 0x4eb   :  { %9487 = vmatprep.subr.bf16.mxu1 %v12064_v18  ;;  %v2931_v18 = vld [vmem:[#allocation11 + $0x1168] sm:$0xff] }
 0x4ec   :  { %v12160_v23 = vcombine.high %v2923_v27, %v2931_v18  ;;  %v12159_v32 = vcombine.low %v2923_v27, %v2931_v18  ;;  %v3011_v12 = vld [vmem:[#allocation11 + $0x13e8] sm:$0xff] }
 0x4ed   :  { %9324 = vmatpush1.bf16.msra.mxu0 %v12061_v13  ;;  %v2938_v13 = vld [vmem:[#allocation11 + $0x11a0] sm:$0xff] }
 0x4ee   :  { %9488 = vmatpush1.bf16.msra.mxu1 %v12063_v25  ;;  %9325 = vmatprep.subr.bf16.mxu0 %v12078_v28  ;;  %v2946_v25 = vld [vmem:[#allocation11 + $0x11e0] sm:$0xff]  ;;  %v2939_v28 = vld [vmem:[#allocation11 + $0x11a8] sm:$0xff] }
 0x4ef   :  { %9489 = vmatprep.subr.bf16.mxu1 %v12080_v29  ;;  %v2947_v29 = vld [vmem:[#allocation11 + $0x11e8] sm:$0xff]  ;;  %v12174_v33 = vcombine.high %v2938_v13, %v2946_v25  ;;  %v12173_v43 = vcombine.low %v2938_v13, %v2946_v25 }
 0x4f0   :  { %v12176_v34 = vcombine.high %v2939_v28, %v2947_v29  ;;  %v12175_v48 = vcombine.low %v2939_v28, %v2947_v29 }
 0x4f1   :  { %9326 = vmatpush1.bf16.msra.mxu0 %v12077_v37  ;;  %v2954_v37 = vld [vmem:[#allocation11 + $0x1220] sm:$0xff] }
 0x4f2   :  { %9490 = vmatpush1.bf16.msra.mxu1 %v12079_v38  ;;  %9327 = vmatprep.subr.bf16.mxu0 %v12094_v41  ;;  %v2962_v38 = vld [vmem:[#allocation11 + $0x1260] sm:$0xff]  ;;  %v2955_v41 = vld [vmem:[#allocation11 + $0x1228] sm:$0xff] }
 0x4f3   :  { %9491 = vmatprep.subr.bf16.mxu1 %v12096_v42  ;;  %v2963_v42 = vld [vmem:[#allocation11 + $0x1268] sm:$0xff]  ;;  %v12190_v49 = vcombine.high %v2954_v37, %v2962_v38  ;;  %v12189_v59 = vcombine.low %v2954_v37, %v2962_v38 }
 0x4f4   :  { %v12192_v52 = vcombine.high %v2955_v41, %v2963_v42  ;;  %v12191_v44 = vcombine.low %v2955_v41, %v2963_v42 }
 0x4f5   :  { %9328 = vmatpush1.bf16.msra.mxu0 %v12093_v9  ;;  %v2970_v9 = vld [vmem:[#allocation11 + $0x12a0] sm:$0xff] }
 0x4f6   :  { %9492 = vmatpush1.bf16.msra.mxu1 %v12095_v63  ;;  %9329 = vmatprep.subr.bf16.mxu0 %v12110_v55  ;;  %v2978_v63 = vld [vmem:[#allocation11 + $0x12e0] sm:$0xff]  ;;  %v2971_v55 = vld [vmem:[#allocation11 + $0x12a8] sm:$0xff] }
 0x4f7   :  { %9493 = vmatprep.subr.bf16.mxu1 %v12112_v58  ;;  %v2979_v58 = vld [vmem:[#allocation11 + $0x12e8] sm:$0xff]  ;;  %v12206_v60 = vcombine.high %v2970_v9, %v2978_v63  ;;  %v12205_v5 = vcombine.low %v2970_v9, %v2978_v63 }
 0x4f8   :  { %v12208_v61 = vcombine.high %v2971_v55, %v2979_v58  ;;  %v12207_v6 = vcombine.low %v2971_v55, %v2979_v58 }
 0x4f9   :  { %9330 = vmatpush1.bf16.msra.mxu0 %v12109_v1  ;;  %v2986_v1 = vld [vmem:[#allocation11 + $0x1320] sm:$0xff] }
 0x4fa   :  { %9494 = vmatpush1.bf16.msra.mxu1 %v12111_v2  ;;  %9340 = vmatprep.subr.bf16.mxu0 %v12126_v3  ;;  %v2994_v2 = vld [vmem:[#allocation11 + $0x1360] sm:$0xff]  ;;  %v2987_v3 = vld [vmem:[#allocation11 + $0x1328] sm:$0xff] }
 0x4fb   :  { %9504 = vmatprep.subr.bf16.mxu1 %v12128_v0  ;;  %v2995_v0 = vld [vmem:[#allocation11 + $0x1368] sm:$0xff]  ;;  %v12221_v14 = vcombine.low %v2986_v1, %v2994_v2 }
 0x4fc   :  { %9332 = vmatmul.mubr.bf16.vlgmr.msra.gmra.mrb[20].mxu0 %v13749_v56  ;;  %v12224_v8 = vcombine.high %v2987_v3, %v2995_v0 }
 0x4fd   :  { %9496 = vmatmul.mubr.bf16.vlgmr.msra.gmra.mrb[20].mxu1 %v13749_v56  ;;  %9341 = vmatpush1.bf16.msra.mxu0 %v12125_v7  ;;  %v12222_v7 = vcombine.high %v2986_v1, %v2994_v2 }
 0x4fe   :  { %9372 = vmatprep.mubr.bf16.mxu0 %v13770_v36  ;;  %9505 = vmatpush1.bf16.msra.mxu1 %v12127_v10  ;;  %v3010_v10 = vld [vmem:[#allocation11 + $0x13e0] sm:$0xff] }
 0x4ff   :  { %9536 = vmatprep.mubr.bf16.mxu1 %v13770_v36  ;;  %9342 = vmatprep.subr.bf16.mxu0 %v12142_v11  ;;  %v3003_v11 = vld [vmem:[#allocation11 + $0x13a8] sm:$0xff]  ;;  %v12238_v27 = vcombine.high %v3002_v30, %v3010_v10  ;;  %v12237_v13 = vcombine.low %v3002_v30, %v3010_v10 }
 0x500   :  { %9506 = vmatprep.subr.bf16.mxu1 %v12144_v46  ;;  %v12223_v46 = vcombine.low %v2987_v3, %v2995_v0  ;;  %v12240_v18 = vcombine.high %v3003_v11, %v3011_v12  ;;  %v12239_v25 = vcombine.low %v3003_v11, %v3011_v12 }
 0x501   :  { %9343 = vmatpush1.bf16.msra.mxu0 %v12141_v15  ;;  %v3018_v15 = vld [vmem:[#allocation11 + $0x1420] sm:$0xff] }
 0x502   :  { %9507 = vmatpush1.bf16.msra.mxu1 %v12143_v19  ;;  %9344 = vmatprep.subr.bf16.mxu0 %v12158_v22  ;;  %v3026_v19 = vld [vmem:[#allocation11 + $0x1460] sm:$0xff]  ;;  %v3019_v22 = vld [vmem:[#allocation11 + $0x1428] sm:$0xff] }
 0x503   :  { %9508 = vmatprep.subr.bf16.mxu1 %v12160_v23  ;;  %v3027_v23 = vld [vmem:[#allocation11 + $0x1468] sm:$0xff]  ;;  %v12254_v28 = vcombine.high %v3018_v15, %v3026_v19  ;;  %v12253_v37 = vcombine.low %v3018_v15, %v3026_v19 }
 0x504   :  { %v12256_v29 = vcombine.high %v3019_v22, %v3027_v23  ;;  %v12255_v38 = vcombine.low %v3019_v22, %v3027_v23 }
 0x505   :  { %9345 = vmatpush1.bf16.msra.mxu0 %v12157_v31  ;;  %v3034_v31 = vld [vmem:[#allocation11 + $0x14a0] sm:$0xff] }
 0x506   :  { %9509 = vmatpush1.bf16.msra.mxu1 %v12159_v32  ;;  %9346 = vmatprep.subr.bf16.mxu0 %v12174_v33  ;;  %v3042_v32 = vld [vmem:[#allocation11 + $0x14e0] sm:$0xff]  ;;  %v3035_v33 = vld [vmem:[#allocation11 + $0x14a8] sm:$0xff] }
 0x507   :  { %9510 = vmatprep.subr.bf16.mxu1 %v12176_v34  ;;  %v3043_v34 = vld [vmem:[#allocation11 + $0x14e8] sm:$0xff]  ;;  %v12270_v41 = vcombine.high %v3034_v31, %v3042_v32  ;;  %v12269_v9 = vcombine.low %v3034_v31, %v3042_v32 }
 0x508   :  { %v12272_v42 = vcombine.high %v3035_v33, %v3043_v34  ;;  %v12271_v63 = vcombine.low %v3035_v33, %v3043_v34 }
 0x509   :  { %9347 = vmatpush1.bf16.msra.mxu0 %v12173_v43  ;;  %v3050_v43 = vld [vmem:[#allocation11 + $0x1520] sm:$0xff] }
 0x50a   :  { %9511 = vmatpush1.bf16.msra.mxu1 %v12175_v48  ;;  %9348 = vmatprep.subr.bf16.mxu0 %v12190_v49  ;;  %v3058_v48 = vld [vmem:[#allocation11 + $0x1560] sm:$0xff]  ;;  %v3051_v49 = vld [vmem:[#allocation11 + $0x1528] sm:$0xff] }
 0x50b   :  { %9512 = vmatprep.subr.bf16.mxu1 %v12192_v52  ;;  %v3059_v52 = vld [vmem:[#allocation11 + $0x1568] sm:$0xff]  ;;  %v12286_v55 = vcombine.high %v3050_v43, %v3058_v48  ;;  %v12285_v1 = vcombine.low %v3050_v43, %v3058_v48 }
 0x50c   :  { %v12288_v58 = vcombine.high %v3051_v49, %v3059_v52  ;;  %v12287_v2 = vcombine.low %v3051_v49, %v3059_v52 }
 0x50d   :  { %9349 = vmatpush1.bf16.msra.mxu0 %v12189_v59  ;;  %v3066_v59 = vld [vmem:[#allocation11 + $0x15a0] sm:$0xff] }
 0x50e   :  { %9513 = vmatpush1.bf16.msra.mxu1 %v12191_v44  ;;  %9350 = vmatprep.subr.bf16.mxu0 %v12206_v60  ;;  %v3074_v44 = vld [vmem:[#allocation11 + $0x15e0] sm:$0xff]  ;;  %v3067_v60 = vld [vmem:[#allocation11 + $0x15a8] sm:$0xff] }
 0x50f   :  { %9514 = vmatprep.subr.bf16.mxu1 %v12208_v61  ;;  %v3075_v61 = vld [vmem:[#allocation11 + $0x15e8] sm:$0xff]  ;;  %v12302_v3 = vcombine.high %v3066_v59, %v3074_v44  ;;  %v12301_v30 = vcombine.low %v3066_v59, %v3074_v44 }
 0x510   :  { %v12304_v0 = vcombine.high %v3067_v60, %v3075_v61  ;;  %v12303_v10 = vcombine.low %v3067_v60, %v3075_v61 }
 0x511   :  { %9351 = vmatpush1.bf16.msra.mxu0 %v12205_v5  ;;  %v3082_v5 = vld [vmem:[#allocation11 + $0x1620] sm:$0xff] }
 0x512   :  { %9515 = vmatpush1.bf16.msra.mxu1 %v12207_v6  ;;  %9352 = vmatprep.subr.bf16.mxu0 %v12222_v7  ;;  %v3090_v6 = vld [vmem:[#allocation11 + $0x1660] sm:$0xff]  ;;  %v3083_v7 = vld [vmem:[#allocation11 + $0x1628] sm:$0xff] }
 0x513   :  { %9516 = vmatprep.subr.bf16.mxu1 %v12224_v8  ;;  %v3091_v8 = vld [vmem:[#allocation11 + $0x1668] sm:$0xff]  ;;  %v12318_v11 = vcombine.high %v3082_v5, %v3090_v6  ;;  %v12317_v15 = vcombine.low %v3082_v5, %v3090_v6 }
 0x514   :  { %v12320_v12 = vcombine.high %v3083_v7, %v3091_v8  ;;  %v12319_v19 = vcombine.low %v3083_v7, %v3091_v8  ;;  %v3171_v5 = vld [vmem:[#allocation11 + $0x18e8] sm:$0xff]  ;;  %v3178_v8 = vld [vmem:[#allocation11 + $0x1920] sm:$0xff] }
 0x515   :  { %9353 = vmatpush1.bf16.msra.mxu0 %v12221_v14  ;;  %v3098_v14 = vld [vmem:[#allocation11 + $0x16a0] sm:$0xff] }
 0x516   :  { %9517 = vmatpush1.bf16.msra.mxu1 %v12223_v46  ;;  %9354 = vmatprep.subr.bf16.mxu0 %v12238_v27  ;;  %v3106_v46 = vld [vmem:[#allocation11 + $0x16e0] sm:$0xff]  ;;  %v3099_v27 = vld [vmem:[#allocation11 + $0x16a8] sm:$0xff] }
 0x517   :  { %9518 = vmatprep.subr.bf16.mxu1 %v12240_v18  ;;  %v3107_v18 = vld [vmem:[#allocation11 + $0x16e8] sm:$0xff]  ;;  %v12334_v22 = vcombine.high %v3098_v14, %v3106_v46  ;;  %v12333_v31 = vcombine.low %v3098_v14, %v3106_v46 }
 0x518   :  { %v12336_v23 = vcombine.high %v3099_v27, %v3107_v18  ;;  %v12335_v32 = vcombine.low %v3099_v27, %v3107_v18 }
 0x519   :  { %9355 = vmatpush1.bf16.msra.mxu0 %v12237_v13  ;;  %v3114_v13 = vld [vmem:[#allocation11 + $0x1720] sm:$0xff] }
 0x51a   :  { %9519 = vmatpush1.bf16.msra.mxu1 %v12239_v25  ;;  %9356 = vmatprep.subr.bf16.mxu0 %v12254_v28  ;;  %v3122_v25 = vld [vmem:[#allocation11 + $0x1760] sm:$0xff]  ;;  %v3115_v28 = vld [vmem:[#allocation11 + $0x1728] sm:$0xff] }
 0x51b   :  { %9520 = vmatprep.subr.bf16.mxu1 %v12256_v29  ;;  %v3123_v29 = vld [vmem:[#allocation11 + $0x1768] sm:$0xff]  ;;  %v12350_v33 = vcombine.high %v3114_v13, %v3122_v25  ;;  %v12349_v43 = vcombine.low %v3114_v13, %v3122_v25 }
 0x51c   :  { %v12352_v34 = vcombine.high %v3115_v28, %v3123_v29  ;;  %v12351_v48 = vcombine.low %v3115_v28, %v3123_v29 }
 0x51d   :  { %9357 = vmatpush1.bf16.msra.mxu0 %v12253_v37  ;;  %v3130_v37 = vld [vmem:[#allocation11 + $0x17a0] sm:$0xff] }
 0x51e   :  { %9521 = vmatpush1.bf16.msra.mxu1 %v12255_v38  ;;  %9358 = vmatprep.subr.bf16.mxu0 %v12270_v41  ;;  %v3138_v38 = vld [vmem:[#allocation11 + $0x17e0] sm:$0xff]  ;;  %v3131_v41 = vld [vmem:[#allocation11 + $0x17a8] sm:$0xff] }
 0x51f   :  { %9522 = vmatprep.subr.bf16.mxu1 %v12272_v42  ;;  %v3139_v42 = vld [vmem:[#allocation11 + $0x17e8] sm:$0xff]  ;;  %v12366_v49 = vcombine.high %v3130_v37, %v3138_v38  ;;  %v12365_v59 = vcombine.low %v3130_v37, %v3138_v38 }
 0x520   :  { %v12368_v52 = vcombine.high %v3131_v41, %v3139_v42  ;;  %v12367_v44 = vcombine.low %v3131_v41, %v3139_v42 }
 0x521   :  { %9359 = vmatpush1.bf16.msra.mxu0 %v12269_v9  ;;  %v3146_v9 = vld [vmem:[#allocation11 + $0x1820] sm:$0xff] }
 0x522   :  { %9523 = vmatpush1.bf16.msra.mxu1 %v12271_v63  ;;  %9360 = vmatprep.subr.bf16.mxu0 %v12286_v55  ;;  %v3154_v63 = vld [vmem:[#allocation11 + $0x1860] sm:$0xff]  ;;  %v3147_v55 = vld [vmem:[#allocation11 + $0x1828] sm:$0xff] }
 0x523   :  { %9524 = vmatprep.subr.bf16.mxu1 %v12288_v58  ;;  %v3155_v58 = vld [vmem:[#allocation11 + $0x1868] sm:$0xff]  ;;  %v12382_v60 = vcombine.high %v3146_v9, %v3154_v63 }
 0x524   :  { %v12384_v61 = vcombine.high %v3147_v55, %v3155_v58  ;;  %v12383_v6 = vcombine.low %v3147_v55, %v3155_v58 }
 0x525   :  { %9361 = vmatpush1.bf16.msra.mxu0 %v12285_v1  ;;  %v3162_v1 = vld [vmem:[#allocation11 + $0x18a0] sm:$0xff] }
 0x526   :  { %9525 = vmatpush1.bf16.msra.mxu1 %v12287_v2  ;;  %9362 = vmatprep.subr.bf16.mxu0 %v12302_v3  ;;  %v3170_v2 = vld [vmem:[#allocation11 + $0x18e0] sm:$0xff]  ;;  %v12381_v3 = vcombine.low %v3146_v9, %v3154_v63 }
 0x527   :  { %9526 = vmatprep.subr.bf16.mxu1 %v12304_v0  ;;  %v3163_v0 = vld [vmem:[#allocation11 + $0x18a8] sm:$0xff]  ;;  %v12398_v7 = vcombine.high %v3162_v1, %v3170_v2  ;;  %v12397_v14 = vcombine.low %v3162_v1, %v3170_v2 }
 0x528   :  { %v12399_v46 = vcombine.low %v3163_v0, %v3171_v5 }
 0x529   :  { %9363 = vmatpush1.bf16.msra.mxu0 %v12301_v30  ;;  %v3186_v30 = vld [vmem:[#allocation11 + $0x1960] sm:$0xff] }
 0x52a   :  { %9527 = vmatpush1.bf16.msra.mxu1 %v12303_v10  ;;  %9364 = vmatprep.subr.bf16.mxu0 %v12318_v11  ;;  %v12400_v10 = vcombine.high %v3163_v0, %v3171_v5  ;;  %v3179_v11 = vld [vmem:[#allocation11 + $0x1928] sm:$0xff]  ;;  %v12414_v27 = vcombine.high %v3178_v8, %v3186_v30  ;;  %v12413_v13 = vcombine.low %v3178_v8, %v3186_v30 }
 0x52b   :  { %9528 = vmatprep.subr.bf16.mxu1 %v12320_v12  ;;  %v3187_v12 = vld [vmem:[#allocation11 + $0x1968] sm:$0xff] }
 0x52c   :  { %v12416_v18 = vcombine.high %v3179_v11, %v3187_v12  ;;  %v12415_v25 = vcombine.low %v3179_v11, %v3187_v12  ;;  %v3267_v11 = vld [vmem:[#allocation11 + $0x1be8] sm:$0xff] }
 0x52d   :  { %9365 = vmatpush1.bf16.msra.mxu0 %v12317_v15  ;;  %v3194_v15 = vld [vmem:[#allocation11 + $0x19a0] sm:$0xff] }
 0x52e   :  { %9529 = vmatpush1.bf16.msra.mxu1 %v12319_v19  ;;  %9366 = vmatprep.subr.bf16.mxu0 %v12334_v22  ;;  %v3202_v19 = vld [vmem:[#allocation11 + $0x19e0] sm:$0xff]  ;;  %v3195_v22 = vld [vmem:[#allocation11 + $0x19a8] sm:$0xff] }
 0x52f   :  { %9530 = vmatprep.subr.bf16.mxu1 %v12336_v23  ;;  %v3203_v23 = vld [vmem:[#allocation11 + $0x19e8] sm:$0xff]  ;;  %v12430_v28 = vcombine.high %v3194_v15, %v3202_v19  ;;  %v12429_v37 = vcombine.low %v3194_v15, %v3202_v19 }
 0x530   :  { %v12432_v29 = vcombine.high %v3195_v22, %v3203_v23  ;;  %v12431_v38 = vcombine.low %v3195_v22, %v3203_v23 }
 0x531   :  { %9367 = vmatpush1.bf16.msra.mxu0 %v12333_v31  ;;  %v3210_v31 = vld [vmem:[#allocation11 + $0x1a20] sm:$0xff] }
 0x532   :  { %9531 = vmatpush1.bf16.msra.mxu1 %v12335_v32  ;;  %9368 = vmatprep.subr.bf16.mxu0 %v12350_v33  ;;  %v3218_v32 = vld [vmem:[#allocation11 + $0x1a60] sm:$0xff]  ;;  %v3211_v33 = vld [vmem:[#allocation11 + $0x1a28] sm:$0xff] }
 0x533   :  { %9532 = vmatprep.subr.bf16.mxu1 %v12352_v34  ;;  %v3219_v34 = vld [vmem:[#allocation11 + $0x1a68] sm:$0xff]  ;;  %v12446_v41 = vcombine.high %v3210_v31, %v3218_v32  ;;  %v12445_v9 = vcombine.low %v3210_v31, %v3218_v32 }
 0x534   :  { %v12448_v42 = vcombine.high %v3211_v33, %v3219_v34  ;;  %v12447_v63 = vcombine.low %v3211_v33, %v3219_v34 }
 0x535   :  { %9369 = vmatpush1.bf16.msra.mxu0 %v12349_v43  ;;  %v3226_v43 = vld [vmem:[#allocation11 + $0x1aa0] sm:$0xff] }
 0x536   :  { %9533 = vmatpush1.bf16.msra.mxu1 %v12351_v48  ;;  %9370 = vmatprep.subr.bf16.mxu0 %v12366_v49  ;;  %v3234_v48 = vld [vmem:[#allocation11 + $0x1ae0] sm:$0xff]  ;;  %v3227_v49 = vld [vmem:[#allocation11 + $0x1aa8] sm:$0xff] }
 0x537   :  { %9534 = vmatprep.subr.bf16.mxu1 %v12368_v52  ;;  %v3235_v52 = vld [vmem:[#allocation11 + $0x1ae8] sm:$0xff]  ;;  %v12462_v55 = vcombine.high %v3226_v43, %v3234_v48  ;;  %v12461_v1 = vcombine.low %v3226_v43, %v3234_v48 }
 0x538   :  { %v12464_v58 = vcombine.high %v3227_v49, %v3235_v52  ;;  %v12463_v2 = vcombine.low %v3227_v49, %v3235_v52 }
 0x539   :  { %9371 = vmatpush1.bf16.msra.mxu0 %v12365_v59  ;;  %v3242_v59 = vld [vmem:[#allocation11 + $0x1b20] sm:$0xff] }
 0x53a   :  { %9535 = vmatpush1.bf16.msra.mxu1 %v12367_v44  ;;  %9381 = vmatprep.subr.bf16.mxu0 %v12382_v60  ;;  %v3250_v44 = vld [vmem:[#allocation11 + $0x1b60] sm:$0xff]  ;;  %v3243_v60 = vld [vmem:[#allocation11 + $0x1b28] sm:$0xff] }
 0x53b   :  { %9545 = vmatprep.subr.bf16.mxu1 %v12384_v61  ;;  %v3251_v61 = vld [vmem:[#allocation11 + $0x1b68] sm:$0xff] }
 0x53c   :  { %9373 = vmatmul.mubr.bf16.vlgmr.msra.gmra.mrb[20].mxu0 %v13772_v39  ;;  %v12480_v5 = vcombine.high %v3243_v60, %v3251_v61  ;;  %v12479_v15 = vcombine.low %v3243_v60, %v3251_v61 }
 0x53d   :  { %9537 = vmatmul.mubr.bf16.vlgmr.msra.gmra.mrb[20].mxu1 %v13772_v39  ;;  %9382 = vmatpush1.bf16.msra.mxu0 %v12381_v3  ;;  %v12478_v3 = vcombine.high %v3242_v59, %v3250_v44 }
 0x53e   :  { %9413 = vmatprep.mubr.bf16.mxu0 %v13776_v50  ;;  %9546 = vmatpush1.bf16.msra.mxu1 %v12383_v6  ;;  %v3258_v6 = vld [vmem:[#allocation11 + $0x1ba0] sm:$0xff] }
 0x53f   :  { %9577 = vmatprep.mubr.bf16.mxu1 %v13776_v50  ;;  %9383 = vmatprep.subr.bf16.mxu0 %v12398_v7  ;;  %v3266_v7 = vld [vmem:[#allocation11 + $0x1be0] sm:$0xff] }
 0x540   :  { %9547 = vmatprep.subr.bf16.mxu1 %v12400_v10  ;;  %v3259_v10 = vld [vmem:[#allocation11 + $0x1ba8] sm:$0xff]  ;;  %v12494_v19 = vcombine.high %v3258_v6, %v3266_v7  ;;  %v12493_v31 = vcombine.low %v3258_v6, %v3266_v7 }
 0x541   :  { %9384 = vmatpush1.bf16.msra.mxu0 %v12397_v14  ;;  %v12496_v23 = vcombine.high %v3259_v10, %v3267_v11  ;;  %v12495_v32 = vcombine.low %v3259_v10, %v3267_v11 }
 0x542   :  { %9548 = vmatpush1.bf16.msra.mxu1 %v12399_v46  ;;  %9385 = vmatprep.subr.bf16.mxu0 %v12414_v27  ;;  %v12477_v46 = vcombine.low %v3242_v59, %v3250_v44 }
 0x543   :  { %9549 = vmatprep.subr.bf16.mxu1 %v12416_v18 }
 0x545   :  { %9386 = vmatpush1.bf16.msra.mxu0 %v12413_v13  ;;  %v3274_v13 = vld [vmem:[#allocation11 + $0x1c20] sm:$0xff] }
 0x546   :  { %9550 = vmatpush1.bf16.msra.mxu1 %v12415_v25  ;;  %9387 = vmatprep.subr.bf16.mxu0 %v12430_v28  ;;  %v3282_v25 = vld [vmem:[#allocation11 + $0x1c60] sm:$0xff]  ;;  %v3275_v28 = vld [vmem:[#allocation11 + $0x1c28] sm:$0xff] }
 0x547   :  { %9551 = vmatprep.subr.bf16.mxu1 %v12432_v29  ;;  %v3283_v29 = vld [vmem:[#allocation11 + $0x1c68] sm:$0xff]  ;;  %v12510_v33 = vcombine.high %v3274_v13, %v3282_v25  ;;  %v12509_v43 = vcombine.low %v3274_v13, %v3282_v25  ;;  %v3354_v13 = vld [vmem:[#allocation11 + $0x1ea0] sm:$0xff] }
 0x548   :  { %v12512_v34 = vcombine.high %v3275_v28, %v3283_v29  ;;  %v12511_v48 = vcombine.low %v3275_v28, %v3283_v29  ;;  %v3362_v25 = vld [vmem:[#allocation11 + $0x1ee0] sm:$0xff]  ;;  %v3355_v28 = vld [vmem:[#allocation11 + $0x1ea8] sm:$0xff] }
 0x549   :  { %9388 = vmatpush1.bf16.msra.mxu0 %v12429_v37  ;;  %v3290_v37 = vld [vmem:[#allocation11 + $0x1ca0] sm:$0xff]  ;;  %v3363_v29 = vld [vmem:[#allocation11 + $0x1ee8] sm:$0xff] }
 0x54a   :  { %9552 = vmatpush1.bf16.msra.mxu1 %v12431_v38  ;;  %9389 = vmatprep.subr.bf16.mxu0 %v12446_v41  ;;  %v3298_v38 = vld [vmem:[#allocation11 + $0x1ce0] sm:$0xff]  ;;  %v3291_v41 = vld [vmem:[#allocation11 + $0x1ca8] sm:$0xff] }
 0x54b   :  { %9553 = vmatprep.subr.bf16.mxu1 %v12448_v42  ;;  %v3299_v42 = vld [vmem:[#allocation11 + $0x1ce8] sm:$0xff]  ;;  %v12526_v49 = vcombine.high %v3290_v37, %v3298_v38  ;;  %v12525_v59 = vcombine.low %v3290_v37, %v3298_v38  ;;  %v3370_v37 = vld [vmem:[#allocation11 + $0x1f20] sm:$0xff] }
 0x54c   :  { %v12528_v52 = vcombine.high %v3291_v41, %v3299_v42  ;;  %v12527_v44 = vcombine.low %v3291_v41, %v3299_v42  ;;  %v3378_v38 = vld [vmem:[#allocation11 + $0x1f60] sm:$0xff]  ;;  %v3371_v41 = vld [vmem:[#allocation11 + $0x1f28] sm:$0xff] }
 0x54d   :  { %9390 = vmatpush1.bf16.msra.mxu0 %v12445_v9  ;;  %v3306_v9 = vld [vmem:[#allocation11 + $0x1d20] sm:$0xff]  ;;  %v3379_v42 = vld [vmem:[#allocation11 + $0x1f68] sm:$0xff] }
 0x54e   :  { %9554 = vmatpush1.bf16.msra.mxu1 %v12447_v63  ;;  %9391 = vmatprep.subr.bf16.mxu0 %v12462_v55  ;;  %v3314_v63 = vld [vmem:[#allocation11 + $0x1d60] sm:$0xff]  ;;  %v3307_v55 = vld [vmem:[#allocation11 + $0x1d28] sm:$0xff] }
 0x54f   :  { %v13829_v0 = vpop.f32.mrb[16].mxu0  ;;  %9555 = vmatprep.subr.bf16.mxu1 %v12464_v58  ;;  %v3315_v58 = vld [vmem:[#allocation11 + $0x1d68] sm:$0xff]  ;;  %v12542_v60 = vcombine.high %v3306_v9, %v3314_v63  ;;  %v12541_v6 = vcombine.low %v3306_v9, %v3314_v63  ;;  %v3386_v9 = vld [vmem:[#allocation11 + $0x1fa0] sm:$0xff] }
 0x550   :  { %v13831_v8 = vpop.f32.mrb[16].mxu1  ;;  %v13833_v30 = vpop.f32.mrb[17].mxu0  ;;  %v12544_v61 = vcombine.high %v3307_v55, %v3315_v58  ;;  %v12543_v7 = vcombine.low %v3307_v55, %v3315_v58  ;;  %v3394_v63 = vld [vmem:[#allocation11 + $0x1fe0] sm:$0xff]  ;;  %v3387_v55 = vld [vmem:[#allocation11 + $0x1fa8] sm:$0xff] }
 0x551   :  { %v13835_v12 = vpop.f32.mrb[17].mxu1  ;;  %v9091_v14 = vpop.f32.mrb[18].mxu0  ;;  %9392 = vmatpush1.bf16.msra.mxu0 %v12461_v1  ;;  %v3322_v1 = vld [vmem:[#allocation11 + $0x1da0] sm:$0xff]  ;;  %v3395_v58 = vld [vmem:[#allocation11 + $0x1fe8] sm:$0xff] }
 0x552   :  { %v9255_v27 = vpop.f32.mrb[18].mxu1  ;;  %9556 = vmatpush1.bf16.msra.mxu1 %v12463_v2  ;;  %v9092_v18 = vpop.f32.mrb[19].mxu0  ;;  %9393 = vmatprep.subr.bf16.mxu0 %v12478_v3  ;;  %v3330_v2 = vld [vmem:[#allocation11 + $0x1de0] sm:$0xff]  ;;  %v3323_v3 = vld [vmem:[#allocation11 + $0x1da8] sm:$0xff] }
 0x553   :  { %v9256_v22 = vpop.f32.mrb[19].mxu1  ;;  %9557 = vmatprep.subr.bf16.mxu1 %v12480_v5  ;;  %v3331_v5 = vld [vmem:[#allocation11 + $0x1de8] sm:$0xff]  ;;  %v12558_v10 = vcombine.high %v3322_v1, %v3330_v2  ;;  %v3338_v14 = vld [vmem:[#allocation11 + $0x1e20] sm:$0xff] }
 0x554   :  { %v12560_v11 = vcombine.high %v3323_v3, %v3331_v5  ;;  %v3339_v27 = vld [vmem:[#allocation11 + $0x1e28] sm:$0xff] }
 0x555   :  { %9394 = vmatpush1.bf16.msra.mxu0 %v12477_v46  ;;  %v3346_v46 = vld [vmem:[#allocation11 + $0x1e60] sm:$0xff]  ;;  %v3347_v18 = vld [vmem:[#allocation11 + $0x1e68] sm:$0xff] }
 0x556   :  { %9558 = vmatpush1.bf16.msra.mxu1 %v12479_v15  ;;  %9395 = vmatprep.subr.bf16.mxu0 %v12494_v19  ;;  %v12557_v15 = vcombine.low %v3322_v1, %v3330_v2  ;;  %v12559_v19 = vcombine.low %v3323_v3, %v3331_v5  ;;  %v12574_v22 = vcombine.high %v3338_v14, %v3346_v46  ;;  %v2380_v1 = vld [vmem:[#allocation11 + $0x30] sm:$0xff]  ;;  %v2381_v3 = vld [vmem:[#allocation11 + $0x38] sm:$0xff] }
 0x557   :  { %9559 = vmatprep.subr.bf16.mxu1 %v12496_v23  ;;  %v12576_v23 = vcombine.high %v3339_v27, %v3347_v18  ;;  %v2388_v2 = vld [vmem:[#allocation11 + $0x70] sm:$0xff]  ;;  %v2389_v5 = vld [vmem:[#allocation11 + $0x78] sm:$0xff] }
 0x559   :  { %9396 = vmatpush1.bf16.msra.mxu0 %v12493_v31  ;;  %v12573_v31 = vcombine.low %v3338_v14, %v3346_v46  ;;  %v2396_v14 = vld [vmem:[#allocation11 + $0xb0] sm:$0xff] }
 0x55a   :  { %9560 = vmatpush1.bf16.msra.mxu1 %v12495_v32  ;;  %9397 = vmatprep.subr.bf16.mxu0 %v12510_v33  ;;  %v12575_v32 = vcombine.low %v3339_v27, %v3347_v18  ;;  %v12590_v33 = vcombine.high %v3354_v13, %v3362_v25  ;;  %v2404_v46 = vld [vmem:[#allocation11 + $0xf0] sm:$0xff]  ;;  %v11617_v27 = vcombine.low %v2380_v1, %v2388_v2  ;;  %v2397_v18 = vld [vmem:[#allocation11 + $0xb8] sm:$0xff] }
 0x55b   :  { %9561 = vmatprep.subr.bf16.mxu1 %v12512_v34  ;;  %v12592_v34 = vcombine.high %v3355_v28, %v3363_v29 }
 0x55d   :  { %9398 = vmatpush1.bf16.msra.mxu0 %v12509_v43  ;;  %v12589_v43 = vcombine.low %v3354_v13, %v3362_v25  ;;  %v2420_v13 = vld [vmem:[#allocation11 + $0x170] sm:$0xff] }
 0x55e   :  { %9562 = vmatpush1.bf16.msra.mxu1 %v12511_v48  ;;  %9399 = vmatprep.subr.bf16.mxu0 %v12526_v49  ;;  %v12591_v48 = vcombine.low %v3355_v28, %v3363_v29  ;;  %v12606_v49 = vcombine.high %v3370_v37, %v3378_v38  ;;  %v2413_v28 = vld [vmem:[#allocation11 + $0x138] sm:$0xff] }
 0x55f   :  { %9563 = vmatprep.subr.bf16.mxu1 %v12528_v52  ;;  %v12608_v52 = vcombine.high %v3371_v41, %v3379_v42  ;;  %v2421_v29 = vld [vmem:[#allocation11 + $0x178] sm:$0xff] }
 0x561   :  { %9400 = vmatpush1.bf16.msra.mxu0 %v12525_v59  ;;  %v12605_v59 = vcombine.low %v3370_v37, %v3378_v38  ;;  %v2428_v37 = vld [vmem:[#allocation11 + $0x1b0] sm:$0xff] }
 0x562   :  { %9564 = vmatpush1.bf16.msra.mxu1 %v12527_v44  ;;  %9401 = vmatprep.subr.bf16.mxu0 %v12542_v60  ;;  %v12607_v44 = vcombine.low %v3371_v41, %v3379_v42  ;;  %v12622_v60 = vcombine.high %v3386_v9, %v3394_v63  ;;  %v2436_v38 = vld [vmem:[#allocation11 + $0x1f0] sm:$0xff]  ;;  %v2429_v41 = vld [vmem:[#allocation11 + $0x1b8] sm:$0xff] }
 0x563   :  { %9565 = vmatprep.subr.bf16.mxu1 %v12544_v61  ;;  %v12624_v61 = vcombine.high %v3387_v55, %v3395_v58  ;;  %v2437_v42 = vld [vmem:[#allocation11 + $0x1f8] sm:$0xff] }
 0x565   :  { %9402 = vmatpush1.bf16.msra.mxu0 %v12541_v6  ;;  %v12621_v6 = vcombine.low %v3386_v9, %v3394_v63  ;;  %v2444_v9 = vld [vmem:[#allocation11 + $0x230] sm:$0xff] }
 0x566   :  { %9566 = vmatpush1.bf16.msra.mxu1 %v12543_v7  ;;  %9403 = vmatprep.subr.bf16.mxu0 %v12558_v10  ;;  %v12623_v7 = vcombine.low %v3387_v55, %v3395_v58  ;;  %v11618_v10 = vcombine.high %v2380_v1, %v2388_v2  ;;  %v2452_v63 = vld [vmem:[#allocation11 + $0x270] sm:$0xff]  ;;  %v2445_v55 = vld [vmem:[#allocation11 + $0x238] sm:$0xff] }
 0x567   :  { %9567 = vmatprep.subr.bf16.mxu1 %v12560_v11  ;;  %v11620_v11 = vcombine.high %v2381_v3, %v2389_v5  ;;  %v2453_v58 = vld [vmem:[#allocation11 + $0x278] sm:$0xff]  ;;  %v2468_v1 = vld [vmem:[#allocation11 + $0x2f0] sm:$0xff] }
 0x568   :  { %v2461_v2 = vld [vmem:[#allocation11 + $0x2b8] sm:$0xff] }
 0x569   :  { %9404 = vmatpush1.bf16.msra.mxu0 %v12557_v15  ;;  %v2405_v15 = vld [vmem:[#allocation11 + $0xf8] sm:$0xff] }
 0x56a   :  { %9568 = vmatpush1.bf16.msra.mxu1 %v12559_v19  ;;  %9405 = vmatprep.subr.bf16.mxu0 %v12574_v22  ;;  %v11619_v19 = vcombine.low %v2381_v3, %v2389_v5  ;;  %v11634_v22 = vcombine.high %v2396_v14, %v2404_v46  ;;  %v11636_v25 = vcombine.high %v2397_v18, %v2405_v15  ;;  %v2469_v3 = vld [vmem:[#allocation11 + $0x2f8] sm:$0xff] }
 0x56b   :  { %9569 = vmatprep.subr.bf16.mxu1 %v12576_v23  ;;  %v2412_v23 = vld [vmem:[#allocation11 + $0x130] sm:$0xff]  ;;  %v11681_v5 = vcombine.low %v2444_v9, %v2452_v63 }
 0x56d   :  { %9406 = vmatpush1.bf16.msra.mxu0 %v12573_v31  ;;  %v11633_v31 = vcombine.low %v2396_v14, %v2404_v46  ;;  %v2484_v14 = vld [vmem:[#allocation11 + $0x370] sm:$0xff]  ;;  %v2477_v46 = vld [vmem:[#allocation11 + $0x338] sm:$0xff] }
 0x56e   :  { %9570 = vmatpush1.bf16.msra.mxu1 %v12575_v32  ;;  %9407 = vmatprep.subr.bf16.mxu0 %v12590_v33  ;;  %v11635_v32 = vcombine.low %v2397_v18, %v2405_v15  ;;  %v11650_v33 = vcombine.high %v2412_v23, %v2420_v13  ;;  %v11699_v15 = vcombine.low %v2461_v2, %v2469_v3 }
 0x56f   :  { %9571 = vmatprep.subr.bf16.mxu1 %v12592_v34  ;;  %v11652_v34 = vcombine.high %v2413_v28, %v2421_v29 }
 0x571   :  { %9408 = vmatpush1.bf16.msra.mxu0 %v12589_v43  ;;  %v11649_v43 = vcombine.low %v2412_v23, %v2420_v13  ;;  %v2492_v23 = vld [vmem:[#allocation11 + $0x3b0] sm:$0xff] }
 0x572   :  { %9572 = vmatpush1.bf16.msra.mxu1 %v12591_v48  ;;  %9409 = vmatprep.subr.bf16.mxu0 %v12606_v49  ;;  %v11651_v48 = vcombine.low %v2413_v28, %v2421_v29  ;;  %v11666_v49 = vcombine.high %v2428_v37, %v2436_v38  ;;  %v2500_v13 = vld [vmem:[#allocation11 + $0x3f0] sm:$0xff]  ;;  %v2501_v28 = vld [vmem:[#allocation11 + $0x3f8] sm:$0xff] }
 0x573   :  { %9573 = vmatprep.subr.bf16.mxu1 %v12608_v52  ;;  %v11668_v52 = vcombine.high %v2429_v41, %v2437_v42 }
 0x575   :  { %9410 = vmatpush1.bf16.msra.mxu0 %v12605_v59  ;;  %v11667_v59 = vcombine.low %v2429_v41, %v2437_v42  ;;  %v2517_v41 = vld [vmem:[#allocation11 + $0x478] sm:$0xff]  ;;  %v11729_v42 = vcombine.low %v2492_v23, %v2500_v13 }
 0x576   :  { %9574 = vmatpush1.bf16.msra.mxu1 %v12607_v44  ;;  %9411 = vmatprep.subr.bf16.mxu0 %v12622_v60  ;;  %v11682_v44 = vcombine.high %v2444_v9, %v2452_v63  ;;  %v11684_v60 = vcombine.high %v2445_v55, %v2453_v58  ;;  %v2532_v9 = vld [vmem:[#allocation11 + $0x4f0] sm:$0xff]  ;;  %v2525_v63 = vld [vmem:[#allocation11 + $0x4b8] sm:$0xff] }
 0x577   :  { %9575 = vmatprep.subr.bf16.mxu1 %v12624_v61  ;;  %v2460_v61 = vld [vmem:[#allocation11 + $0x2b0] sm:$0xff] }
 0x578   :  { %v11697_v18 = vcombine.low %v2460_v61, %v2468_v1 }
 0x579   :  { %9412 = vmatpush1.bf16.msra.mxu0 %v12621_v6  ;;  %v11683_v6 = vcombine.low %v2445_v55, %v2453_v58  ;;  %v2533_v55 = vld [vmem:[#allocation11 + $0x4f8] sm:$0xff] }
 0x57a   :  { %9576 = vmatpush1.bf16.msra.mxu1 %v12623_v7  ;;  %9586 = vmatprep.subr.bf16.mxu0 %v11618_v10  ;;  %v11698_v7 = vcombine.high %v2460_v61, %v2468_v1  ;;  %v11700_v10 = vcombine.high %v2461_v2, %v2469_v3  ;;  %v2548_v61 = vld [vmem:[#allocation11 + $0x570] sm:$0xff]  ;;  %v2541_v1 = vld [vmem:[#allocation11 + $0x538] sm:$0xff] }
 0x57b   :  { %9750 = vmatprep.subr.bf16.mxu1 %v11620_v11  ;;  %v2476_v11 = vld [vmem:[#allocation11 + $0x330] sm:$0xff]  ;;  %v2549_v2 = vld [vmem:[#allocation11 + $0x578] sm:$0xff] }
 0x57c   :  { %9414 = vmatmul.mubr.bf16.vlgmr.msra.gmra.mrb[20].mxu0 %v13787_v4  ;;  %v11713_v29 = vcombine.low %v2476_v11, %v2484_v14 }
 0x57d   :  { %9578 = vmatmul.mubr.bf16.vlgmr.msra.gmra.mrb[20].mxu1 %v13787_v4  ;;  %9587 = vmatpush1.bf16.msra.mxu0 %v11617_v27  ;;  %v2485_v27 = vld [vmem:[#allocation11 + $0x378] sm:$0xff] }
 0x57e   :  { %9618 = vmatprep.mubr.bf16.mxu0 %v13734_v24  ;;  %9751 = vmatpush1.bf16.msra.mxu1 %v11619_v19  ;;  %v11714_v19 = vcombine.high %v2476_v11, %v2484_v14  ;;  %v2564_v11 = vld [vmem:[#allocation11 + $0x5f0] sm:$0xff]  ;;  %v2557_v14 = vld [vmem:[#allocation11 + $0x5b8] sm:$0xff] }
 0x57f   :  { %9782 = vmatprep.mubr.bf16.mxu1 %v13734_v24  ;;  %9588 = vmatprep.subr.bf16.mxu0 %v11634_v22  ;;  %v11665_v24 = vcombine.low %v2428_v37, %v2436_v38  ;;  %v11716_v22 = vcombine.high %v2477_v46, %v2485_v27  ;;  %v2516_v37 = vld [vmem:[#allocation11 + $0x470] sm:$0xff]  ;;  %v2509_v38 = vld [vmem:[#allocation11 + $0x438] sm:$0xff] }
 0x580   :  { %9752 = vmatprep.subr.bf16.mxu1 %v11636_v25  ;;  %v2493_v25 = vld [vmem:[#allocation11 + $0x3b8] sm:$0xff] }
 0x581   :  { %9589 = vmatpush1.bf16.msra.mxu0 %v11633_v31  ;;  %v11715_v31 = vcombine.low %v2477_v46, %v2485_v27  ;;  %v2565_v46 = vld [vmem:[#allocation11 + $0x5f8] sm:$0xff] }
 0x582   :  { %9753 = vmatpush1.bf16.msra.mxu1 %v11635_v32  ;;  %9590 = vmatprep.subr.bf16.mxu0 %v11650_v33  ;;  %v11730_v32 = vcombine.high %v2492_v23, %v2500_v13  ;;  %v11732_v33 = vcombine.high %v2493_v25, %v2501_v28  ;;  %v2580_v23 = vld [vmem:[#allocation11 + $0x670] sm:$0xff]  ;;  %v2573_v13 = vld [vmem:[#allocation11 + $0x638] sm:$0xff] }
 0x583   :  { %9754 = vmatprep.subr.bf16.mxu1 %v11652_v34  ;;  %v2508_v34 = vld [vmem:[#allocation11 + $0x430] sm:$0xff] }
 0x584   :  { %v11745_v58 = vcombine.low %v2508_v34, %v2516_v37 }
 0x585   :  { %9591 = vmatpush1.bf16.msra.mxu0 %v11649_v43  ;;  %v11731_v43 = vcombine.low %v2493_v25, %v2501_v28  ;;  %v2581_v25 = vld [vmem:[#allocation11 + $0x678] sm:$0xff] }
 0x586   :  { %9755 = vmatpush1.bf16.msra.mxu1 %v11651_v48  ;;  %9592 = vmatprep.subr.bf16.mxu0 %v11666_v49  ;;  %v11746_v48 = vcombine.high %v2508_v34, %v2516_v37  ;;  %v11748_v49 = vcombine.high %v2509_v38, %v2517_v41  ;;  %v2596_v34 = vld [vmem:[#allocation11 + $0x6f0] sm:$0xff]  ;;  %v2589_v37 = vld [vmem:[#allocation11 + $0x6b8] sm:$0xff] }
 0x587   :  { %9756 = vmatprep.subr.bf16.mxu1 %v11668_v52  ;;  %v2524_v52 = vld [vmem:[#allocation11 + $0x4b0] sm:$0xff] }
 0x588   :  { %v11761_v3 = vcombine.low %v2524_v52, %v2532_v9 }
 0x589   :  { %9593 = vmatpush1.bf16.msra.mxu0 %v11665_v24  ;;  %v11747_v24 = vcombine.low %v2509_v38, %v2517_v41  ;;  %v2597_v38 = vld [vmem:[#allocation11 + $0x6f8] sm:$0xff] }
 0x58a   :  { %9757 = vmatpush1.bf16.msra.mxu1 %v11667_v59  ;;  %9594 = vmatprep.subr.bf16.mxu0 %v11682_v44  ;;  %v11762_v59 = vcombine.high %v2524_v52, %v2532_v9  ;;  %v11764_v44 = vcombine.high %v2525_v63, %v2533_v55  ;;  %v2612_v52 = vld [vmem:[#allocation11 + $0x770] sm:$0xff]  ;;  %v2605_v9 = vld [vmem:[#allocation11 + $0x738] sm:$0xff] }
 0x58b   :  { %9758 = vmatprep.subr.bf16.mxu1 %v11684_v60  ;;  %v2540_v60 = vld [vmem:[#allocation11 + $0x530] sm:$0xff] }
 0x58c   :  { %v11777_v27 = vcombine.low %v2540_v60, %v2548_v61 }
 0x58d   :  { %9595 = vmatpush1.bf16.msra.mxu0 %v11681_v5  ;;  %v11763_v5 = vcombine.low %v2525_v63, %v2533_v55  ;;  %v2613_v63 = vld [vmem:[#allocation11 + $0x778] sm:$0xff] }
 0x58e   :  { %9759 = vmatpush1.bf16.msra.mxu1 %v11683_v6  ;;  %9596 = vmatprep.subr.bf16.mxu0 %v11698_v7  ;;  %v11778_v6 = vcombine.high %v2540_v60, %v2548_v61  ;;  %v11780_v7 = vcombine.high %v2541_v1, %v2549_v2  ;;  %v2628_v60 = vld [vmem:[#allocation11 + $0x7f0] sm:$0xff]  ;;  %v2621_v61 = vld [vmem:[#allocation11 + $0x7b8] sm:$0xff] }
 0x58f   :  { %9760 = vmatprep.subr.bf16.mxu1 %v11700_v10  ;;  %v2556_v10 = vld [vmem:[#allocation11 + $0x5b0] sm:$0xff] }
 0x590   :  { %v11793_v28 = vcombine.low %v2556_v10, %v2564_v11 }
 0x591   :  { %9597 = vmatpush1.bf16.msra.mxu0 %v11697_v18  ;;  %v11779_v18 = vcombine.low %v2541_v1, %v2549_v2  ;;  %v2629_v1 = vld [vmem:[#allocation11 + $0x7f8] sm:$0xff] }
 0x592   :  { %9761 = vmatpush1.bf16.msra.mxu1 %v11699_v15  ;;  %9598 = vmatprep.subr.bf16.mxu0 %v11714_v19  ;;  %v11794_v15 = vcombine.high %v2556_v10, %v2564_v11  ;;  %v11796_v19 = vcombine.high %v2557_v14, %v2565_v46  ;;  %v2644_v10 = vld [vmem:[#allocation11 + $0x870] sm:$0xff]  ;;  %v2637_v11 = vld [vmem:[#allocation11 + $0x838] sm:$0xff] }
 0x593   :  { %9762 = vmatprep.subr.bf16.mxu1 %v11716_v22  ;;  %v2572_v22 = vld [vmem:[#allocation11 + $0x630] sm:$0xff] }
 0x594   :  { %v11809_v41 = vcombine.low %v2572_v22, %v2580_v23 }
 0x595   :  { %9599 = vmatpush1.bf16.msra.mxu0 %v11713_v29  ;;  %v11795_v29 = vcombine.low %v2557_v14, %v2565_v46  ;;  %v2645_v14 = vld [vmem:[#allocation11 + $0x878] sm:$0xff] }
 0x596   :  { %9763 = vmatpush1.bf16.msra.mxu1 %v11715_v31  ;;  %9600 = vmatprep.subr.bf16.mxu0 %v11730_v32  ;;  %v11810_v31 = vcombine.high %v2572_v22, %v2580_v23  ;;  %v11812_v32 = vcombine.high %v2573_v13, %v2581_v25  ;;  %v2660_v22 = vld [vmem:[#allocation11 + $0x8f0] sm:$0xff] }
 0x597   :  { %9764 = vmatprep.subr.bf16.mxu1 %v11732_v33  ;;  %v2588_v33 = vld [vmem:[#allocation11 + $0x6b0] sm:$0xff] }
 0x598   :  { %v11825_v55 = vcombine.low %v2588_v33, %v2596_v34 }
 0x599   :  { %9601 = vmatpush1.bf16.msra.mxu0 %v11729_v42  ;;  %v11811_v42 = vcombine.low %v2573_v13, %v2581_v25  ;;  %v2653_v13 = vld [vmem:[#allocation11 + $0x8b8] sm:$0xff] }
 0x59a   :  { %9765 = vmatpush1.bf16.msra.mxu1 %v11731_v43  ;;  %9602 = vmatprep.subr.bf16.mxu0 %v11746_v48  ;;  %v11826_v43 = vcombine.high %v2588_v33, %v2596_v34  ;;  %v11828_v48 = vcombine.high %v2589_v37, %v2597_v38  ;;  %v2661_v25 = vld [vmem:[#allocation11 + $0x8f8] sm:$0xff] }
 0x59b   :  { %9766 = vmatprep.subr.bf16.mxu1 %v11748_v49  ;;  %v2604_v49 = vld [vmem:[#allocation11 + $0x730] sm:$0xff]  ;;  %v11892_v33 = vcombine.high %v2653_v13, %v2661_v25  ;;  %v2669_v34 = vld [vmem:[#allocation11 + $0x938] sm:$0xff] }
 0x59c   :  { %v11841_v2 = vcombine.low %v2604_v49, %v2612_v52 }
 0x59d   :  { %9603 = vmatpush1.bf16.msra.mxu0 %v11745_v58  ;;  %v11827_v58 = vcombine.low %v2589_v37, %v2597_v38  ;;  %v2677_v37 = vld [vmem:[#allocation11 + $0x978] sm:$0xff] }
 0x59e   :  { %9767 = vmatpush1.bf16.msra.mxu1 %v11747_v24  ;;  %9604 = vmatprep.subr.bf16.mxu0 %v11762_v59  ;;  %v11842_v24 = vcombine.high %v2604_v49, %v2612_v52  ;;  %v11844_v59 = vcombine.high %v2605_v9, %v2613_v63  ;;  %v2692_v49 = vld [vmem:[#allocation11 + $0x9f0] sm:$0xff]  ;;  %v2685_v52 = vld [vmem:[#allocation11 + $0x9b8] sm:$0xff] }
 0x59f   :  { %9768 = vmatprep.subr.bf16.mxu1 %v11764_v44  ;;  %v2620_v44 = vld [vmem:[#allocation11 + $0x7b0] sm:$0xff] }
 0x5a0   :  { %v11857_v46 = vcombine.low %v2620_v44, %v2628_v60 }
 0x5a1   :  { %9605 = vmatpush1.bf16.msra.mxu0 %v11761_v3  ;;  %v11843_v3 = vcombine.low %v2605_v9, %v2613_v63  ;;  %v2693_v9 = vld [vmem:[#allocation11 + $0x9f8] sm:$0xff] }
 0x5a2   :  { %9769 = vmatpush1.bf16.msra.mxu1 %v11763_v5  ;;  %9606 = vmatprep.subr.bf16.mxu0 %v11778_v6  ;;  %v11858_v5 = vcombine.high %v2620_v44, %v2628_v60  ;;  %v11860_v6 = vcombine.high %v2621_v61, %v2629_v1  ;;  %v2701_v44 = vld [vmem:[#allocation11 + $0xa38] sm:$0xff] }
 0x5a3   :  { %9770 = vmatprep.subr.bf16.mxu1 %v11780_v7  ;;  %v2636_v7 = vld [vmem:[#allocation11 + $0x830] sm:$0xff]  ;;  %v2709_v60 = vld [vmem:[#allocation11 + $0xa78] sm:$0xff] }
 0x5a4   :  { %v11873_v23 = vcombine.low %v2636_v7, %v2644_v10 }
 0x5a5   :  { %9607 = vmatpush1.bf16.msra.mxu0 %v11777_v27  ;;  %v11859_v27 = vcombine.low %v2621_v61, %v2629_v1  ;;  %v11923_v61 = vcombine.low %v2685_v52, %v2693_v9 }
 0x5a6   :  { %9771 = vmatpush1.bf16.msra.mxu1 %v11779_v18  ;;  %9608 = vmatprep.subr.bf16.mxu0 %v11794_v15  ;;  %v11874_v18 = vcombine.high %v2636_v7, %v2644_v10  ;;  %v11876_v15 = vcombine.high %v2637_v11, %v2645_v14  ;;  %v2725_v7 = vld [vmem:[#allocation11 + $0xaf8] sm:$0xff] }
 0x5a7   :  { %9772 = vmatprep.subr.bf16.mxu1 %v11796_v19  ;;  %v2652_v19 = vld [vmem:[#allocation11 + $0x8b0] sm:$0xff] }
 0x5a8   :  { %v11889_v38 = vcombine.low %v2652_v19, %v2660_v22 }
 0x5a9   :  { %9609 = vmatpush1.bf16.msra.mxu0 %v11793_v28  ;;  %v11875_v28 = vcombine.low %v2637_v11, %v2645_v14  ;;  %v11939_v11 = vcombine.low %v2701_v44, %v2709_v60 }
 0x5aa   :  { %9773 = vmatpush1.bf16.msra.mxu1 %v11795_v29  ;;  %9610 = vmatprep.subr.bf16.mxu0 %v11810_v31  ;;  %v11890_v29 = vcombine.high %v2652_v19, %v2660_v22  ;;  %v2668_v31 = vld [vmem:[#allocation11 + $0x930] sm:$0xff]  ;;  %v2741_v19 = vld [vmem:[#allocation11 + $0xb78] sm:$0xff] }
 0x5ab   :  { %9774 = vmatprep.subr.bf16.mxu1 %v11812_v32  ;;  %v2676_v32 = vld [vmem:[#allocation11 + $0x970] sm:$0xff] }
 0x5ac   :  { %v11905_v63 = vcombine.low %v2668_v31, %v2676_v32 }
 0x5ad   :  { %9611 = vmatpush1.bf16.msra.mxu0 %v11809_v41  ;;  %v11891_v41 = vcombine.low %v2653_v13, %v2661_v25 }
 0x5ae   :  { %9775 = vmatpush1.bf16.msra.mxu1 %v11811_v42  ;;  %9612 = vmatprep.subr.bf16.mxu0 %v11826_v43  ;;  %v11906_v42 = vcombine.high %v2668_v31, %v2676_v32  ;;  %v11908_v43 = vcombine.high %v2669_v34, %v2677_v37  ;;  %v2749_v31 = vld [vmem:[#allocation11 + $0xbb8] sm:$0xff] }
 0x5af   :  { %9776 = vmatprep.subr.bf16.mxu1 %v11828_v48  ;;  %v2684_v48 = vld [vmem:[#allocation11 + $0x9b0] sm:$0xff]  ;;  %v2757_v32 = vld [vmem:[#allocation11 + $0xbf8] sm:$0xff] }
 0x5b1   :  { %9613 = vmatpush1.bf16.msra.mxu0 %v11825_v55  ;;  %v11922_v55 = vcombine.high %v2684_v48, %v2692_v49 }
 0x5b2   :  { %9777 = vmatpush1.bf16.msra.mxu1 %v11827_v58  ;;  %9614 = vmatprep.subr.bf16.mxu0 %v11842_v24  ;;  %v11924_v58 = vcombine.high %v2685_v52, %v2693_v9  ;;  %v2700_v24 = vld [vmem:[#allocation11 + $0xa30] sm:$0xff]  ;;  %v11987_v52 = vcombine.low %v2749_v31, %v2757_v32 }
 0x5b3   :  { %9778 = vmatprep.subr.bf16.mxu1 %v11844_v59  ;;  %v2708_v59 = vld [vmem:[#allocation11 + $0xa70] sm:$0xff] }
 0x5b4   :  { %v11938_v1 = vcombine.high %v2700_v24, %v2708_v59  ;;  %v11937_v10 = vcombine.low %v2700_v24, %v2708_v59  ;;  %v2789_v24 = vld [vmem:[#allocation11 + $0xcf8] sm:$0xff] }
 0x5b5   :  { %9615 = vmatpush1.bf16.msra.mxu0 %v11841_v2  ;;  %v11940_v2 = vcombine.high %v2701_v44, %v2709_v60 }
 0x5b6   :  { %9779 = vmatpush1.bf16.msra.mxu1 %v11843_v3  ;;  %9616 = vmatprep.subr.bf16.mxu0 %v11858_v5  ;;  %v2716_v3 = vld [vmem:[#allocation11 + $0xab0] sm:$0xff] }
 0x5b7   :  { %9780 = vmatprep.subr.bf16.mxu1 %v11860_v6  ;;  %v2724_v5 = vld [vmem:[#allocation11 + $0xaf0] sm:$0xff]  ;;  %v2717_v6 = vld [vmem:[#allocation11 + $0xab8] sm:$0xff] }
 0x5b8   :  { %v11954_v14 = vcombine.high %v2716_v3, %v2724_v5  ;;  %v11953_v22 = vcombine.low %v2716_v3, %v2724_v5  ;;  %v2805_v3 = vld [vmem:[#allocation11 + $0xd78] sm:$0xff] }
 0x5b9   :  { %9617 = vmatpush1.bf16.msra.mxu0 %v11857_v46  ;;  %v11956_v46 = vcombine.high %v2717_v6, %v2725_v7 }
 0x5ba   :  { %9781 = vmatpush1.bf16.msra.mxu1 %v11859_v27  ;;  %9627 = vmatprep.subr.bf16.mxu0 %v11874_v18  ;;  %v2732_v27 = vld [vmem:[#allocation11 + $0xb30] sm:$0xff] }
 0x5bb   :  { %9791 = vmatprep.subr.bf16.mxu1 %v11876_v15  ;;  %v2740_v18 = vld [vmem:[#allocation11 + $0xb70] sm:$0xff]  ;;  %v2733_v15 = vld [vmem:[#allocation11 + $0xb38] sm:$0xff] }
 0x5bc   :  { %9619 = vmatmul.mubr.bf16.vlgmr.msra.gmra.mrb[24].mxu0 %v13736_v26  ;;  %v11970_v13 = vcombine.high %v2732_v27, %v2740_v18  ;;  %v11972_v25 = vcombine.high %v2733_v15, %v2741_v19 }
 0x5bd   :  { %9783 = vmatmul.mubr.bf16.vlgmr.msra.gmra.mrb[24].mxu1 %v13736_v26  ;;  %9628 = vmatpush1.bf16.msra.mxu0 %v11873_v23  ;;  %v11907_v26 = vcombine.low %v2669_v34, %v2677_v37  ;;  %v11955_v23 = vcombine.low %v2717_v6, %v2725_v7  ;;  %v11971_v34 = vcombine.low %v2733_v15, %v2741_v19 }
 0x5be   :  { %9659 = vmatprep.mubr.bf16.mxu0 %v13740_v35  ;;  %9792 = vmatpush1.bf16.msra.mxu1 %v11875_v28  ;;  %v2748_v28 = vld [vmem:[#allocation11 + $0xbb0] sm:$0xff] }
 0x5bf   :  { %9823 = vmatprep.mubr.bf16.mxu1 %v13740_v35  ;;  %9629 = vmatprep.subr.bf16.mxu0 %v11890_v29  ;;  %v11921_v35 = vcombine.low %v2684_v48, %v2692_v49  ;;  %v2756_v29 = vld [vmem:[#allocation11 + $0xbf0] sm:$0xff]  ;;  %v2773_v48 = vld [vmem:[#allocation11 + $0xc78] sm:$0xff] }
 0x5c0   :  { %9793 = vmatprep.subr.bf16.mxu1 %v11892_v33  ;;  %v11969_v33 = vcombine.low %v2732_v27, %v2740_v18  ;;  %v11986_v37 = vcombine.high %v2748_v28, %v2756_v29  ;;  %v11985_v49 = vcombine.low %v2748_v28, %v2756_v29  ;;  %v2821_v27 = vld [vmem:[#allocation11 + $0xdf8] sm:$0xff] }
 0x5c1   :  { %9630 = vmatpush1.bf16.msra.mxu0 %v11889_v38  ;;  %v11988_v38 = vcombine.high %v2749_v31, %v2757_v32  ;;  %v2837_v28 = vld [vmem:[#allocation11 + $0xe78] sm:$0xff] }
 0x5c2   :  { %9794 = vmatpush1.bf16.msra.mxu1 %v11891_v41  ;;  %9631 = vmatprep.subr.bf16.mxu0 %v11906_v42  ;;  %v2764_v41 = vld [vmem:[#allocation11 + $0xc30] sm:$0xff] }
 0x5c3   :  { %9795 = vmatprep.subr.bf16.mxu1 %v11908_v43  ;;  %v2772_v42 = vld [vmem:[#allocation11 + $0xc70] sm:$0xff]  ;;  %v2765_v43 = vld [vmem:[#allocation11 + $0xc38] sm:$0xff] }
 0x5c4   :  { %v12002_v9 = vcombine.high %v2764_v41, %v2772_v42  ;;  %v12001_v59 = vcombine.low %v2764_v41, %v2772_v42  ;;  %v12003_v44 = vcombine.low %v2765_v43, %v2773_v48  ;;  %v2853_v41 = vld [vmem:[#allocation11 + $0xef8] sm:$0xff] }
 0x5c5   :  { %9632 = vmatpush1.bf16.msra.mxu0 %v11905_v63  ;;  %v12004_v63 = vcombine.high %v2765_v43, %v2773_v48 }
 0x5c6   :  { %9796 = vmatpush1.bf16.msra.mxu1 %v11907_v26  ;;  %9633 = vmatprep.subr.bf16.mxu0 %v11922_v55  ;;  %v2780_v26 = vld [vmem:[#allocation11 + $0xcb0] sm:$0xff] }
 0x5c7   :  { %9797 = vmatprep.subr.bf16.mxu1 %v11924_v58  ;;  %v2788_v55 = vld [vmem:[#allocation11 + $0xcf0] sm:$0xff]  ;;  %v2781_v58 = vld [vmem:[#allocation11 + $0xcb8] sm:$0xff] }
 0x5c8   :  { %v12018_v60 = vcombine.high %v2780_v26, %v2788_v55  ;;  %v12017_v5 = vcombine.low %v2780_v26, %v2788_v55  ;;  %v12019_v6 = vcombine.low %v2781_v58, %v2789_v24  ;;  %v2869_v26 = vld [vmem:[#allocation11 + $0xf78] sm:$0xff] }
 0x5c9   :  { %9634 = vmatpush1.bf16.msra.mxu0 %v11921_v35  ;;  %v12020_v35 = vcombine.high %v2781_v58, %v2789_v24 }
 0x5ca   :  { %9798 = vmatpush1.bf16.msra.mxu1 %v11923_v61  ;;  %9635 = vmatprep.subr.bf16.mxu0 %v11938_v1  ;;  %v2796_v61 = vld [vmem:[#allocation11 + $0xd30] sm:$0xff] }
 0x5cb   :  { %9799 = vmatprep.subr.bf16.mxu1 %v11940_v2  ;;  %v2804_v1 = vld [vmem:[#allocation11 + $0xd70] sm:$0xff]  ;;  %v2797_v2 = vld [vmem:[#allocation11 + $0xd38] sm:$0xff] }
 0x5cc   :  { %v12034_v7 = vcombine.high %v2796_v61, %v2804_v1  ;;  %v12033_v18 = vcombine.low %v2796_v61, %v2804_v1  ;;  %v12035_v15 = vcombine.low %v2797_v2, %v2805_v3  ;;  %v2885_v61 = vld [vmem:[#allocation11 + $0xff8] sm:$0xff] }
 0x5cd   :  { %9636 = vmatpush1.bf16.msra.mxu0 %v11937_v10  ;;  %v12036_v10 = vcombine.high %v2797_v2, %v2805_v3 }
 0x5ce   :  { %9800 = vmatpush1.bf16.msra.mxu1 %v11939_v11  ;;  %9637 = vmatprep.subr.bf16.mxu0 %v11954_v14  ;;  %v2812_v11 = vld [vmem:[#allocation11 + $0xdb0] sm:$0xff] }
 0x5cf   :  { %9801 = vmatprep.subr.bf16.mxu1 %v11956_v46  ;;  %v2820_v14 = vld [vmem:[#allocation11 + $0xdf0] sm:$0xff]  ;;  %v2813_v46 = vld [vmem:[#allocation11 + $0xdb8] sm:$0xff] }
 0x5d0   :  { %v12050_v19 = vcombine.high %v2812_v11, %v2820_v14  ;;  %v12049_v29 = vcombine.low %v2812_v11, %v2820_v14  ;;  %v12051_v31 = vcombine.low %v2813_v46, %v2821_v27  ;;  %v2901_v11 = vld [vmem:[#allocation11 + $0x1078] sm:$0xff] }
 0x5d1   :  { %9638 = vmatpush1.bf16.msra.mxu0 %v11953_v22  ;;  %v12052_v22 = vcombine.high %v2813_v46, %v2821_v27 }
 0x5d2   :  { %9802 = vmatpush1.bf16.msra.mxu1 %v11955_v23  ;;  %9639 = vmatprep.subr.bf16.mxu0 %v11970_v13  ;;  %v2828_v23 = vld [vmem:[#allocation11 + $0xe30] sm:$0xff] }
 0x5d3   :  { %9803 = vmatprep.subr.bf16.mxu1 %v11972_v25  ;;  %v2836_v13 = vld [vmem:[#allocation11 + $0xe70] sm:$0xff]  ;;  %v2829_v25 = vld [vmem:[#allocation11 + $0xe38] sm:$0xff] }
 0x5d4   :  { %v12066_v32 = vcombine.high %v2828_v23, %v2836_v13  ;;  %v12065_v42 = vcombine.low %v2828_v23, %v2836_v13  ;;  %v12067_v43 = vcombine.low %v2829_v25, %v2837_v28  ;;  %v2909_v23 = vld [vmem:[#allocation11 + $0x10b8] sm:$0xff] }
 0x5d5   :  { %9640 = vmatpush1.bf16.msra.mxu0 %v11969_v33  ;;  %v12068_v33 = vcombine.high %v2829_v25, %v2837_v28  ;;  %v2917_v13 = vld [vmem:[#allocation11 + $0x10f8] sm:$0xff] }
 0x5d6   :  { %9804 = vmatpush1.bf16.msra.mxu1 %v11971_v34  ;;  %9641 = vmatprep.subr.bf16.mxu0 %v11986_v37  ;;  %v2844_v34 = vld [vmem:[#allocation11 + $0xeb0] sm:$0xff] }
 0x5d7   :  { %9805 = vmatprep.subr.bf16.mxu1 %v11988_v38  ;;  %v2852_v37 = vld [vmem:[#allocation11 + $0xef0] sm:$0xff]  ;;  %v2845_v38 = vld [vmem:[#allocation11 + $0xeb8] sm:$0xff] }
 0x5d8   :  { %v12082_v48 = vcombine.high %v2844_v34, %v2852_v37  ;;  %v12081_v55 = vcombine.low %v2844_v34, %v2852_v37  ;;  %v12083_v58 = vcombine.low %v2845_v38, %v2853_v41  ;;  %v2933_v34 = vld [vmem:[#allocation11 + $0x1178] sm:$0xff] }
 0x5d9   :  { %9642 = vmatpush1.bf16.msra.mxu0 %v11985_v49  ;;  %v12084_v49 = vcombine.high %v2845_v38, %v2853_v41  ;;  %v12147_v38 = vcombine.low %v2909_v23, %v2917_v13 }
 0x5da   :  { %9806 = vmatpush1.bf16.msra.mxu1 %v11987_v52  ;;  %9643 = vmatprep.subr.bf16.mxu0 %v12002_v9  ;;  %v2860_v52 = vld [vmem:[#allocation11 + $0xf30] sm:$0xff] }
 0x5db   :  { %9807 = vmatprep.subr.bf16.mxu1 %v12004_v63  ;;  %v2868_v9 = vld [vmem:[#allocation11 + $0xf70] sm:$0xff]  ;;  %v2861_v63 = vld [vmem:[#allocation11 + $0xf38] sm:$0xff] }
 0x5dc   :  { %v12098_v24 = vcombine.high %v2860_v52, %v2868_v9  ;;  %v12097_v1 = vcombine.low %v2860_v52, %v2868_v9  ;;  %v12099_v2 = vcombine.low %v2861_v63, %v2869_v26  ;;  %v2949_v52 = vld [vmem:[#allocation11 + $0x11f8] sm:$0xff] }
 0x5dd   :  { %9644 = vmatpush1.bf16.msra.mxu0 %v12001_v59  ;;  %v12100_v59 = vcombine.high %v2861_v63, %v2869_v26 }
 0x5de   :  { %9808 = vmatpush1.bf16.msra.mxu1 %v12003_v44  ;;  %9645 = vmatprep.subr.bf16.mxu0 %v12018_v60  ;;  %v2876_v44 = vld [vmem:[#allocation11 + $0xfb0] sm:$0xff] }
 0x5df   :  { %9809 = vmatprep.subr.bf16.mxu1 %v12020_v35  ;;  %v2884_v60 = vld [vmem:[#allocation11 + $0xff0] sm:$0xff]  ;;  %v2877_v35 = vld [vmem:[#allocation11 + $0xfb8] sm:$0xff] }
 0x5e0   :  { %v12114_v3 = vcombine.high %v2876_v44, %v2884_v60  ;;  %v12113_v14 = vcombine.low %v2876_v44, %v2884_v60  ;;  %v12115_v46 = vcombine.low %v2877_v35, %v2885_v61 }
 0x5e1   :  { %9646 = vmatpush1.bf16.msra.mxu0 %v12017_v5  ;;  %v12116_v5 = vcombine.high %v2877_v35, %v2885_v61  ;;  %v2972_v61 = vld [vmem:[#allocation11 + $0x12b0] sm:$0xff] }
 0x5e2   :  { %9810 = vmatpush1.bf16.msra.mxu1 %v12019_v6  ;;  %9647 = vmatprep.subr.bf16.mxu0 %v12034_v7  ;;  %v2892_v6 = vld [vmem:[#allocation11 + $0x1030] sm:$0xff] }
 0x5e3   :  { %9811 = vmatprep.subr.bf16.mxu1 %v12036_v10  ;;  %v2900_v7 = vld [vmem:[#allocation11 + $0x1070] sm:$0xff]  ;;  %v2893_v10 = vld [vmem:[#allocation11 + $0x1038] sm:$0xff] }
 0x5e4   :  { %v12130_v27 = vcombine.high %v2892_v6, %v2900_v7  ;;  %v12131_v25 = vcombine.low %v2893_v10, %v2901_v11 }
 0x5e5   :  { %9648 = vmatpush1.bf16.msra.mxu0 %v12033_v18  ;;  %v12132_v18 = vcombine.high %v2893_v10, %v2901_v11  ;;  %v2988_v11 = vld [vmem:[#allocation11 + $0x1330] sm:$0xff] }
 0x5e6   :  { %9812 = vmatpush1.bf16.msra.mxu1 %v12035_v15  ;;  %9649 = vmatprep.subr.bf16.mxu0 %v12050_v19  ;;  %v2908_v15 = vld [vmem:[#allocation11 + $0x10b0] sm:$0xff] }
 0x5e7   :  { %9813 = vmatprep.subr.bf16.mxu1 %v12052_v22  ;;  %v2916_v19 = vld [vmem:[#allocation11 + $0x10f0] sm:$0xff]  ;;  %v12129_v22 = vcombine.low %v2892_v6, %v2900_v7 }
 0x5e8   :  { %v12146_v28 = vcombine.high %v2908_v15, %v2916_v19  ;;  %v12145_v37 = vcombine.low %v2908_v15, %v2916_v19 }
 0x5e9   :  { %9650 = vmatpush1.bf16.msra.mxu0 %v12049_v29  ;;  %v2924_v29 = vld [vmem:[#allocation11 + $0x1130] sm:$0xff] }
 0x5ea   :  { %9814 = vmatpush1.bf16.msra.mxu1 %v12051_v31  ;;  %9651 = vmatprep.subr.bf16.mxu0 %v12066_v32  ;;  %v2932_v31 = vld [vmem:[#allocation11 + $0x1170] sm:$0xff]  ;;  %v12148_v32 = vcombine.high %v2909_v23, %v2917_v13 }
 0x5eb   :  { %9815 = vmatprep.subr.bf16.mxu1 %v12068_v33  ;;  %v2925_v33 = vld [vmem:[#allocation11 + $0x1138] sm:$0xff]  ;;  %v12162_v41 = vcombine.high %v2924_v29, %v2932_v31  ;;  %v12161_v9 = vcombine.low %v2924_v29, %v2932_v31  ;;  %v3004_v23 = vld [vmem:[#allocation11 + $0x13b0] sm:$0xff] }
 0x5ec   :  { %v3012_v13 = vld [vmem:[#allocation11 + $0x13f0] sm:$0xff] }
 0x5ed   :  { %9652 = vmatpush1.bf16.msra.mxu0 %v12065_v42  ;;  %v12164_v42 = vcombine.high %v2925_v33, %v2933_v34 }
 0x5ee   :  { %9816 = vmatpush1.bf16.msra.mxu1 %v12067_v43  ;;  %9653 = vmatprep.subr.bf16.mxu0 %v12082_v48  ;;  %v2940_v43 = vld [vmem:[#allocation11 + $0x11b0] sm:$0xff] }
 0x5ef   :  { %9817 = vmatprep.subr.bf16.mxu1 %v12084_v49  ;;  %v2948_v48 = vld [vmem:[#allocation11 + $0x11f0] sm:$0xff]  ;;  %v2941_v49 = vld [vmem:[#allocation11 + $0x11b8] sm:$0xff] }
 0x5f0   :  { %v12178_v63 = vcombine.high %v2940_v43, %v2948_v48  ;;  %v12180_v26 = vcombine.high %v2941_v49, %v2949_v52  ;;  %v12179_v44 = vcombine.low %v2941_v49, %v2949_v52  ;;  %v3036_v52 = vld [vmem:[#allocation11 + $0x14b0] sm:$0xff] }
 0x5f1   :  { %9654 = vmatpush1.bf16.msra.mxu0 %v12081_v55  ;;  %v2956_v55 = vld [vmem:[#allocation11 + $0x1230] sm:$0xff] }
 0x5f2   :  { %9818 = vmatpush1.bf16.msra.mxu1 %v12083_v58  ;;  %9655 = vmatprep.subr.bf16.mxu0 %v12098_v24  ;;  %v2964_v58 = vld [vmem:[#allocation11 + $0x1270] sm:$0xff]  ;;  %v2957_v24 = vld [vmem:[#allocation11 + $0x1238] sm:$0xff] }
 0x5f3   :  { %9819 = vmatprep.subr.bf16.mxu1 %v12100_v59  ;;  %v2965_v59 = vld [vmem:[#allocation11 + $0x1278] sm:$0xff]  ;;  %v12194_v60 = vcombine.high %v2956_v55, %v2964_v58 }
 0x5f4   :  { %v12196_v35 = vcombine.high %v2957_v24, %v2965_v59  ;;  %v12195_v6 = vcombine.low %v2957_v24, %v2965_v59  ;;  %v3052_v59 = vld [vmem:[#allocation11 + $0x1530] sm:$0xff] }
 0x5f5   :  { %9656 = vmatpush1.bf16.msra.mxu0 %v12097_v1  ;;  %v2980_v1 = vld [vmem:[#allocation11 + $0x12f0] sm:$0xff] }
 0x5f6   :  { %9820 = vmatpush1.bf16.msra.mxu1 %v12099_v2  ;;  %9657 = vmatprep.subr.bf16.mxu0 %v12114_v3  ;;  %v2973_v2 = vld [vmem:[#allocation11 + $0x12b8] sm:$0xff]  ;;  %v12210_v7 = vcombine.high %v2972_v61, %v2980_v1 }
 0x5f7   :  { %9821 = vmatprep.subr.bf16.mxu1 %v12116_v5  ;;  %v2981_v3 = vld [vmem:[#allocation11 + $0x12f8] sm:$0xff]  ;;  %v12193_v5 = vcombine.low %v2956_v55, %v2964_v58 }
 0x5f8   :  { %v12212_v10 = vcombine.high %v2973_v2, %v2981_v3  ;;  %v12211_v15 = vcombine.low %v2973_v2, %v2981_v3  ;;  %v3068_v3 = vld [vmem:[#allocation11 + $0x15b0] sm:$0xff] }
 0x5f9   :  { %9658 = vmatpush1.bf16.msra.mxu0 %v12113_v14  ;;  %v2996_v14 = vld [vmem:[#allocation11 + $0x1370] sm:$0xff] }
 0x5fa   :  { %9822 = vmatpush1.bf16.msra.mxu1 %v12115_v46  ;;  %9668 = vmatprep.subr.bf16.mxu0 %v12130_v27  ;;  %v2989_v46 = vld [vmem:[#allocation11 + $0x1338] sm:$0xff]  ;;  %v12226_v19 = vcombine.high %v2988_v11, %v2996_v14  ;;  %v12225_v29 = vcombine.low %v2988_v11, %v2996_v14 }
 0x5fb   :  { %9832 = vmatprep.subr.bf16.mxu1 %v12132_v18  ;;  %v2997_v27 = vld [vmem:[#allocation11 + $0x1378] sm:$0xff]  ;;  %v12209_v18 = vcombine.low %v2972_v61, %v2980_v1 }
 0x5fc   :  { %9660 = vmatmul.mubr.bf16.vlgmr.msra.gmra.mrb[24].mxu0 %v13749_v56  ;;  %v12227_v31 = vcombine.low %v2989_v46, %v2997_v27 }
 0x5fd   :  { %9824 = vmatmul.mubr.bf16.vlgmr.msra.gmra.mrb[24].mxu1 %v13749_v56  ;;  %9669 = vmatpush1.bf16.msra.mxu0 %v12129_v22  ;;  %v12163_v56 = vcombine.low %v2925_v33, %v2933_v34  ;;  %v12228_v22 = vcombine.high %v2989_v46, %v2997_v27  ;;  %v3020_v34 = vld [vmem:[#allocation11 + $0x1430] sm:$0xff] }
 0x5fe   :  { %9700 = vmatprep.mubr.bf16.mxu0 %v13770_v36  ;;  %9833 = vmatpush1.bf16.msra.mxu1 %v12131_v25  ;;  %v3005_v25 = vld [vmem:[#allocation11 + $0x13b8] sm:$0xff]  ;;  %v3084_v27 = vld [vmem:[#allocation11 + $0x1630] sm:$0xff] }
 0x5ff   :  { %9864 = vmatprep.mubr.bf16.mxu1 %v13770_v36  ;;  %9670 = vmatprep.subr.bf16.mxu0 %v12146_v28  ;;  %v12177_v36 = vcombine.low %v2940_v43, %v2948_v48  ;;  %v3013_v28 = vld [vmem:[#allocation11 + $0x13f8] sm:$0xff] }
 0x600   :  { %9834 = vmatprep.subr.bf16.mxu1 %v12148_v32  ;;  %v12242_v32 = vcombine.high %v3004_v23, %v3012_v13  ;;  %v12244_v33 = vcombine.high %v3005_v25, %v3013_v28  ;;  %v12243_v43 = vcombine.low %v3005_v25, %v3013_v28  ;;  %v3100_v28 = vld [vmem:[#allocation11 + $0x16b0] sm:$0xff] }
 0x601   :  { %9671 = vmatpush1.bf16.msra.mxu0 %v12145_v37  ;;  %v3028_v37 = vld [vmem:[#allocation11 + $0x1470] sm:$0xff] }
 0x602   :  { %9835 = vmatpush1.bf16.msra.mxu1 %v12147_v38  ;;  %9672 = vmatprep.subr.bf16.mxu0 %v12162_v41  ;;  %v3021_v38 = vld [vmem:[#allocation11 + $0x1438] sm:$0xff]  ;;  %v12258_v48 = vcombine.high %v3020_v34, %v3028_v37 }
 0x603   :  { %9836 = vmatprep.subr.bf16.mxu1 %v12164_v42  ;;  %v3029_v41 = vld [vmem:[#allocation11 + $0x1478] sm:$0xff]  ;;  %v12241_v42 = vcombine.low %v3004_v23, %v3012_v13 }
 0x604   :  { %v12260_v49 = vcombine.high %v3021_v38, %v3029_v41  ;;  %v12259_v55 = vcombine.low %v3021_v38, %v3029_v41  ;;  %v3116_v41 = vld [vmem:[#allocation11 + $0x1730] sm:$0xff] }
 0x605   :  { %9673 = vmatpush1.bf16.msra.mxu0 %v12161_v9  ;;  %v3044_v9 = vld [vmem:[#allocation11 + $0x14f0] sm:$0xff] }
 0x606   :  { %9837 = vmatpush1.bf16.msra.mxu1 %v12163_v56  ;;  %9674 = vmatprep.subr.bf16.mxu0 %v12178_v63  ;;  %v3037_v56 = vld [vmem:[#allocation11 + $0x14b8] sm:$0xff]  ;;  %v12274_v58 = vcombine.high %v3036_v52, %v3044_v9 }
 0x607   :  { %9838 = vmatprep.subr.bf16.mxu1 %v12180_v26  ;;  %v3045_v63 = vld [vmem:[#allocation11 + $0x14f8] sm:$0xff]  ;;  %v12257_v26 = vcombine.low %v3020_v34, %v3028_v37 }
 0x608   :  { %v12276_v24 = vcombine.high %v3037_v56, %v3045_v63  ;;  %v12275_v61 = vcombine.low %v3037_v56, %v3045_v63  ;;  %v3132_v63 = vld [vmem:[#allocation11 + $0x17b0] sm:$0xff] }
 0x609   :  { %9675 = vmatpush1.bf16.msra.mxu0 %v12177_v36  ;;  %v3060_v36 = vld [vmem:[#allocation11 + $0x1570] sm:$0xff] }
 0x60a   :  { %9839 = vmatpush1.bf16.msra.mxu1 %v12179_v44  ;;  %9676 = vmatprep.subr.bf16.mxu0 %v12194_v60  ;;  %v3053_v44 = vld [vmem:[#allocation11 + $0x1538] sm:$0xff]  ;;  %v12290_v1 = vcombine.high %v3052_v59, %v3060_v36 }
 0x60b   :  { %9840 = vmatprep.subr.bf16.mxu1 %v12196_v35  ;;  %v3061_v60 = vld [vmem:[#allocation11 + $0x1578] sm:$0xff]  ;;  %v12273_v35 = vcombine.low %v3036_v52, %v3044_v9 }
 0x60c   :  { %v12292_v2 = vcombine.high %v3053_v44, %v3061_v60  ;;  %v12291_v11 = vcombine.low %v3053_v44, %v3061_v60  ;;  %v3148_v60 = vld [vmem:[#allocation11 + $0x1830] sm:$0xff] }
 0x60d   :  { %9677 = vmatpush1.bf16.msra.mxu0 %v12193_v5  ;;  %v3076_v5 = vld [vmem:[#allocation11 + $0x15f0] sm:$0xff] }
 0x60e   :  { %9841 = vmatpush1.bf16.msra.mxu1 %v12195_v6  ;;  %9678 = vmatprep.subr.bf16.mxu0 %v12210_v7  ;;  %v3069_v6 = vld [vmem:[#allocation11 + $0x15b8] sm:$0xff]  ;;  %v12306_v14 = vcombine.high %v3068_v3, %v3076_v5 }
 0x60f   :  { %9842 = vmatprep.subr.bf16.mxu1 %v12212_v10  ;;  %v3077_v7 = vld [vmem:[#allocation11 + $0x15f8] sm:$0xff]  ;;  %v12289_v10 = vcombine.low %v3052_v59, %v3060_v36 }
 0x610   :  { %v12308_v46 = vcombine.high %v3069_v6, %v3077_v7  ;;  %v12307_v23 = vcombine.low %v3069_v6, %v3077_v7  ;;  %v3164_v7 = vld [vmem:[#allocation11 + $0x18b0] sm:$0xff] }
 0x611   :  { %9679 = vmatpush1.bf16.msra.mxu0 %v12209_v18  ;;  %v3092_v18 = vld [vmem:[#allocation11 + $0x1670] sm:$0xff] }
 0x612   :  { %9843 = vmatpush1.bf16.msra.mxu1 %v12211_v15  ;;  %9680 = vmatprep.subr.bf16.mxu0 %v12226_v19  ;;  %v3085_v15 = vld [vmem:[#allocation11 + $0x1638] sm:$0xff]  ;;  %v12322_v13 = vcombine.high %v3084_v27, %v3092_v18 }
 0x613   :  { %9844 = vmatprep.subr.bf16.mxu1 %v12228_v22  ;;  %v3093_v19 = vld [vmem:[#allocation11 + $0x1678] sm:$0xff]  ;;  %v12305_v22 = vcombine.low %v3068_v3, %v3076_v5 }
 0x614   :  { %v12324_v25 = vcombine.high %v3085_v15, %v3093_v19  ;;  %v12323_v34 = vcombine.low %v3085_v15, %v3093_v19  ;;  %v3180_v15 = vld [vmem:[#allocation11 + $0x1930] sm:$0xff] }
 0x615   :  { %9681 = vmatpush1.bf16.msra.mxu0 %v12225_v29  ;;  %v3108_v29 = vld [vmem:[#allocation11 + $0x16f0] sm:$0xff] }
 0x616   :  { %9845 = vmatpush1.bf16.msra.mxu1 %v12227_v31  ;;  %9682 = vmatprep.subr.bf16.mxu0 %v12242_v32  ;;  %v3101_v31 = vld [vmem:[#allocation11 + $0x16b8] sm:$0xff]  ;;  %v12338_v37 = vcombine.high %v3100_v28, %v3108_v29  ;;  %v3188_v19 = vld [vmem:[#allocation11 + $0x1970] sm:$0xff] }
 0x617   :  { %9846 = vmatprep.subr.bf16.mxu1 %v12244_v33  ;;  %v3109_v32 = vld [vmem:[#allocation11 + $0x16f8] sm:$0xff]  ;;  %v12321_v33 = vcombine.low %v3084_v27, %v3092_v18 }
 0x618   :  { %v12340_v38 = vcombine.high %v3101_v31, %v3109_v32  ;;  %v12339_v52 = vcombine.low %v3101_v31, %v3109_v32  ;;  %v3196_v32 = vld [vmem:[#allocation11 + $0x19b0] sm:$0xff] }
 0x619   :  { %9683 = vmatpush1.bf16.msra.mxu0 %v12241_v42  ;;  %v3124_v42 = vld [vmem:[#allocation11 + $0x1770] sm:$0xff] }
 0x61a   :  { %9847 = vmatpush1.bf16.msra.mxu1 %v12243_v43  ;;  %9684 = vmatprep.subr.bf16.mxu0 %v12258_v48  ;;  %v3117_v43 = vld [vmem:[#allocation11 + $0x1738] sm:$0xff]  ;;  %v12354_v9 = vcombine.high %v3116_v41, %v3124_v42 }
 0x61b   :  { %9848 = vmatprep.subr.bf16.mxu1 %v12260_v49  ;;  %v3125_v48 = vld [vmem:[#allocation11 + $0x1778] sm:$0xff]  ;;  %v12337_v49 = vcombine.low %v3100_v28, %v3108_v29  ;;  %v12418_v29 = vcombine.high %v3180_v15, %v3188_v19 }
 0x61c   :  { %v12356_v56 = vcombine.high %v3117_v43, %v3125_v48  ;;  %v12355_v59 = vcombine.low %v3117_v43, %v3125_v48  ;;  %v3212_v43 = vld [vmem:[#allocation11 + $0x1a30] sm:$0xff] }
 0x61d   :  { %9685 = vmatpush1.bf16.msra.mxu0 %v12257_v26  ;;  %v3140_v26 = vld [vmem:[#allocation11 + $0x17f0] sm:$0xff] }
 0x61e   :  { %9849 = vmatpush1.bf16.msra.mxu1 %v12259_v55  ;;  %9686 = vmatprep.subr.bf16.mxu0 %v12274_v58  ;;  %v3133_v55 = vld [vmem:[#allocation11 + $0x17b8] sm:$0xff]  ;;  %v12370_v36 = vcombine.high %v3132_v63, %v3140_v26  ;;  %v3220_v48 = vld [vmem:[#allocation11 + $0x1a70] sm:$0xff] }
 0x61f   :  { %9850 = vmatprep.subr.bf16.mxu1 %v12276_v24  ;;  %v3141_v58 = vld [vmem:[#allocation11 + $0x17f8] sm:$0xff]  ;;  %v12353_v24 = vcombine.low %v3116_v41, %v3124_v42 }
 0x620   :  { %v12372_v44 = vcombine.high %v3133_v55, %v3141_v58  ;;  %v12371_v3 = vcombine.low %v3133_v55, %v3141_v58  ;;  %v3236_v55 = vld [vmem:[#allocation11 + $0x1af0] sm:$0xff]  ;;  %v3229_v58 = vld [vmem:[#allocation11 + $0x1ab8] sm:$0xff] }
 0x621   :  { %9687 = vmatpush1.bf16.msra.mxu0 %v12273_v35  ;;  %v3156_v35 = vld [vmem:[#allocation11 + $0x1870] sm:$0xff] }
 0x622   :  { %9851 = vmatpush1.bf16.msra.mxu1 %v12275_v61  ;;  %9688 = vmatprep.subr.bf16.mxu0 %v12290_v1  ;;  %v3149_v61 = vld [vmem:[#allocation11 + $0x1838] sm:$0xff]  ;;  %v12386_v5 = vcombine.high %v3148_v60, %v3156_v35 }
 0x623   :  { %9852 = vmatprep.subr.bf16.mxu1 %v12292_v2  ;;  %v3157_v1 = vld [vmem:[#allocation11 + $0x1878] sm:$0xff]  ;;  %v12369_v2 = vcombine.low %v3132_v63, %v3140_v26  ;;  %v3228_v26 = vld [vmem:[#allocation11 + $0x1ab0] sm:$0xff] }
 0x624   :  { %v12388_v6 = vcombine.high %v3149_v61, %v3157_v1  ;;  %v12387_v27 = vcombine.low %v3149_v61, %v3157_v1  ;;  %v3252_v61 = vld [vmem:[#allocation11 + $0x1b70] sm:$0xff]  ;;  %v3245_v1 = vld [vmem:[#allocation11 + $0x1b38] sm:$0xff] }
 0x625   :  { %9689 = vmatpush1.bf16.msra.mxu0 %v12289_v10  ;;  %v3172_v10 = vld [vmem:[#allocation11 + $0x18f0] sm:$0xff] }
 0x626   :  { %9853 = vmatpush1.bf16.msra.mxu1 %v12291_v11  ;;  %9690 = vmatprep.subr.bf16.mxu0 %v12306_v14  ;;  %v12385_v11 = vcombine.low %v3148_v60, %v3156_v35  ;;  %v3165_v14 = vld [vmem:[#allocation11 + $0x18b8] sm:$0xff]  ;;  %v12402_v18 = vcombine.high %v3164_v7, %v3172_v10  ;;  %v3244_v35 = vld [vmem:[#allocation11 + $0x1b30] sm:$0xff] }
 0x627   :  { %9854 = vmatprep.subr.bf16.mxu1 %v12308_v46  ;;  %v3173_v46 = vld [vmem:[#allocation11 + $0x18f8] sm:$0xff] }
 0x628   :  { %v12403_v28 = vcombine.low %v3165_v14, %v3173_v46 }
 0x629   :  { %9691 = vmatpush1.bf16.msra.mxu0 %v12305_v22  ;;  %v12404_v22 = vcombine.high %v3165_v14, %v3173_v46  ;;  %v3268_v14 = vld [vmem:[#allocation11 + $0x1bf0] sm:$0xff] }
 0x62a   :  { %9855 = vmatpush1.bf16.msra.mxu1 %v12307_v23  ;;  %9692 = vmatprep.subr.bf16.mxu0 %v12322_v13  ;;  %v3181_v23 = vld [vmem:[#allocation11 + $0x1938] sm:$0xff] }
 0x62b   :  { %9856 = vmatprep.subr.bf16.mxu1 %v12324_v25  ;;  %v3189_v13 = vld [vmem:[#allocation11 + $0x1978] sm:$0xff]  ;;  %v12401_v25 = vcombine.low %v3164_v7, %v3172_v10 }
 0x62c   :  { %v12420_v31 = vcombine.high %v3181_v23, %v3189_v13 }
 0x62d   :  { %9693 = vmatpush1.bf16.msra.mxu0 %v12321_v33  ;;  %v3204_v33 = vld [vmem:[#allocation11 + $0x19f0] sm:$0xff] }
 0x62e   :  { %9857 = vmatpush1.bf16.msra.mxu1 %v12323_v34  ;;  %9694 = vmatprep.subr.bf16.mxu0 %v12338_v37  ;;  %v3197_v34 = vld [vmem:[#allocation11 + $0x19b8] sm:$0xff]  ;;  %v12434_v41 = vcombine.high %v3196_v32, %v3204_v33 }
 0x62f   :  { %9858 = vmatprep.subr.bf16.mxu1 %v12340_v38  ;;  %v3205_v37 = vld [vmem:[#allocation11 + $0x19f8] sm:$0xff]  ;;  %v12417_v38 = vcombine.low %v3180_v15, %v3188_v19 }
 0x630   :  { %v12436_v42 = vcombine.high %v3197_v34, %v3205_v37  ;;  %v3269_v15 = vld [vmem:[#allocation11 + $0x1bf8] sm:$0xff] }
 0x631   :  { %9695 = vmatpush1.bf16.msra.mxu0 %v12337_v49  ;;  %v3213_v49 = vld [vmem:[#allocation11 + $0x1a38] sm:$0xff] }
 0x632   :  { %9859 = vmatpush1.bf16.msra.mxu1 %v12339_v52  ;;  %9696 = vmatprep.subr.bf16.mxu0 %v12354_v9  ;;  %v3221_v52 = vld [vmem:[#allocation11 + $0x1a78] sm:$0xff]  ;;  %v12435_v9 = vcombine.low %v3197_v34, %v3205_v37  ;;  %v3284_v34 = vld [vmem:[#allocation11 + $0x1c70] sm:$0xff] }
 0x633   :  { %9860 = vmatprep.subr.bf16.mxu1 %v12356_v56  ;;  %v12450_v56 = vcombine.high %v3212_v43, %v3220_v48  ;;  %v12452_v63 = vcombine.high %v3213_v49, %v3221_v52  ;;  %v3277_v37 = vld [vmem:[#allocation11 + $0x1c38] sm:$0xff] }
 0x635   :  { %9697 = vmatpush1.bf16.msra.mxu0 %v12353_v24  ;;  %v3237_v24 = vld [vmem:[#allocation11 + $0x1af8] sm:$0xff] }
 0x636   :  { %9861 = vmatpush1.bf16.msra.mxu1 %v12355_v59  ;;  %9698 = vmatprep.subr.bf16.mxu0 %v12370_v36  ;;  %v12449_v59 = vcombine.low %v3212_v43, %v3220_v48  ;;  %v12451_v36 = vcombine.low %v3213_v49, %v3221_v52  ;;  %v12468_v60 = vcombine.high %v3229_v58, %v3237_v24  ;;  %v3292_v48 = vld [vmem:[#allocation11 + $0x1cb0] sm:$0xff]  ;;  %v3293_v52 = vld [vmem:[#allocation11 + $0x1cb8] sm:$0xff] }
 0x637   :  { %9862 = vmatprep.subr.bf16.mxu1 %v12372_v44  ;;  %v12466_v44 = vcombine.high %v3228_v26, %v3236_v55  ;;  %v3300_v49 = vld [vmem:[#allocation11 + $0x1cf0] sm:$0xff] }
 0x639   :  { %9699 = vmatpush1.bf16.msra.mxu0 %v12369_v2  ;;  %v3253_v2 = vld [vmem:[#allocation11 + $0x1b78] sm:$0xff] }
 0x63a   :  { %9863 = vmatpush1.bf16.msra.mxu1 %v12371_v3  ;;  %9709 = vmatprep.subr.bf16.mxu0 %v12386_v5  ;;  %v12465_v3 = vcombine.low %v3228_v26, %v3236_v55  ;;  %v12467_v5 = vcombine.low %v3229_v58, %v3237_v24  ;;  %v12484_v10 = vcombine.high %v3245_v1, %v3253_v2  ;;  %v3308_v55 = vld [vmem:[#allocation11 + $0x1d30] sm:$0xff]  ;;  %v3309_v24 = vld [vmem:[#allocation11 + $0x1d38] sm:$0xff] }
 0x63b   :  { %9873 = vmatprep.subr.bf16.mxu1 %v12388_v6  ;;  %v12482_v6 = vcombine.high %v3244_v35, %v3252_v61  ;;  %v3316_v58 = vld [vmem:[#allocation11 + $0x1d70] sm:$0xff] }
 0x63c   :  { %9701 = vmatmul.mubr.bf16.vlgmr.msra.gmra.mrb[24].mxu0 %v13772_v39 }
 0x63d   :  { %9865 = vmatmul.mubr.bf16.vlgmr.msra.gmra.mrb[24].mxu1 %v13772_v39  ;;  %9710 = vmatpush1.bf16.msra.mxu0 %v12385_v11  ;;  %v12419_v39 = vcombine.low %v3181_v23, %v3189_v13  ;;  %v3260_v11 = vld [vmem:[#allocation11 + $0x1bb0] sm:$0xff]  ;;  %v12481_v23 = vcombine.low %v3244_v35, %v3252_v61 }
 0x63e   :  { %9741 = vmatprep.mubr.bf16.mxu0 %v13776_v50  ;;  %9874 = vmatpush1.bf16.msra.mxu1 %v12387_v27  ;;  %v3324_v61 = vld [vmem:[#allocation11 + $0x1db0] sm:$0xff] }
 0x63f   :  { %9905 = vmatprep.mubr.bf16.mxu1 %v13776_v50  ;;  %9711 = vmatprep.subr.bf16.mxu0 %v12402_v18  ;;  %v12433_v50 = vcombine.low %v3196_v32, %v3204_v33  ;;  %v3261_v18 = vld [vmem:[#allocation11 + $0x1bb8] sm:$0xff]  ;;  %v3276_v33 = vld [vmem:[#allocation11 + $0x1c30] sm:$0xff] }
 0x640   :  { %9875 = vmatprep.subr.bf16.mxu1 %v12404_v22  ;;  %v12500_v32 = vcombine.high %v3261_v18, %v3269_v15 }
 0x641   :  { %9712 = vmatpush1.bf16.msra.mxu0 %v12401_v25 }
 0x642   :  { %9876 = vmatpush1.bf16.msra.mxu1 %v12403_v28  ;;  %9713 = vmatprep.subr.bf16.mxu0 %v12418_v29  ;;  %v12483_v28 = vcombine.low %v3245_v1, %v3253_v2  ;;  %v12498_v29 = vcombine.high %v3260_v11, %v3268_v14  ;;  %v3332_v1 = vld [vmem:[#allocation11 + $0x1df0] sm:$0xff]  ;;  %v3325_v2 = vld [vmem:[#allocation11 + $0x1db8] sm:$0xff] }
 0x643   :  { %9877 = vmatprep.subr.bf16.mxu1 %v12420_v31 }
 0x645   :  { %9714 = vmatpush1.bf16.msra.mxu0 %v12417_v38  ;;  %v3285_v38 = vld [vmem:[#allocation11 + $0x1c78] sm:$0xff] }
 0x646   :  { %9878 = vmatpush1.bf16.msra.mxu1 %v12419_v39  ;;  %9715 = vmatprep.subr.bf16.mxu0 %v12434_v41  ;;  %v12497_v39 = vcombine.low %v3260_v11, %v3268_v14  ;;  %v12499_v41 = vcombine.low %v3261_v18, %v3269_v15  ;;  %v12516_v43 = vcombine.high %v3277_v37, %v3285_v38  ;;  %v3340_v14 = vld [vmem:[#allocation11 + $0x1e30] sm:$0xff]  ;;  %v3341_v15 = vld [vmem:[#allocation11 + $0x1e38] sm:$0xff] }
 0x647   :  { %9879 = vmatprep.subr.bf16.mxu1 %v12436_v42  ;;  %v12514_v42 = vcombine.high %v3276_v33, %v3284_v34  ;;  %v3348_v18 = vld [vmem:[#allocation11 + $0x1e70] sm:$0xff] }
 0x649   :  { %9716 = vmatpush1.bf16.msra.mxu0 %v12433_v50  ;;  %v3301_v50 = vld [vmem:[#allocation11 + $0x1cf8] sm:$0xff] }
 0x64a   :  { %9880 = vmatpush1.bf16.msra.mxu1 %v12435_v9  ;;  %9717 = vmatprep.subr.bf16.mxu0 %v12450_v56  ;;  %v12513_v9 = vcombine.low %v3276_v33, %v3284_v34  ;;  %v12515_v56 = vcombine.low %v3277_v37, %v3285_v38  ;;  %v12532_v26 = vcombine.high %v3293_v52, %v3301_v50  ;;  %v3365_v33 = vld [vmem:[#allocation11 + $0x1ef8] sm:$0xff] }
 0x64b   :  { %9881 = vmatprep.subr.bf16.mxu1 %v12452_v63  ;;  %v12530_v63 = vcombine.high %v3292_v48, %v3300_v49  ;;  %v12577_v34 = vcombine.low %v3340_v14, %v3348_v18 }
 0x64d   :  { %9718 = vmatpush1.bf16.msra.mxu0 %v12449_v59  ;;  %v3317_v59 = vld [vmem:[#allocation11 + $0x1d78] sm:$0xff] }
 0x64e   :  { %9882 = vmatpush1.bf16.msra.mxu1 %v12451_v36  ;;  %9719 = vmatprep.subr.bf16.mxu0 %v12466_v44  ;;  %v12529_v36 = vcombine.low %v3292_v48, %v3300_v49  ;;  %v12531_v44 = vcombine.low %v3293_v52, %v3301_v50  ;;  %v12548_v35 = vcombine.high %v3309_v24, %v3317_v59  ;;  %v3381_v48 = vld [vmem:[#allocation11 + $0x1f78] sm:$0xff]  ;;  %v13861_v49 = vld [vmem:[#allocation13] sm:$0xff] }
 0x64f   :  { %v13853_v7 = vpop.f32.mrb[20].mxu0  ;;  %9883 = vmatprep.subr.bf16.mxu1 %v12468_v60  ;;  %v12546_v60 = vcombine.high %v3308_v55, %v3316_v58 }
 0x650   :  { %v13855_v46 = vpop.f32.mrb[20].mxu1  ;;  %v13857_v27 = vpop.f32.mrb[21].mxu0 }
 0x651   :  { %v13859_v19 = vpop.f32.mrb[21].mxu1  ;;  %v9419_v22 = vpop.f32.mrb[22].mxu0  ;;  %9720 = vmatpush1.bf16.msra.mxu0 %v12465_v3  ;;  %v3333_v3 = vld [vmem:[#allocation11 + $0x1df8] sm:$0xff] }
 0x652   :  { %v9583_v13 = vpop.f32.mrb[22].mxu1  ;;  %9884 = vmatpush1.bf16.msra.mxu1 %v12467_v5  ;;  %v9420_v25 = vpop.f32.mrb[23].mxu0  ;;  %9721 = vmatprep.subr.bf16.mxu0 %v12482_v6  ;;  %v12545_v5 = vcombine.low %v3308_v55, %v3316_v58  ;;  %v12547_v6 = vcombine.low %v3309_v24, %v3317_v59  ;;  %v12564_v11 = vcombine.high %v3325_v2, %v3333_v3  ;;  %v3349_v22 = vld [vmem:[#allocation11 + $0x1e78] sm:$0xff] }
 0x653   :  { %v9584_v31 = vpop.f32.mrb[23].mxu1  ;;  %9885 = vmatprep.subr.bf16.mxu1 %v12484_v10  ;;  %v12562_v10 = vcombine.high %v3324_v61, %v3332_v1  ;;  %v12563_v13 = vcombine.low %v3325_v2, %v3333_v3  ;;  %v12578_v25 = vcombine.high %v3340_v14, %v3348_v18  ;;  %v12579_v37 = vcombine.low %v3341_v15, %v3349_v22  ;;  %v3389_v58 = vld [vmem:[#allocation11 + $0x1fb8] sm:$0xff]  ;;  %v13138_v14 = vld [vmem:[#allocation14] sm:$0xff]  }
 0x654   :  { %v3364_v31 = vld [vmem:[#allocation11 + $0x1ef0] sm:$0xff]  ;;  %v3409_v55 = vrot.slane %v13861_v49, %v13681_v47  ;;  %v3397_v24 = vld [vmem:[#allocation11 + $0x1ff8] sm:$0xff]  ;;  %v3417_v59 = vrot.slane %v13861_v49, %v13688_v62 }
 0x655   :  { %9722 = vmatpush1.bf16.msra.mxu0 %v12481_v23  ;;  %v12561_v23 = vcombine.low %v3324_v61, %v3332_v1  ;;  %v12627_v3 = vcombine.low %v3389_v58, %v3397_v24  ;;  %v13139_v18 = vld [vmem:[#allocation14 + $0x80] sm:$0xff]  }
 0x656   :  { %9886 = vmatpush1.bf16.msra.mxu1 %v12483_v28  ;;  %9723 = vmatprep.subr.bf16.mxu0 %v12498_v29  ;;  %v12580_v28 = vcombine.high %v3341_v15, %v3349_v22  ;;  %v3356_v29 = vld [vmem:[#allocation11 + $0x1eb0] sm:$0xff]  ;;  %v12943_v61 = vadd.f32 %v13809_v20, %v3409_v55  ;;  %v12945_v1 = vadd.f32 %v13811_v21, %v3417_v59  ;;  %v13140_v15 = vld [vmem:[#allocation14 + $0x48] sm:$0xff]   ;;  %v13163_v59 = vld [vmem:[#allocation14 + $0xb0] sm:$0xff]  }
 0x657   :  { %9887 = vmatprep.subr.bf16.mxu1 %v12500_v32  ;;  %v3357_v32 = vld [vmem:[#allocation11 + $0x1eb8] sm:$0xff]  ;;  %v12594_v38 = vcombine.high %v3356_v29, %v3364_v31  ;;  %v12593_v52 = vcombine.low %v3356_v29, %v3364_v31  ;;  %v13146_v29 = vld [vmem:[#allocation14 + $0x10] sm:$0xff]   ;;  %v3433_v55 = vrot.slane %v13861_v49, %v13760_v57 }
 0x658   :  { %v12595_v50 = vcombine.low %v3357_v32, %v3365_v33  ;;  %v13141_v21 = vld [vmem:[#allocation14 + $0xc8] sm:$0xff]   ;;  %v13147_v31 = vld [vmem:[#allocation14 + $0x90] sm:$0xff]  }
 0x659   :  { %9724 = vmatpush1.bf16.msra.mxu0 %v12497_v39  ;;  %v12596_v39 = vcombine.high %v3357_v32, %v3365_v33  ;;  %v13148_v32 = vld [vmem:[#allocation14 + $0x58] sm:$0xff]  }
 0x65a   :  { %9888 = vmatpush1.bf16.msra.mxu1 %v12499_v41  ;;  %9725 = vmatprep.subr.bf16.mxu0 %v12514_v42  ;;  %v3372_v41 = vld [vmem:[#allocation11 + $0x1f30] sm:$0xff]  ;;  %v13149_v33 = vld [vmem:[#allocation14 + $0xd8] sm:$0xff]  }
 0x65b   :  { %9889 = vmatprep.subr.bf16.mxu1 %v12516_v43  ;;  %v3380_v42 = vld [vmem:[#allocation11 + $0x1f70] sm:$0xff]  ;;  %v3373_v43 = vld [vmem:[#allocation11 + $0x1f38] sm:$0xff] }
 0x65d   :  { %9726 = vmatpush1.bf16.msra.mxu0 %v12513_v9  ;;  %v12610_v9 = vcombine.high %v3372_v41, %v3380_v42 }
 0x65e   :  { %9890 = vmatpush1.bf16.msra.mxu1 %v12515_v56  ;;  %9727 = vmatprep.subr.bf16.mxu0 %v12530_v63  ;;  %v12612_v56 = vcombine.high %v3373_v43, %v3381_v48  ;;  %v3388_v63 = vld [vmem:[#allocation11 + $0x1fb0] sm:$0xff] }
 0x65f   :  { %9891 = vmatprep.subr.bf16.mxu1 %v12532_v26  ;;  %v3396_v26 = vld [vmem:[#allocation11 + $0x1ff0] sm:$0xff] }
 0x660   :  { %v12625_v2 = vcombine.low %v3388_v63, %v3396_v26 }
 0x661   :  { %9728 = vmatpush1.bf16.msra.mxu0 %v12529_v36  ;;  %v12609_v36 = vcombine.low %v3372_v41, %v3380_v42  ;;  %v13155_v41 = vld [vmem:[#allocation14 + $0xa0] sm:$0xff]   ;;  %v13156_v42 = vld [vmem:[#allocation14 + $0x68] sm:$0xff]  }
 0x662   :  { %9892 = vmatpush1.bf16.msra.mxu1 %v12531_v44  ;;  %9729 = vmatprep.subr.bf16.mxu0 %v12546_v60  ;;  %v12611_v44 = vcombine.low %v3373_v43, %v3381_v48  ;;  %v12626_v60 = vcombine.high %v3388_v63, %v3396_v26  ;;  %v13157_v43 = vld [vmem:[#allocation14 + $0xe8] sm:$0xff]   ;;  %v13161_v63 = vld [vmem:[#allocation14 + $0xf0] sm:$0xff]   ;;  %v3425_v26 = vrot.slane %v13861_v49, %v13757_v53 }
 0x663   :  { %9893 = vmatprep.subr.bf16.mxu1 %v12548_v35  ;;  %v12628_v35 = vcombine.high %v3389_v58, %v3397_v24  ;;  %v13158_v48 = vld [vmem:[#allocation14 + $0x28] sm:$0xff]   ;;  %v13162_v58 = vld [vmem:[#allocation14 + $0x30] sm:$0xff]  }
 0x665   :  { %9730 = vmatpush1.bf16.msra.mxu0 %v12545_v5  ;;  %v13136_v5 = vld [vmem:[#allocation14 + $0x40] sm:$0xff]  }
 0x666   :  { %9894 = vmatpush1.bf16.msra.mxu1 %v12547_v6  ;;  %9731 = vmatprep.subr.bf16.mxu0 %v12562_v10  ;;  %v13137_v6 = vld [vmem:[#allocation14 + $0xc0] sm:$0xff]   ;;  %v9915_v10 = vmax.f32 %v12943_v61, 0.0  ;;  %v12949_v61 = vadd.f32 %v13835_v12, %v3433_v55  ;;  %v13172_v12 = vld [vmem:[#allocation14 + $0x148] sm:$0xff]  }
 0x667   :  { %9895 = vmatprep.subr.bf16.mxu1 %v12564_v11  ;;  %v9917_v11 = vmax.f32 %v12945_v1, 0.0  ;;  %v13166_v1 = vld [vmem:[#allocation14 + $0x38] sm:$0xff]  }
 0x668   :  { %v9931_v20 = vpack.c.bf16 %v9915_v10, %v9915_v10 }
 0x669   :  { %9732 = vmatpush1.bf16.msra.mxu0 %v12561_v23  ;;  %v9933_v22 = vpack.c.bf16 %v9917_v11, %v9917_v11  ;;  %v13142_v23 = vld [vmem:[#allocation14 + $0x8] sm:$0xff]   ;;  %v9921_v11 = vmax.f32 %v12949_v61, 0.0 }
 0x66a   :  { %9896 = vmatpush1.bf16.msra.mxu1 %v12563_v13  ;;  %9733 = vmatprep.subr.bf16.mxu0 %v12578_v25  ;;  %v13143_v13 = vld [vmem:[#allocation14 + $0x88] sm:$0xff]   ;;  %v13144_v25 = vld [vmem:[#allocation14 + $0x50] sm:$0xff]  }
 0x66b   :  { %9897 = vmatprep.subr.bf16.mxu1 %v12580_v28  ;;  %v13145_v28 = vld [vmem:[#allocation14 + $0xd0] sm:$0xff]  }
 0x66d   :  { %9734 = vmatpush1.bf16.msra.mxu0 %v12577_v34  ;;  %v13151_v34 = vld [vmem:[#allocation14 + $0x98] sm:$0xff]  }
 0x66e   :  { %9898 = vmatpush1.bf16.msra.mxu1 %v12579_v37  ;;  %9735 = vmatprep.subr.bf16.mxu0 %v12594_v38  ;;  %v13152_v37 = vld [vmem:[#allocation14 + $0x60] sm:$0xff]  }
 0x66f   :  { %9899 = vmatprep.subr.bf16.mxu1 %v12596_v39  ;;  %v13153_v38 = vld [vmem:[#allocation14 + $0xe0] sm:$0xff]  }
 0x670   :  { %v13154_v39 = vld [vmem:[#allocation14 + $0x20] sm:$0xff]  }
 0x671   :  { %9736 = vmatpush1.bf16.msra.mxu0 %v12593_v52  ;;  %v3405_v52 = vrot.slane %v13861_v49, %v13676_v45 }
 0x672   :  { %9900 = vmatpush1.bf16.msra.mxu1 %v12595_v50  ;;  %9737 = vmatprep.subr.bf16.mxu0 %v12610_v9  ;;  %v13159_v50 = vld [vmem:[#allocation14 + $0xa8] sm:$0xff]   ;;  %v13160_v9 = vld [vmem:[#allocation14 + $0x70] sm:$0xff]  }
 0x673   :  { %9901 = vmatprep.subr.bf16.mxu1 %v12612_v56  ;;  %v3413_v56 = vrot.slane %v13861_v49, %v13707_v54  ;;  %v12942_v24 = vadd.f32 %v13805_v16, %v3405_v52  ;;  %v3421_v52 = vrot.slane %v13861_v49, %v13754_v51 }
 0x675   :  { %9738 = vmatpush1.bf16.msra.mxu0 %v12609_v36  ;;  %v13164_v36 = vld [vmem:[#allocation14 + $0x78] sm:$0xff]  }
 0x676   :  { %9902 = vmatpush1.bf16.msra.mxu1 %v12611_v44  ;;  %9739 = vmatprep.subr.bf16.mxu0 %v12626_v60  ;;  %v12944_v44 = vadd.f32 %v13807_v17, %v3413_v56  ;;  %v13165_v60 = vld [vmem:[#allocation14 + $0xf8] sm:$0xff]   ;;  %v13170_v17 = vld [vmem:[#allocation14 + $0x100] sm:$0xff]   ;;  %v3429_v56 = vrot.slane %v13861_v49, %v13783_v40 }
 0x677   :  { %9903 = vmatprep.subr.bf16.mxu1 %v12628_v35  ;;  %v12947_v35 = vadd.f32 %v13833_v30, %v3425_v26  ;;  %v13171_v30 = vld [vmem:[#allocation14 + $0x180] sm:$0xff]   ;;  %v13197_v49 = vld [vmem:[#allocation14 + $0x1f8] sm:$0xff]  }
 0x678   :  { %v9916_v16 = vmax.f32 %v12944_v44, 0.0  ;;  %v12948_v44 = vadd.f32 %v13831_v8, %v3429_v56  ;;  %v13202_v8 = vld [vmem:[#allocation14 + $0x200] sm:$0xff]   ;;  %v13230_v56 = vld [vmem:[#allocation14 + $0x238] sm:$0xff]  }
 0x679   :  { %9740 = vmatpush1.bf16.msra.mxu0 %v12625_v2  ;;  %v9914_v2 = vmax.f32 %v12942_v24, 0.0  ;;  %v9919_v10 = vmax.f32 %v12947_v35, 0.0  ;;  %v12946_v24 = vadd.f32 %v13829_v0, %v3421_v52  ;;  %v13227_v52 = vld [vmem:[#allocation14 + $0x2b0] sm:$0xff]  }
 0x67a   :  { %9904 = vmatpush1.bf16.msra.mxu1 %v12627_v3  ;;  %12758 = vmatprep.subr.bf16.mxu0 %v13136_v5  ;;  %v13167_v3 = vld [vmem:[#allocation14 + $0xb8] sm:$0xff]   ;;  %v13168_v5 = vld [vmem:[#allocation14 + $0x140] sm:$0xff]   ;;  %v9920_v0 = vmax.f32 %v12948_v44, 0.0  ;;  %v13237_v44 = vld [vmem:[#allocation14 + $0x3c8] sm:$0xff]  }
 0x67b   :  { %12780 = vmatprep.subr.bf16.mxu1 %v13137_v6  ;;  %v13169_v6 = vld [vmem:[#allocation14 + $0x1c0] sm:$0xff]   ;;  %v9918_v61 = vmax.f32 %v12946_v24, 0.0 }
 0x67c   :  { %9742 = vmatmul.mubr.bf16.vlgmr.msra.gmra.mrb[24].mxu0 %v13787_v4 }
 0x67d   :  { %9906 = vmatmul.mubr.bf16.vlgmr.msra.gmra.mrb[24].mxu1 %v13787_v4  ;;  %12759 = vmatpush3.bf16.msra.mxu0 %v13138_v14  ;;  %v13150_v4 = vld [vmem:[#allocation14 + $0x18] sm:$0xff]   ;;  %v9930_v14 = vpack.c.bf16 %v9914_v2, %v9914_v2  ;;  %v13201_v2 = vld [vmem:[#allocation14 + $0x2c0] sm:$0xff]  }
 0x67e   :  { %11009 = vmatprep.mubr.bf16.mxu0 %v9931_v20  ;;  %12781 = vmatpush3.bf16.msra.mxu1 %v13139_v18  ;;  %v9932_v18 = vpack.c.bf16 %v9916_v16, %v9916_v16  ;;  %v13173_v20 = vld [vmem:[#allocation14 + $0x1c8] sm:$0xff]   ;;  %v9934_v16 = vpack.c.bf16 %v9918_v61, %v9918_v61  ;;  %v13242_v61 = vld [vmem:[#allocation14 + $0x310] sm:$0xff]  }
 0x67f   :  { %11049 = vmatprep.mubr.bf16.mxu1 %v9933_v22  ;;  %12760 = vmatprep.subr.bf16.mxu0 %v13140_v15  ;;  %v9935_v15 = vpack.c.bf16 %v9919_v10, %v9919_v10  ;;  %v13174_v22 = vld [vmem:[#allocation14 + $0x108] sm:$0xff]  }
 0x680   :  { %12782 = vmatprep.subr.bf16.mxu1 %v13141_v21  ;;  %v9937_v21 = vpack.c.bf16 %v9921_v11, %v9921_v11  ;;  %v13205_v11 = vld [vmem:[#allocation14 + $0x2c8] sm:$0xff]  }
 0x681   :  { %12761 = vmatpush3.bf16.msra.mxu0 %v13142_v23  ;;  %v13175_v23 = vld [vmem:[#allocation14 + $0x188] sm:$0xff]  }
 0x682   :  { %12783 = vmatpush3.bf16.msra.mxu1 %v13143_v13  ;;  %12762 = vmatprep.subr.bf16.mxu0 %v13144_v25  ;;  %v13176_v13 = vld [vmem:[#allocation14 + $0x150] sm:$0xff]  }
 0x683   :  { %12784 = vmatprep.subr.bf16.mxu1 %v13145_v28  ;;  %v13177_v25 = vld [vmem:[#allocation14 + $0x1d0] sm:$0xff]  }
 0x684   :  { %v13178_v28 = vld [vmem:[#allocation14 + $0x110] sm:$0xff]  }
 0x685   :  { %12763 = vmatpush3.bf16.msra.mxu0 %v13146_v29  ;;  %v13179_v29 = vld [vmem:[#allocation14 + $0x190] sm:$0xff]  }
 0x686   :  { %12785 = vmatpush3.bf16.msra.mxu1 %v13147_v31  ;;  %12764 = vmatprep.subr.bf16.mxu0 %v13148_v32  ;;  %v13180_v31 = vld [vmem:[#allocation14 + $0x158] sm:$0xff]  }
 0x687   :  { %12786 = vmatprep.subr.bf16.mxu1 %v13149_v33  ;;  %v13181_v32 = vld [vmem:[#allocation14 + $0x1d8] sm:$0xff]  }
 0x688   :  { %v13182_v33 = vld [vmem:[#allocation14 + $0x118] sm:$0xff]  }
 0x689   :  { %12765 = vmatpush3.bf16.msra.mxu0 %v13150_v4  ;;  %v13183_v4 = vld [vmem:[#allocation14 + $0x198] sm:$0xff]  }
 0x68a   :  { %12787 = vmatpush3.bf16.msra.mxu1 %v13151_v34  ;;  %12766 = vmatprep.subr.bf16.mxu0 %v13152_v37  ;;  %v13184_v34 = vld [vmem:[#allocation14 + $0x160] sm:$0xff]  }
 0x68b   :  { %12788 = vmatprep.subr.bf16.mxu1 %v13153_v38  ;;  %v13185_v37 = vld [vmem:[#allocation14 + $0x1e0] sm:$0xff]  }
 0x68c   :  { %v13186_v38 = vld [vmem:[#allocation14 + $0x120] sm:$0xff]  }
 0x68d   :  { %12767 = vmatpush3.bf16.msra.mxu0 %v13154_v39  ;;  %v13187_v39 = vld [vmem:[#allocation14 + $0x1a0] sm:$0xff]  }
 0x68e   :  { %12789 = vmatpush3.bf16.msra.mxu1 %v13155_v41  ;;  %12768 = vmatprep.subr.bf16.mxu0 %v13156_v42  ;;  %v13188_v41 = vld [vmem:[#allocation14 + $0x168] sm:$0xff]  }
 0x68f   :  { %12790 = vmatprep.subr.bf16.mxu1 %v13157_v43  ;;  %v13189_v42 = vld [vmem:[#allocation14 + $0x1e8] sm:$0xff]   ;;  %v13883_v43 = vld [vmem:[#allocation13 + $0x8] sm:$0xff] }
 0x690   :  { %v3441_v26 = vrot.slane %v13883_v43, %v13681_v47  ;;  %v3449_v55 = vrot.slane %v13883_v43, %v13688_v62  ;;  %v13198_v47 = vld [vmem:[#allocation14 + $0x138] sm:$0xff]  }
 0x691   :  { %12769 = vmatpush3.bf16.msra.mxu0 %v13158_v48  ;;  %v13190_v48 = vld [vmem:[#allocation14 + $0x128] sm:$0xff]   ;;  %v13199_v62 = vld [vmem:[#allocation14 + $0x1b8] sm:$0xff]  }
 0x692   :  { %12791 = vmatpush3.bf16.msra.mxu1 %v13159_v50  ;;  %12770 = vmatprep.subr.bf16.mxu0 %v13160_v9  ;;  %v13191_v50 = vld [vmem:[#allocation14 + $0x1a8] sm:$0xff]   ;;  %v13192_v9 = vld [vmem:[#allocation14 + $0x170] sm:$0xff]   ;;  %v12953_v35 = vadd.f32 %v13859_v19, %v3449_v55 }
 0x693   :  { %12792 = vmatprep.subr.bf16.mxu1 %v13161_v63  ;;  %v13193_v63 = vld [vmem:[#allocation14 + $0x1f0] sm:$0xff]   ;;  %v13204_v19 = vld [vmem:[#allocation14 + $0x248] sm:$0xff]  }
 0x695   :  { %12771 = vmatpush3.bf16.msra.mxu0 %v13162_v58  ;;  %v13194_v58 = vld [vmem:[#allocation14 + $0x130] sm:$0xff]  }
 0x696   :  { %12793 = vmatpush3.bf16.msra.mxu1 %v13163_v59  ;;  %12772 = vmatprep.subr.bf16.mxu0 %v13164_v36  ;;  %v13195_v59 = vld [vmem:[#allocation14 + $0x1b0] sm:$0xff]   ;;  %v13196_v36 = vld [vmem:[#allocation14 + $0x178] sm:$0xff]  }
 0x697   :  { %12794 = vmatprep.subr.bf16.mxu1 %v13165_v60  ;;  %v12951_v60 = vadd.f32 %v13857_v27, %v3441_v26  ;;  %v13203_v27 = vld [vmem:[#allocation14 + $0x280] sm:$0xff]  }
 0x698   :  { %v13232_v26 = vld [vmem:[#allocation14 + $0x340] sm:$0xff]  }
 0x699   :  { %12773 = vmatpush3.bf16.msra.mxu0 %v13166_v1  ;;  %v13200_v1 = vld [vmem:[#allocation14 + $0x240] sm:$0xff]  }
 0x69a   :  { %12795 = vmatpush3.bf16.msra.mxu1 %v13167_v3  ;;  %12802 = vmatprep.subr.bf16.mxu0 %v13168_v5  ;;  %v9923_v3 = vmax.f32 %v12951_v60, 0.0  ;;  %v9925_v5 = vmax.f32 %v12953_v35, 0.0  ;;  %v13239_v60 = vld [vmem:[#allocation14 + $0x388] sm:$0xff]   ;;  %v13240_v35 = vld [vmem:[#allocation14 + $0x350] sm:$0xff]  }
 0x69b   :  { %12824 = vmatprep.subr.bf16.mxu1 %v13169_v6  ;;  %v9936_v6 = vpack.c.bf16 %v9920_v0, %v9920_v0  ;;  %v13245_v0 = vld [vmem:[#allocation14 + $0x3d8] sm:$0xff]  }
 0x69c   :  { %11010 = vmatmul.mubr.bf16.vlgmr.msra.gmra.mrb[28].mxu0 %v9930_v14  ;;  %v9939_v10 = vpack.c.bf16 %v9923_v3, %v9923_v3  ;;  %v13206_v14 = vld [vmem:[#allocation14 + $0x208] sm:$0xff]   ;;  %v13247_v3 = vld [vmem:[#allocation14 + $0x398] sm:$0xff]  }
 0x69d   :  { %11050 = vmatmul.mubr.bf16.vlgmr.msra.gmra.mrb[28].mxu1 %v9932_v18  ;;  %12803 = vmatpush3.bf16.msra.mxu0 %v13170_v17  ;;  %v9941_v17 = vpack.c.bf16 %v9925_v5, %v9925_v5  ;;  %v13208_v18 = vld [vmem:[#allocation14 + $0x250] sm:$0xff]   ;;  %v13248_v5 = vld [vmem:[#allocation14 + $0x360] sm:$0xff]  }
 0x69e   :  { %11089 = vmatprep.mubr.bf16.mxu0 %v9935_v15  ;;  %12825 = vmatpush3.bf16.msra.mxu1 %v13171_v30  ;;  %v13207_v30 = vld [vmem:[#allocation14 + $0x288] sm:$0xff]   ;;  %v13210_v15 = vld [vmem:[#allocation14 + $0x210] sm:$0xff]  }
 0x69f   :  { %11129 = vmatprep.mubr.bf16.mxu1 %v9937_v21  ;;  %12804 = vmatprep.subr.bf16.mxu0 %v13172_v12  ;;  %v13209_v12 = vld [vmem:[#allocation14 + $0x2d0] sm:$0xff]   ;;  %v13212_v21 = vld [vmem:[#allocation14 + $0x258] sm:$0xff]  }
 0x6a0   :  { %12826 = vmatprep.subr.bf16.mxu1 %v13173_v20  ;;  %v13211_v20 = vld [vmem:[#allocation14 + $0x290] sm:$0xff]  }
 0x6a1   :  { %12805 = vmatpush3.bf16.msra.mxu0 %v13174_v22  ;;  %v13213_v22 = vld [vmem:[#allocation14 + $0x2d8] sm:$0xff]  }
 0x6a2   :  { %12827 = vmatpush3.bf16.msra.mxu1 %v13175_v23  ;;  %12806 = vmatprep.subr.bf16.mxu0 %v13176_v13  ;;  %v13214_v23 = vld [vmem:[#allocation14 + $0x218] sm:$0xff]  }
 0x6a3   :  { %12828 = vmatprep.subr.bf16.mxu1 %v13177_v25  ;;  %v13215_v13 = vld [vmem:[#allocation14 + $0x298] sm:$0xff]   ;;  %v13216_v25 = vld [vmem:[#allocation14 + $0x260] sm:$0xff]  }
 0x6a5   :  { %12807 = vmatpush3.bf16.msra.mxu0 %v13178_v28  ;;  %v13217_v28 = vld [vmem:[#allocation14 + $0x2e0] sm:$0xff]  }
 0x6a6   :  { %12829 = vmatpush3.bf16.msra.mxu1 %v13179_v29  ;;  %12808 = vmatprep.subr.bf16.mxu0 %v13180_v31  ;;  %v13218_v29 = vld [vmem:[#allocation14 + $0x220] sm:$0xff]  }
 0x6a7   :  { %12830 = vmatprep.subr.bf16.mxu1 %v13181_v32  ;;  %v13219_v31 = vld [vmem:[#allocation14 + $0x2a0] sm:$0xff]   ;;  %v13220_v32 = vld [vmem:[#allocation14 + $0x268] sm:$0xff]  }
 0x6a9   :  { %12809 = vmatpush3.bf16.msra.mxu0 %v13182_v33  ;;  %v13221_v33 = vld [vmem:[#allocation14 + $0x2e8] sm:$0xff]  }
 0x6aa   :  { %12831 = vmatpush3.bf16.msra.mxu1 %v13183_v4  ;;  %12810 = vmatprep.subr.bf16.mxu0 %v13184_v34  ;;  %v13222_v4 = vld [vmem:[#allocation14 + $0x228] sm:$0xff]   ;;  %v3437_v34 = vrot.slane %v13883_v43, %v13676_v45  ;;  %v13229_v45 = vld [vmem:[#allocation14 + $0x2f8] sm:$0xff]  }
 0x6ab   :  { %12832 = vmatprep.subr.bf16.mxu1 %v13185_v37  ;;  %v13223_v37 = vld [vmem:[#allocation14 + $0x2a8] sm:$0xff]  }
 0x6ad   :  { %12811 = vmatpush3.bf16.msra.mxu0 %v13186_v38  ;;  %v13224_v38 = vld [vmem:[#allocation14 + $0x270] sm:$0xff]  }
 0x6ae   :  { %12833 = vmatpush3.bf16.msra.mxu1 %v13187_v39  ;;  %12812 = vmatprep.subr.bf16.mxu0 %v13188_v41  ;;  %v3445_v39 = vrot.slane %v13883_v43, %v13707_v54  ;;  %v13225_v41 = vld [vmem:[#allocation14 + $0x2f0] sm:$0xff]   ;;  %v13231_v54 = vld [vmem:[#allocation14 + $0x2b8] sm:$0xff]  }
 0x6af   :  { %12834 = vmatprep.subr.bf16.mxu1 %v13189_v42  ;;  %v13226_v42 = vld [vmem:[#allocation14 + $0x230] sm:$0xff]  }
 0x6b1   :  { %12813 = vmatpush3.bf16.msra.mxu0 %v13190_v48  ;;  %v12950_v48 = vadd.f32 %v13853_v7, %v3437_v34  ;;  %v13234_v7 = vld [vmem:[#allocation14 + $0x300] sm:$0xff]  }
 0x6b2   :  { %12835 = vmatpush3.bf16.msra.mxu1 %v13191_v50  ;;  %12814 = vmatprep.subr.bf16.mxu0 %v13192_v9  ;;  %v13228_v50 = vld [vmem:[#allocation14 + $0x278] sm:$0xff]   ;;  %v12952_v9 = vadd.f32 %v13855_v46, %v3445_v39 }
 0x6b3   :  { %12836 = vmatprep.subr.bf16.mxu1 %v13193_v63  ;;  %v9922_v63 = vmax.f32 %v12950_v48, 0.0 }
 0x6b4   :  { %v9924_v55 = vmax.f32 %v12952_v9, 0.0 }
 0x6b5   :  { %12815 = vmatpush3.bf16.msra.mxu0 %v13194_v58  ;;  %v13233_v58 = vld [vmem:[#allocation14 + $0x3c0] sm:$0xff]   ;;  %v9938_v24 = vpack.c.bf16 %v9922_v63, %v9922_v63 }
 0x6b6   :  { %12837 = vmatpush3.bf16.msra.mxu1 %v13195_v59  ;;  %12816 = vmatprep.subr.bf16.mxu0 %v13196_v36  ;;  %v13235_v59 = vld [vmem:[#allocation14 + $0x380] sm:$0xff]   ;;  %v13236_v36 = vld [vmem:[#allocation14 + $0x348] sm:$0xff]   ;;  %v9940_v46 = vpack.c.bf16 %v9924_v55, %v9924_v55 }
 0x6b7   :  { %12838 = vmatprep.subr.bf16.mxu1 %v13197_v49  ;;  %v13238_v49 = vld [vmem:[#allocation14 + $0x308] sm:$0xff]  }
 0x6b9   :  { %12817 = vmatpush3.bf16.msra.mxu0 %v13198_v47  ;;  %v13241_v47 = vld [vmem:[#allocation14 + $0x3d0] sm:$0xff]  }
 0x6ba   :  { %12839 = vmatpush3.bf16.msra.mxu1 %v13199_v62  ;;  %12846 = vmatprep.subr.bf16.mxu0 %v13200_v1  ;;  %v13243_v62 = vld [vmem:[#allocation14 + $0x390] sm:$0xff]   ;;  %v13244_v1 = vld [vmem:[#allocation14 + $0x358] sm:$0xff]  }
 0x6bb   :  { %12868 = vmatprep.subr.bf16.mxu1 %v13201_v2  ;;  %v13246_v2 = vld [vmem:[#allocation14 + $0x318] sm:$0xff]  }
 0x6bc   :  { %11090 = vmatmul.mubr.bf16.vlgmr.msra.gmra.mrb[32].mxu0 %v9934_v16  ;;  %v13250_v16 = vld [vmem:[#allocation14 + $0x320] sm:$0xff]  }
 0x6bd   :  { %11130 = vmatmul.mubr.bf16.vlgmr.msra.gmra.mrb[32].mxu1 %v9936_v6  ;;  %12847 = vmatpush3.bf16.msra.mxu0 %v13202_v8  ;;  %v13249_v8 = vld [vmem:[#allocation14 + $0x3e0] sm:$0xff]   ;;  %v13252_v6 = vld [vmem:[#allocation14 + $0x368] sm:$0xff]  }
 0x6be   :  { %11169 = vmatprep.mubr.bf16.mxu0 %v9939_v10  ;;  %12869 = vmatpush3.bf16.msra.mxu1 %v13203_v27  ;;  %v13251_v27 = vld [vmem:[#allocation14 + $0x3a0] sm:$0xff]   ;;  %v13254_v10 = vld [vmem:[#allocation14 + $0x328] sm:$0xff]  }
 0x6bf   :  { %11209 = vmatprep.mubr.bf16.mxu1 %v9941_v17  ;;  %12848 = vmatprep.subr.bf16.mxu0 %v13204_v19  ;;  %v13253_v19 = vld [vmem:[#allocation14 + $0x3e8] sm:$0xff]   ;;  %v13256_v17 = vld [vmem:[#allocation14 + $0x370] sm:$0xff]  }
 0x6c0   :  { %12870 = vmatprep.subr.bf16.mxu1 %v13205_v11  ;;  %v13255_v11 = vld [vmem:[#allocation14 + $0x3a8] sm:$0xff]  }
 0x6c1   :  { %12849 = vmatpush3.bf16.msra.mxu0 %v13206_v14  ;;  %v13257_v14 = vld [vmem:[#allocation14 + $0x3f0] sm:$0xff]  }
 0x6c2   :  { %12871 = vmatpush3.bf16.msra.mxu1 %v13207_v30  ;;  %12850 = vmatprep.subr.bf16.mxu0 %v13208_v18  ;;  %v13258_v30 = vld [vmem:[#allocation14 + $0x330] sm:$0xff]  }
 0x6c3   :  { %12872 = vmatprep.subr.bf16.mxu1 %v13209_v12  ;;  %v13259_v18 = vld [vmem:[#allocation14 + $0x3b0] sm:$0xff]   ;;  %v13260_v12 = vld [vmem:[#allocation14 + $0x378] sm:$0xff]  }
 0x6c5   :  { %12851 = vmatpush3.bf16.msra.mxu0 %v13210_v15  ;;  %v13261_v15 = vld [vmem:[#allocation14 + $0x3f8] sm:$0xff]  }
 0x6c6   :  { %12873 = vmatpush3.bf16.msra.mxu1 %v13211_v20  ;;  %12852 = vmatprep.subr.bf16.mxu0 %v13212_v21  ;;  %v13262_v20 = vld [vmem:[#allocation14 + $0x338] sm:$0xff]  }
 0x6c7   :  { %12874 = vmatprep.subr.bf16.mxu1 %v13213_v22  ;;  %v13263_v21 = vld [vmem:[#allocation14 + $0x3b8] sm:$0xff]   ;;  %v3453_v22 = vrot.slane %v13883_v43, %v13754_v51 }
 0x6c9   :  { %12853 = vmatpush3.bf16.msra.mxu0 %v13214_v23  ;;  %v3461_v23 = vrot.slane %v13883_v43, %v13783_v40 }
 0x6ca   :  { %12875 = vmatpush3.bf16.msra.mxu1 %v13215_v13  ;;  %12854 = vmatprep.subr.bf16.mxu0 %v13216_v25  ;;  %v3457_v13 = vrot.slane %v13883_v43, %v13757_v53  ;;  %v3465_v25 = vrot.slane %v13883_v43, %v13760_v57 }
 0x6cb   :  { %12876 = vmatprep.subr.bf16.mxu1 %v13217_v28 }
 0x6cd   :  { %12855 = vmatpush3.bf16.msra.mxu0 %v13218_v29 }
 0x6ce   :  { %12877 = vmatpush3.bf16.msra.mxu1 %v13219_v31  ;;  %12856 = vmatprep.subr.bf16.mxu0 %v13220_v32 }
 0x6cf   :  { %12878 = vmatprep.subr.bf16.mxu1 %v13221_v33 }
 0x6d1   :  { %12857 = vmatpush3.bf16.msra.mxu0 %v13222_v4 }
 0x6d2   :  { %12879 = vmatpush3.bf16.msra.mxu1 %v13223_v37  ;;  %12858 = vmatprep.subr.bf16.mxu0 %v13224_v38 }
 0x6d3   :  { %12880 = vmatprep.subr.bf16.mxu1 %v13225_v41 }
 0x6d5   :  { %12859 = vmatpush3.bf16.msra.mxu0 %v13226_v42 }
 0x6d6   :  { %12881 = vmatpush3.bf16.msra.mxu1 %v13227_v52  ;;  %12860 = vmatprep.subr.bf16.mxu0 %v13228_v50 }
 0x6d7   :  { %12882 = vmatprep.subr.bf16.mxu1 %v13229_v45 }
 0x6d9   :  { %12861 = vmatpush3.bf16.msra.mxu0 %v13230_v56  ;;  %v12629_v56 = vld [vmem:[#allocation16] ss:$0 sm:$0xff] }
 0x6da   :  { %12883 = vmatpush3.bf16.msra.mxu1 %v13231_v54  ;;  %12890 = vmatprep.subr.bf16.mxu0 %v13232_v26 }
 0x6db   :  { %12912 = vmatprep.subr.bf16.mxu1 %v13233_v58 }
 0x6dc   :  { %11170 = vmatmul.mubr.bf16.vlgmr.msra.gmra.mrb[36].mxu0 %v9938_v24 }
 0x6dd   :  { %11210 = vmatmul.mubr.bf16.vlgmr.msra.gmra.mrb[36].mxu1 %v9940_v46  ;;  %12891 = vmatpush3.bf16.msra.mxu0 %v13234_v7 }
 0x6de   :  { %12913 = vmatpush3.bf16.msra.mxu1 %v13235_v59  ;;  %12892 = vmatprep.subr.bf16.mxu0 %v13236_v36 }
 0x6df   :  { %12914 = vmatprep.subr.bf16.mxu1 %v13237_v44 }
 0x6e1   :  { %12893 = vmatpush3.bf16.msra.mxu0 %v13238_v49 }
 0x6e2   :  { %12915 = vmatpush3.bf16.msra.mxu1 %v13239_v60  ;;  %12894 = vmatprep.subr.bf16.mxu0 %v13240_v35 }
 0x6e3   :  { %12916 = vmatprep.subr.bf16.mxu1 %v13241_v47 }
 0x6e5   :  { %12895 = vmatpush3.bf16.msra.mxu0 %v13242_v61 }
 0x6e6   :  { %12917 = vmatpush3.bf16.msra.mxu1 %v13243_v62  ;;  %12896 = vmatprep.subr.bf16.mxu0 %v13244_v1 }
 0x6e7   :  { %12918 = vmatprep.subr.bf16.mxu1 %v13245_v0 }
 0x6e9   :  { %12897 = vmatpush3.bf16.msra.mxu0 %v13246_v2 }
 0x6ea   :  { %12919 = vmatpush3.bf16.msra.mxu1 %v13247_v3  ;;  %12898 = vmatprep.subr.bf16.mxu0 %v13248_v5 }
 0x6eb   :  { %12920 = vmatprep.subr.bf16.mxu1 %v13249_v8 }
 0x6ed   :  { %12899 = vmatpush3.bf16.msra.mxu0 %v13250_v16 }
 0x6ee   :  { %12921 = vmatpush3.bf16.msra.mxu1 %v13251_v27  ;;  %12900 = vmatprep.subr.bf16.mxu0 %v13252_v6 }
 0x6ef   :  { %12922 = vmatprep.subr.bf16.mxu1 %v13253_v19 }
 0x6f1   :  { %12901 = vmatpush3.bf16.msra.mxu0 %v13254_v10 }
 0x6f2   :  { %12923 = vmatpush3.bf16.msra.mxu1 %v13255_v11  ;;  %12902 = vmatprep.subr.bf16.mxu0 %v13256_v17 }
 0x6f3   :  { %12924 = vmatprep.subr.bf16.mxu1 %v13257_v14 }
 0x6f5   :  { %12903 = vmatpush3.bf16.msra.mxu0 %v13258_v30 }
 0x6f6   :  { %12925 = vmatpush3.bf16.msra.mxu1 %v13259_v18  ;;  %12904 = vmatprep.subr.bf16.mxu0 %v13260_v12 }
 0x6f7   :  { %12926 = vmatprep.subr.bf16.mxu1 %v13261_v15 }
 0x6f9   :  { %12905 = vmatpush3.bf16.msra.mxu0 %v13262_v20 }
 0x6fa   :  { %12927 = vmatpush3.bf16.msra.mxu1 %v13263_v21 }
 0x74f   :  { %v9743_v28 = vpop.f32.mrb[24].mxu0 }
 0x750   :  { %v12954_v29 = vadd.f32 %v9743_v28, %v3453_v22  ;;  %v9907_v31 = vpop.f32.mrb[24].mxu1  ;;  %v9745_v32 = vpop.f32.mrb[25].mxu0 }
 0x751   :  { %v12956_v33 = vadd.f32 %v9907_v31, %v3461_v23  ;;  %v12955_v4 = vadd.f32 %v9745_v32, %v3457_v13  ;;  %v9909_v34 = vpop.f32.mrb[25].mxu1  ;;  %v9747_v37 = vpop.f32.mrb[26].mxu0 }
 0x752   :  { %v9926_v38 = vmax.f32 %v12954_v29, 0.0  ;;  %v12957_v39 = vadd.f32 %v9909_v34, %v3465_v25  ;;  %v9911_v51 = vpop.f32.mrb[26].mxu1  ;;  %v9748_v41 = vpop.f32.mrb[27].mxu0 }
 0x753   :  { %v9928_v42 = vmax.f32 %v12956_v33, 0.0  ;;  %v9927_v40 = vmax.f32 %v12955_v4, 0.0  ;;  %v9912_v48 = vpop.f32.mrb[27].mxu1 }
 0x754   :  { %v9929_v52 = vmax.f32 %v12957_v39, 0.0  ;;  %v9942_v50 = vpack.c.bf16 %v9926_v38, %v9926_v38 }
 0x755   :  { %v9943_v53 = vpack.c.bf16 %v9927_v40, %v9927_v40  ;;  %v9944_v57 = vpack.c.bf16 %v9928_v42, %v9928_v42 }
 0x756   :  { %v9945_v9 = vpack.c.bf16 %v9929_v52, %v9929_v52 }
 0x757   :  { %11249 = vmatprep.mubr.bf16.mxu0 %v9943_v53 }
 0x758   :  { %11289 = vmatprep.mubr.bf16.mxu1 %v9945_v9  ;;  %11250 = vmatmul.mubr.bf16.vlgmr.msra.gmra.mrb[40].mxu0 %v9942_v50 }
 0x759   :  { %11290 = vmatmul.mubr.bf16.vlgmr.msra.gmra.mrb[40].mxu1 %v9944_v57 }
 0x76f   :  { %v12774_v43 = vpop.f32.mrb[28].mxu0 }
 0x770   :  { %v12796_v45 = vpop.f32.mrb[28].mxu1  ;;  %v12775_v63 = vpop.f32.mrb[29].mxu0 }
 0x771   :  { %v12776_v54 = vadd.f32 %v12775_v63, %v12774_v43  ;;  %v12797_v26 = vpop.f32.mrb[29].mxu1  ;;  %v12777_v55 = vpop.f32.mrb[30].mxu0 }
 0x772   :  { %v12798_v58 = vadd.f32 %v12797_v26, %v12796_v45  ;;  %v12799_v7 = vpop.f32.mrb[30].mxu1  ;;  %v12778_v24 = vpop.f32.mrb[31].mxu0 }
 0x773   :  { %v11012_v59 = vadd.f32 %v12776_v54, %v12629_v56  ;;  %v12800_v36 = vpop.f32.mrb[31].mxu1 }
 0x775   :  { %v11052_v46 = vadd.f32 %v12798_v58, %v11012_v59 }
 0x78f   :  { %v12818_v44 = vpop.f32.mrb[32].mxu0 }
 0x790   :  { %v12840_v49 = vpop.f32.mrb[32].mxu1  ;;  %v12819_v60 = vpop.f32.mrb[33].mxu0 }
 0x791   :  { %v12820_v35 = vadd.f32 %v12819_v60, %v12818_v44  ;;  %v12841_v47 = vpop.f32.mrb[33].mxu1  ;;  %v12821_v61 = vpop.f32.mrb[34].mxu0 }
 0x792   :  { %v12842_v62 = vadd.f32 %v12841_v47, %v12840_v49  ;;  %v12843_v1 = vpop.f32.mrb[34].mxu1  ;;  %v12822_v0 = vpop.f32.mrb[35].mxu0 }
 0x793   :  { %v11092_v2 = vadd.f32 %v12820_v35, %v11052_v46  ;;  %v12844_v3 = vpop.f32.mrb[35].mxu1 }
 0x795   :  { %v11132_v5 = vadd.f32 %v12842_v62, %v11092_v2 }
 0x7af   :  { %v12862_v8 = vpop.f32.mrb[36].mxu0 }
 0x7b0   :  { %v12884_v16 = vpop.f32.mrb[36].mxu1  ;;  %v12863_v27 = vpop.f32.mrb[37].mxu0 }
 0x7b1   :  { %v12864_v6 = vadd.f32 %v12863_v27, %v12862_v8  ;;  %v12885_v19 = vpop.f32.mrb[37].mxu1  ;;  %v12865_v10 = vpop.f32.mrb[38].mxu0 }
 0x7b2   :  { %v12886_v11 = vadd.f32 %v12885_v19, %v12884_v16  ;;  %v12887_v17 = vpop.f32.mrb[38].mxu1  ;;  %v12866_v14 = vpop.f32.mrb[39].mxu0 }
 0x7b3   :  { %v11172_v30 = vadd.f32 %v12864_v6, %v11132_v5  ;;  %v12888_v18 = vpop.f32.mrb[39].mxu1 }
 0x7b5   :  { %v11212_v12 = vadd.f32 %v12886_v11, %v11172_v30 }
 0x82b   :  { %v12906_v15 = vpop.f32.mrb[40].mxu0 }
 0x82c   :  { %v12928_v20 = vpop.f32.mrb[40].mxu1  ;;  %v12907_v21 = vpop.f32.mrb[41].mxu0 }
 0x82d   :  { %v12908_v22 = vadd.f32 %v12907_v21, %v12906_v15  ;;  %v12929_v23 = vpop.f32.mrb[41].mxu1  ;;  %v12909_v13 = vpop.f32.mrb[42].mxu0 }
 0x82e   :  { %v12930_v25 = vadd.f32 %v12929_v23, %v12928_v20  ;;  %v12931_v28 = vpop.f32.mrb[42].mxu1  ;;  %v12910_v29 = vpop.f32.mrb[43].mxu0 }
 0x82f   :  { %v11252_v31 = vadd.f32 %v12908_v22, %v11212_v12  ;;  %v12932_v32 = vpop.f32.mrb[43].mxu1 }
 0x831   :  { %v11292_v33 = vadd.f32 %v12930_v25, %v11252_v31 }
 0x833   :  { %11297 = vst [vmem:[#allocation17] sm:$0xff] %v11292_v33 }
 0x834   :  { %13474 = shalt.err (!%p13471_p6)
}
 0x835   :  { %s13475_s21 = scalar_lea.hbm %s13932_s9, 128 }
 0x836   :  { %p13476_p7 = scmp.ne.s32.totalorder %s13932_s9, %s13475_s21  ;;  %p13479_p8 = scmp.lt.u32.totalorder %s13475_s21, %s13932_s9 }
 0x838   :  { %p13481_p9 = pnand %p13479_p8, %p13476_p7 }
 0x83a   :  { %13484 = shalt.err (!%p13481_p9)
}
 0x83b   :  { %11307 = dma.vmem_to_hbm [thread:$0]  %s11305_s3, 128, %s13932_s9, [#allocation4]  }
 0x83c   :  { %13495 = dma.done.wait [#allocation4], 128  }
 0x83d   :  { %13496 = vsyncadd [#allocation4], 4294967168 }
 0x83e   :  { %11311 = vsyncpa [#allocation3], 1 }
 0x83f   :  { %11312 = vsyncpa [#allocation6], 1 }
 0x840   :  { %11313 = vsyncpa [#allocation9], 1 }
 0x841   :  { %11314 = vsyncpa [#allocation12], 1 }
 0x842   :  { %11315 = vsyncpa [#allocation15], 1 }
 0x843   :  { %11316 = vsyncpa [#allocation4], 1 }

</bundles_post_ra>
